<compile_context>
chip_gen: v7x
topology: tpu7x:2x2x1
jax: 0.10.0
libtpu: 0.0.40
codegen_flags: <defaults>
</compile_context>

<pallas_src>
import jax
import jax.numpy as jnp
from jax.experimental import pallas as pl
from jax.experimental.pallas import tpu as pltpu

NUM_LAYERS = 5
HIDDEN = 3
INPUT = 3
GATES = 4 * HIDDEN
BLOCK = 16                       # padded sublane rows per layer block (>= batch, multiple of 8)
N_ROWS = NUM_LAYERS * BLOCK      # 80 stacked state rows


def lstm_wavefront_kernel(x_ref, h0_ref, c0_ref, wih0_ref, wup_ref, whh_ref,
                          b_ref, gsc_ref, gof_ref, lw_ref, lb_ref, o_ref):
    """Whole forward pass, fully VMEM resident, wavefront over (layer, time).

    x_ref   : (T, BLOCK, 3)  input, time-major, batch padded to BLOCK rows
    h0_ref  : (80, 3)        initial hidden state, layers stacked/padded
    c0_ref  : (80, 3)        initial cell state,   layers stacked/padded
    wih0_ref: (3, 12)        layer-0 input->gate weights (transposed, prescaled)
    wup_ref : (3, 80, 12)    input->gate weights of the layer ABOVE each block
    whh_ref : (3, 80, 12)    hidden->gate weights per block (prescaled)
    b_ref   : (80, 12)       combined bias per block (prescaled)
    gsc_ref : (80, 12)       post-tanh scale  (0.5 for i/f/o, 1.0 for g)
    gof_ref : (80, 12)       post-tanh offset (0.5 for i/f/o, 0.0 for g)
    lw_ref  : (3, 3)         linear weight, transposed (in, out)
    lb_ref  : (1, 3)         linear bias
    o_ref   : (B, 3)         softmax output
    """
    T = x_ref.shape[0]
    N = h0_ref.shape[0]
    B = o_ref.shape[0]
    S = T + NUM_LAYERS - 1                       # wavefront steps (12)
    f32 = jnp.float32

    # ---- hoisted constants (all broadcasts were pre-expanded on the host) ----
    whh = [whh_ref[k] for k in range(HIDDEN)]    # (N, 12) each
    wup = [wup_ref[k] for k in range(HIDDEN)]    # (N, 12) each
    gsc = gsc_ref[...]
    gof = gof_ref[...]
    b_stack = b_ref[...]
    b_top = b_stack[:BLOCK]
    b_rest = b_stack[BLOCK:]
    zeros_blk = jnp.zeros((BLOCK, GATES), f32)

    # ---- prologue: layer-0 input projection for every timestep, bias folded.
    # Pure VPU work, entirely off the recurrent critical path.
    x = x_ref[...]                                                   # (T, BLOCK, 3)
    wih0_rows = [jnp.broadcast_to(wih0_ref[k:k + 1, :], (BLOCK, GATES))
                 for k in range(INPUT)]
    xb = []
    for s in range(S):
        if s < T:
            xt = x[s]                                                # (BLOCK, 3)
            xp = (xt[:, 0:1] * wih0_rows[0] + xt[:, 1:2] * wih0_rows[1]) \
                 + xt[:, 2:3] * wih0_rows[2]                         # (BLOCK, 12)
            xb.append(jnp.concatenate([b_top + xp, b_rest], axis=0)) # (N, 12)
        else:
            xb.append(b_stack)                                       # layer 0 done

    # ---- wavefront recurrence: step s runs cell (l, t=s-l) for every layer ----
    H = h0_ref[...]                                                  # (N, 3)
    C = c0_ref[...]

    for s in range(S):
        # One lane-broadcast per hidden column, shared by both projections.
        ha = jnp.broadcast_to(H[:, 0:1], (N, GATES))
        hb = jnp.broadcast_to(H[:, 1:2], (N, GATES))
        hc = jnp.broadcast_to(H[:, 2:3], (N, GATES))

        # Recurrent projection (block l = layer l) and next-layer input
        # projection (block l = contribution to layer l+1), balanced trees.
        rec = (ha * whh[0] + hb * whh[1]) + hc * whh[2]
        up = (ha * wup[0] + hb * wup[1]) + hc * wup[2]
        # Shift 'up' one layer block downwards; block size 16 is vreg-aligned
        # so this is plain vreg movement (no intra-vreg sublane rotate).
        up_shift = jnp.concatenate([zeros_blk, up[:N - BLOCK]], axis=0)

        gates = (xb[s] + rec) + up_shift                             # (N, 12)

        # Single tanh covers all 4 gates of all 5 layers; affine fix-up turns
        # the prescaled i/f/o columns back into sigmoids.
        act = jnp.tanh(gates) * gsc + gof
        i_g = act[:, 0 * HIDDEN:1 * HIDDEN]
        f_g = act[:, 1 * HIDDEN:2 * HIDDEN]
        g_g = act[:, 2 * HIDDEN:3 * HIDDEN]
        o_g = act[:, 3 * HIDDEN:4 * HIDDEN]

        c_new = f_g * C + i_g * g_g
        h_new = o_g * jnp.tanh(c_new)

        if s < NUM_LAYERS - 1:
            # Ramp-up: layers the wavefront has not reached yet keep their
            # initial state.  Static, block-aligned concatenate (no select).
            cut = (s + 1) * BLOCK
            H = jnp.concatenate([h_new[:cut], H[cut:]], axis=0)
            C = jnp.concatenate([c_new[:cut], C[cut:]], axis=0)
        else:
            # Steady state / ramp-down: no masking needed — stale layers'
            # garbage is only ever read by layers that are also finished.
            H, C = h_new, c_new

    # ---- epilogue: last timestep of the top layer -> Linear -> ReLU -> softmax
    top = (NUM_LAYERS - 1) * BLOCK
    h_top = H[top:top + B, :]                                        # (B, 3)
    lw_rows = [jnp.broadcast_to(lw_ref[k:k + 1, :], (B, HIDDEN)) for k in range(HIDDEN)]
    lb = jnp.broadcast_to(lb_ref[...], (B, HIDDEN))
    lin = (lb + h_top[:, 0:1] * lw_rows[0]) \
          + (h_top[:, 1:2] * lw_rows[1] + h_top[:, 2:3] * lw_rows[2])
    r = jnp.maximum(lin, 0.0)
    m = jnp.max(r, axis=1, keepdims=True)
    e = jnp.exp(r - m)
    o_ref[...] = e / jnp.sum(e, axis=1, keepdims=True)


def net_forward(x, h0, c0, params):
    """x: (B, T, 3) batch-first like PyTorch.  Returns softmax probs (B, 3)."""
    wih0, wup, whh, b_stack, gsc, gof, lw_t, lb = params
    B, T, _ = x.shape
    pad = BLOCK - B
    # Time-major + pad batch to the 16-row layer block (tiny host-side ops;
    # keeps the kernel on proven leading-axis indexing only).
    x_p = jnp.pad(jnp.transpose(x, (1, 0, 2)), ((0, 0), (0, pad), (0, 0)))
    h0s = jnp.pad(h0, ((0, 0), (0, pad), (0, 0))).reshape(N_ROWS, HIDDEN)
    c0s = jnp.pad(c0, ((0, 0), (0, pad), (0, 0))).reshape(N_ROWS, HIDDEN)

    vmem = pl.BlockSpec(memory_space=pltpu.MemorySpace.VMEM)
    return pl.pallas_call(
        lstm_wavefront_kernel,
        out_shape=jax.ShapeDtypeStruct((B, HIDDEN), jnp.float32),
        in_specs=[vmem] * 11,
        out_specs=vmem,
    )(x_p, h0s, c0s, wih0, wup, whh, b_stack, gsc, gof, lw_t, lb)


def make_raw_params(key):
    """PyTorch-default-style init: Uniform(-k, k), k = 1/sqrt(hidden).
    Shapes match nn.LSTM(3,3,5) + nn.Linear(3,3). Gate order: i, f, g, o."""
    k = 1.0 / jnp.sqrt(jnp.float32(HIDDEN))
    keys = jax.random.split(key, 6)
    w_ih = jax.random.uniform(keys[0], (NUM_LAYERS, GATES, INPUT), jnp.float32, -k, k)
    w_hh = jax.random.uniform(keys[1], (NUM_LAYERS, GATES, HIDDEN), jnp.float32, -k, k)
    b_ih = jax.random.uniform(keys[2], (NUM_LAYERS, GATES), jnp.float32, -k, k)
    b_hh = jax.random.uniform(keys[3], (NUM_LAYERS, GATES), jnp.float32, -k, k)
    lin_w = jax.random.uniform(keys[4], (HIDDEN, HIDDEN), jnp.float32, -k, k)
    lin_b = jax.random.uniform(keys[5], (HIDDEN,), jnp.float32, -k, k)
    return w_ih, w_hh, b_ih, b_hh, lin_w, lin_b


def pack_params(raw):
    """Host-side packing into the stacked wavefront layout:
    transpose, fold b_ih+b_hh, fold the 0.5 sigmoid pre-scale into i/f/o
    columns, and pre-broadcast everything to the (N_ROWS, 12) stacked layout
    so the kernel contains no loop-invariant broadcasts."""
    w_ih, w_hh, b_ih, b_hh, lin_w, lin_b = raw
    cs = jnp.concatenate([jnp.full((2 * HIDDEN,), 0.5), jnp.ones((HIDDEN,)),
                          jnp.full((HIDDEN,), 0.5)]).astype(jnp.float32)
    co = jnp.concatenate([jnp.full((2 * HIDDEN,), 0.5), jnp.zeros((HIDDEN,)),
                          jnp.full((HIDDEN,), 0.5)]).astype(jnp.float32)

    wih_t = jnp.transpose(w_ih, (0, 2, 1)) * cs          # (L, 3, 12) prescaled
    whh_t = jnp.transpose(w_hh, (0, 2, 1)) * cs          # (L, 3, 12) prescaled

    wih0 = wih_t[0]                                      # (3, 12) layer-0 input weights
    # Input weights of the layer ABOVE each block (top block unused -> zeros).
    wup_l = jnp.concatenate([wih_t[1:], jnp.zeros((1, HIDDEN, GATES), jnp.float32)], axis=0)
    wup = jnp.repeat(jnp.transpose(wup_l, (1, 0, 2)), BLOCK, axis=1)   # (3, N, 12)
    whh = jnp.repeat(jnp.transpose(whh_t, (1, 0, 2)), BLOCK, axis=1)   # (3, N, 12)

    b_stack = jnp.repeat((b_ih + b_hh) * cs, BLOCK, axis=0)            # (N, 12)
    gsc = jnp.tile(cs.reshape(1, GATES), (N_ROWS, 1))                  # (N, 12)
    gof = jnp.tile(co.reshape(1, GATES), (N_ROWS, 1))                  # (N, 12)

    lw_t = lin_w.T                                                     # (3, 3)
    lb = lin_b.reshape(1, HIDDEN)                                      # (1, 3)
    return wih0, wup, whh, b_stack, gsc, gof, lw_t, lb


def reference_forward(x, h0, c0, raw):
    """Pure-JAX (non-Pallas) reference with standard PyTorch LSTM semantics."""
    w_ih, w_hh, b_ih, b_hh, lin_w, lin_b = raw
    B, T, _ = x.shape
    layer_in = x
    for l in range(NUM_LAYERS):
        h, c = h0[l], c0[l]
        outs = []
        for t in range(T):
            z = layer_in[:, t, :] @ w_ih[l].T + h @ w_hh[l].T + b_ih[l] + b_hh[l]
            i = jax.nn.sigmoid(z[:, 0 * HIDDEN:1 * HIDDEN])
            f = jax.nn.sigmoid(z[:, 1 * HIDDEN:2 * HIDDEN])
            g = jnp.tanh(z[:, 2 * HIDDEN:3 * HIDDEN])
            o = jax.nn.sigmoid(z[:, 3 * HIDDEN:4 * HIDDEN])
            c = f * c + i * g
            h = o * jnp.tanh(c)
            outs.append(h)
        layer_in = jnp.stack(outs, axis=1)
    last = layer_in[:, -1, :]
    lin = last @ lin_w.T + lin_b
    r = jnp.maximum(lin, 0.0)
    return jax.nn.softmax(r, axis=1)


if __name__ == "__main__":
    key = jax.random.PRNGKey(0)
    k_x, k_h0, k_c0, k_params = jax.random.split(key, 4)

    BATCH, SEQ = 10, 8  # batch fixed to 10 by the module's hard-coded h0/c0 shape
    x = jax.random.normal(k_x, (BATCH, SEQ, INPUT), jnp.float32)
    # TODO(synk): PyTorch draws h0/c0 with torch.randn inside every forward();
    # here they are deterministic inputs generated once with a fixed key.
    h0 = jax.random.normal(k_h0, (NUM_LAYERS, BATCH, HIDDEN), jnp.float32)
    c0 = jax.random.normal(k_c0, (NUM_LAYERS, BATCH, HIDDEN), jnp.float32)

    raw = make_raw_params(k_params)
    params = pack_params(raw)

    y = net_forward(x, h0, c0, params)
    y = jax.block_until_ready(y)

    assert y.shape == (BATCH, HIDDEN)
    # softmax rows must sum to 1
    assert bool(jnp.all(jnp.abs(jnp.sum(y, axis=1) - 1.0) < 1e-5))
    # compare against the pure-JAX reference of the PyTorch forward
    y_ref = reference_forward(x, h0, c0, raw)
    assert bool(jnp.all(jnp.abs(y - y_ref) < 1e-3))
    print("KERNEL_OK")
</pallas_src>

<mosaic_0001>
module attributes {stable_mosaic.version = 11 : i64} {
  func.func @lstm_wavefront_kernel(%arg0: memref<8x16x3xf32, #tpu.memory_space<vmem>>, %arg1: memref<80x3xf32, #tpu.memory_space<vmem>>, %arg2: memref<80x3xf32, #tpu.memory_space<vmem>>, %arg3: memref<3x12xf32, #tpu.memory_space<vmem>>, %arg4: memref<3x80x12xf32, #tpu.memory_space<vmem>>, %arg5: memref<3x80x12xf32, #tpu.memory_space<vmem>>, %arg6: memref<80x12xf32, #tpu.memory_space<vmem>>, %arg7: memref<80x12xf32, #tpu.memory_space<vmem>>, %arg8: memref<80x12xf32, #tpu.memory_space<vmem>>, %arg9: memref<3x3xf32, #tpu.memory_space<vmem>>, %arg10: memref<1x3xf32, #tpu.memory_space<vmem>>, %arg11: memref<10x3xf32, #tpu.memory_space<vmem>>) attributes {dimension_semantics = [], scalar_prefetch = 0 : i64, scratch_operands = 0 : i64, tpu.core_type = #tpu.core_type<tc>} {
    %c0 = arith.constant 0 : index
    %c0_0 = arith.constant 0 : index
    %c0_1 = arith.constant 0 : index
    %0 = vector.load %arg5[%c0, %c0_0, %c0_1] : memref<3x80x12xf32, #tpu.memory_space<vmem>>, vector<1x80x12xf32>
    %1 = vector.shape_cast %0 : vector<1x80x12xf32> to vector<80x12xf32>
    %c1 = arith.constant 1 : index
    %c0_2 = arith.constant 0 : index
    %c0_3 = arith.constant 0 : index
    %2 = vector.load %arg5[%c1, %c0_2, %c0_3] : memref<3x80x12xf32, #tpu.memory_space<vmem>>, vector<1x80x12xf32>
    %3 = vector.shape_cast %2 : vector<1x80x12xf32> to vector<80x12xf32>
    %c2 = arith.constant 2 : index
    %c0_4 = arith.constant 0 : index
    %c0_5 = arith.constant 0 : index
    %4 = vector.load %arg5[%c2, %c0_4, %c0_5] : memref<3x80x12xf32, #tpu.memory_space<vmem>>, vector<1x80x12xf32>
    %5 = vector.shape_cast %4 : vector<1x80x12xf32> to vector<80x12xf32>
    %c0_6 = arith.constant 0 : index
    %c0_7 = arith.constant 0 : index
    %c0_8 = arith.constant 0 : index
    %6 = vector.load %arg4[%c0_6, %c0_7, %c0_8] : memref<3x80x12xf32, #tpu.memory_space<vmem>>, vector<1x80x12xf32>
    %7 = vector.shape_cast %6 : vector<1x80x12xf32> to vector<80x12xf32>
    %c1_9 = arith.constant 1 : index
    %c0_10 = arith.constant 0 : index
    %c0_11 = arith.constant 0 : index
    %8 = vector.load %arg4[%c1_9, %c0_10, %c0_11] : memref<3x80x12xf32, #tpu.memory_space<vmem>>, vector<1x80x12xf32>
    %9 = vector.shape_cast %8 : vector<1x80x12xf32> to vector<80x12xf32>
    %c2_12 = arith.constant 2 : index
    %c0_13 = arith.constant 0 : index
    %c0_14 = arith.constant 0 : index
    %10 = vector.load %arg4[%c2_12, %c0_13, %c0_14] : memref<3x80x12xf32, #tpu.memory_space<vmem>>, vector<1x80x12xf32>
    %11 = vector.shape_cast %10 : vector<1x80x12xf32> to vector<80x12xf32>
    %c0_15 = arith.constant 0 : index
    %c0_16 = arith.constant 0 : index
    %12 = vector.load %arg7[%c0_15, %c0_16] : memref<80x12xf32, #tpu.memory_space<vmem>>, vector<80x12xf32>
    %c0_17 = arith.constant 0 : index
    %c0_18 = arith.constant 0 : index
    %13 = vector.load %arg8[%c0_17, %c0_18] : memref<80x12xf32, #tpu.memory_space<vmem>>, vector<80x12xf32>
    %c0_19 = arith.constant 0 : index
    %c0_20 = arith.constant 0 : index
    %14 = vector.load %arg6[%c0_19, %c0_20] : memref<80x12xf32, #tpu.memory_space<vmem>>, vector<80x12xf32>
    %15 = vector.extract_strided_slice %14 {offsets = [0, 0], sizes = [16, 12], strides = [1, 1]} : vector<80x12xf32> to vector<16x12xf32>
    %16 = vector.extract_strided_slice %14 {offsets = [16, 0], sizes = [64, 12], strides = [1, 1]} : vector<80x12xf32> to vector<64x12xf32>
    %cst = arith.constant 0.000000e+00 : f32
    %17 = vector.broadcast %cst : f32 to vector<16x12xf32>
    %c0_21 = arith.constant 0 : index
    %c0_22 = arith.constant 0 : index
    %c0_23 = arith.constant 0 : index
    %18 = vector.load %arg0[%c0_21, %c0_22, %c0_23] : memref<8x16x3xf32, #tpu.memory_space<vmem>>, vector<8x16x3xf32>
    %c0_24 = arith.constant 0 : index
    %c0_25 = arith.constant 0 : index
    %19 = vector.load %arg3[%c0_24, %c0_25] : memref<3x12xf32, #tpu.memory_space<vmem>>, vector<1x12xf32>
    %20 = vector.shape_cast %19 : vector<1x12xf32> to vector<1x12xf32>
    %21 = vector.broadcast %20 : vector<1x12xf32> to vector<16x12xf32>
    %c1_26 = arith.constant 1 : index
    %c0_27 = arith.constant 0 : index
    %22 = vector.load %arg3[%c1_26, %c0_27] : memref<3x12xf32, #tpu.memory_space<vmem>>, vector<1x12xf32>
    %23 = vector.shape_cast %22 : vector<1x12xf32> to vector<1x12xf32>
    %24 = vector.broadcast %23 : vector<1x12xf32> to vector<16x12xf32>
    %c2_28 = arith.constant 2 : index
    %c0_29 = arith.constant 0 : index
    %25 = vector.load %arg3[%c2_28, %c0_29] : memref<3x12xf32, #tpu.memory_space<vmem>>, vector<1x12xf32>
    %26 = vector.shape_cast %25 : vector<1x12xf32> to vector<1x12xf32>
    %27 = vector.broadcast %26 : vector<1x12xf32> to vector<16x12xf32>
    %28 = vector.extract_strided_slice %18 {offsets = [0, 0, 0], sizes = [1, 16, 3], strides = [1, 1, 1]} : vector<8x16x3xf32> to vector<1x16x3xf32>
    %29 = vector.shape_cast %28 : vector<1x16x3xf32> to vector<16x3xf32>
    %30 = vector.extract_strided_slice %29 {offsets = [0, 0], sizes = [16, 1], strides = [1, 1]} : vector<16x3xf32> to vector<16x1xf32>
    %31 = vector.broadcast %30 : vector<16x1xf32> to vector<16x12xf32>
    %32 = arith.mulf %31, %21 : vector<16x12xf32>
    %33 = vector.extract_strided_slice %29 {offsets = [0, 1], sizes = [16, 1], strides = [1, 1]} : vector<16x3xf32> to vector<16x1xf32>
    %34 = vector.broadcast %33 : vector<16x1xf32> to vector<16x12xf32>
    %35 = arith.mulf %34, %24 : vector<16x12xf32>
    %36 = arith.addf %32, %35 : vector<16x12xf32>
    %37 = vector.extract_strided_slice %29 {offsets = [0, 2], sizes = [16, 1], strides = [1, 1]} : vector<16x3xf32> to vector<16x1xf32>
    %38 = vector.broadcast %37 : vector<16x1xf32> to vector<16x12xf32>
    %39 = arith.mulf %38, %27 : vector<16x12xf32>
    %40 = arith.addf %36, %39 : vector<16x12xf32>
    %41 = arith.addf %15, %40 : vector<16x12xf32>
    %42 = tpu.concatenate %41, %16 in 0 : vector<16x12xf32>, vector<64x12xf32> -> vector<80x12xf32>
    %43 = vector.extract_strided_slice %18 {offsets = [1, 0, 0], sizes = [1, 16, 3], strides = [1, 1, 1]} : vector<8x16x3xf32> to vector<1x16x3xf32>
    %44 = vector.shape_cast %43 : vector<1x16x3xf32> to vector<16x3xf32>
    %45 = vector.extract_strided_slice %44 {offsets = [0, 0], sizes = [16, 1], strides = [1, 1]} : vector<16x3xf32> to vector<16x1xf32>
    %46 = vector.broadcast %45 : vector<16x1xf32> to vector<16x12xf32>
    %47 = arith.mulf %46, %21 : vector<16x12xf32>
    %48 = vector.extract_strided_slice %44 {offsets = [0, 1], sizes = [16, 1], strides = [1, 1]} : vector<16x3xf32> to vector<16x1xf32>
    %49 = vector.broadcast %48 : vector<16x1xf32> to vector<16x12xf32>
    %50 = arith.mulf %49, %24 : vector<16x12xf32>
    %51 = arith.addf %47, %50 : vector<16x12xf32>
    %52 = vector.extract_strided_slice %44 {offsets = [0, 2], sizes = [16, 1], strides = [1, 1]} : vector<16x3xf32> to vector<16x1xf32>
    %53 = vector.broadcast %52 : vector<16x1xf32> to vector<16x12xf32>
    %54 = arith.mulf %53, %27 : vector<16x12xf32>
    %55 = arith.addf %51, %54 : vector<16x12xf32>
    %56 = arith.addf %15, %55 : vector<16x12xf32>
    %57 = tpu.concatenate %56, %16 in 0 : vector<16x12xf32>, vector<64x12xf32> -> vector<80x12xf32>
    %58 = vector.extract_strided_slice %18 {offsets = [2, 0, 0], sizes = [1, 16, 3], strides = [1, 1, 1]} : vector<8x16x3xf32> to vector<1x16x3xf32>
    %59 = vector.shape_cast %58 : vector<1x16x3xf32> to vector<16x3xf32>
    %60 = vector.extract_strided_slice %59 {offsets = [0, 0], sizes = [16, 1], strides = [1, 1]} : vector<16x3xf32> to vector<16x1xf32>
    %61 = vector.broadcast %60 : vector<16x1xf32> to vector<16x12xf32>
    %62 = arith.mulf %61, %21 : vector<16x12xf32>
    %63 = vector.extract_strided_slice %59 {offsets = [0, 1], sizes = [16, 1], strides = [1, 1]} : vector<16x3xf32> to vector<16x1xf32>
    %64 = vector.broadcast %63 : vector<16x1xf32> to vector<16x12xf32>
    %65 = arith.mulf %64, %24 : vector<16x12xf32>
    %66 = arith.addf %62, %65 : vector<16x12xf32>
    %67 = vector.extract_strided_slice %59 {offsets = [0, 2], sizes = [16, 1], strides = [1, 1]} : vector<16x3xf32> to vector<16x1xf32>
    %68 = vector.broadcast %67 : vector<16x1xf32> to vector<16x12xf32>
    %69 = arith.mulf %68, %27 : vector<16x12xf32>
    %70 = arith.addf %66, %69 : vector<16x12xf32>
    %71 = arith.addf %15, %70 : vector<16x12xf32>
    %72 = tpu.concatenate %71, %16 in 0 : vector<16x12xf32>, vector<64x12xf32> -> vector<80x12xf32>
    %73 = vector.extract_strided_slice %18 {offsets = [3, 0, 0], sizes = [1, 16, 3], strides = [1, 1, 1]} : vector<8x16x3xf32> to vector<1x16x3xf32>
    %74 = vector.shape_cast %73 : vector<1x16x3xf32> to vector<16x3xf32>
    %75 = vector.extract_strided_slice %74 {offsets = [0, 0], sizes = [16, 1], strides = [1, 1]} : vector<16x3xf32> to vector<16x1xf32>
    %76 = vector.broadcast %75 : vector<16x1xf32> to vector<16x12xf32>
    %77 = arith.mulf %76, %21 : vector<16x12xf32>
    %78 = vector.extract_strided_slice %74 {offsets = [0, 1], sizes = [16, 1], strides = [1, 1]} : vector<16x3xf32> to vector<16x1xf32>
    %79 = vector.broadcast %78 : vector<16x1xf32> to vector<16x12xf32>
    %80 = arith.mulf %79, %24 : vector<16x12xf32>
    %81 = arith.addf %77, %80 : vector<16x12xf32>
    %82 = vector.extract_strided_slice %74 {offsets = [0, 2], sizes = [16, 1], strides = [1, 1]} : vector<16x3xf32> to vector<16x1xf32>
    %83 = vector.broadcast %82 : vector<16x1xf32> to vector<16x12xf32>
    %84 = arith.mulf %83, %27 : vector<16x12xf32>
    %85 = arith.addf %81, %84 : vector<16x12xf32>
    %86 = arith.addf %15, %85 : vector<16x12xf32>
    %87 = tpu.concatenate %86, %16 in 0 : vector<16x12xf32>, vector<64x12xf32> -> vector<80x12xf32>
    %88 = vector.extract_strided_slice %18 {offsets = [4, 0, 0], sizes = [1, 16, 3], strides = [1, 1, 1]} : vector<8x16x3xf32> to vector<1x16x3xf32>
    %89 = vector.shape_cast %88 : vector<1x16x3xf32> to vector<16x3xf32>
    %90 = vector.extract_strided_slice %89 {offsets = [0, 0], sizes = [16, 1], strides = [1, 1]} : vector<16x3xf32> to vector<16x1xf32>
    %91 = vector.broadcast %90 : vector<16x1xf32> to vector<16x12xf32>
    %92 = arith.mulf %91, %21 : vector<16x12xf32>
    %93 = vector.extract_strided_slice %89 {offsets = [0, 1], sizes = [16, 1], strides = [1, 1]} : vector<16x3xf32> to vector<16x1xf32>
    %94 = vector.broadcast %93 : vector<16x1xf32> to vector<16x12xf32>
    %95 = arith.mulf %94, %24 : vector<16x12xf32>
    %96 = arith.addf %92, %95 : vector<16x12xf32>
    %97 = vector.extract_strided_slice %89 {offsets = [0, 2], sizes = [16, 1], strides = [1, 1]} : vector<16x3xf32> to vector<16x1xf32>
    %98 = vector.broadcast %97 : vector<16x1xf32> to vector<16x12xf32>
    %99 = arith.mulf %98, %27 : vector<16x12xf32>
    %100 = arith.addf %96, %99 : vector<16x12xf32>
    %101 = arith.addf %15, %100 : vector<16x12xf32>
    %102 = tpu.concatenate %101, %16 in 0 : vector<16x12xf32>, vector<64x12xf32> -> vector<80x12xf32>
    %103 = vector.extract_strided_slice %18 {offsets = [5, 0, 0], sizes = [1, 16, 3], strides = [1, 1, 1]} : vector<8x16x3xf32> to vector<1x16x3xf32>
    %104 = vector.shape_cast %103 : vector<1x16x3xf32> to vector<16x3xf32>
    %105 = vector.extract_strided_slice %104 {offsets = [0, 0], sizes = [16, 1], strides = [1, 1]} : vector<16x3xf32> to vector<16x1xf32>
    %106 = vector.broadcast %105 : vector<16x1xf32> to vector<16x12xf32>
    %107 = arith.mulf %106, %21 : vector<16x12xf32>
    %108 = vector.extract_strided_slice %104 {offsets = [0, 1], sizes = [16, 1], strides = [1, 1]} : vector<16x3xf32> to vector<16x1xf32>
    %109 = vector.broadcast %108 : vector<16x1xf32> to vector<16x12xf32>
    %110 = arith.mulf %109, %24 : vector<16x12xf32>
    %111 = arith.addf %107, %110 : vector<16x12xf32>
    %112 = vector.extract_strided_slice %104 {offsets = [0, 2], sizes = [16, 1], strides = [1, 1]} : vector<16x3xf32> to vector<16x1xf32>
    %113 = vector.broadcast %112 : vector<16x1xf32> to vector<16x12xf32>
    %114 = arith.mulf %113, %27 : vector<16x12xf32>
    %115 = arith.addf %111, %114 : vector<16x12xf32>
    %116 = arith.addf %15, %115 : vector<16x12xf32>
    %117 = tpu.concatenate %116, %16 in 0 : vector<16x12xf32>, vector<64x12xf32> -> vector<80x12xf32>
    %118 = vector.extract_strided_slice %18 {offsets = [6, 0, 0], sizes = [1, 16, 3], strides = [1, 1, 1]} : vector<8x16x3xf32> to vector<1x16x3xf32>
    %119 = vector.shape_cast %118 : vector<1x16x3xf32> to vector<16x3xf32>
    %120 = vector.extract_strided_slice %119 {offsets = [0, 0], sizes = [16, 1], strides = [1, 1]} : vector<16x3xf32> to vector<16x1xf32>
    %121 = vector.broadcast %120 : vector<16x1xf32> to vector<16x12xf32>
    %122 = arith.mulf %121, %21 : vector<16x12xf32>
    %123 = vector.extract_strided_slice %119 {offsets = [0, 1], sizes = [16, 1], strides = [1, 1]} : vector<16x3xf32> to vector<16x1xf32>
    %124 = vector.broadcast %123 : vector<16x1xf32> to vector<16x12xf32>
    %125 = arith.mulf %124, %24 : vector<16x12xf32>
    %126 = arith.addf %122, %125 : vector<16x12xf32>
    %127 = vector.extract_strided_slice %119 {offsets = [0, 2], sizes = [16, 1], strides = [1, 1]} : vector<16x3xf32> to vector<16x1xf32>
    %128 = vector.broadcast %127 : vector<16x1xf32> to vector<16x12xf32>
    %129 = arith.mulf %128, %27 : vector<16x12xf32>
    %130 = arith.addf %126, %129 : vector<16x12xf32>
    %131 = arith.addf %15, %130 : vector<16x12xf32>
    %132 = tpu.concatenate %131, %16 in 0 : vector<16x12xf32>, vector<64x12xf32> -> vector<80x12xf32>
    %133 = vector.extract_strided_slice %18 {offsets = [7, 0, 0], sizes = [1, 16, 3], strides = [1, 1, 1]} : vector<8x16x3xf32> to vector<1x16x3xf32>
    %134 = vector.shape_cast %133 : vector<1x16x3xf32> to vector<16x3xf32>
    %135 = vector.extract_strided_slice %134 {offsets = [0, 0], sizes = [16, 1], strides = [1, 1]} : vector<16x3xf32> to vector<16x1xf32>
    %136 = vector.broadcast %135 : vector<16x1xf32> to vector<16x12xf32>
    %137 = arith.mulf %136, %21 : vector<16x12xf32>
    %138 = vector.extract_strided_slice %134 {offsets = [0, 1], sizes = [16, 1], strides = [1, 1]} : vector<16x3xf32> to vector<16x1xf32>
    %139 = vector.broadcast %138 : vector<16x1xf32> to vector<16x12xf32>
    %140 = arith.mulf %139, %24 : vector<16x12xf32>
    %141 = arith.addf %137, %140 : vector<16x12xf32>
    %142 = vector.extract_strided_slice %134 {offsets = [0, 2], sizes = [16, 1], strides = [1, 1]} : vector<16x3xf32> to vector<16x1xf32>
    %143 = vector.broadcast %142 : vector<16x1xf32> to vector<16x12xf32>
    %144 = arith.mulf %143, %27 : vector<16x12xf32>
    %145 = arith.addf %141, %144 : vector<16x12xf32>
    %146 = arith.addf %15, %145 : vector<16x12xf32>
    %147 = tpu.concatenate %146, %16 in 0 : vector<16x12xf32>, vector<64x12xf32> -> vector<80x12xf32>
    %c0_30 = arith.constant 0 : index
    %c0_31 = arith.constant 0 : index
    %148 = vector.load %arg1[%c0_30, %c0_31] : memref<80x3xf32, #tpu.memory_space<vmem>>, vector<80x3xf32>
    %c0_32 = arith.constant 0 : index
    %c0_33 = arith.constant 0 : index
    %149 = vector.load %arg2[%c0_32, %c0_33] : memref<80x3xf32, #tpu.memory_space<vmem>>, vector<80x3xf32>
    %150 = vector.extract_strided_slice %148 {offsets = [0, 0], sizes = [80, 1], strides = [1, 1]} : vector<80x3xf32> to vector<80x1xf32>
    %151 = vector.shape_cast %150 : vector<80x1xf32> to vector<80x1xf32>
    %152 = vector.broadcast %151 : vector<80x1xf32> to vector<80x12xf32>
    %153 = vector.extract_strided_slice %148 {offsets = [0, 1], sizes = [80, 1], strides = [1, 1]} : vector<80x3xf32> to vector<80x1xf32>
    %154 = vector.shape_cast %153 : vector<80x1xf32> to vector<80x1xf32>
    %155 = vector.broadcast %154 : vector<80x1xf32> to vector<80x12xf32>
    %156 = vector.extract_strided_slice %148 {offsets = [0, 2], sizes = [80, 1], strides = [1, 1]} : vector<80x3xf32> to vector<80x1xf32>
    %157 = vector.shape_cast %156 : vector<80x1xf32> to vector<80x1xf32>
    %158 = vector.broadcast %157 : vector<80x1xf32> to vector<80x12xf32>
    %159 = arith.mulf %152, %1 : vector<80x12xf32>
    %160 = arith.mulf %155, %3 : vector<80x12xf32>
    %161 = arith.addf %159, %160 : vector<80x12xf32>
    %162 = arith.mulf %158, %5 : vector<80x12xf32>
    %163 = arith.addf %161, %162 : vector<80x12xf32>
    %164 = arith.mulf %152, %7 : vector<80x12xf32>
    %165 = arith.mulf %155, %9 : vector<80x12xf32>
    %166 = arith.addf %164, %165 : vector<80x12xf32>
    %167 = arith.mulf %158, %11 : vector<80x12xf32>
    %168 = arith.addf %166, %167 : vector<80x12xf32>
    %169 = vector.extract_strided_slice %168 {offsets = [0, 0], sizes = [64, 12], strides = [1, 1]} : vector<80x12xf32> to vector<64x12xf32>
    %170 = tpu.concatenate %17, %169 in 0 : vector<16x12xf32>, vector<64x12xf32> -> vector<80x12xf32>
    %171 = arith.addf %42, %163 : vector<80x12xf32>
    %172 = arith.addf %171, %170 : vector<80x12xf32>
    %173 = math.tanh %172 : vector<80x12xf32>
    %174 = arith.mulf %173, %12 : vector<80x12xf32>
    %175 = arith.addf %174, %13 : vector<80x12xf32>
    %176 = vector.extract_strided_slice %175 {offsets = [0, 0], sizes = [80, 3], strides = [1, 1]} : vector<80x12xf32> to vector<80x3xf32>
    %177 = vector.extract_strided_slice %175 {offsets = [0, 3], sizes = [80, 3], strides = [1, 1]} : vector<80x12xf32> to vector<80x3xf32>
    %178 = vector.extract_strided_slice %175 {offsets = [0, 6], sizes = [80, 3], strides = [1, 1]} : vector<80x12xf32> to vector<80x3xf32>
    %179 = vector.extract_strided_slice %175 {offsets = [0, 9], sizes = [80, 3], strides = [1, 1]} : vector<80x12xf32> to vector<80x3xf32>
    %180 = arith.mulf %177, %149 : vector<80x3xf32>
    %181 = arith.mulf %176, %178 : vector<80x3xf32>
    %182 = arith.addf %180, %181 : vector<80x3xf32>
    %183 = math.tanh %182 : vector<80x3xf32>
    %184 = arith.mulf %179, %183 : vector<80x3xf32>
    %185 = vector.extract_strided_slice %184 {offsets = [0, 0], sizes = [16, 3], strides = [1, 1]} : vector<80x3xf32> to vector<16x3xf32>
    %186 = vector.extract_strided_slice %148 {offsets = [16, 0], sizes = [64, 3], strides = [1, 1]} : vector<80x3xf32> to vector<64x3xf32>
    %187 = tpu.concatenate %185, %186 in 0 : vector<16x3xf32>, vector<64x3xf32> -> vector<80x3xf32>
    %188 = vector.extract_strided_slice %182 {offsets = [0, 0], sizes = [16, 3], strides = [1, 1]} : vector<80x3xf32> to vector<16x3xf32>
    %189 = vector.extract_strided_slice %149 {offsets = [16, 0], sizes = [64, 3], strides = [1, 1]} : vector<80x3xf32> to vector<64x3xf32>
    %190 = tpu.concatenate %188, %189 in 0 : vector<16x3xf32>, vector<64x3xf32> -> vector<80x3xf32>
    %191 = vector.extract_strided_slice %187 {offsets = [0, 0], sizes = [80, 1], strides = [1, 1]} : vector<80x3xf32> to vector<80x1xf32>
    %192 = vector.shape_cast %191 : vector<80x1xf32> to vector<80x1xf32>
    %193 = vector.broadcast %192 : vector<80x1xf32> to vector<80x12xf32>
    %194 = vector.extract_strided_slice %187 {offsets = [0, 1], sizes = [80, 1], strides = [1, 1]} : vector<80x3xf32> to vector<80x1xf32>
    %195 = vector.shape_cast %194 : vector<80x1xf32> to vector<80x1xf32>
    %196 = vector.broadcast %195 : vector<80x1xf32> to vector<80x12xf32>
    %197 = vector.extract_strided_slice %187 {offsets = [0, 2], sizes = [80, 1], strides = [1, 1]} : vector<80x3xf32> to vector<80x1xf32>
    %198 = vector.shape_cast %197 : vector<80x1xf32> to vector<80x1xf32>
    %199 = vector.broadcast %198 : vector<80x1xf32> to vector<80x12xf32>
    %200 = arith.mulf %193, %1 : vector<80x12xf32>
    %201 = arith.mulf %196, %3 : vector<80x12xf32>
    %202 = arith.addf %200, %201 : vector<80x12xf32>
    %203 = arith.mulf %199, %5 : vector<80x12xf32>
    %204 = arith.addf %202, %203 : vector<80x12xf32>
    %205 = arith.mulf %193, %7 : vector<80x12xf32>
    %206 = arith.mulf %196, %9 : vector<80x12xf32>
    %207 = arith.addf %205, %206 : vector<80x12xf32>
    %208 = arith.mulf %199, %11 : vector<80x12xf32>
    %209 = arith.addf %207, %208 : vector<80x12xf32>
    %210 = vector.extract_strided_slice %209 {offsets = [0, 0], sizes = [64, 12], strides = [1, 1]} : vector<80x12xf32> to vector<64x12xf32>
    %211 = tpu.concatenate %17, %210 in 0 : vector<16x12xf32>, vector<64x12xf32> -> vector<80x12xf32>
    %212 = arith.addf %57, %204 : vector<80x12xf32>
    %213 = arith.addf %212, %211 : vector<80x12xf32>
    %214 = math.tanh %213 : vector<80x12xf32>
    %215 = arith.mulf %214, %12 : vector<80x12xf32>
    %216 = arith.addf %215, %13 : vector<80x12xf32>
    %217 = vector.extract_strided_slice %216 {offsets = [0, 0], sizes = [80, 3], strides = [1, 1]} : vector<80x12xf32> to vector<80x3xf32>
    %218 = vector.extract_strided_slice %216 {offsets = [0, 3], sizes = [80, 3], strides = [1, 1]} : vector<80x12xf32> to vector<80x3xf32>
    %219 = vector.extract_strided_slice %216 {offsets = [0, 6], sizes = [80, 3], strides = [1, 1]} : vector<80x12xf32> to vector<80x3xf32>
    %220 = vector.extract_strided_slice %216 {offsets = [0, 9], sizes = [80, 3], strides = [1, 1]} : vector<80x12xf32> to vector<80x3xf32>
    %221 = arith.mulf %218, %190 : vector<80x3xf32>
    %222 = arith.mulf %217, %219 : vector<80x3xf32>
    %223 = arith.addf %221, %222 : vector<80x3xf32>
    %224 = math.tanh %223 : vector<80x3xf32>
    %225 = arith.mulf %220, %224 : vector<80x3xf32>
    %226 = vector.extract_strided_slice %225 {offsets = [0, 0], sizes = [32, 3], strides = [1, 1]} : vector<80x3xf32> to vector<32x3xf32>
    %227 = vector.extract_strided_slice %187 {offsets = [32, 0], sizes = [48, 3], strides = [1, 1]} : vector<80x3xf32> to vector<48x3xf32>
    %228 = tpu.concatenate %226, %227 in 0 : vector<32x3xf32>, vector<48x3xf32> -> vector<80x3xf32>
    %229 = vector.extract_strided_slice %223 {offsets = [0, 0], sizes = [32, 3], strides = [1, 1]} : vector<80x3xf32> to vector<32x3xf32>
    %230 = vector.extract_strided_slice %190 {offsets = [32, 0], sizes = [48, 3], strides = [1, 1]} : vector<80x3xf32> to vector<48x3xf32>
    %231 = tpu.concatenate %229, %230 in 0 : vector<32x3xf32>, vector<48x3xf32> -> vector<80x3xf32>
    %232 = vector.extract_strided_slice %228 {offsets = [0, 0], sizes = [80, 1], strides = [1, 1]} : vector<80x3xf32> to vector<80x1xf32>
    %233 = vector.shape_cast %232 : vector<80x1xf32> to vector<80x1xf32>
    %234 = vector.broadcast %233 : vector<80x1xf32> to vector<80x12xf32>
    %235 = vector.extract_strided_slice %228 {offsets = [0, 1], sizes = [80, 1], strides = [1, 1]} : vector<80x3xf32> to vector<80x1xf32>
    %236 = vector.shape_cast %235 : vector<80x1xf32> to vector<80x1xf32>
    %237 = vector.broadcast %236 : vector<80x1xf32> to vector<80x12xf32>
    %238 = vector.extract_strided_slice %228 {offsets = [0, 2], sizes = [80, 1], strides = [1, 1]} : vector<80x3xf32> to vector<80x1xf32>
    %239 = vector.shape_cast %238 : vector<80x1xf32> to vector<80x1xf32>
    %240 = vector.broadcast %239 : vector<80x1xf32> to vector<80x12xf32>
    %241 = arith.mulf %234, %1 : vector<80x12xf32>
    %242 = arith.mulf %237, %3 : vector<80x12xf32>
    %243 = arith.addf %241, %242 : vector<80x12xf32>
    %244 = arith.mulf %240, %5 : vector<80x12xf32>
    %245 = arith.addf %243, %244 : vector<80x12xf32>
    %246 = arith.mulf %234, %7 : vector<80x12xf32>
    %247 = arith.mulf %237, %9 : vector<80x12xf32>
    %248 = arith.addf %246, %247 : vector<80x12xf32>
    %249 = arith.mulf %240, %11 : vector<80x12xf32>
    %250 = arith.addf %248, %249 : vector<80x12xf32>
    %251 = vector.extract_strided_slice %250 {offsets = [0, 0], sizes = [64, 12], strides = [1, 1]} : vector<80x12xf32> to vector<64x12xf32>
    %252 = tpu.concatenate %17, %251 in 0 : vector<16x12xf32>, vector<64x12xf32> -> vector<80x12xf32>
    %253 = arith.addf %72, %245 : vector<80x12xf32>
    %254 = arith.addf %253, %252 : vector<80x12xf32>
    %255 = math.tanh %254 : vector<80x12xf32>
    %256 = arith.mulf %255, %12 : vector<80x12xf32>
    %257 = arith.addf %256, %13 : vector<80x12xf32>
    %258 = vector.extract_strided_slice %257 {offsets = [0, 0], sizes = [80, 3], strides = [1, 1]} : vector<80x12xf32> to vector<80x3xf32>
    %259 = vector.extract_strided_slice %257 {offsets = [0, 3], sizes = [80, 3], strides = [1, 1]} : vector<80x12xf32> to vector<80x3xf32>
    %260 = vector.extract_strided_slice %257 {offsets = [0, 6], sizes = [80, 3], strides = [1, 1]} : vector<80x12xf32> to vector<80x3xf32>
    %261 = vector.extract_strided_slice %257 {offsets = [0, 9], sizes = [80, 3], strides = [1, 1]} : vector<80x12xf32> to vector<80x3xf32>
    %262 = arith.mulf %259, %231 : vector<80x3xf32>
    %263 = arith.mulf %258, %260 : vector<80x3xf32>
    %264 = arith.addf %262, %263 : vector<80x3xf32>
    %265 = math.tanh %264 : vector<80x3xf32>
    %266 = arith.mulf %261, %265 : vector<80x3xf32>
    %267 = vector.extract_strided_slice %266 {offsets = [0, 0], sizes = [48, 3], strides = [1, 1]} : vector<80x3xf32> to vector<48x3xf32>
    %268 = vector.extract_strided_slice %228 {offsets = [48, 0], sizes = [32, 3], strides = [1, 1]} : vector<80x3xf32> to vector<32x3xf32>
    %269 = tpu.concatenate %267, %268 in 0 : vector<48x3xf32>, vector<32x3xf32> -> vector<80x3xf32>
    %270 = vector.extract_strided_slice %264 {offsets = [0, 0], sizes = [48, 3], strides = [1, 1]} : vector<80x3xf32> to vector<48x3xf32>
    %271 = vector.extract_strided_slice %231 {offsets = [48, 0], sizes = [32, 3], strides = [1, 1]} : vector<80x3xf32> to vector<32x3xf32>
    %272 = tpu.concatenate %270, %271 in 0 : vector<48x3xf32>, vector<32x3xf32> -> vector<80x3xf32>
    %273 = vector.extract_strided_slice %269 {offsets = [0, 0], sizes = [80, 1], strides = [1, 1]} : vector<80x3xf32> to vector<80x1xf32>
    %274 = vector.shape_cast %273 : vector<80x1xf32> to vector<80x1xf32>
    %275 = vector.broadcast %274 : vector<80x1xf32> to vector<80x12xf32>
    %276 = vector.extract_strided_slice %269 {offsets = [0, 1], sizes = [80, 1], strides = [1, 1]} : vector<80x3xf32> to vector<80x1xf32>
    %277 = vector.shape_cast %276 : vector<80x1xf32> to vector<80x1xf32>
    %278 = vector.broadcast %277 : vector<80x1xf32> to vector<80x12xf32>
    %279 = vector.extract_strided_slice %269 {offsets = [0, 2], sizes = [80, 1], strides = [1, 1]} : vector<80x3xf32> to vector<80x1xf32>
    %280 = vector.shape_cast %279 : vector<80x1xf32> to vector<80x1xf32>
    %281 = vector.broadcast %280 : vector<80x1xf32> to vector<80x12xf32>
    %282 = arith.mulf %275, %1 : vector<80x12xf32>
    %283 = arith.mulf %278, %3 : vector<80x12xf32>
    %284 = arith.addf %282, %283 : vector<80x12xf32>
    %285 = arith.mulf %281, %5 : vector<80x12xf32>
    %286 = arith.addf %284, %285 : vector<80x12xf32>
    %287 = arith.mulf %275, %7 : vector<80x12xf32>
    %288 = arith.mulf %278, %9 : vector<80x12xf32>
    %289 = arith.addf %287, %288 : vector<80x12xf32>
    %290 = arith.mulf %281, %11 : vector<80x12xf32>
    %291 = arith.addf %289, %290 : vector<80x12xf32>
    %292 = vector.extract_strided_slice %291 {offsets = [0, 0], sizes = [64, 12], strides = [1, 1]} : vector<80x12xf32> to vector<64x12xf32>
    %293 = tpu.concatenate %17, %292 in 0 : vector<16x12xf32>, vector<64x12xf32> -> vector<80x12xf32>
    %294 = arith.addf %87, %286 : vector<80x12xf32>
    %295 = arith.addf %294, %293 : vector<80x12xf32>
    %296 = math.tanh %295 : vector<80x12xf32>
    %297 = arith.mulf %296, %12 : vector<80x12xf32>
    %298 = arith.addf %297, %13 : vector<80x12xf32>
    %299 = vector.extract_strided_slice %298 {offsets = [0, 0], sizes = [80, 3], strides = [1, 1]} : vector<80x12xf32> to vector<80x3xf32>
    %300 = vector.extract_strided_slice %298 {offsets = [0, 3], sizes = [80, 3], strides = [1, 1]} : vector<80x12xf32> to vector<80x3xf32>
    %301 = vector.extract_strided_slice %298 {offsets = [0, 6], sizes = [80, 3], strides = [1, 1]} : vector<80x12xf32> to vector<80x3xf32>
    %302 = vector.extract_strided_slice %298 {offsets = [0, 9], sizes = [80, 3], strides = [1, 1]} : vector<80x12xf32> to vector<80x3xf32>
    %303 = arith.mulf %300, %272 : vector<80x3xf32>
    %304 = arith.mulf %299, %301 : vector<80x3xf32>
    %305 = arith.addf %303, %304 : vector<80x3xf32>
    %306 = math.tanh %305 : vector<80x3xf32>
    %307 = arith.mulf %302, %306 : vector<80x3xf32>
    %308 = vector.extract_strided_slice %307 {offsets = [0, 0], sizes = [64, 3], strides = [1, 1]} : vector<80x3xf32> to vector<64x3xf32>
    %309 = vector.extract_strided_slice %269 {offsets = [64, 0], sizes = [16, 3], strides = [1, 1]} : vector<80x3xf32> to vector<16x3xf32>
    %310 = tpu.concatenate %308, %309 in 0 : vector<64x3xf32>, vector<16x3xf32> -> vector<80x3xf32>
    %311 = vector.extract_strided_slice %305 {offsets = [0, 0], sizes = [64, 3], strides = [1, 1]} : vector<80x3xf32> to vector<64x3xf32>
    %312 = vector.extract_strided_slice %272 {offsets = [64, 0], sizes = [16, 3], strides = [1, 1]} : vector<80x3xf32> to vector<16x3xf32>
    %313 = tpu.concatenate %311, %312 in 0 : vector<64x3xf32>, vector<16x3xf32> -> vector<80x3xf32>
    %314 = vector.extract_strided_slice %310 {offsets = [0, 0], sizes = [80, 1], strides = [1, 1]} : vector<80x3xf32> to vector<80x1xf32>
    %315 = vector.shape_cast %314 : vector<80x1xf32> to vector<80x1xf32>
    %316 = vector.broadcast %315 : vector<80x1xf32> to vector<80x12xf32>
    %317 = vector.extract_strided_slice %310 {offsets = [0, 1], sizes = [80, 1], strides = [1, 1]} : vector<80x3xf32> to vector<80x1xf32>
    %318 = vector.shape_cast %317 : vector<80x1xf32> to vector<80x1xf32>
    %319 = vector.broadcast %318 : vector<80x1xf32> to vector<80x12xf32>
    %320 = vector.extract_strided_slice %310 {offsets = [0, 2], sizes = [80, 1], strides = [1, 1]} : vector<80x3xf32> to vector<80x1xf32>
    %321 = vector.shape_cast %320 : vector<80x1xf32> to vector<80x1xf32>
    %322 = vector.broadcast %321 : vector<80x1xf32> to vector<80x12xf32>
    %323 = arith.mulf %316, %1 : vector<80x12xf32>
    %324 = arith.mulf %319, %3 : vector<80x12xf32>
    %325 = arith.addf %323, %324 : vector<80x12xf32>
    %326 = arith.mulf %322, %5 : vector<80x12xf32>
    %327 = arith.addf %325, %326 : vector<80x12xf32>
    %328 = arith.mulf %316, %7 : vector<80x12xf32>
    %329 = arith.mulf %319, %9 : vector<80x12xf32>
    %330 = arith.addf %328, %329 : vector<80x12xf32>
    %331 = arith.mulf %322, %11 : vector<80x12xf32>
    %332 = arith.addf %330, %331 : vector<80x12xf32>
    %333 = vector.extract_strided_slice %332 {offsets = [0, 0], sizes = [64, 12], strides = [1, 1]} : vector<80x12xf32> to vector<64x12xf32>
    %334 = tpu.concatenate %17, %333 in 0 : vector<16x12xf32>, vector<64x12xf32> -> vector<80x12xf32>
    %335 = arith.addf %102, %327 : vector<80x12xf32>
    %336 = arith.addf %335, %334 : vector<80x12xf32>
    %337 = math.tanh %336 : vector<80x12xf32>
    %338 = arith.mulf %337, %12 : vector<80x12xf32>
    %339 = arith.addf %338, %13 : vector<80x12xf32>
    %340 = vector.extract_strided_slice %339 {offsets = [0, 0], sizes = [80, 3], strides = [1, 1]} : vector<80x12xf32> to vector<80x3xf32>
    %341 = vector.extract_strided_slice %339 {offsets = [0, 3], sizes = [80, 3], strides = [1, 1]} : vector<80x12xf32> to vector<80x3xf32>
    %342 = vector.extract_strided_slice %339 {offsets = [0, 6], sizes = [80, 3], strides = [1, 1]} : vector<80x12xf32> to vector<80x3xf32>
    %343 = vector.extract_strided_slice %339 {offsets = [0, 9], sizes = [80, 3], strides = [1, 1]} : vector<80x12xf32> to vector<80x3xf32>
    %344 = arith.mulf %341, %313 : vector<80x3xf32>
    %345 = arith.mulf %340, %342 : vector<80x3xf32>
    %346 = arith.addf %344, %345 : vector<80x3xf32>
    %347 = math.tanh %346 : vector<80x3xf32>
    %348 = arith.mulf %343, %347 : vector<80x3xf32>
    %349 = vector.extract_strided_slice %348 {offsets = [0, 0], sizes = [80, 1], strides = [1, 1]} : vector<80x3xf32> to vector<80x1xf32>
    %350 = vector.shape_cast %349 : vector<80x1xf32> to vector<80x1xf32>
    %351 = vector.broadcast %350 : vector<80x1xf32> to vector<80x12xf32>
    %352 = vector.extract_strided_slice %348 {offsets = [0, 1], sizes = [80, 1], strides = [1, 1]} : vector<80x3xf32> to vector<80x1xf32>
    %353 = vector.shape_cast %352 : vector<80x1xf32> to vector<80x1xf32>
    %354 = vector.broadcast %353 : vector<80x1xf32> to vector<80x12xf32>
    %355 = vector.extract_strided_slice %348 {offsets = [0, 2], sizes = [80, 1], strides = [1, 1]} : vector<80x3xf32> to vector<80x1xf32>
    %356 = vector.shape_cast %355 : vector<80x1xf32> to vector<80x1xf32>
    %357 = vector.broadcast %356 : vector<80x1xf32> to vector<80x12xf32>
    %358 = arith.mulf %351, %1 : vector<80x12xf32>
    %359 = arith.mulf %354, %3 : vector<80x12xf32>
    %360 = arith.addf %358, %359 : vector<80x12xf32>
    %361 = arith.mulf %357, %5 : vector<80x12xf32>
    %362 = arith.addf %360, %361 : vector<80x12xf32>
    %363 = arith.mulf %351, %7 : vector<80x12xf32>
    %364 = arith.mulf %354, %9 : vector<80x12xf32>
    %365 = arith.addf %363, %364 : vector<80x12xf32>
    %366 = arith.mulf %357, %11 : vector<80x12xf32>
    %367 = arith.addf %365, %366 : vector<80x12xf32>
    %368 = vector.extract_strided_slice %367 {offsets = [0, 0], sizes = [64, 12], strides = [1, 1]} : vector<80x12xf32> to vector<64x12xf32>
    %369 = tpu.concatenate %17, %368 in 0 : vector<16x12xf32>, vector<64x12xf32> -> vector<80x12xf32>
    %370 = arith.addf %117, %362 : vector<80x12xf32>
    %371 = arith.addf %370, %369 : vector<80x12xf32>
    %372 = math.tanh %371 : vector<80x12xf32>
    %373 = arith.mulf %372, %12 : vector<80x12xf32>
    %374 = arith.addf %373, %13 : vector<80x12xf32>
    %375 = vector.extract_strided_slice %374 {offsets = [0, 0], sizes = [80, 3], strides = [1, 1]} : vector<80x12xf32> to vector<80x3xf32>
    %376 = vector.extract_strided_slice %374 {offsets = [0, 3], sizes = [80, 3], strides = [1, 1]} : vector<80x12xf32> to vector<80x3xf32>
    %377 = vector.extract_strided_slice %374 {offsets = [0, 6], sizes = [80, 3], strides = [1, 1]} : vector<80x12xf32> to vector<80x3xf32>
    %378 = vector.extract_strided_slice %374 {offsets = [0, 9], sizes = [80, 3], strides = [1, 1]} : vector<80x12xf32> to vector<80x3xf32>
    %379 = arith.mulf %376, %346 : vector<80x3xf32>
    %380 = arith.mulf %375, %377 : vector<80x3xf32>
    %381 = arith.addf %379, %380 : vector<80x3xf32>
    %382 = math.tanh %381 : vector<80x3xf32>
    %383 = arith.mulf %378, %382 : vector<80x3xf32>
    %384 = vector.extract_strided_slice %383 {offsets = [0, 0], sizes = [80, 1], strides = [1, 1]} : vector<80x3xf32> to vector<80x1xf32>
    %385 = vector.shape_cast %384 : vector<80x1xf32> to vector<80x1xf32>
    %386 = vector.broadcast %385 : vector<80x1xf32> to vector<80x12xf32>
    %387 = vector.extract_strided_slice %383 {offsets = [0, 1], sizes = [80, 1], strides = [1, 1]} : vector<80x3xf32> to vector<80x1xf32>
    %388 = vector.shape_cast %387 : vector<80x1xf32> to vector<80x1xf32>
    %389 = vector.broadcast %388 : vector<80x1xf32> to vector<80x12xf32>
    %390 = vector.extract_strided_slice %383 {offsets = [0, 2], sizes = [80, 1], strides = [1, 1]} : vector<80x3xf32> to vector<80x1xf32>
    %391 = vector.shape_cast %390 : vector<80x1xf32> to vector<80x1xf32>
    %392 = vector.broadcast %391 : vector<80x1xf32> to vector<80x12xf32>
    %393 = arith.mulf %386, %1 : vector<80x12xf32>
    %394 = arith.mulf %389, %3 : vector<80x12xf32>
    %395 = arith.addf %393, %394 : vector<80x12xf32>
    %396 = arith.mulf %392, %5 : vector<80x12xf32>
    %397 = arith.addf %395, %396 : vector<80x12xf32>
    %398 = arith.mulf %386, %7 : vector<80x12xf32>
    %399 = arith.mulf %389, %9 : vector<80x12xf32>
    %400 = arith.addf %398, %399 : vector<80x12xf32>
    %401 = arith.mulf %392, %11 : vector<80x12xf32>
    %402 = arith.addf %400, %401 : vector<80x12xf32>
    %403 = vector.extract_strided_slice %402 {offsets = [0, 0], sizes = [64, 12], strides = [1, 1]} : vector<80x12xf32> to vector<64x12xf32>
    %404 = tpu.concatenate %17, %403 in 0 : vector<16x12xf32>, vector<64x12xf32> -> vector<80x12xf32>
    %405 = arith.addf %132, %397 : vector<80x12xf32>
    %406 = arith.addf %405, %404 : vector<80x12xf32>
    %407 = math.tanh %406 : vector<80x12xf32>
    %408 = arith.mulf %407, %12 : vector<80x12xf32>
    %409 = arith.addf %408, %13 : vector<80x12xf32>
    %410 = vector.extract_strided_slice %409 {offsets = [0, 0], sizes = [80, 3], strides = [1, 1]} : vector<80x12xf32> to vector<80x3xf32>
    %411 = vector.extract_strided_slice %409 {offsets = [0, 3], sizes = [80, 3], strides = [1, 1]} : vector<80x12xf32> to vector<80x3xf32>
    %412 = vector.extract_strided_slice %409 {offsets = [0, 6], sizes = [80, 3], strides = [1, 1]} : vector<80x12xf32> to vector<80x3xf32>
    %413 = vector.extract_strided_slice %409 {offsets = [0, 9], sizes = [80, 3], strides = [1, 1]} : vector<80x12xf32> to vector<80x3xf32>
    %414 = arith.mulf %411, %381 : vector<80x3xf32>
    %415 = arith.mulf %410, %412 : vector<80x3xf32>
    %416 = arith.addf %414, %415 : vector<80x3xf32>
    %417 = math.tanh %416 : vector<80x3xf32>
    %418 = arith.mulf %413, %417 : vector<80x3xf32>
    %419 = vector.extract_strided_slice %418 {offsets = [0, 0], sizes = [80, 1], strides = [1, 1]} : vector<80x3xf32> to vector<80x1xf32>
    %420 = vector.shape_cast %419 : vector<80x1xf32> to vector<80x1xf32>
    %421 = vector.broadcast %420 : vector<80x1xf32> to vector<80x12xf32>
    %422 = vector.extract_strided_slice %418 {offsets = [0, 1], sizes = [80, 1], strides = [1, 1]} : vector<80x3xf32> to vector<80x1xf32>
    %423 = vector.shape_cast %422 : vector<80x1xf32> to vector<80x1xf32>
    %424 = vector.broadcast %423 : vector<80x1xf32> to vector<80x12xf32>
    %425 = vector.extract_strided_slice %418 {offsets = [0, 2], sizes = [80, 1], strides = [1, 1]} : vector<80x3xf32> to vector<80x1xf32>
    %426 = vector.shape_cast %425 : vector<80x1xf32> to vector<80x1xf32>
    %427 = vector.broadcast %426 : vector<80x1xf32> to vector<80x12xf32>
    %428 = arith.mulf %421, %1 : vector<80x12xf32>
    %429 = arith.mulf %424, %3 : vector<80x12xf32>
    %430 = arith.addf %428, %429 : vector<80x12xf32>
    %431 = arith.mulf %427, %5 : vector<80x12xf32>
    %432 = arith.addf %430, %431 : vector<80x12xf32>
    %433 = arith.mulf %421, %7 : vector<80x12xf32>
    %434 = arith.mulf %424, %9 : vector<80x12xf32>
    %435 = arith.addf %433, %434 : vector<80x12xf32>
    %436 = arith.mulf %427, %11 : vector<80x12xf32>
    %437 = arith.addf %435, %436 : vector<80x12xf32>
    %438 = vector.extract_strided_slice %437 {offsets = [0, 0], sizes = [64, 12], strides = [1, 1]} : vector<80x12xf32> to vector<64x12xf32>
    %439 = tpu.concatenate %17, %438 in 0 : vector<16x12xf32>, vector<64x12xf32> -> vector<80x12xf32>
    %440 = arith.addf %147, %432 : vector<80x12xf32>
    %441 = arith.addf %440, %439 : vector<80x12xf32>
    %442 = math.tanh %441 : vector<80x12xf32>
    %443 = arith.mulf %442, %12 : vector<80x12xf32>
    %444 = arith.addf %443, %13 : vector<80x12xf32>
    %445 = vector.extract_strided_slice %444 {offsets = [0, 0], sizes = [80, 3], strides = [1, 1]} : vector<80x12xf32> to vector<80x3xf32>
    %446 = vector.extract_strided_slice %444 {offsets = [0, 3], sizes = [80, 3], strides = [1, 1]} : vector<80x12xf32> to vector<80x3xf32>
    %447 = vector.extract_strided_slice %444 {offsets = [0, 6], sizes = [80, 3], strides = [1, 1]} : vector<80x12xf32> to vector<80x3xf32>
    %448 = vector.extract_strided_slice %444 {offsets = [0, 9], sizes = [80, 3], strides = [1, 1]} : vector<80x12xf32> to vector<80x3xf32>
    %449 = arith.mulf %446, %416 : vector<80x3xf32>
    %450 = arith.mulf %445, %447 : vector<80x3xf32>
    %451 = arith.addf %449, %450 : vector<80x3xf32>
    %452 = math.tanh %451 : vector<80x3xf32>
    %453 = arith.mulf %448, %452 : vector<80x3xf32>
    %454 = vector.extract_strided_slice %453 {offsets = [0, 0], sizes = [80, 1], strides = [1, 1]} : vector<80x3xf32> to vector<80x1xf32>
    %455 = vector.shape_cast %454 : vector<80x1xf32> to vector<80x1xf32>
    %456 = vector.broadcast %455 : vector<80x1xf32> to vector<80x12xf32>
    %457 = vector.extract_strided_slice %453 {offsets = [0, 1], sizes = [80, 1], strides = [1, 1]} : vector<80x3xf32> to vector<80x1xf32>
    %458 = vector.shape_cast %457 : vector<80x1xf32> to vector<80x1xf32>
    %459 = vector.broadcast %458 : vector<80x1xf32> to vector<80x12xf32>
    %460 = vector.extract_strided_slice %453 {offsets = [0, 2], sizes = [80, 1], strides = [1, 1]} : vector<80x3xf32> to vector<80x1xf32>
    %461 = vector.shape_cast %460 : vector<80x1xf32> to vector<80x1xf32>
    %462 = vector.broadcast %461 : vector<80x1xf32> to vector<80x12xf32>
    %463 = arith.mulf %456, %1 : vector<80x12xf32>
    %464 = arith.mulf %459, %3 : vector<80x12xf32>
    %465 = arith.addf %463, %464 : vector<80x12xf32>
    %466 = arith.mulf %462, %5 : vector<80x12xf32>
    %467 = arith.addf %465, %466 : vector<80x12xf32>
    %468 = arith.mulf %456, %7 : vector<80x12xf32>
    %469 = arith.mulf %459, %9 : vector<80x12xf32>
    %470 = arith.addf %468, %469 : vector<80x12xf32>
    %471 = arith.mulf %462, %11 : vector<80x12xf32>
    %472 = arith.addf %470, %471 : vector<80x12xf32>
    %473 = vector.extract_strided_slice %472 {offsets = [0, 0], sizes = [64, 12], strides = [1, 1]} : vector<80x12xf32> to vector<64x12xf32>
    %474 = tpu.concatenate %17, %473 in 0 : vector<16x12xf32>, vector<64x12xf32> -> vector<80x12xf32>
    %475 = arith.addf %14, %467 : vector<80x12xf32>
    %476 = arith.addf %475, %474 : vector<80x12xf32>
    %477 = math.tanh %476 : vector<80x12xf32>
    %478 = arith.mulf %477, %12 : vector<80x12xf32>
    %479 = arith.addf %478, %13 : vector<80x12xf32>
    %480 = vector.extract_strided_slice %479 {offsets = [0, 0], sizes = [80, 3], strides = [1, 1]} : vector<80x12xf32> to vector<80x3xf32>
    %481 = vector.extract_strided_slice %479 {offsets = [0, 3], sizes = [80, 3], strides = [1, 1]} : vector<80x12xf32> to vector<80x3xf32>
    %482 = vector.extract_strided_slice %479 {offsets = [0, 6], sizes = [80, 3], strides = [1, 1]} : vector<80x12xf32> to vector<80x3xf32>
    %483 = vector.extract_strided_slice %479 {offsets = [0, 9], sizes = [80, 3], strides = [1, 1]} : vector<80x12xf32> to vector<80x3xf32>
    %484 = arith.mulf %481, %451 : vector<80x3xf32>
    %485 = arith.mulf %480, %482 : vector<80x3xf32>
    %486 = arith.addf %484, %485 : vector<80x3xf32>
    %487 = math.tanh %486 : vector<80x3xf32>
    %488 = arith.mulf %483, %487 : vector<80x3xf32>
    %489 = vector.extract_strided_slice %488 {offsets = [0, 0], sizes = [80, 1], strides = [1, 1]} : vector<80x3xf32> to vector<80x1xf32>
    %490 = vector.shape_cast %489 : vector<80x1xf32> to vector<80x1xf32>
    %491 = vector.broadcast %490 : vector<80x1xf32> to vector<80x12xf32>
    %492 = vector.extract_strided_slice %488 {offsets = [0, 1], sizes = [80, 1], strides = [1, 1]} : vector<80x3xf32> to vector<80x1xf32>
    %493 = vector.shape_cast %492 : vector<80x1xf32> to vector<80x1xf32>
    %494 = vector.broadcast %493 : vector<80x1xf32> to vector<80x12xf32>
    %495 = vector.extract_strided_slice %488 {offsets = [0, 2], sizes = [80, 1], strides = [1, 1]} : vector<80x3xf32> to vector<80x1xf32>
    %496 = vector.shape_cast %495 : vector<80x1xf32> to vector<80x1xf32>
    %497 = vector.broadcast %496 : vector<80x1xf32> to vector<80x12xf32>
    %498 = arith.mulf %491, %1 : vector<80x12xf32>
    %499 = arith.mulf %494, %3 : vector<80x12xf32>
    %500 = arith.addf %498, %499 : vector<80x12xf32>
    %501 = arith.mulf %497, %5 : vector<80x12xf32>
    %502 = arith.addf %500, %501 : vector<80x12xf32>
    %503 = arith.mulf %491, %7 : vector<80x12xf32>
    %504 = arith.mulf %494, %9 : vector<80x12xf32>
    %505 = arith.addf %503, %504 : vector<80x12xf32>
    %506 = arith.mulf %497, %11 : vector<80x12xf32>
    %507 = arith.addf %505, %506 : vector<80x12xf32>
    %508 = vector.extract_strided_slice %507 {offsets = [0, 0], sizes = [64, 12], strides = [1, 1]} : vector<80x12xf32> to vector<64x12xf32>
    %509 = tpu.concatenate %17, %508 in 0 : vector<16x12xf32>, vector<64x12xf32> -> vector<80x12xf32>
    %510 = arith.addf %14, %502 : vector<80x12xf32>
    %511 = arith.addf %510, %509 : vector<80x12xf32>
    %512 = math.tanh %511 : vector<80x12xf32>
    %513 = arith.mulf %512, %12 : vector<80x12xf32>
    %514 = arith.addf %513, %13 : vector<80x12xf32>
    %515 = vector.extract_strided_slice %514 {offsets = [0, 0], sizes = [80, 3], strides = [1, 1]} : vector<80x12xf32> to vector<80x3xf32>
    %516 = vector.extract_strided_slice %514 {offsets = [0, 3], sizes = [80, 3], strides = [1, 1]} : vector<80x12xf32> to vector<80x3xf32>
    %517 = vector.extract_strided_slice %514 {offsets = [0, 6], sizes = [80, 3], strides = [1, 1]} : vector<80x12xf32> to vector<80x3xf32>
    %518 = vector.extract_strided_slice %514 {offsets = [0, 9], sizes = [80, 3], strides = [1, 1]} : vector<80x12xf32> to vector<80x3xf32>
    %519 = arith.mulf %516, %486 : vector<80x3xf32>
    %520 = arith.mulf %515, %517 : vector<80x3xf32>
    %521 = arith.addf %519, %520 : vector<80x3xf32>
    %522 = math.tanh %521 : vector<80x3xf32>
    %523 = arith.mulf %518, %522 : vector<80x3xf32>
    %524 = vector.extract_strided_slice %523 {offsets = [0, 0], sizes = [80, 1], strides = [1, 1]} : vector<80x3xf32> to vector<80x1xf32>
    %525 = vector.shape_cast %524 : vector<80x1xf32> to vector<80x1xf32>
    %526 = vector.broadcast %525 : vector<80x1xf32> to vector<80x12xf32>
    %527 = vector.extract_strided_slice %523 {offsets = [0, 1], sizes = [80, 1], strides = [1, 1]} : vector<80x3xf32> to vector<80x1xf32>
    %528 = vector.shape_cast %527 : vector<80x1xf32> to vector<80x1xf32>
    %529 = vector.broadcast %528 : vector<80x1xf32> to vector<80x12xf32>
    %530 = vector.extract_strided_slice %523 {offsets = [0, 2], sizes = [80, 1], strides = [1, 1]} : vector<80x3xf32> to vector<80x1xf32>
    %531 = vector.shape_cast %530 : vector<80x1xf32> to vector<80x1xf32>
    %532 = vector.broadcast %531 : vector<80x1xf32> to vector<80x12xf32>
    %533 = arith.mulf %526, %1 : vector<80x12xf32>
    %534 = arith.mulf %529, %3 : vector<80x12xf32>
    %535 = arith.addf %533, %534 : vector<80x12xf32>
    %536 = arith.mulf %532, %5 : vector<80x12xf32>
    %537 = arith.addf %535, %536 : vector<80x12xf32>
    %538 = arith.mulf %526, %7 : vector<80x12xf32>
    %539 = arith.mulf %529, %9 : vector<80x12xf32>
    %540 = arith.addf %538, %539 : vector<80x12xf32>
    %541 = arith.mulf %532, %11 : vector<80x12xf32>
    %542 = arith.addf %540, %541 : vector<80x12xf32>
    %543 = vector.extract_strided_slice %542 {offsets = [0, 0], sizes = [64, 12], strides = [1, 1]} : vector<80x12xf32> to vector<64x12xf32>
    %544 = tpu.concatenate %17, %543 in 0 : vector<16x12xf32>, vector<64x12xf32> -> vector<80x12xf32>
    %545 = arith.addf %14, %537 : vector<80x12xf32>
    %546 = arith.addf %545, %544 : vector<80x12xf32>
    %547 = math.tanh %546 : vector<80x12xf32>
    %548 = arith.mulf %547, %12 : vector<80x12xf32>
    %549 = arith.addf %548, %13 : vector<80x12xf32>
    %550 = vector.extract_strided_slice %549 {offsets = [0, 0], sizes = [80, 3], strides = [1, 1]} : vector<80x12xf32> to vector<80x3xf32>
    %551 = vector.extract_strided_slice %549 {offsets = [0, 3], sizes = [80, 3], strides = [1, 1]} : vector<80x12xf32> to vector<80x3xf32>
    %552 = vector.extract_strided_slice %549 {offsets = [0, 6], sizes = [80, 3], strides = [1, 1]} : vector<80x12xf32> to vector<80x3xf32>
    %553 = vector.extract_strided_slice %549 {offsets = [0, 9], sizes = [80, 3], strides = [1, 1]} : vector<80x12xf32> to vector<80x3xf32>
    %554 = arith.mulf %551, %521 : vector<80x3xf32>
    %555 = arith.mulf %550, %552 : vector<80x3xf32>
    %556 = arith.addf %554, %555 : vector<80x3xf32>
    %557 = math.tanh %556 : vector<80x3xf32>
    %558 = arith.mulf %553, %557 : vector<80x3xf32>
    %559 = vector.extract_strided_slice %558 {offsets = [0, 0], sizes = [80, 1], strides = [1, 1]} : vector<80x3xf32> to vector<80x1xf32>
    %560 = vector.shape_cast %559 : vector<80x1xf32> to vector<80x1xf32>
    %561 = vector.broadcast %560 : vector<80x1xf32> to vector<80x12xf32>
    %562 = vector.extract_strided_slice %558 {offsets = [0, 1], sizes = [80, 1], strides = [1, 1]} : vector<80x3xf32> to vector<80x1xf32>
    %563 = vector.shape_cast %562 : vector<80x1xf32> to vector<80x1xf32>
    %564 = vector.broadcast %563 : vector<80x1xf32> to vector<80x12xf32>
    %565 = vector.extract_strided_slice %558 {offsets = [0, 2], sizes = [80, 1], strides = [1, 1]} : vector<80x3xf32> to vector<80x1xf32>
    %566 = vector.shape_cast %565 : vector<80x1xf32> to vector<80x1xf32>
    %567 = vector.broadcast %566 : vector<80x1xf32> to vector<80x12xf32>
    %568 = arith.mulf %561, %1 : vector<80x12xf32>
    %569 = arith.mulf %564, %3 : vector<80x12xf32>
    %570 = arith.addf %568, %569 : vector<80x12xf32>
    %571 = arith.mulf %567, %5 : vector<80x12xf32>
    %572 = arith.addf %570, %571 : vector<80x12xf32>
    %573 = arith.mulf %561, %7 : vector<80x12xf32>
    %574 = arith.mulf %564, %9 : vector<80x12xf32>
    %575 = arith.addf %573, %574 : vector<80x12xf32>
    %576 = arith.mulf %567, %11 : vector<80x12xf32>
    %577 = arith.addf %575, %576 : vector<80x12xf32>
    %578 = vector.extract_strided_slice %577 {offsets = [0, 0], sizes = [64, 12], strides = [1, 1]} : vector<80x12xf32> to vector<64x12xf32>
    %579 = tpu.concatenate %17, %578 in 0 : vector<16x12xf32>, vector<64x12xf32> -> vector<80x12xf32>
    %580 = arith.addf %14, %572 : vector<80x12xf32>
    %581 = arith.addf %580, %579 : vector<80x12xf32>
    %582 = math.tanh %581 : vector<80x12xf32>
    %583 = arith.mulf %582, %12 : vector<80x12xf32>
    %584 = arith.addf %583, %13 : vector<80x12xf32>
    %585 = vector.extract_strided_slice %584 {offsets = [0, 0], sizes = [80, 3], strides = [1, 1]} : vector<80x12xf32> to vector<80x3xf32>
    %586 = vector.extract_strided_slice %584 {offsets = [0, 3], sizes = [80, 3], strides = [1, 1]} : vector<80x12xf32> to vector<80x3xf32>
    %587 = vector.extract_strided_slice %584 {offsets = [0, 6], sizes = [80, 3], strides = [1, 1]} : vector<80x12xf32> to vector<80x3xf32>
    %588 = vector.extract_strided_slice %584 {offsets = [0, 9], sizes = [80, 3], strides = [1, 1]} : vector<80x12xf32> to vector<80x3xf32>
    %589 = arith.mulf %586, %556 : vector<80x3xf32>
    %590 = arith.mulf %585, %587 : vector<80x3xf32>
    %591 = arith.addf %589, %590 : vector<80x3xf32>
    %592 = math.tanh %591 : vector<80x3xf32>
    %593 = arith.mulf %588, %592 : vector<80x3xf32>
    %594 = vector.extract_strided_slice %593 {offsets = [64, 0], sizes = [10, 3], strides = [1, 1]} : vector<80x3xf32> to vector<10x3xf32>
    %c0_34 = arith.constant 0 : index
    %c0_35 = arith.constant 0 : index
    %595 = vector.load %arg9[%c0_34, %c0_35] : memref<3x3xf32, #tpu.memory_space<vmem>>, vector<1x3xf32>
    %596 = vector.shape_cast %595 : vector<1x3xf32> to vector<1x3xf32>
    %597 = vector.broadcast %596 : vector<1x3xf32> to vector<10x3xf32>
    %c1_36 = arith.constant 1 : index
    %c0_37 = arith.constant 0 : index
    %598 = vector.load %arg9[%c1_36, %c0_37] : memref<3x3xf32, #tpu.memory_space<vmem>>, vector<1x3xf32>
    %599 = vector.shape_cast %598 : vector<1x3xf32> to vector<1x3xf32>
    %600 = vector.broadcast %599 : vector<1x3xf32> to vector<10x3xf32>
    %c2_38 = arith.constant 2 : index
    %c0_39 = arith.constant 0 : index
    %601 = vector.load %arg9[%c2_38, %c0_39] : memref<3x3xf32, #tpu.memory_space<vmem>>, vector<1x3xf32>
    %602 = vector.shape_cast %601 : vector<1x3xf32> to vector<1x3xf32>
    %603 = vector.broadcast %602 : vector<1x3xf32> to vector<10x3xf32>
    %c0_40 = arith.constant 0 : index
    %c0_41 = arith.constant 0 : index
    %604 = vector.load %arg10[%c0_40, %c0_41] : memref<1x3xf32, #tpu.memory_space<vmem>>, vector<1x3xf32>
    %605 = vector.shape_cast %604 : vector<1x3xf32> to vector<1x3xf32>
    %606 = vector.broadcast %605 : vector<1x3xf32> to vector<10x3xf32>
    %607 = vector.extract_strided_slice %594 {offsets = [0, 0], sizes = [10, 1], strides = [1, 1]} : vector<10x3xf32> to vector<10x1xf32>
    %608 = vector.broadcast %607 : vector<10x1xf32> to vector<10x3xf32>
    %609 = arith.mulf %608, %597 : vector<10x3xf32>
    %610 = arith.addf %606, %609 : vector<10x3xf32>
    %611 = vector.extract_strided_slice %594 {offsets = [0, 1], sizes = [10, 1], strides = [1, 1]} : vector<10x3xf32> to vector<10x1xf32>
    %612 = vector.broadcast %611 : vector<10x1xf32> to vector<10x3xf32>
    %613 = arith.mulf %612, %600 : vector<10x3xf32>
    %614 = vector.extract_strided_slice %594 {offsets = [0, 2], sizes = [10, 1], strides = [1, 1]} : vector<10x3xf32> to vector<10x1xf32>
    %615 = vector.broadcast %614 : vector<10x1xf32> to vector<10x3xf32>
    %616 = arith.mulf %615, %603 : vector<10x3xf32>
    %617 = arith.addf %613, %616 : vector<10x3xf32>
    %618 = arith.addf %610, %617 : vector<10x3xf32>
    %cst_42 = arith.constant 0.000000e+00 : f32
    %619 = vector.broadcast %cst_42 : f32 to vector<10x3xf32>
    %620 = arith.maximumf %618, %619 : vector<10x3xf32>
    %cst_43 = arith.constant dense<0xFF800000> : vector<10xf32>
    %621 = vector.multi_reduction <maximumf>, %620, %cst_43 [1] : vector<10x3xf32> to vector<10xf32>
    %622 = vector.shape_cast %621 : vector<10xf32> to vector<10x1xf32>
    %623 = vector.broadcast %622 : vector<10x1xf32> to vector<10x3xf32>
    %624 = arith.subf %620, %623 : vector<10x3xf32>
    %625 = math.exp %624 : vector<10x3xf32>
    %cst_44 = arith.constant dense<0.000000e+00> : vector<10xf32>
    %626 = vector.multi_reduction <add>, %625, %cst_44 [1] : vector<10x3xf32> to vector<10xf32>
    %627 = vector.shape_cast %626 : vector<10xf32> to vector<10x1xf32>
    %628 = vector.broadcast %627 : vector<10x1xf32> to vector<10x3xf32>
    %629 = arith.divf %625, %628 : vector<10x3xf32>
    %c0_45 = arith.constant 0 : index
    %c0_46 = arith.constant 0 : index
    %630 = vector.load %arg11[%c0_45, %c0_46] : memref<10x3xf32, #tpu.memory_space<vmem>>, vector<10x3xf32>
    tpu.vector_store %arg11[%c0_45, %c0_46], %629 {strides = array<i32>} : memref<10x3xf32, #tpu.memory_space<vmem>>, vector<10x3xf32>,
    return
  }
}

</mosaic_0001>

<bundles_post_ra>
// kernel: tpu_custom_call.1
= control target key start
LH: loop header
LB: loop body
LE: loop exit
PB: predicated region body
PF: predicated region fallthrough
CT: control target
= control target key end

     0   :  { %v9318_v0 = vmov 1   ;;  %v9322_v1 = vmov 0   ;;  %v9320_v5 = vmov 2   ;;  %s5154_s13 = smov 122   ;;  %s5155_s20 = smov 3   ;;  %vm4223_vm0 = vcmask 23552   ;;  %s9304_s0 = inlined_call_operand.vmem [shape: f32[8,16,3], index: 0, kind: input, shape index: {}]   ;;  %s9305_s1 = inlined_call_operand.vmem [shape: f32[80,3], index: 1, kind: input, shape index: {}]   ;;  %s9306_s3 = inlined_call_operand.vmem [shape: f32[3,12], index: 3, kind: input, shape index: {}]   ;;  %s9307_s5 = inlined_call_operand.vmem [shape: f32[3,80,12], index: 5, kind: input, shape index: {}]   ;;  %s9308_s6 = inlined_call_operand.vmem [shape: f32[80,12], index: 6, kind: input, shape index: {}]   ;;  %s9309_s7 = inlined_call_operand.vmem [shape: f32[80,12], index: 7, kind: input, shape index: {}]   ;;  %s9310_s8 = inlined_call_operand.vmem [shape: f32[80,12], index: 8, kind: input, shape index: {}]   ;;  %s9311_s2 = inlined_call_operand.vmem [shape: f32[80,3], index: 2, kind: input, shape index: {}]   ;;  %s9312_s4 = inlined_call_operand.vmem [shape: f32[3,80,12], index: 4, kind: input, shape index: {}]   ;;  %s9313_s9 = inlined_call_operand.vmem [shape: f32[3,3], index: 9, kind: input, shape index: {}]   ;;  %s9314_s10 = inlined_call_operand.vmem [shape: f32[1,3], index: 10, kind: input, shape index: {}]   ;;  %s9315_s11 = inlined_call_operand.vmem [shape: f32[10,3], index: 11, kind: output, shape index: {}]  }
   0x1   :  { %4307 = vset.pattern.permute.xlu1 %v9318_v0  ;;  %4306 = vset.pattern.permute.xlu0 %v9322_v1  ;;  %v126_v2 = vld [vmem:[%s9304_s0] sm:$0xff]  ;;  %v127_v3 = vld [vmem:[%s9304_s0 + $0x8] sm:$0xff]  ;;  %v5266_v22 = vld [vmem:[%s9307_s5 + $0x50] sm:$0xff]  ;;  %s5157_s23 = smov 6   ;;  %s5158_s26 = smov 9   ;;  %vm4227_vm1 = vcmask 17408  }
   0x2   :  { %170 = vperm.xlu1 %4307, %v126_v2   ;;  %159 = vperm.xlu0 %4306, %v126_v2   ;;  %v462_v4 = vld [vmem:[%s9305_s1 + $0x8] sm:$0xff]  ;;  %v461_v6 = vld [vmem:[%s9305_s1] sm:$0xff]  ;;  %v5286_v35 = vld [vmem:[%s9307_s5 + $0x58] sm:$0xff] }
   0x3   :  { %v5243_v13 = vld [vmem:[%s9306_s3 + $0x1] ss:$0 sm:$0xff]  ;;  %v5248_v14 = vld [vmem:[%s9306_s3] ss:$0 sm:$0xff]  ;;  %v5255_v19 = vld [vmem:[%s9306_s3 + $0x2] ss:$0 sm:$0xff] }
   0x4   :  { %v5261_v21 = vld [vmem:[%s9307_s5] sm:$0xff]  ;;  %v5292_v38 = vld [vmem:[%s9307_s5 + $0x8] sm:$0xff] }
   0x5   :  { %v5271_v24 = vld [vmem:[%s9307_s5 + $0xa0] sm:$0xff]  ;;  %v5299_v44 = vld [vmem:[%s9307_s5 + $0xa8] sm:$0xff] }
   0x6   :  { %174 = vperm.xlu1 %4307, %v127_v3   ;;  %164 = vperm.xlu0 %4306, %v127_v3   ;;  %v5280_v32 = vld [vmem:[%s9308_s6] sm:$0xff]  ;;  %v5305_v47 = vld [vmem:[%s9308_s6 + $0x8] sm:$0xff] }
   0x7   :  { %v5312_v54 = vld [vmem:[%s9309_s7] sm:$0xff]  ;;  %v5328_v59 = vld [vmem:[%s9309_s7 + $0x8] sm:$0xff] }
   0x8   :  { %v5317_v56 = vld [vmem:[%s9310_s8] sm:$0xff]  ;;  %v5336_v62 = vld [vmem:[%s9310_s8 + $0x8] sm:$0xff] }
   0x9   :  { %v471_v60 = vld [vmem:[%s9311_s2] sm:$0xff] }
   0xa   :  { %4308 = vset.pattern.permute.xlu1 %v9320_v5  ;;  %488 = vperm.xlu0 %4306, %v462_v4  }
   0xb   :  { %186 = vperm.xlu1 %4308, %v127_v3   ;;  %v472_v3 = vld [vmem:[%s9311_s2 + $0x8] sm:$0xff] }
   0xe   :  { %4310 = vset.pattern.permute.xlu0 %v9320_v5 }
   0xf   :  { %4309 = vset.pattern.permute.xlu1 %v9322_v1  ;;  %182 = vperm.xlu0 %4310, %v126_v2  }
  0x10   :  { %483 = vperm.xlu1 %4309, %v461_v6  }
  0x13   :  { %500 = vperm.xlu0 %4310, %v461_v6  }
  0x14   :  { %4311 = vset.pattern.permute.xlu1 %v9318_v0 }
  0x15   :  { %492 = vperm.xlu1 %4311, %v461_v6  }
  0x19   :  { %496 = vperm.xlu1 %4311, %v462_v4  }
  0x1d   :  { %4312 = vset.pattern.permute.xlu1 %v9320_v5 }
  0x1e   :  { %504 = vperm.xlu1 %4312, %v462_v4  }
  0x81   :  { %v171_v7 = vpop.permute.xlu1 %170  ;;  %v160_v8 = vpop.permute.xlu0 %159 }
  0x82   :  { %v177_v16 = vmul.f32 %v5243_v13, %v171_v7  ;;  %v167_v17 = vmul.f32 %v5248_v14, %v160_v8 }
  0x84   :  { %v179_v23 = vadd.f32 %v177_v16, %v167_v17 }
  0x85   :  { %v175_v9 = vpop.permute.xlu1 %174  ;;  %v165_v10 = vpop.permute.xlu0 %164 }
  0x86   :  { %v178_v30 = vmul.f32 %v5243_v13, %v175_v9  ;;  %v168_v31 = vmul.f32 %v5248_v14, %v165_v10 }
  0x88   :  { %v180_v41 = vadd.f32 %v178_v30, %v168_v31  ;;  %v9326_v31 = vmov 10  }
  0x89   :  { %v489_v11 = vpop.permute.xlu0 %488 }
  0x8a   :  { %v187_v12 = vpop.permute.xlu1 %186  ;;  %v508_v45 = vmul.f32 %v489_v11, %v5292_v38 }
  0x8b   :  { %v190_v36 = vmul.f32 %v5255_v19, %v187_v12 }
  0x8d   :  { %v192_v46 = vadd.f32 %v190_v36, %v180_v41  ;;  %v129_v36 = vld [vmem:[%s9304_s0 + $0x18] sm:$0xff] }
  0x8e   :  { %v183_v15 = vpop.permute.xlu0 %182 }
  0x8f   :  { %v484_v18 = vpop.permute.xlu1 %483  ;;  %v189_v20 = vmul.f32 %v5255_v19, %v183_v15  ;;  %v194_v51 = vadd.f32 %v192_v46, %v5305_v47  ;;  %v9316_v15 = vmov 9  }
  0x90   :  { %v507_v28 = vmul.f32 %v484_v18, %v5261_v21  ;;  %4313 = vset.pattern.permute.xlu1 %v9316_v15  ;;  %4314 = vset.pattern.permute.xlu0 %v9316_v15 }
  0x91   :  { %v191_v27 = vadd.f32 %v189_v20, %v179_v23 }
  0x92   :  { %v501_v25 = vpop.permute.xlu0 %500 }
  0x93   :  { %v513_v33 = vmul.f32 %v5271_v24, %v501_v25  ;;  %v193_v39 = vadd.f32 %v191_v27, %v5280_v32  ;;  %v463_v25 = vld [vmem:[%s9305_s1 + $0x10] sm:$0xff]  ;;  %v464_v27 = vld [vmem:[%s9305_s1 + $0x18] sm:$0xff] }
  0x94   :  { %v493_v26 = vpop.permute.xlu1 %492 }
  0x95   :  { %v509_v29 = vmul.f32 %v5266_v22, %v493_v26 }
  0x97   :  { %v511_v34 = vadd.f32 %v509_v29, %v507_v28 }
  0x98   :  { %v497_v37 = vpop.permute.xlu1 %496 }
  0x99   :  { %v515_v40 = vadd.f32 %v513_v33, %v511_v34  ;;  %v510_v42 = vmul.f32 %v5286_v35, %v497_v37  ;;  %v128_v34 = vld [vmem:[%s9304_s0 + $0x10] sm:$0xff]  ;;  %v9324_v37 = vmov 11  }
  0x9b   :  { %v517_v43 = vadd.f32 %v515_v40, %v193_v39  ;;  %v512_v49 = vadd.f32 %v510_v42, %v508_v45 }
  0x9d   :  { %4562 = vtanh.f32 %v517_v43  ;;  %v505_v48 = vpop.permute.xlu1 %504 }
  0x9e   :  { %v514_v50 = vmul.f32 %v5299_v44, %v505_v48 }
  0xa0   :  { %v516_v52 = vadd.f32 %v514_v50, %v512_v49 }
  0xa2   :  { %v518_v53 = vadd.f32 %v516_v52, %v194_v51 }
  0xa4   :  { %4564 = vtanh.f32 %v518_v53  ;;  %v5399_v53 = vld [vmem:[%s9307_s5 + $0x60] sm:$0xff] }
  0xa7   :  { %v4563_v55 = vpop.eup %4562 }
  0xa8   :  { %v523_v57 = vmul.f32 %v4563_v55, %v5312_v54 }
  0xaa   :  { %v5321_v58 = vadd.f32 %v523_v57, %v5317_v56  ;;  %v5404_v57 = vld [vmem:[%s9307_s5 + $0x10] sm:$0xff] }
  0xac   :  { %539 = vrot.lane.b32.xlu1 %v5321_v58, %s5154_s13 }
  0xae   :  { %v4565_v61 = vpop.eup %4564 }
  0xaf   :  { %v524_v63 = vmul.f32 %v4565_v61, %v5328_v59 }
  0xb0   :  { %529 = vrot.lane.b32.xlu1 %v471_v60, %s5155_s20 }
  0xb1   :  { %v5341_v2 = vadd.f32 %v524_v63, %v5336_v62 }
  0xb3   :  { %541 = vrot.lane.b32.xlu0 %v5341_v2, %s5154_s13 }
  0xb7   :  { %531 = vrot.lane.b32.xlu0 %v472_v3, %s5155_s20 }
 0x11e   :  { %v540_v4 = vpop.permute.xlu1 %539 }
 0x11f   :  { %v545_v6 = vmul.f32 %v540_v4, %v5321_v58 }
 0x121   :  { %549 = vrot.lane.b32.xlu1 %v545_v6, %s5155_s20 }
 0x122   :  { %v530_v9 = vpop.permute.xlu1 %529 }
 0x123   :  { %v535_v10 = vmul.f32 %v530_v9, %v5321_v58  ;;  %v5420_v9 = vld [vmem:[%s9312_s4 + $0x50] sm:$0xff] }
 0x125   :  { %v542_v7 = vpop.permute.xlu0 %541 }
 0x126   :  { %v546_v8 = vmul.f32 %v542_v7, %v5341_v2 }
 0x128   :  { %551 = vrot.lane.b32.xlu0 %v546_v8, %s5155_s20 }
 0x129   :  { %v532_v16 = vpop.permute.xlu0 %531 }
 0x12a   :  { %v536_v17 = vmul.f32 %v532_v16, %v5341_v2 }
 0x193   :  { %v550_v11 = vpop.permute.xlu1 %549 }
 0x194   :  { %v5354_v12 = vadd.f32 %v550_v11, %v535_v10  ;;  %v5425_v10 = vld [vmem:[%s9312_s4] sm:$0xff] }
 0x196   :  { %4566 = vtanh.f32 %v5354_v12 }
 0x19a   :  { %v552_v18 = vpop.permute.xlu0 %551 }
 0x19b   :  { %v5360_v20 = vadd.f32 %v552_v18, %v536_v17  ;;  %v5431_v18 = vld [vmem:[%s9312_s4 + $0xa0] sm:$0xff] }
 0x19d   :  { %4568 = vtanh.f32 %v5360_v20 }
 0x1a0   :  { %v4567_v23 = vpop.eup %4566 }
 0x1a1   :  { %561 = vrot.lane.b32.xlu1 %v4567_v23, %s5157_s23 }
 0x1a5   :  { %577 = vrot.lane.b32.xlu1 %v463_v25, %s5158_s26 }
 0x1a7   :  { %v4569_v26 = vpop.eup %4568 }
 0x1a8   :  { %563 = vrot.lane.b32.xlu0 %v4569_v26, %s5157_s23 }
 0x1ac   :  { %579 = vrot.lane.b32.xlu0 %v464_v27, %s5158_s26 }
 0x213   :  { %v562_v28 = vpop.permute.xlu1 %561 }
 0x214   :  { %v567_v39 = vmul.f32 %v562_v28, %v5321_v58  ;;  %v5409_v58 = vld [vmem:[%s9307_s5 + $0xb0] sm:$0xff] }
 0x217   :  { %v578_v29 = vpop.permute.xlu1 %577 }
 0x218   :  { %636 = vperm.xlu1 %4313, %v578_v29  }
 0x21a   :  { %v564_v30 = vpop.permute.xlu0 %563 }
 0x21b   :  { %v568_v40 = vmul.f32 %v564_v30, %v5341_v2  ;;  %v5439_v30 = vld [vmem:[%s9308_s6 + $0x10] sm:$0xff] }
 0x21c   :  { %4315 = vset.pattern.permute.xlu1 %v9326_v31 }
 0x21d   :  { %652 = vperm.xlu1 %4315, %v578_v29  }
 0x21e   :  { %v580_v33 = vpop.permute.xlu0 %579 }
 0x21f   :  { %640 = vperm.xlu0 %4314, %v580_v33  }
 0x221   :  { %656 = vperm.xlu1 %4315, %v580_v33  }
 0x223   :  { %4316 = vset.pattern.permute.xlu0 %v9322_v1 }
 0x224   :  { %197 = vperm.xlu0 %4316, %v128_v34  }
 0x225   :  { %4317 = vset.pattern.permute.xlu1 %v9322_v1 }
 0x226   :  { %202 = vperm.xlu1 %4317, %v129_v36  }
 0x228   :  { %4319 = vset.pattern.permute.xlu0 %v9318_v0 }
 0x229   :  { %212 = vperm.xlu0 %4319, %v129_v36  }
 0x22a   :  { %4318 = vset.pattern.permute.xlu1 %v9318_v0 }
 0x22b   :  { %208 = vperm.xlu1 %4318, %v128_v34  }
 0x22d   :  { %4321 = vset.pattern.permute.xlu0 %v9324_v37 }
 0x22e   :  { %672 = vperm.xlu0 %4321, %v580_v33   ;;  %v5444_v33 = vld [vmem:[%s9307_s5 + $0x18] sm:$0xff] }
 0x22f   :  { %4320 = vset.pattern.permute.xlu1 %v9324_v37 }
 0x230   :  { %668 = vperm.xlu1 %4320, %v578_v29  }
 0x232   :  { %4324 = vset.pattern.permute.xlu0 %v9326_v31 }
 0x233   :  { %644 = vperm.xlu0 %4324, %v567_v39  }
 0x234   :  { %4322 = vset.pattern.permute.xlu1 %v9320_v5 }
 0x235   :  { %220 = vperm.xlu1 %4322, %v128_v34  }
 0x237   :  { %4326 = vset.pattern.permute.xlu0 %v9324_v37 }
 0x238   :  { %660 = vperm.xlu0 %4326, %v567_v39  }
 0x239   :  { %224 = vperm.xlu1 %4322, %v129_v36  }
 0x23c   :  { %4328 = vset.pattern.permute.xlu0 %v9316_v15 }
 0x23d   :  { %4323 = vset.pattern.permute.xlu1 %v9316_v15 }
 0x23e   :  { %627 = vperm.xlu1 %4323, %v567_v39  }
 0x242   :  { %632 = vperm.xlu1 %4323, %v568_v40  }
 0x246   :  { %4325 = vset.pattern.permute.xlu1 %v9326_v31 }
 0x247   :  { %648 = vperm.xlu1 %4325, %v568_v40  }
 0x24b   :  { %4327 = vset.pattern.permute.xlu1 %v9324_v37 }
 0x24c   :  { %664 = vperm.xlu1 %4327, %v568_v40  }
 0x250   :  { %4329 = vset.pattern.permute.xlu1 %v9316_v15 }
 0x297   :  { %v637_v41 = vpop.permute.xlu1 %636 }
 0x298   :  { %v677_v4 = vmul.f32 %v637_v41, %v5404_v57  ;;  %v5451_v41 = vld [vmem:[%s9307_s5 + $0x68] sm:$0xff] }
 0x29c   :  { %v653_v42 = vpop.permute.xlu1 %652 }
 0x29d   :  { %v681_v60 = vmul.f32 %v5399_v53, %v653_v42 }
 0x29e   :  { %v641_v43 = vpop.permute.xlu0 %640 }
 0x29f   :  { %v685_v8 = vadd.f32 %v681_v60, %v677_v4  ;;  %v678_v60 = vmul.f32 %v641_v43, %v5444_v33 }
 0x2a0   :  { %v657_v45 = vpop.permute.xlu1 %656 }
 0x2a3   :  { %v198_v46 = vpop.permute.xlu0 %197 }
 0x2a4   :  { %v205_v63 = vmul.f32 %v5248_v14, %v198_v46 }
 0x2a5   :  { %v203_v48 = vpop.permute.xlu1 %202 }
 0x2a8   :  { %v213_v50 = vpop.permute.xlu0 %212 }
 0x2aa   :  { %v209_v49 = vpop.permute.xlu1 %208 }
 0x2ab   :  { %v215_v2 = vmul.f32 %v5243_v13, %v209_v49 }
 0x2ad   :  { %v673_v52 = vpop.permute.xlu0 %672  ;;  %v217_v11 = vadd.f32 %v215_v2, %v205_v63  ;;  %v682_v63 = vmul.f32 %v5451_v41, %v657_v45  ;;  %v216_v2 = vmul.f32 %v5243_v13, %v213_v50  ;;  %v5474_v45 = vld [vmem:[%s9312_s4 + $0x8] sm:$0xff] }
 0x2af   :  { %v669_v51 = vpop.permute.xlu1 %668  ;;  %v686_v50 = vadd.f32 %v682_v63, %v678_v60 }
 0x2b0   :  { %v689_v6 = vmul.f32 %v5409_v58, %v669_v51 }
 0x2b2   :  { %v645_v61 = vpop.permute.xlu0 %644  ;;  %v693_v16 = vadd.f32 %v689_v6, %v685_v8  ;;  %v206_v8 = vmul.f32 %v5248_v14, %v203_v48  ;;  %v5481_v48 = vld [vmem:[%s9312_s4 + $0xa8] sm:$0xff] }
 0x2b3   :  { %v679_v17 = vmul.f32 %v5266_v22, %v645_v61  ;;  %v697_v26 = vmul.f32 %v5420_v9, %v645_v61  ;;  %v5459_v61 = vld [vmem:[%s9307_s5 + $0xb8] sm:$0xff] }
 0x2b4   :  { %v221_v55 = vpop.permute.xlu1 %220  ;;  %v707_v46 = vadd.f32 %v693_v16, %v5439_v30  ;;  %v690_v43 = vmul.f32 %v5459_v61, %v673_v52 }
 0x2b5   :  { %v227_v7 = vmul.f32 %v5255_v19, %v221_v55 }
 0x2b6   :  { %v694_v52 = vadd.f32 %v690_v43, %v686_v50  ;;  %v473_v50 = vld [vmem:[%s9311_s2 + $0x10] sm:$0xff] }
 0x2b7   :  { %v661_v23 = vpop.permute.xlu0 %660  ;;  %v229_v27 = vadd.f32 %v227_v7, %v217_v11  ;;  %v5466_v7 = vld [vmem:[%s9312_s4 + $0x58] sm:$0xff] }
 0x2b8   :  { %v225_v3 = vpop.permute.xlu1 %224  ;;  %v687_v34 = vmul.f32 %v5271_v24, %v661_v23  ;;  %v701_v36 = vmul.f32 %v5431_v18, %v661_v23 }
 0x2b9   :  { %v231_v49 = vadd.f32 %v229_v27, %v5280_v32  ;;  %v228_v11 = vmul.f32 %v5255_v19, %v225_v3 }
 0x2bd   :  { %v628_v25 = vpop.permute.xlu1 %627 }
 0x2be   :  { %v675_v28 = vmul.f32 %v628_v25, %v5261_v21  ;;  %v695_v29 = vmul.f32 %v628_v25, %v5425_v10 }
 0x2c0   :  { %v683_v39 = vadd.f32 %v679_v17, %v675_v28  ;;  %v699_v40 = vadd.f32 %v697_v26, %v695_v29  ;;  %v218_v17 = vadd.f32 %v216_v2, %v206_v8  ;;  %v5488_v28 = vld [vmem:[%s9308_s6 + $0x18] sm:$0xff] }
 0x2c1   :  { %v633_v42 = vpop.permute.xlu1 %632 }
 0x2c2   :  { %v691_v51 = vadd.f32 %v687_v34, %v683_v39  ;;  %v703_v55 = vadd.f32 %v701_v36, %v699_v40  ;;  %v230_v3 = vadd.f32 %v228_v11, %v218_v17  ;;  %v676_v26 = vmul.f32 %v633_v42, %v5292_v38  ;;  %v5522_v17 = vld [vmem:[%s9309_s7 + $0x18] sm:$0xff] }
 0x2c3   :  { %v696_v27 = vmul.f32 %v633_v42, %v5474_v45  ;;  %v5497_v42 = vld [vmem:[%s9309_s7 + $0x10] sm:$0xff] }
 0x2c4   :  { %v705_v4 = vadd.f32 %v691_v51, %v231_v49  ;;  %v711_v6 = vadd.f32 %v707_v46, %v703_v55  ;;  %v708_v46 = vadd.f32 %v694_v52, %v5488_v28  ;;  %v232_v49 = vadd.f32 %v230_v3, %v5305_v47  ;;  %v5527_v52 = vld [vmem:[%s9310_s8 + $0x18] sm:$0xff] }
 0x2c6   :  { %4570 = vtanh.f32 %v705_v4  ;;  %v649_v16 = vpop.permute.xlu1 %648 }
 0x2c7   :  { %4572 = vtanh.f32 %v711_v6  ;;  %v680_v23 = vmul.f32 %v5286_v35, %v649_v16  ;;  %v698_v25 = vmul.f32 %v5466_v7, %v649_v16  ;;  %v5502_v6 = vld [vmem:[%s9310_s8 + $0x10] sm:$0xff] }
 0x2c9   :  { %v684_v34 = vadd.f32 %v680_v23, %v676_v26  ;;  %v700_v36 = vadd.f32 %v698_v25, %v696_v27 }
 0x2cb   :  { %v665_v29 = vpop.permute.xlu1 %664 }
 0x2cc   :  { %v688_v39 = vmul.f32 %v5299_v44, %v665_v29  ;;  %v702_v40 = vmul.f32 %v5481_v48, %v665_v29 }
 0x2ce   :  { %v692_v51 = vadd.f32 %v688_v39, %v684_v34  ;;  %v704_v55 = vadd.f32 %v702_v40, %v700_v36  ;;  %v474_v34 = vld [vmem:[%s9311_s2 + $0x18] sm:$0xff] }
 0x2d0   :  { %v4571_v60 = vpop.eup %4570  ;;  %v706_v63 = vadd.f32 %v692_v51, %v232_v49  ;;  %v712_v2 = vadd.f32 %v708_v46, %v704_v55  ;;  %v465_v49 = vld [vmem:[%s9305_s1 + $0x20] sm:$0xff] }
 0x2d1   :  { %v4573_v4 = vpop.eup %4572  ;;  %v717_v11 = vmul.f32 %v4571_v60, %v5312_v54 }
 0x2d2   :  { %4574 = vtanh.f32 %v706_v63  ;;  %v719_v8 = vmul.f32 %v4573_v4, %v5497_v42 }
 0x2d3   :  { %4576 = vtanh.f32 %v712_v2  ;;  %v5512_v16 = vadd.f32 %v717_v11, %v5317_v56  ;;  %v466_v2 = vld [vmem:[%s9305_s1 + $0x28] sm:$0xff] }
 0x2d4   :  { %v5506_v43 = vadd.f32 %v719_v8, %v5502_v6 }
 0x2d6   :  { %737 = vrot.lane.b32.xlu0 %v5506_v43, %s5154_s13 }
 0x2da   :  { %733 = vrot.lane.b32.xlu0 %v5512_v16, %s5154_s13 }
 0x2dc   :  { %v4575_v23 = vpop.eup %4574 }
 0x2dd   :  { %v4577_v25 = vpop.eup %4576  ;;  %v718_v27 = vmul.f32 %v4575_v23, %v5328_v59  ;;  %v725_v23 = vmul.f32 %v5512_v16, %v5354_v12 }
 0x2de   :  { %601 = vrot.lane.b32.xlu0 %v473_v50, %s5155_s20  ;;  %v720_v3 = vmul.f32 %v4577_v25, %v5522_v17 }
 0x2df   :  { %v5538_v29 = vadd.f32 %v718_v27, %v5336_v62 }
 0x2e0   :  { %v5532_v26 = vadd.f32 %v720_v3, %v5527_v52 }
 0x2e2   :  { %739 = vrot.lane.b32.xlu1 %v5532_v26, %s5154_s13 }
 0x2e6   :  { %735 = vrot.lane.b32.xlu1 %v5538_v29, %s5154_s13 }
 0x2ea   :  { %603 = vrot.lane.b32.xlu1 %v474_v34, %s5155_s20 }
 0x348   :  { %v738_v36 = vpop.permute.xlu0 %737 }
 0x349   :  { %v747_v39 = vmul.f32 %v738_v36, %v5506_v43 }
 0x34b   :  { %757 = vrot.lane.b32.xlu0 %v747_v39, %s5155_s20 }
 0x34c   :  { %v734_v40 = vpop.permute.xlu0 %733 }
 0x34d   :  { %v745_v46 = vmul.f32 %v734_v40, %v5512_v16 }
 0x34f   :  { %753 = vrot.lane.b32.xlu0 %v745_v46, %s5155_s20  ;;  %v726_v46 = vmul.f32 %v5538_v29, %v5360_v20  ;;  %v131_v20 = vld [vmem:[%s9304_s0 + $0x28] sm:$0xff] }
 0x350   :  { %v602_v4 = vpop.permute.xlu0 %601 }
 0x351   :  { %v727_v8 = vmul.f32 %v5506_v43, %v602_v4  ;;  %v130_v4 = vld [vmem:[%s9304_s0 + $0x20] sm:$0xff] }
 0x353   :  { %581 = vrot.lane.b32.xlu0 %v465_v49, %s5158_s26 }
 0x354   :  { %v740_v51 = vpop.permute.xlu1 %739 }
 0x355   :  { %v748_v55 = vmul.f32 %v740_v51, %v5532_v26 }
 0x357   :  { %759 = vrot.lane.b32.xlu1 %v748_v55, %s5155_s20 }
 0x358   :  { %v736_v60 = vpop.permute.xlu1 %735 }
 0x359   :  { %v746_v63 = vmul.f32 %v736_v60, %v5538_v29 }
 0x35b   :  { %755 = vrot.lane.b32.xlu1 %v746_v63, %s5155_s20 }
 0x35c   :  { %v604_v27 = vpop.permute.xlu1 %603 }
 0x35d   :  { %v728_v34 = vmul.f32 %v5532_v26, %v604_v27 }
 0x35f   :  { %583 = vrot.lane.b32.xlu1 %v466_v2, %s5158_s26 }
 0x3bd   :  { %v758_v11 = vpop.permute.xlu0 %757 }
 0x3be   :  { %v5563_v50 = vadd.f32 %v758_v11, %v727_v8 }
 0x3c0   :  { %9509 = vst [vmem:[#allocation2_spill] sm:$0xff] %v5563_v50  ;;  %4578 = vtanh.f32 %v5563_v50 }
 0x3c1   :  { %v754_v25 = vpop.permute.xlu0 %753 }
 0x3c2   :  { %v5568_v3 = vadd.f32 %v754_v25, %v725_v23 }
 0x3c4   :  { %4580 = vtanh.f32 %v5568_v3 }
 0x3c5   :  { %v582_v55 = vpop.permute.xlu0 %581 }
 0x3c9   :  { %v760_v36 = vpop.permute.xlu1 %759 }
 0x3ca   :  { %v4579_v39 = vpop.eup %4578  ;;  %v5572_v40 = vadd.f32 %v760_v36, %v728_v34 }
 0x3cb   :  { %781 = vrot.lane.b32.xlu0 %v4579_v39, %s5157_s23 }
 0x3cc   :  { %9510 = vst [vmem:[#allocation3_spill] sm:$0xff] %v5572_v40  ;;  %4582 = vtanh.f32 %v5572_v40 }
 0x3cd   :  { %v756_v12 = vpop.permute.xlu1 %755 }
 0x3ce   :  { %v4581_v49 = vpop.eup %4580  ;;  %v5578_v51 = vadd.f32 %v756_v12, %v726_v46 }
 0x3cf   :  { %777 = vrot.lane.b32.xlu0 %v4581_v49, %s5157_s23 }
 0x3d0   :  { %9511 = vst [vmem:[#allocation4_spill] sm:$0xff] %v5578_v51  ;;  %4584 = vtanh.f32 %v5578_v51 }
 0x3d1   :  { %v584_v2 = vpop.permute.xlu1 %583 }
 0x3d3   :  { %814 = vperm.xlu0 %4328, %v582_v55  }
 0x3d6   :  { %v4583_v60 = vpop.eup %4582 }
 0x3d7   :  { %783 = vrot.lane.b32.xlu1 %v4583_v60, %s5157_s23  ;;  %4331 = vset.pattern.permute.xlu0 %v9324_v37 }
 0x3d8   :  { %862 = vperm.xlu0 %4331, %v582_v55  }
 0x3da   :  { %v4585_v63 = vpop.eup %4584 }
 0x3db   :  { %779 = vrot.lane.b32.xlu1 %v4585_v63, %s5157_s23 }
 0x3dc   :  { %4334 = vset.pattern.permute.xlu0 %v9322_v1 }
 0x3dd   :  { %240 = vperm.xlu0 %4334, %v131_v20  }
 0x3df   :  { %818 = vperm.xlu1 %4329, %v584_v2  }
 0x3e1   :  { %4336 = vset.pattern.permute.xlu0 %v9320_v5 }
 0x3e2   :  { %258 = vperm.xlu0 %4336, %v130_v4  }
 0x3e3   :  { %4330 = vset.pattern.permute.xlu1 %v9326_v31 }
 0x3e4   :  { %838 = vperm.xlu1 %4330, %v582_v55  }
 0x3e6   :  { %4337 = vset.pattern.permute.xlu0 %v9326_v31 }
 0x3e7   :  { %842 = vperm.xlu0 %4337, %v584_v2  }
 0x3e8   :  { %4332 = vset.pattern.permute.xlu1 %v9324_v37 }
 0x3e9   :  { %866 = vperm.xlu1 %4332, %v584_v2  }
 0x3ed   :  { %4333 = vset.pattern.permute.xlu1 %v9322_v1 }
 0x3ee   :  { %235 = vperm.xlu1 %4333, %v130_v4  }
 0x3f2   :  { %4335 = vset.pattern.permute.xlu1 %v9318_v0  ;;  %v5638_v0 = vld [vmem:[%s9307_s5 + $0x78] sm:$0xff] }
 0x3f3   :  { %246 = vperm.xlu1 %4335, %v130_v4   ;;  %9515 = vst [vmem:[#allocation8_spill] sm:$0xff] %v5638_v0 }
 0x3f7   :  { %250 = vperm.xlu1 %4335, %v131_v20  }
 0x3fb   :  { %4338 = vset.pattern.permute.xlu1 %v9320_v5 }
 0x3fc   :  { %262 = vperm.xlu1 %4338, %v131_v20  }
 0x400   :  { %4339 = vset.pattern.permute.xlu1 %v9316_v15 }
 0x43d   :  { %v782_v8 = vpop.permute.xlu0 %781 }
 0x43e   :  { %v791_v11 = vmul.f32 %v782_v8, %v5506_v43 }
 0x440   :  { %805 = vperm.xlu1 %4339, %v791_v11   ;;  %830 = vperm.xlu0 %4337, %v791_v11  }
 0x441   :  { %v778_v23 = vpop.permute.xlu0 %777 }
 0x442   :  { %v789_v25 = vmul.f32 %v778_v23, %v5512_v16  ;;  %v5621_v23 = vld [vmem:[%s9307_s5 + $0x70] sm:$0xff] }
 0x443   :  { %9513 = vst [vmem:[#allocation6_spill] sm:$0xff] %v5621_v23 }
 0x444   :  { %4341 = vset.pattern.permute.xlu0 %v9316_v15 }
 0x445   :  { %795 = vperm.xlu0 %4341, %v789_v25  }
 0x449   :  { %v784_v27 = vpop.permute.xlu1 %783  ;;  %4344 = vset.pattern.permute.xlu0 %v9326_v31 }
 0x44a   :  { %v792_v34 = vmul.f32 %v784_v27, %v5532_v26 }
 0x44c   :  { %810 = vperm.xlu1 %4339, %v792_v34  }
 0x44d   :  { %v780_v36 = vpop.permute.xlu1 %779 }
 0x44e   :  { %v790_v39 = vmul.f32 %v780_v36, %v5538_v29 }
 0x450   :  { %4340 = vset.pattern.permute.xlu1 %v9326_v31  ;;  %826 = vperm.xlu0 %4344, %v790_v39  }
 0x451   :  { %834 = vperm.xlu1 %4340, %v792_v34  }
 0x452   :  { %v815_v46 = vpop.permute.xlu0 %814 }
 0x454   :  { %4346 = vset.pattern.permute.xlu0 %v9324_v37 }
 0x455   :  { %4342 = vset.pattern.permute.xlu1 %v9316_v15  ;;  %850 = vperm.xlu0 %4346, %v790_v39  }
 0x456   :  { %800 = vperm.xlu1 %4342, %v790_v39   ;;  %v5628_v39 = vld [vmem:[%s9307_s5 + $0xc0] sm:$0xff] }
 0x457   :  { %v863_v49 = vpop.permute.xlu0 %862 }
 0x459   :  { %4347 = vset.pattern.permute.xlu0 %v9316_v15 }
 0x45a   :  { %4343 = vset.pattern.permute.xlu1 %v9326_v31 }
 0x45b   :  { %822 = vperm.xlu1 %4343, %v789_v25  }
 0x45c   :  { %v241_v60 = vpop.permute.xlu0 %240 }
 0x45e   :  { %v819_v43 = vpop.permute.xlu1 %818 }
 0x45f   :  { %4345 = vset.pattern.permute.xlu1 %v9324_v37 }
 0x460   :  { %854 = vperm.xlu1 %4345, %v791_v11   ;;  %v5616_v11 = vld [vmem:[%s9307_s5 + $0x20] sm:$0xff] }
 0x461   :  { %v259_v20 = vpop.permute.xlu0 %258  ;;  %9512 = vst [vmem:[#allocation5_spill] sm:$0xff] %v5616_v11 }
 0x463   :  { %v839_v16 = vpop.permute.xlu1 %838 }
 0x464   :  { %858 = vperm.xlu1 %4345, %v792_v34   ;;  %v873_v34 = vmul.f32 %v815_v46, %v5616_v11  ;;  %v879_v36 = vmul.f32 %v5621_v23, %v839_v16  ;;  %v891_v46 = vmul.f32 %v5628_v39, %v863_v49  ;;  %v244_v23 = vmul.f32 %v5248_v14, %v241_v60  ;;  %v5647_v11 = vld [vmem:[%s9307_s5 + $0xc8] sm:$0xff]  ;;  %v5660_v49 = vld [vmem:[%s9312_s4 + $0x60] sm:$0xff] }
 0x466   :  { %v843_v8 = vpop.permute.xlu0 %842  ;;  %v885_v1 = vadd.f32 %v879_v36, %v873_v34 }
 0x467   :  { %v880_v37 = vmul.f32 %v5638_v0, %v843_v8 }
 0x468   :  { %846 = vperm.xlu1 %4345, %v789_v25   ;;  %v867_v26 = vpop.permute.xlu1 %866  ;;  %v897_v60 = vadd.f32 %v891_v46, %v885_v1 }
 0x469   :  { %v892_v34 = vmul.f32 %v5647_v11, %v867_v26 }
 0x46c   :  { %4348 = vset.pattern.permute.xlu1 %v9316_v15  ;;  %v5633_v15 = vld [vmem:[%s9307_s5 + $0x28] sm:$0xff] }
 0x46d   :  { %v236_v29 = vpop.permute.xlu1 %235  ;;  %9514 = vst [vmem:[#allocation7_spill] sm:$0xff] %v5633_v15  ;;  %v874_v16 = vmul.f32 %v819_v43, %v5633_v15  ;;  %v5655_v43 = vld [vmem:[%s9312_s4 + $0x10] sm:$0xff] }
 0x46e   :  { %v243_v40 = vmul.f32 %v5248_v14, %v236_v29  ;;  %v265_v29 = vmul.f32 %v5255_v19, %v259_v20  ;;  %v5677_v20 = vld [vmem:[%s9312_s4 + $0x68] sm:$0xff] }
 0x46f   :  { %v886_v8 = vadd.f32 %v880_v37, %v874_v16 }
 0x472   :  { %v247_v12 = vpop.permute.xlu1 %246 }
 0x473   :  { %v253_v51 = vmul.f32 %v5243_v13, %v247_v12 }
 0x475   :  { %v255_v12 = vadd.f32 %v253_v51, %v243_v40  ;;  %v898_v40 = vadd.f32 %v892_v34, %v886_v8 }
 0x476   :  { %v251_v55 = vpop.permute.xlu1 %250 }
 0x477   :  { %v254_v50 = vmul.f32 %v5243_v13, %v251_v55  ;;  %v5667_v13 = vld [vmem:[%s9308_s6 + $0x20] sm:$0xff] }
 0x479   :  { %v256_v55 = vadd.f32 %v254_v50, %v244_v23  ;;  %v5683_v50 = vld [vmem:[%s9312_s4 + $0xb0] sm:$0xff] }
 0x47b   :  { %v263_v63 = vpop.permute.xlu1 %262 }
 0x47c   :  { %v266_v15 = vmul.f32 %v5255_v19, %v263_v63  ;;  %v923_v19 = vadd.f32 %v897_v60, %v5667_v13 }
 0x47e   :  { %v268_v63 = vadd.f32 %v266_v15, %v256_v55 }
 0x4bf   :  { %v806_v2 = vpop.permute.xlu1 %805  ;;  %v831_v25 = vpop.permute.xlu0 %830 }
 0x4c0   :  { %v901_v0 = vmul.f32 %v806_v2, %v5655_v43  ;;  %v905_v1 = vmul.f32 %v5660_v49, %v831_v25  ;;  %v871_v37 = vmul.f32 %v806_v2, %v5404_v57  ;;  %v877_v26 = vmul.f32 %v5399_v53, %v831_v25  ;;  %v5690_v53 = vld [vmem:[%s9312_s4 + $0x18] sm:$0xff] }
 0x4c1   :  { %v267_v57 = vadd.f32 %v265_v29, %v255_v12 }
 0x4c2   :  { %v909_v25 = vadd.f32 %v905_v1, %v901_v0  ;;  %v883_v34 = vadd.f32 %v877_v26, %v871_v37 }
 0x4c4   :  { %v796_v31 = vpop.permute.xlu0 %795 }
 0x4c5   :  { %v869_v0 = vmul.f32 %v796_v31, %v5261_v21 }
 0x4cb   :  { %v811_v4 = vpop.permute.xlu1 %810 }
 0x4cc   :  { %v872_v16 = vmul.f32 %v811_v4, %v5444_v33 }
 0x4cf   :  { %v827_v36 = vpop.permute.xlu0 %826 }
 0x4d0   :  { %v835_v27 = vpop.permute.xlu1 %834  ;;  %v876_v2 = vmul.f32 %v5286_v35, %v827_v36  ;;  %v904_v15 = vmul.f32 %v5466_v7, %v827_v36  ;;  %v5702_v35 = vld [vmem:[%s9312_s4 + $0xb8] sm:$0xff] }
 0x4d1   :  { %v878_v51 = vmul.f32 %v5451_v41, %v835_v27  ;;  %v906_v60 = vmul.f32 %v5677_v20, %v835_v27  ;;  %v5709_v27 = vld [vmem:[%s9308_s6 + $0x28] sm:$0xff] }
 0x4d3   :  { %v884_v33 = vadd.f32 %v878_v51, %v872_v16 }
 0x4d4   :  { %v851_v8 = vpop.permute.xlu0 %850 }
 0x4d5   :  { %v801_v5 = vpop.permute.xlu1 %800  ;;  %v888_v7 = vmul.f32 %v5299_v44, %v851_v8  ;;  %v912_v51 = vmul.f32 %v5481_v48, %v851_v8  ;;  %v924_v44 = vadd.f32 %v898_v40, %v5709_v27  ;;  %v269_v48 = vadd.f32 %v267_v57, %v5280_v32  ;;  %v5733_v32 = vld [vmem:[%s9310_s8 + $0x20] sm:$0xff] }
 0x4d6   :  { %v870_v46 = vmul.f32 %v801_v5, %v5292_v38  ;;  %v900_v38 = vmul.f32 %v801_v5, %v5474_v45  ;;  %v902_v5 = vmul.f32 %v811_v4, %v5690_v53 }
 0x4d8   :  { %v882_v29 = vadd.f32 %v876_v2, %v870_v46  ;;  %v908_v36 = vadd.f32 %v904_v15, %v900_v38  ;;  %v910_v37 = vadd.f32 %v906_v60, %v902_v5  ;;  %v899_v46 = vmul.f32 %v796_v31, %v5425_v10 }
 0x4da   :  { %v823_v14 = vpop.permute.xlu1 %822  ;;  %v894_v2 = vadd.f32 %v888_v7, %v882_v29 }
 0x4db   :  { %v903_v55 = vmul.f32 %v5420_v9, %v823_v14  ;;  %v270_v9 = vadd.f32 %v268_v63, %v5305_v47 }
 0x4dd   :  { %v920_v8 = vadd.f32 %v894_v2, %v270_v9  ;;  %v468_v9 = vld [vmem:[%s9305_s1 + $0x38] sm:$0xff] }
 0x4df   :  { %v855_v23 = vpop.permute.xlu1 %854 }
 0x4e0   :  { %v913_v41 = vmul.f32 %v5683_v50, %v855_v23  ;;  %v889_v12 = vmul.f32 %v5409_v58, %v855_v23  ;;  %v875_v58 = vmul.f32 %v5266_v22, %v823_v14  ;;  %v916_v14 = vadd.f32 %v912_v51, %v908_v36 }
 0x4e2   :  { %v917_v45 = vadd.f32 %v913_v41, %v909_v25  ;;  %v895_v23 = vadd.f32 %v889_v12, %v883_v34  ;;  %v881_v25 = vadd.f32 %v875_v58, %v869_v0  ;;  %v5747_v12 = vld [vmem:[%s9310_s8 + $0x28] sm:$0xff] }
 0x4e3   :  { %v859_v1 = vpop.permute.xlu1 %858 }
 0x4e4   :  { %v929_v26 = vadd.f32 %v923_v19, %v917_v45  ;;  %v890_v21 = vmul.f32 %v5459_v61, %v859_v1  ;;  %v914_v4 = vmul.f32 %v5702_v35, %v859_v1  ;;  %v907_v19 = vadd.f32 %v903_v55, %v899_v46 }
 0x4e5   :  { %v921_v40 = vadd.f32 %v895_v23, %v5439_v30 }
 0x4e6   :  { %4586 = vtanh.f32 %v929_v26  ;;  %v896_v38 = vadd.f32 %v890_v21, %v884_v33  ;;  %v918_v22 = vadd.f32 %v914_v4, %v910_v37 }
 0x4e7   :  { %v847_v16 = vpop.permute.xlu1 %846 }
 0x4e8   :  { %v922_v61 = vadd.f32 %v896_v38, %v5488_v28  ;;  %v930_v60 = vadd.f32 %v924_v44, %v918_v22  ;;  %v887_v31 = vmul.f32 %v5271_v24, %v847_v16  ;;  %v911_v10 = vmul.f32 %v5431_v18, %v847_v16  ;;  %v5728_v24 = vld [vmem:[%s9309_s7 + $0x20] sm:$0xff]  ;;  %v5739_v28 = vld [vmem:[%s9309_s7 + $0x28] sm:$0xff] }
 0x4ea   :  { %v928_v41 = vadd.f32 %v922_v61, %v916_v14  ;;  %4588 = vtanh.f32 %v930_v60  ;;  %v893_v34 = vadd.f32 %v887_v31, %v881_v25  ;;  %v915_v47 = vadd.f32 %v911_v10, %v907_v19  ;;  %v467_v14 = vld [vmem:[%s9305_s1 + $0x30] sm:$0xff] }
 0x4ec   :  { %4590 = vtanh.f32 %v928_v41  ;;  %v919_v63 = vadd.f32 %v893_v34, %v269_v48  ;;  %v927_v15 = vadd.f32 %v921_v40, %v915_v47 }
 0x4ed   :  { %4592 = vtanh.f32 %v920_v8 }
 0x4ee   :  { %4594 = vtanh.f32 %v919_v63 }
 0x4ef   :  { %4596 = vtanh.f32 %v927_v15 }
 0x4f0   :  { %v4587_v18 = vpop.eup %4586 }
 0x4f1   :  { %v941_v30 = vmul.f32 %v4587_v18, %v5728_v24  ;;  %v9516_v18 = vld [vmem:[#allocation2_spill] sm:$0xff] }
 0x4f3   :  { %v5742_v57 = vadd.f32 %v941_v30, %v5733_v32 }
 0x4f4   :  { %v4589_v29 = vpop.eup %4588 }
 0x4f5   :  { %969 = vrot.lane.b32.xlu1 %v5742_v57, %s5154_s13  ;;  %v942_v0 = vmul.f32 %v4589_v29, %v5739_v28 }
 0x4f6   :  { %v4591_v5 = vpop.eup %4590 }
 0x4f7   :  { %v4593_v33 = vpop.eup %4592  ;;  %v5753_v45 = vadd.f32 %v942_v0, %v5747_v12  ;;  %v940_v7 = vmul.f32 %v4591_v5, %v5522_v17  ;;  %v9517_v0 = vld [vmem:[#allocation4_spill] sm:$0xff] }
 0x4f8   :  { %v4595_v36 = vpop.eup %4594  ;;  %v938_v37 = vmul.f32 %v4593_v33, %v5328_v59  ;;  %v475_v59 = vld [vmem:[%s9311_s2 + $0x20] sm:$0xff] }
 0x4f9   :  { %v4597_v58 = vpop.eup %4596  ;;  %971 = vrot.lane.b32.xlu1 %v5753_v45, %s5154_s13  ;;  %v5760_v1 = vadd.f32 %v940_v7, %v5527_v52  ;;  %v937_v21 = vmul.f32 %v4595_v36, %v5312_v54  ;;  %v476_v54 = vld [vmem:[%s9311_s2 + $0x28] sm:$0xff]  ;;  %v9518_v7 = vmov 10  }
 0x4fa   :  { %v939_v55 = vmul.f32 %v4597_v58, %v5497_v42  ;;  %v5772_v17 = vadd.f32 %v938_v37, %v5336_v62  ;;  %v9519_v36 = vld [vmem:[#allocation3_spill] sm:$0xff] }
 0x4fb   :  { %v5775_v42 = vadd.f32 %v937_v21, %v5317_v56  ;;  %v952_v58 = vmul.f32 %v5760_v1, %v9519_v36  ;;  %v5912_v36 = vld [vmem:[%s9307_s5 + $0xd0] sm:$0xff] }
 0x4fc   :  { %v5764_v26 = vadd.f32 %v939_v55, %v5502_v6  ;;  %v950_v5 = vmul.f32 %v5772_v17, %v9517_v0  ;;  %v9520_v55 = vmov 11  }
 0x4fd   :  { %967 = vrot.lane.b32.xlu1 %v5760_v1, %s5154_s13  ;;  %v949_v34 = vmul.f32 %v5775_v42, %v5568_v3 }
 0x4fe   :  { %965 = vrot.lane.b32.xlu0 %v5764_v26, %s5154_s13  ;;  %v951_v30 = vmul.f32 %v5764_v26, %v9516_v18  ;;  %v5903_v18 = vld [vmem:[%s9307_s5 + $0x30] sm:$0xff] }
 0x501   :  { %963 = vrot.lane.b32.xlu1 %v5772_v17, %s5154_s13 }
 0x502   :  { %961 = vrot.lane.b32.xlu0 %v5775_v42, %s5154_s13 }
 0x505   :  { %607 = vrot.lane.b32.xlu1 %v476_v54, %s5155_s20  ;;  %v9521_v54 = vmov 0  }
 0x506   :  { %605 = vrot.lane.b32.xlu0 %v475_v59, %s5155_s20 }
 0x567   :  { %v970_v56 = vpop.permute.xlu1 %969 }
 0x568   :  { %v983_v62 = vmul.f32 %v970_v56, %v5742_v57 }
 0x56a   :  { %999 = vrot.lane.b32.xlu0 %v983_v62, %s5155_s20 }
 0x56b   :  { %v972_v6 = vpop.permute.xlu1 %971 }
 0x56c   :  { %v984_v52 = vmul.f32 %v972_v6, %v5753_v45 }
 0x56e   :  { %1001 = vrot.lane.b32.xlu1 %v984_v52, %s5155_s20  ;;  %v133_v52 = vld [vmem:[%s9304_s0 + $0x38] sm:$0xff] }
 0x56f   :  { %v968_v4 = vpop.permute.xlu1 %967 }
 0x570   :  { %v982_v46 = vmul.f32 %v968_v4, %v5760_v1  ;;  %v966_v51 = vpop.permute.xlu0 %965 }
 0x571   :  { %v981_v2 = vmul.f32 %v966_v51, %v5764_v26  ;;  %v9522_v51 = vmov 2  }
 0x572   :  { %997 = vrot.lane.b32.xlu1 %v982_v46, %s5155_s20  ;;  %v132_v46 = vld [vmem:[%s9304_s0 + $0x30] sm:$0xff] }
 0x573   :  { %995 = vrot.lane.b32.xlu0 %v981_v2, %s5155_s20  ;;  %v964_v23 = vpop.permute.xlu1 %963  ;;  %v9523_v2 = vmov 1  }
 0x574   :  { %v980_v44 = vmul.f32 %v964_v23, %v5772_v17  ;;  %v962_v38 = vpop.permute.xlu0 %961  ;;  %v9524_v23 = vmov 9  }
 0x575   :  { %v979_v22 = vmul.f32 %v962_v38, %v5775_v42 }
 0x576   :  { %993 = vrot.lane.b32.xlu1 %v980_v44, %s5155_s20 }
 0x577   :  { %991 = vrot.lane.b32.xlu0 %v979_v22, %s5155_s20  ;;  %v608_v25 = vpop.permute.xlu1 %607 }
 0x578   :  { %v606_v19 = vpop.permute.xlu0 %605  ;;  %v954_v40 = vmul.f32 %v5753_v45, %v608_v25 }
 0x579   :  { %v953_v10 = vmul.f32 %v5742_v57, %v606_v19 }
 0x57a   :  { %587 = vrot.lane.b32.xlu1 %v468_v9, %s5158_s26 }
 0x57b   :  { %585 = vrot.lane.b32.xlu0 %v467_v14, %s5158_s26 }
 0x5dc   :  { %v1000_v61 = vpop.permute.xlu0 %999 }
 0x5dd   :  { %v5810_v48 = vadd.f32 %v1000_v61, %v953_v10 }
 0x5df   :  { %4598 = vtanh.f32 %v5810_v48 }
 0x5e0   :  { %v1002_v16 = vpop.permute.xlu1 %1001 }
 0x5e1   :  { %v5815_v47 = vadd.f32 %v1002_v16, %v954_v40 }
 0x5e3   :  { %4600 = vtanh.f32 %v5815_v47 }
 0x5e4   :  { %v998_v60 = vpop.permute.xlu1 %997 }
 0x5e5   :  { %v996_v31 = vpop.permute.xlu0 %995  ;;  %v5835_v37 = vadd.f32 %v998_v60, %v952_v58  ;;  %v5917_v58 = vld [vmem:[%s9312_s4 + $0x20] sm:$0xff] }
 0x5e6   :  { %v5825_v33 = vadd.f32 %v996_v31, %v951_v30 }
 0x5e8   :  { %v994_v8 = vpop.permute.xlu1 %993 }
 0x5e9   :  { %v992_v41 = vpop.permute.xlu0 %991  ;;  %v5827_v3 = vadd.f32 %v994_v8, %v950_v5  ;;  %v4599_v21 = vpop.eup %4598 }
 0x5ea   :  { %v5818_v63 = vadd.f32 %v992_v41, %v949_v34 }
 0x5ec   :  { %v588_v15 = vpop.permute.xlu1 %587  ;;  %4602 = vtanh.f32 %v5818_v63 }
 0x5ed   :  { %v586_v29 = vpop.permute.xlu0 %585  ;;  %1086 = vperm.xlu1 %4348, %v588_v15   ;;  %4604 = vtanh.f32 %v5825_v33  ;;  %v4601_v59 = vpop.eup %4600 }
 0x5ee   :  { %1082 = vperm.xlu0 %4347, %v586_v29   ;;  %4606 = vtanh.f32 %v5827_v3 }
 0x5ef   :  { %4608 = vtanh.f32 %v5835_v37 }
 0x5f1   :  { %4349 = vset.pattern.permute.xlu1 %v9518_v7 }
 0x5f2   :  { %4350 = vset.pattern.permute.xlu0 %v9520_v55  ;;  %1114 = vperm.xlu1 %4349, %v586_v29  }
 0x5f3   :  { %1146 = vperm.xlu0 %4350, %v586_v29  }
 0x5f6   :  { %4351 = vset.pattern.permute.xlu1 %v9520_v55  ;;  %v4603_v56 = vpop.eup %4602 }
 0x5f7   :  { %1035 = vrot.lane.b32.xlu0 %v4599_v21, %s5157_s23  ;;  %1150 = vperm.xlu1 %4351, %v588_v15   ;;  %v4605_v62 = vpop.eup %4604  ;;  %v5922_v21 = vld [vmem:[%s9312_s4 + $0x70] sm:$0xff] }
 0x5f8   :  { %4353 = vset.pattern.permute.xlu0 %v9521_v54  ;;  %v4607_v6 = vpop.eup %4606 }
 0x5f9   :  { %v4609_v4 = vpop.eup %4608 }
 0x5fb   :  { %1027 = vrot.lane.b32.xlu0 %v4603_v56, %s5157_s23  ;;  %1037 = vrot.lane.b32.xlu1 %v4601_v59, %s5157_s23 }
 0x5fc   :  { %4352 = vset.pattern.permute.xlu1 %v9521_v54 }
 0x5ff   :  { %1031 = vrot.lane.b32.xlu0 %v4605_v62, %s5157_s23  ;;  %1029 = vrot.lane.b32.xlu1 %v4607_v6, %s5157_s23 }
 0x603   :  { %278 = vperm.xlu0 %4353, %v133_v52   ;;  %1033 = vrot.lane.b32.xlu1 %v4609_v4, %s5157_s23 }
 0x607   :  { %4355 = vset.pattern.permute.xlu0 %v9522_v51  ;;  %273 = vperm.xlu1 %4352, %v132_v46  }
 0x608   :  { %296 = vperm.xlu0 %4355, %v132_v46  }
 0x60b   :  { %4354 = vset.pattern.permute.xlu1 %v9523_v2 }
 0x60c   :  { %4356 = vset.pattern.permute.xlu0 %v9518_v7  ;;  %284 = vperm.xlu1 %4354, %v132_v46  }
 0x60d   :  { %1118 = vperm.xlu0 %4356, %v588_v15   ;;  %v5898_v15 = vld [vmem:[%s9307_s5 + $0x80] sm:$0xff] }
 0x610   :  { %288 = vperm.xlu1 %4354, %v133_v52  }
 0x614   :  { %4357 = vset.pattern.permute.xlu1 %v9522_v51 }
 0x615   :  { %300 = vperm.xlu1 %4357, %v133_v52   ;;  %v5929_v52 = vld [vmem:[%s9307_s5 + $0x88] sm:$0xff] }
 0x619   :  { %4358 = vset.pattern.permute.xlu1 %v9524_v23 }
 0x66c   :  { %v5859_v44 = vpop.permute.xlu1 %1086 }
 0x66d   :  { %v1083_v38 = vpop.permute.xlu0 %1082 }
 0x66e   :  { %v1159_v5 = vmul.f32 %v1083_v38, %v5903_v18  ;;  %v5936_v38 = vld [vmem:[%s9312_s4 + $0xc0] sm:$0xff] }
 0x66f   :  { %9525 = vst [vmem:[#allocation2_spill] sm:$0xff] %v5936_v38 }
 0x671   :  { %v1115_v22 = vpop.permute.xlu1 %1114 }
 0x672   :  { %v5861_v9 = vpop.permute.xlu0 %1146  ;;  %v1167_v30 = vmul.f32 %v5898_v15, %v1115_v22  ;;  %v5941_v22 = vld [vmem:[%s9307_s5 + $0x38] sm:$0xff] }
 0x673   :  { %v1183_v6 = vmul.f32 %v5912_v36, %v5861_v9  ;;  %9526 = vst [vmem:[#allocation4_spill] sm:$0xff] %v5941_v22 }
 0x674   :  { %v1175_v59 = vadd.f32 %v1167_v30, %v1159_v5 }
 0x676   :  { %v1036_v14 = vpop.permute.xlu0 %1035  ;;  %v5863_v25 = vpop.permute.xlu1 %1150  ;;  %v1191_v9 = vadd.f32 %v1183_v6, %v1175_v59  ;;  %v5976_v6 = vld [vmem:[%s9312_s4 + $0xc8] sm:$0xff] }
 0x677   :  { %v1049_v19 = vmul.f32 %v1036_v14, %v5742_v57  ;;  %9531 = vst [vmem:[#allocation12_spill] sm:$0xff] %v5976_v6 }
 0x679   :  { %1106 = vperm.xlu0 %4356, %v1049_v19   ;;  %1073 = vperm.xlu1 %4358, %v1049_v19  }
 0x67a   :  { %v1038_v16 = vpop.permute.xlu1 %1037  ;;  %v1028_v60 = vpop.permute.xlu0 %1027 }
 0x67b   :  { %v1050_v61 = vmul.f32 %v1038_v16, %v5753_v45  ;;  %v1045_v31 = vmul.f32 %v1028_v60, %v5775_v42 }
 0x67d   :  { %4360 = vset.pattern.permute.xlu0 %v9520_v55  ;;  %1078 = vperm.xlu1 %4358, %v1050_v61  }
 0x67e   :  { %1138 = vperm.xlu0 %4360, %v1049_v19   ;;  %v1030_v10 = vpop.permute.xlu1 %1029  ;;  %v1032_v42 = vpop.permute.xlu0 %1031  ;;  %v5948_v19 = vld [vmem:[%s9308_s6 + $0x30] sm:$0xff] }
 0x67f   :  { %v1046_v57 = vmul.f32 %v1030_v10, %v5772_v17  ;;  %v1047_v17 = vmul.f32 %v1032_v42, %v5764_v26  ;;  %9527 = vst [vmem:[#allocation3_spill] sm:$0xff] %v5948_v19  ;;  %v1160_v10 = vmul.f32 %v5859_v44, %v5941_v22  ;;  %v5963_v42 = vld [vmem:[%s9312_s4 + $0x78] sm:$0xff] }
 0x680   :  { %9529 = vst [vmem:[#allocation10_spill] sm:$0xff] %v5963_v42 }
 0x681   :  { %4359 = vset.pattern.permute.xlu1 %v9518_v7 }
 0x682   :  { %4362 = vset.pattern.permute.xlu0 %v9524_v23  ;;  %1110 = vperm.xlu1 %4359, %v1050_v61   ;;  %v1034_v45 = vpop.permute.xlu1 %1033  ;;  %v5887_v40 = vpop.permute.xlu0 %278 }
 0x683   :  { %1053 = vperm.xlu0 %4362, %v1045_v31   ;;  %v1048_v8 = vmul.f32 %v1034_v45, %v5760_v1  ;;  %v5958_v45 = vld [vmem:[%s9307_s5 + $0xd8] sm:$0xff] }
 0x684   :  { %9528 = vst [vmem:[#allocation9_spill] sm:$0xff] %v5958_v45  ;;  %v1184_v5 = vmul.f32 %v5958_v45, %v5863_v25 }
 0x686   :  { %4361 = vset.pattern.permute.xlu1 %v9520_v55  ;;  %v5885_v1 = vpop.permute.xlu1 %273 }
 0x687   :  { %4365 = vset.pattern.permute.xlu0 %v9518_v7  ;;  %1142 = vperm.xlu1 %4361, %v1050_v61   ;;  %v5891_v41 = vpop.permute.xlu0 %296 }
 0x688   :  { %1094 = vperm.xlu0 %4365, %v1046_v57  }
 0x68b   :  { %4363 = vset.pattern.permute.xlu1 %v9524_v23  ;;  %v5889_v26 = vpop.permute.xlu1 %284 }
 0x68c   :  { %4367 = vset.pattern.permute.xlu0 %v9524_v23  ;;  %1058 = vperm.xlu1 %4363, %v1046_v57   ;;  %v1119_v29 = vpop.permute.xlu0 %1118 }
 0x68d   :  { %1068 = vperm.xlu0 %4367, %v1048_v8   ;;  %v1168_v16 = vmul.f32 %v5929_v52, %v1119_v29  ;;  %v5968_v29 = vld [vmem:[%s9312_s4 + $0x28] sm:$0xff] }
 0x68e   :  { %9530 = vst [vmem:[#allocation11_spill] sm:$0xff] %v5968_v29 }
 0x68f   :  { %v5893_v34 = vpop.permute.xlu1 %288 }
 0x690   :  { %4364 = vset.pattern.permute.xlu1 %v9518_v7 }
 0x691   :  { %4370 = vset.pattern.permute.xlu0 %v9520_v55  ;;  %1090 = vperm.xlu1 %4364, %v1045_v31  }
 0x692   :  { %1126 = vperm.xlu0 %4370, %v1046_v57   ;;  %v1229_v57 = vadd.f32 %v1191_v9, %v5948_v19  ;;  %v5983_v9 = vld [vmem:[%s9308_s6 + $0x38] sm:$0xff] }
 0x693   :  { %9532 = vst [vmem:[#allocation13_spill] sm:$0xff] %v5983_v9 }
 0x694   :  { %v5906_v0 = vpop.permute.xlu1 %300 }
 0x695   :  { %4366 = vset.pattern.permute.xlu1 %v9524_v23 }
 0x696   :  { %1063 = vperm.xlu1 %4366, %v1047_v17   ;;  %4371 = vset.pattern.permute.xlu0 %v9524_v23 }
 0x69a   :  { %4368 = vset.pattern.permute.xlu1 %v9518_v7 }
 0x69b   :  { %1098 = vperm.xlu1 %4368, %v1047_v17  }
 0x69f   :  { %1102 = vperm.xlu1 %4368, %v1048_v8  }
 0x6a3   :  { %4369 = vset.pattern.permute.xlu1 %v9520_v55 }
 0x6a4   :  { %1130 = vperm.xlu1 %4369, %v1047_v17   ;;  %v1176_v17 = vadd.f32 %v1168_v16, %v1160_v10 }
 0x6a8   :  { %1134 = vperm.xlu1 %4369, %v1048_v8  }
 0x6ac   :  { %1122 = vperm.xlu1 %4369, %v1045_v31  }
 0x6b0   :  { %4372 = vset.pattern.permute.xlu1 %v9524_v23 }
 0x6f8   :  { %v1074_v56 = vpop.permute.xlu1 %1073  ;;  %v1107_v62 = vpop.permute.xlu0 %1106 }
 0x6f9   :  { %v1197_v4 = vmul.f32 %v1074_v56, %v5917_v58  ;;  %v1203_v46 = vmul.f32 %v5922_v21, %v1107_v62 }
 0x6fb   :  { %v1209_v60 = vadd.f32 %v1203_v46, %v1197_v4  ;;  %v1192_v4 = vadd.f32 %v1184_v5, %v1176_v17  ;;  %v5990_v17 = vld [vmem:[%s9309_s7 + $0x30] sm:$0xff] }
 0x6fc   :  { %v5943_v14 = vpop.permute.xlu1 %1078  ;;  %9533 = vst [vmem:[#allocation14_spill] sm:$0xff] %v5990_v17  ;;  %v5995_v5 = vld [vmem:[%s9310_s8 + $0x30] sm:$0xff] }
 0x6fd   :  { %v1139_v61 = vpop.permute.xlu0 %1138  ;;  %v1198_v46 = vmul.f32 %v5943_v14, %v5968_v29  ;;  %9534 = vst [vmem:[#allocation15_spill] sm:$0xff] %v5995_v5 }
 0x6fe   :  { %v1215_v31 = vmul.f32 %v5936_v38, %v1139_v61  ;;  %v1181_v19 = vmul.f32 %v5628_v39, %v1139_v61  ;;  %v6045_v38 = vld [vmem:[%s9306_s3 + $0x2] ss:$0 sm:$0xff] }
 0x6ff   :  { %v304_v39 = vmul.f32 %v6045_v38, %v5906_v0  ;;  %v6064_v0 = vld [vmem:[%s9307_s5] sm:$0xff] }
 0x700   :  { %v1221_v8 = vadd.f32 %v1215_v31, %v1209_v60  ;;  %v1230_v31 = vadd.f32 %v1192_v4, %v5983_v9  ;;  %v9536_v9 = vld [vmem:[#allocation5_spill] sm:$0xff] }
 0x701   :  { %v1111_v30 = vpop.permute.xlu1 %1110 }
 0x702   :  { %v1237_v44 = vadd.f32 %v1229_v57, %v1221_v8  ;;  %v1204_v59 = vmul.f32 %v5963_v42, %v1111_v30  ;;  %v6029_v42 = vld [vmem:[%s9306_s3 + $0x1] ss:$0 sm:$0xff] }
 0x703   :  { %9540 = vst [vmem:[#allocation17_spill] sm:$0xff] %v6029_v42 }
 0x704   :  { %4610 = vtanh.f32 %v1237_v44  ;;  %v1210_v60 = vadd.f32 %v1204_v59, %v1198_v46  ;;  %v5998_v46 = vpop.permute.xlu0 %1053 }
 0x706   :  { %v1143_v16 = vpop.permute.xlu1 %1142 }
 0x707   :  { %v1216_v25 = vmul.f32 %v5976_v6, %v1143_v16 }
 0x709   :  { %v1222_v10 = vadd.f32 %v1216_v25, %v1210_v60 }
 0x70b   :  { %v1238_v57 = vadd.f32 %v1230_v31, %v1222_v10  ;;  %v1059_v8 = vpop.permute.xlu1 %1058  ;;  %v6010_v31 = vld [vmem:[%s9309_s7 + $0x38] sm:$0xff]  ;;  %v1095_v10 = vpop.permute.xlu0 %1094 }
 0x70c   :  { %9535 = vst [vmem:[#allocation16_spill] sm:$0xff] %v6010_v31 }
 0x70d   :  { %4612 = vtanh.f32 %v1238_v57 }
 0x70e   :  { %v4611_v44 = vpop.eup %4610 }
 0x70f   :  { %v1253_v59 = vmul.f32 %v4611_v44, %v5990_v17  ;;  %v1157_v44 = vmul.f32 %v1074_v56, %v9536_v9  ;;  %v9537_v17 = vld [vmem:[#allocation6_spill] sm:$0xff]  ;;  %v291_v56 = vmul.f32 %v6029_v42, %v5889_v26  ;;  %v303_v26 = vmul.f32 %v6045_v38, %v5891_v41 }
 0x710   :  { %v6000_v4 = vpop.permute.xlu1 %1090  ;;  %v1165_v6 = vmul.f32 %v9537_v17, %v1107_v62  ;;  %v292_v17 = vmul.f32 %v6029_v42, %v5893_v34 }
 0x711   :  { %v6003_v60 = vadd.f32 %v1253_v59, %v5995_v5  ;;  %v6017_v59 = vld [vmem:[%s9310_s8 + $0x38] sm:$0xff]  ;;  %v6022_v5 = vld [vmem:[%s9306_s3] ss:$0 sm:$0xff] }
 0x712   :  { %9538 = vst [vmem:[#allocation5_spill] sm:$0xff] %v6017_v59  ;;  %9539 = vst [vmem:[#allocation6_spill] sm:$0xff] %v6022_v5  ;;  %v281_v29 = vmul.f32 %v6022_v5, %v5885_v1  ;;  %v282_v9 = vmul.f32 %v6022_v5, %v5887_v40  ;;  %v1173_v22 = vadd.f32 %v1165_v6, %v1157_v44  ;;  %v1069_v40 = vpop.permute.xlu0 %1068 }
 0x713   :  { %1291 = vrot.lane.b32.xlu1 %v6003_v60, %s5154_s13  ;;  %v1182_v5 = vmul.f32 %v5647_v11, %v1143_v16  ;;  %v6071_v11 = vld [vmem:[%s9307_s5 + $0x58] sm:$0xff] }
 0x714   :  { %v294_v34 = vadd.f32 %v292_v17, %v282_v9  ;;  %v1189_v61 = vadd.f32 %v1181_v19, %v1173_v22  ;;  %v1153_v22 = vmul.f32 %v6064_v0, %v5998_v46  ;;  %v6090_v17 = vld [vmem:[%s9307_s5 + $0x60] sm:$0xff] }
 0x715   :  { %v1064_v25 = vpop.permute.xlu1 %1063 }
 0x716   :  { %v1227_v42 = vadd.f32 %v1189_v61, %v5667_v13  ;;  %v6077_v13 = vld [vmem:[%s9307_s5 + $0x8] sm:$0xff]  ;;  %v1127_v19 = vpop.permute.xlu0 %1126 }
 0x717   :  { %v4613_v57 = vpop.eup %4612 }
 0x718   :  { %v1254_v62 = vmul.f32 %v4613_v57, %v6010_v31  ;;  %v293_v57 = vadd.f32 %v291_v56, %v281_v29  ;;  %v306_v56 = vadd.f32 %v304_v39, %v294_v34  ;;  %v6102_v34 = vld [vmem:[%s9312_s4 + $0x8] sm:$0xff] }
 0x71a   :  { %v1099_v45 = vpop.permute.xlu1 %1098  ;;  %v6040_v1 = vadd.f32 %v1254_v62, %v6017_v59  ;;  %v9541_v62 = vld [vmem:[#allocation8_spill] sm:$0xff]  ;;  %v9542_v59 = vld [vmem:[#allocation7_spill] sm:$0xff]  ;;  %v6058_v29 = vadd.f32 %v303_v26, %v293_v57 }
 0x71b   :  { %v1166_v6 = vmul.f32 %v9541_v62, %v1111_v30  ;;  %v1158_v31 = vmul.f32 %v5943_v14, %v9542_v59  ;;  %v1201_v41 = vmul.f32 %v5660_v49, %v1099_v45  ;;  %v1162_v49 = vmul.f32 %v6071_v11, %v1095_v10  ;;  %9543 = vst [vmem:[#allocation8_spill] sm:$0xff] %v6090_v17  ;;  %v6096_v57 = vld [vmem:[%s9307_s5 + $0x68] sm:$0xff]  ;;  %v6110_v62 = vld [vmem:[%s9307_s5 + $0x18] sm:$0xff] }
 0x71c   :  { %1293 = vrot.lane.b32.xlu1 %v6040_v1, %s5154_s13  ;;  %v1154_v14 = vmul.f32 %v6077_v13, %v1059_v8  ;;  %v1195_v30 = vmul.f32 %v1064_v25, %v5655_v43  ;;  %v1163_v26 = vmul.f32 %v6090_v17, %v1099_v45  ;;  %9544 = vst [vmem:[#allocation7_spill] sm:$0xff] %v6096_v57  ;;  %9545 = vst [vmem:[#allocation18_spill] sm:$0xff] %v6110_v62 }
 0x71d   :  { %v1174_v9 = vadd.f32 %v1166_v6, %v1158_v31  ;;  %v6084_v31 = vld [vmem:[%s9312_s4 + $0x58] sm:$0xff]  ;;  %v1156_v6 = vmul.f32 %v6110_v62, %v1069_v40 }
 0x71e   :  { %v1103_v44 = vpop.permute.xlu1 %1102  ;;  %v1200_v59 = vmul.f32 %v6084_v31, %v1095_v10  ;;  %v1194_v10 = vmul.f32 %v6102_v34, %v1059_v8  ;;  %v1207_v39 = vadd.f32 %v1201_v41, %v1195_v30  ;;  %v6128_v8 = vld [vmem:[%s9307_s5 + $0xb0] sm:$0xff]  ;;  %v1170_v41 = vadd.f32 %v1162_v49, %v1154_v14 }
 0x71f   :  { %v1190_v16 = vadd.f32 %v1182_v5, %v1174_v9  ;;  %v1164_v43 = vmul.f32 %v6096_v57, %v1103_v44  ;;  %v1202_v61 = vmul.f32 %v5677_v20, %v1103_v44  ;;  %v6116_v9 = vld [vmem:[%s9307_s5 + $0xa8] sm:$0xff]  ;;  %v6122_v20 = vld [vmem:[%s9307_s5 + $0x10] sm:$0xff]  ;;  %9548 = vst [vmem:[#allocation21_spill] sm:$0xff] %v6128_v8  ;;  %v1196_v30 = vmul.f32 %v1069_v40, %v5690_v53 }
 0x720   :  { %9546 = vst [vmem:[#allocation19_spill] sm:$0xff] %v6116_v9  ;;  %v1178_v57 = vmul.f32 %v6116_v9, %v1127_v19  ;;  %9547 = vst [vmem:[#allocation20_spill] sm:$0xff] %v6122_v20  ;;  %v6135_v9 = vld [vmem:[%s9307_s5 + $0x50] sm:$0xff]  ;;  %v6149_v53 = vld [vmem:[%s9312_s4 + $0xa8] sm:$0xff] }
 0x721   :  { %9549 = vst [vmem:[#allocation22_spill] sm:$0xff] %v6135_v9  ;;  %v1161_v62 = vmul.f32 %v6135_v9, %v6000_v4  ;;  %9551 = vst [vmem:[#allocation24_spill] sm:$0xff] %v6149_v53  ;;  %v1212_v40 = vmul.f32 %v6149_v53, %v1127_v19  ;;  %v1172_v14 = vadd.f32 %v1164_v43, %v1156_v6 }
 0x722   :  { %v1186_v43 = vadd.f32 %v1178_v57, %v1170_v41 }
 0x723   :  { %v1131_v5 = vpop.permute.xlu1 %1130 }
 0x724   :  { %v1213_v45 = vmul.f32 %v5683_v50, %v1131_v5  ;;  %v1155_v50 = vmul.f32 %v6122_v20, %v1064_v25  ;;  %v1179_v44 = vmul.f32 %v6128_v8, %v1131_v5  ;;  %v6142_v25 = vld [vmem:[%s9312_s4 + $0x50] sm:$0xff]  ;;  %v1208_v20 = vadd.f32 %v1202_v61, %v1196_v30 }
 0x725   :  { %9550 = vst [vmem:[#allocation23_spill] sm:$0xff] %v6142_v25  ;;  %v1199_v5 = vmul.f32 %v6142_v25, %v6000_v4  ;;  %v6162_v25 = vld [vmem:[%s9312_s4] sm:$0xff] }
 0x726   :  { %v1219_v17 = vadd.f32 %v1213_v45, %v1207_v39  ;;  %v1171_v49 = vadd.f32 %v1163_v26, %v1155_v50  ;;  %v6155_v45 = vld [vmem:[%s9307_s5 + $0xb8] sm:$0xff]  ;;  %v1193_v19 = vmul.f32 %v6162_v25, %v5998_v46  ;;  %v1206_v26 = vadd.f32 %v1200_v59, %v1194_v10  ;;  %v6182_v59 = vld [vmem:[%s9307_s5 + $0xa0] sm:$0xff] }
 0x727   :  { %v1135_v8 = vpop.permute.xlu1 %1134  ;;  %9552 = vst [vmem:[#allocation25_spill] sm:$0xff] %v6155_v45  ;;  %v6176_v46 = vld [vmem:[%s9308_s6 + $0x18] sm:$0xff]  ;;  %v6194_v10 = vld [vmem:[%s9308_s6] sm:$0xff] }
 0x728   :  { %v1235_v39 = vadd.f32 %v1227_v42, %v1219_v17  ;;  %v1180_v9 = vmul.f32 %v6155_v45, %v1135_v8  ;;  %v1214_v4 = vmul.f32 %v5702_v35, %v1135_v8  ;;  %v1187_v42 = vadd.f32 %v1179_v44, %v1171_v49  ;;  %v6170_v35 = vld [vmem:[%s9308_s6 + $0x8] sm:$0xff] }
 0x729   :  { %v1228_v17 = vadd.f32 %v1190_v16, %v5709_v27  ;;  %v308_v50 = vadd.f32 %v6170_v35, %v306_v56  ;;  %v1169_v8 = vadd.f32 %v1161_v62, %v1153_v22  ;;  %v1205_v30 = vadd.f32 %v1199_v5, %v1193_v19  ;;  %v6188_v56 = vld [vmem:[%s9312_s4 + $0xa0] sm:$0xff] }
 0x72a   :  { %4614 = vtanh.f32 %v1235_v39  ;;  %v1188_v61 = vadd.f32 %v1180_v9, %v1172_v14  ;;  %v1220_v6 = vadd.f32 %v1214_v4, %v1208_v20  ;;  %v1218_v45 = vadd.f32 %v1212_v40, %v1206_v26  ;;  %v6201_v20 = vld [vmem:[%s9308_s6 + $0x10] sm:$0xff] }
 0x72b   :  { %v1123_v53 = vpop.permute.xlu1 %1122  ;;  %v307_v62 = vadd.f32 %v6194_v10, %v6058_v29  ;;  %v1224_v9 = vadd.f32 %v1186_v43, %v308_v50  ;;  %v1225_v44 = vadd.f32 %v6201_v20, %v1187_v42  ;;  %v6217_v42 = vld [vmem:[%s9309_s7 + $0x18] sm:$0xff]  ;;  %v6239_v50 = vld [vmem:[%s9309_s7 + $0x8] sm:$0xff] }
 0x72c   :  { %v1226_v27 = vadd.f32 %v6176_v46, %v1188_v61  ;;  %v1236_v16 = vadd.f32 %v1228_v17, %v1220_v6  ;;  %v1177_v57 = vmul.f32 %v6182_v59, %v1123_v53  ;;  %v1211_v22 = vmul.f32 %v6188_v56, %v1123_v53  ;;  %v6231_v61 = vld [vmem:[%s9310_s8 + $0x18] sm:$0xff] }
 0x72e   :  { %v1234_v41 = vadd.f32 %v1226_v27, %v1218_v45  ;;  %4616 = vtanh.f32 %v1236_v16  ;;  %v1185_v5 = vadd.f32 %v1177_v57, %v1169_v8  ;;  %v1217_v53 = vadd.f32 %v1211_v22, %v1205_v30  ;;  %v6245_v30 = vld [vmem:[%s9310_s8 + $0x10] sm:$0xff]  ;;  %v6253_v16 = vld [vmem:[%s9309_s7] sm:$0xff]  ;;  %v6263_v22 = vld [vmem:[%s9310_s8 + $0x8] sm:$0xff] }
 0x730   :  { %4618 = vtanh.f32 %v1234_v41  ;;  %v1223_v40 = vadd.f32 %v1185_v5, %v307_v62  ;;  %v1233_v49 = vadd.f32 %v1225_v44, %v1217_v53  ;;  %v478_v41 = vld [vmem:[%s9311_s2 + $0x38] sm:$0xff]  ;;  %v477_v5 = vld [vmem:[%s9311_s2 + $0x30] sm:$0xff] }
 0x731   :  { %4620 = vtanh.f32 %v1224_v9  ;;  %v6271_v9 = vld [vmem:[%s9310_s8] sm:$0xff] }
 0x732   :  { %4622 = vtanh.f32 %v1223_v40 }
 0x733   :  { %4624 = vtanh.f32 %v1233_v49 }
 0x734   :  { %v4615_v14 = vpop.eup %4614 }
 0x735   :  { %v1251_v29 = vmul.f32 %v4615_v14, %v5728_v24 }
 0x737   :  { %v6206_v39 = vadd.f32 %v1251_v29, %v5733_v32 }
 0x738   :  { %v4617_v4 = vpop.eup %4616 }
 0x739   :  { %1287 = vrot.lane.b32.xlu0 %v6206_v39, %s5154_s13  ;;  %v1252_v45 = vmul.f32 %v4617_v4, %v5739_v28  ;;  %v6225_v28 = vld [vmem:[%s9309_s7 + $0x10] sm:$0xff] }
 0x73a   :  { %v4619_v19 = vpop.eup %4618 }
 0x73b   :  { %v4621_v26 = vpop.eup %4620  ;;  %v6212_v43 = vadd.f32 %v1252_v45, %v5747_v12  ;;  %v1250_v24 = vmul.f32 %v6217_v42, %v4619_v19 }
 0x73c   :  { %v4623_v32 = vpop.eup %4622  ;;  %v1248_v8 = vmul.f32 %v6239_v50, %v4621_v26 }
 0x73d   :  { %v4625_v17 = vpop.eup %4624  ;;  %1289 = vrot.lane.b32.xlu1 %v6212_v43, %s5154_s13  ;;  %v6234_v6 = vadd.f32 %v6231_v61, %v1250_v24  ;;  %v1247_v57 = vmul.f32 %v6253_v16, %v4623_v32 }
 0x73e   :  { %v1249_v12 = vmul.f32 %v6225_v28, %v4625_v17  ;;  %v6266_v62 = vadd.f32 %v6263_v22, %v1248_v8 }
 0x73f   :  { %v6274_v44 = vadd.f32 %v6271_v9, %v1247_v57 }
 0x740   :  { %v6248_v27 = vadd.f32 %v6245_v30, %v1249_v12 }
 0x741   :  { %1285 = vrot.lane.b32.xlu1 %v6234_v6, %s5154_s13 }
 0x742   :  { %1283 = vrot.lane.b32.xlu0 %v6248_v27, %s5154_s13 }
 0x745   :  { %1281 = vrot.lane.b32.xlu1 %v6266_v62, %s5154_s13 }
 0x746   :  { %1279 = vrot.lane.b32.xlu0 %v6274_v44, %s5154_s13 }
 0x749   :  { %611 = vrot.lane.b32.xlu1 %v478_v41, %s5155_s20 }
 0x74a   :  { %609 = vrot.lane.b32.xlu0 %v477_v5, %s5155_s20  ;;  %v470_v5 = vld [vmem:[%s9305_s1 + $0x48] sm:$0xff] }
 0x785   :  { %v1292_v53 = vpop.permute.xlu1 %1291 }
 0x786   :  { %v1309_v40 = vmul.f32 %v1292_v53, %v6003_v60  ;;  %v469_v53 = vld [vmem:[%s9305_s1 + $0x40] sm:$0xff] }
 0x788   :  { %1331 = vrot.lane.b32.xlu0 %v1309_v40, %s5155_s20 }
 0x78e   :  { %v1294_v49 = vpop.permute.xlu1 %1293 }
 0x78f   :  { %v1310_v14 = vmul.f32 %v1294_v49, %v6040_v1 }
 0x791   :  { %1333 = vrot.lane.b32.xlu1 %v1310_v14, %s5155_s20 }
 0x7ab   :  { %v1288_v29 = vpop.permute.xlu0 %1287 }
 0x7ac   :  { %v1307_v4 = vmul.f32 %v1288_v29, %v6206_v39 }
 0x7ae   :  { %1327 = vrot.lane.b32.xlu0 %v1307_v4, %s5155_s20 }
 0x7af   :  { %v1290_v45 = vpop.permute.xlu1 %1289 }
 0x7b0   :  { %v1308_v19 = vmul.f32 %v1290_v45, %v6212_v43 }
 0x7b2   :  { %1329 = vrot.lane.b32.xlu1 %v1308_v19, %s5155_s20 }
 0x7b3   :  { %v1286_v26 = vpop.permute.xlu1 %1285 }
 0x7b4   :  { %v1306_v24 = vmul.f32 %v1286_v26, %v6234_v6  ;;  %v1284_v32 = vpop.permute.xlu0 %1283 }
 0x7b5   :  { %v1305_v17 = vmul.f32 %v1284_v32, %v6248_v27 }
 0x7b6   :  { %1325 = vrot.lane.b32.xlu1 %v1306_v24, %s5155_s20 }
 0x7b7   :  { %1323 = vrot.lane.b32.xlu0 %v1305_v17, %s5155_s20  ;;  %v1282_v12 = vpop.permute.xlu1 %1281 }
 0x7b8   :  { %v1304_v8 = vmul.f32 %v1282_v12, %v6266_v62  ;;  %v1280_v57 = vpop.permute.xlu0 %1279 }
 0x7b9   :  { %v1303_v41 = vmul.f32 %v1280_v57, %v6274_v44 }
 0x7ba   :  { %1321 = vrot.lane.b32.xlu1 %v1304_v8, %s5155_s20 }
 0x7bb   :  { %1319 = vrot.lane.b32.xlu0 %v1303_v41, %s5155_s20  ;;  %v612_v40 = vpop.permute.xlu1 %611  ;;  %v1263_v41 = vmul.f32 %v6274_v44, %v5818_v63 }
 0x7bc   :  { %v610_v49 = vpop.permute.xlu0 %609 }
 0x7bd   :  { %v1269_v8 = vmul.f32 %v6003_v60, %v610_v49  ;;  %v1270_v49 = vmul.f32 %v6040_v1, %v612_v40  ;;  %v1265_v40 = vmul.f32 %v6248_v27, %v5825_v33  ;;  %v1268_v33 = vmul.f32 %v6212_v43, %v5815_v47 }
 0x7be   :  { %591 = vrot.lane.b32.xlu1 %v470_v5, %s5158_s26  ;;  %v135_v5 = vld [vmem:[%s9304_s0 + $0x48] sm:$0xff] }
 0x7bf   :  { %589 = vrot.lane.b32.xlu0 %v469_v53, %s5158_s26 }
 0x7fa   :  { %v1332_v29 = vpop.permute.xlu0 %1331 }
 0x7fb   :  { %v6314_v57 = vadd.f32 %v1332_v29, %v1269_v8  ;;  %v1267_v29 = vmul.f32 %v6206_v39, %v5810_v48 }
 0x7fd   :  { %9553 = vst [vmem:[#allocation26_spill] sm:$0xff] %v6314_v57  ;;  %4626 = vtanh.f32 %v6314_v57 }
 0x803   :  { %v1334_v14 = vpop.permute.xlu1 %1333 }
 0x804   :  { %v6330_v63 = vadd.f32 %v1334_v14, %v1270_v49 }
 0x806   :  { %9555 = vst [vmem:[#allocation28_spill] sm:$0xff] %v6330_v63 }
 0x820   :  { %v1328_v45 = vpop.permute.xlu0 %1327 }
 0x821   :  { %v6335_v8 = vadd.f32 %v1328_v45, %v1267_v29  ;;  %v4627_v45 = vpop.eup %4626 }
 0x823   :  { %9556 = vst [vmem:[#allocation29_spill] sm:$0xff] %v6335_v8 }
 0x824   :  { %v1330_v4 = vpop.permute.xlu1 %1329 }
 0x828   :  { %v1326_v19 = vpop.permute.xlu1 %1325 }
 0x829   :  { %v1324_v26 = vpop.permute.xlu0 %1323 }
 0x82a   :  { %v6345_v48 = vadd.f32 %v1324_v26, %v1265_v40 }
 0x82c   :  { %v1322_v24 = vpop.permute.xlu1 %1321  ;;  %9557 = vst [vmem:[#allocation30_spill] sm:$0xff] %v6345_v48 }
 0x82d   :  { %v1320_v32 = vpop.permute.xlu0 %1319 }
 0x82e   :  { %v6323_v53 = vadd.f32 %v1320_v32, %v1263_v41  ;;  %v1264_v32 = vmul.f32 %v6266_v62, %v5827_v3  ;;  %v6355_v3 = vadd.f32 %v1330_v4, %v1268_v33  ;;  %v1266_v41 = vmul.f32 %v6234_v6, %v5835_v37 }
 0x830   :  { %v592_v17 = vpop.permute.xlu1 %591  ;;  %9554 = vst [vmem:[#allocation27_spill] sm:$0xff] %v6323_v53  ;;  %4628 = vtanh.f32 %v6323_v53  ;;  %v6348_v14 = vadd.f32 %v1322_v24, %v1264_v32  ;;  %9559 = vst [vmem:[#allocation32_spill] sm:$0xff] %v6355_v3  ;;  %v6365_v4 = vadd.f32 %v1326_v19, %v1266_v41 }
 0x831   :  { %v590_v12 = vpop.permute.xlu0 %589  ;;  %1444 = vperm.xlu1 %4372, %v592_v17   ;;  %4630 = vtanh.f32 %v6330_v63 }
 0x832   :  { %1440 = vperm.xlu0 %4371, %v590_v12   ;;  %4632 = vtanh.f32 %v6335_v8  ;;  %9558 = vst [vmem:[#allocation31_spill] sm:$0xff] %v6348_v14  ;;  %9560 = vst [vmem:[#allocation33_spill] sm:$0xff] %v6365_v4 }
 0x833   :  { %4634 = vtanh.f32 %v6345_v48 }
 0x834   :  { %4636 = vtanh.f32 %v6348_v14 }
 0x835   :  { %4373 = vset.pattern.permute.xlu1 %v9518_v7  ;;  %4638 = vtanh.f32 %v6355_v3 }
 0x836   :  { %4374 = vset.pattern.permute.xlu0 %v9520_v55  ;;  %1480 = vperm.xlu1 %4373, %v590_v12   ;;  %4640 = vtanh.f32 %v6365_v4 }
 0x837   :  { %1520 = vperm.xlu0 %4374, %v590_v12   ;;  %v134_v12 = vld [vmem:[%s9304_s0 + $0x40] sm:$0xff] }
 0x83a   :  { %4375 = vset.pattern.permute.xlu1 %v9520_v55  ;;  %v4629_v26 = vpop.eup %4628 }
 0x83b   :  { %4377 = vset.pattern.permute.xlu0 %v9521_v54  ;;  %1524 = vperm.xlu1 %4375, %v592_v17   ;;  %v4631_v47 = vpop.eup %4630 }
 0x83c   :  { %316 = vperm.xlu0 %4377, %v135_v5   ;;  %v4633_v24 = vpop.eup %4632 }
 0x83d   :  { %v4635_v49 = vpop.eup %4634 }
 0x83e   :  { %v4637_v29 = vpop.eup %4636 }
 0x83f   :  { %4376 = vset.pattern.permute.xlu1 %v9521_v54 }
 0x840   :  { %4379 = vset.pattern.permute.xlu0 %v9522_v51  ;;  %311 = vperm.xlu1 %4376, %v134_v12  }
 0x841   :  { %334 = vperm.xlu0 %4379, %v134_v12  }
 0x844   :  { %4378 = vset.pattern.permute.xlu1 %v9523_v2 }
 0x845   :  { %1379 = vrot.lane.b32.xlu0 %v4627_v45, %s5157_s23  ;;  %322 = vperm.xlu1 %4378, %v134_v12   ;;  %v4639_v12 = vpop.eup %4638 }
 0x846   :  { %4380 = vset.pattern.permute.xlu0 %v9518_v7  ;;  %v4641_v37 = vpop.eup %4640 }
 0x849   :  { %1367 = vrot.lane.b32.xlu0 %v4629_v26, %s5157_s23  ;;  %326 = vperm.xlu1 %4378, %v135_v5  }
 0x84d   :  { %1375 = vrot.lane.b32.xlu0 %v4633_v24, %s5157_s23  ;;  %1381 = vrot.lane.b32.xlu1 %v4631_v47, %s5157_s23 }
 0x84e   :  { %4381 = vset.pattern.permute.xlu1 %v9522_v51 }
 0x851   :  { %1371 = vrot.lane.b32.xlu0 %v4635_v49, %s5157_s23  ;;  %1369 = vrot.lane.b32.xlu1 %v4637_v29, %s5157_s23 }
 0x855   :  { %1484 = vperm.xlu0 %4380, %v592_v17   ;;  %1377 = vrot.lane.b32.xlu1 %v4639_v12, %s5157_s23 }
 0x859   :  { %338 = vperm.xlu1 %4381, %v135_v5  }
 0x85d   :  { %1373 = vrot.lane.b32.xlu1 %v4641_v37, %s5157_s23 }
 0x85e   :  { %4382 = vset.pattern.permute.xlu1 %v9524_v23 }
 0x8b0   :  { %v6374_v19 = vpop.permute.xlu1 %1444 }
 0x8b1   :  { %v6376_v40 = vpop.permute.xlu0 %1440 }
 0x8b5   :  { %v6378_v32 = vpop.permute.xlu1 %1480 }
 0x8b6   :  { %v6380_v45 = vpop.permute.xlu0 %1520 }
 0x8ba   :  { %v6382_v33 = vpop.permute.xlu1 %1524 }
 0x8bb   :  { %v6384_v26 = vpop.permute.xlu0 %316 }
 0x8bf   :  { %v6386_v17 = vpop.permute.xlu1 %311 }
 0x8c0   :  { %v6388_v5 = vpop.permute.xlu0 %334 }
 0x8c4   :  { %v1380_v47 = vpop.permute.xlu0 %1379  ;;  %v6390_v24 = vpop.permute.xlu1 %322 }
 0x8c5   :  { %v1397_v41 = vmul.f32 %v1380_v47, %v6003_v60 }
 0x8c7   :  { %1472 = vperm.xlu0 %4380, %v1397_v41   ;;  %1431 = vperm.xlu1 %4382, %v1397_v41  }
 0x8c8   :  { %v6393_v49 = vpop.permute.xlu1 %326  ;;  %v1368_v29 = vpop.permute.xlu0 %1367 }
 0x8c9   :  { %v1391_v48 = vmul.f32 %v1368_v29, %v6274_v44  ;;  %v6426_v29 = vld [vmem:[%s9307_s5 + $0x40] sm:$0xff] }
 0x8ca   :  { %9561 = vst [vmem:[#allocation34_spill] sm:$0xff] %v6426_v29 }
 0x8cb   :  { %4384 = vset.pattern.permute.xlu0 %v9520_v55 }
 0x8cc   :  { %1512 = vperm.xlu0 %4384, %v1397_v41   ;;  %v1382_v12 = vpop.permute.xlu1 %1381  ;;  %v1376_v41 = vpop.permute.xlu0 %1375 }
 0x8cd   :  { %v1398_v37 = vmul.f32 %v1382_v12, %v6040_v1  ;;  %v1535_v12 = vmul.f32 %v6376_v40, %v6426_v29  ;;  %v6464_v29 = vld [vmem:[%s9308_s6 + $0x40] sm:$0xff] }
 0x8ce   :  { %9567 = vst [vmem:[#allocation40_spill] sm:$0xff] %v6464_v29 }
 0x8cf   :  { %1436 = vperm.xlu1 %4382, %v1398_v37  }
 0x8d0   :  { %4386 = vset.pattern.permute.xlu0 %v9524_v23  ;;  %v1370_v4 = vpop.permute.xlu1 %1369 }
 0x8d1   :  { %1401 = vperm.xlu0 %4386, %v1391_v48   ;;  %v1392_v60 = vmul.f32 %v1370_v4, %v6266_v62  ;;  %v1395_v62 = vmul.f32 %v1376_v41, %v6206_v39  ;;  %v1372_v39 = vpop.permute.xlu0 %1371 }
 0x8d3   :  { %4383 = vset.pattern.permute.xlu1 %v9518_v7 }
 0x8d4   :  { %v1378_v47 = vpop.permute.xlu1 %1377  ;;  %1476 = vperm.xlu1 %4383, %v1398_v37  }
 0x8d5   :  { %4389 = vset.pattern.permute.xlu0 %v9518_v7  ;;  %v1396_v1 = vmul.f32 %v1378_v47, %v6212_v43  ;;  %v6445_v47 = vld [vmem:[%s9312_s4 + $0x30] sm:$0xff] }
 0x8d6   :  { %1452 = vperm.xlu0 %4389, %v1392_v60   ;;  %9564 = vst [vmem:[#allocation37_spill] sm:$0xff] %v6445_v47 }
 0x8d8   :  { %4385 = vset.pattern.permute.xlu1 %v9520_v55  ;;  %v6404_v44 = vpop.permute.xlu1 %338 }
 0x8d9   :  { %1516 = vperm.xlu1 %4385, %v1398_v37  }
 0x8da   :  { %4391 = vset.pattern.permute.xlu0 %v9524_v23 }
 0x8db   :  { %1426 = vperm.xlu0 %4391, %v1396_v1  }
 0x8dc   :  { %v1374_v4 = vpop.permute.xlu1 %1373 }
 0x8dd   :  { %4387 = vset.pattern.permute.xlu1 %v9524_v23  ;;  %v1394_v43 = vmul.f32 %v1374_v4, %v6234_v6  ;;  %v1393_v6 = vmul.f32 %v1372_v39, %v6248_v27  ;;  %v6431_v27 = vld [vmem:[%s9307_s5 + $0x90] sm:$0xff] }
 0x8de   :  { %1406 = vperm.xlu1 %4387, %v1392_v60   ;;  %9562 = vst [vmem:[#allocation35_spill] sm:$0xff] %v6431_v27  ;;  %v1545_v37 = vmul.f32 %v6431_v27, %v6378_v32  ;;  %v6459_v39 = vld [vmem:[%s9312_s4 + $0xd0] sm:$0xff] }
 0x8df   :  { %4393 = vset.pattern.permute.xlu0 %v9520_v55  ;;  %9566 = vst [vmem:[#allocation39_spill] sm:$0xff] %v6459_v39 }
 0x8e0   :  { %1504 = vperm.xlu0 %4393, %v1395_v62   ;;  %v1555_v40 = vadd.f32 %v1545_v37, %v1535_v12 }
 0x8e2   :  { %4388 = vset.pattern.permute.xlu1 %v9518_v7 }
 0x8e3   :  { %1448 = vperm.xlu1 %4388, %v1391_v48  }
 0x8e4   :  { %4396 = vset.pattern.permute.xlu0 %v9524_v23 }
 0x8e5   :  { %1416 = vperm.xlu0 %4396, %v1394_v43  }
 0x8e7   :  { %4390 = vset.pattern.permute.xlu1 %v9524_v23 }
 0x8e8   :  { %1421 = vperm.xlu1 %4390, %v1395_v62  }
 0x8e9   :  { %4399 = vset.pattern.permute.xlu0 %v9520_v55 }
 0x8ea   :  { %1492 = vperm.xlu0 %4399, %v1392_v60   ;;  %v1485_v60 = vpop.permute.xlu0 %1484 }
 0x8ec   :  { %4392 = vset.pattern.permute.xlu1 %v9518_v7 }
 0x8ed   :  { %1464 = vperm.xlu1 %4392, %v1395_v62  }
 0x8ee   :  { %4401 = vset.pattern.permute.xlu0 %v9521_v54 }
 0x8f1   :  { %1468 = vperm.xlu1 %4392, %v1396_v1  }
 0x8f5   :  { %4394 = vset.pattern.permute.xlu1 %v9520_v55 }
 0x8f6   :  { %1508 = vperm.xlu1 %4394, %v1396_v1   ;;  %v6450_v1 = vld [vmem:[%s9312_s4 + $0x80] sm:$0xff] }
 0x8f7   :  { %9565 = vst [vmem:[#allocation38_spill] sm:$0xff] %v6450_v1 }
 0x8fa   :  { %4395 = vset.pattern.permute.xlu1 %v9524_v23 }
 0x8fb   :  { %1411 = vperm.xlu1 %4395, %v1393_v6  }
 0x8ff   :  { %4397 = vset.pattern.permute.xlu1 %v9518_v7 }
 0x900   :  { %1456 = vperm.xlu1 %4397, %v1393_v6  }
 0x904   :  { %1460 = vperm.xlu1 %4397, %v1394_v43  }
 0x908   :  { %4398 = vset.pattern.permute.xlu1 %v9520_v55 }
 0x909   :  { %1496 = vperm.xlu1 %4398, %v1393_v6  }
 0x90d   :  { %1500 = vperm.xlu1 %4398, %v1394_v43  }
 0x911   :  { %1488 = vperm.xlu1 %4398, %v1391_v48   ;;  %v6440_v48 = vld [vmem:[%s9307_s5 + $0xe0] sm:$0xff] }
 0x912   :  { %9563 = vst [vmem:[#allocation36_spill] sm:$0xff] %v6440_v48  ;;  %v1565_v32 = vmul.f32 %v6440_v48, %v6380_v45  ;;  %v6469_v45 = vld [vmem:[%s9307_s5 + $0x98] sm:$0xff] }
 0x913   :  { %9568 = vst [vmem:[#allocation41_spill] sm:$0xff] %v6469_v45  ;;  %v1546_v27 = vmul.f32 %v6469_v45, %v1485_v60  ;;  %v6494_v60 = vld [vmem:[%s9312_s4 + $0x38] sm:$0xff] }
 0x914   :  { %v1575_v6 = vadd.f32 %v1565_v32, %v1555_v40  ;;  %9572 = vst [vmem:[#allocation45_spill] sm:$0xff] %v6494_v60 }
 0x915   :  { %4400 = vset.pattern.permute.xlu1 %v9521_v54 }
 0x916   :  { %v1625_v40 = vadd.f32 %v1575_v6, %v6464_v29 }
 0x946   :  { %v1432_v41 = vpop.permute.xlu1 %1431  ;;  %v1473_v62 = vpop.permute.xlu0 %1472 }
 0x947   :  { %v1583_v4 = vmul.f32 %v1432_v41, %v6445_v47  ;;  %v1591_v43 = vmul.f32 %v6450_v1, %v1473_v62  ;;  %v6475_v1 = vld [vmem:[%s9307_s5 + $0x48] sm:$0xff] }
 0x948   :  { %9569 = vst [vmem:[#allocation42_spill] sm:$0xff] %v6475_v1  ;;  %v1536_v55 = vmul.f32 %v6374_v19, %v6475_v1 }
 0x949   :  { %v1599_v37 = vadd.f32 %v1591_v43, %v1583_v4  ;;  %v6484_v4 = vld [vmem:[%s9307_s5 + $0xe8] sm:$0xff] }
 0x94a   :  { %9570 = vst [vmem:[#allocation43_spill] sm:$0xff] %v6484_v4  ;;  %v6489_v43 = vld [vmem:[%s9312_s4 + $0x88] sm:$0xff]  ;;  %v1556_v6 = vadd.f32 %v1546_v27, %v1536_v55  ;;  %v1566_v19 = vmul.f32 %v6484_v4, %v6382_v33  ;;  %v6522_v4 = vld [vmem:[%s9310_s8 + $0x40] sm:$0xff] }
 0x94b   :  { %v1513_v12 = vpop.permute.xlu0 %1512  ;;  %9571 = vst [vmem:[#allocation44_spill] sm:$0xff] %v6489_v43  ;;  %v6508_v55 = vld [vmem:[%s9308_s6 + $0x48] sm:$0xff]  ;;  %9576 = vst [vmem:[#allocation49_spill] sm:$0xff] %v6522_v4 }
 0x94c   :  { %v1607_v47 = vmul.f32 %v6459_v39, %v1513_v12  ;;  %9574 = vst [vmem:[#allocation47_spill] sm:$0xff] %v6508_v55 }
 0x94e   :  { %v1615_v32 = vadd.f32 %v1607_v47, %v1599_v37  ;;  %v1437_v48 = vpop.permute.xlu1 %1436 }
 0x950   :  { %v1635_v54 = vadd.f32 %v1625_v40, %v1615_v32  ;;  %v1576_v40 = vadd.f32 %v1566_v19, %v1556_v6  ;;  %v1584_v32 = vmul.f32 %v1437_v48, %v6494_v60  ;;  %v6511_v33 = vpop.permute.xlu0 %1401 }
 0x952   :  { %4642 = vtanh.f32 %v1635_v54  ;;  %v6502_v54 = vld [vmem:[%s9312_s4 + $0xd8] sm:$0xff]  ;;  %v1626_v6 = vadd.f32 %v1576_v40, %v6508_v55  ;;  %v1533_v40 = vmul.f32 %v1432_v41, %v5903_v18 }
 0x953   :  { %v1477_v47 = vpop.permute.xlu1 %1476  ;;  %9573 = vst [vmem:[#allocation46_spill] sm:$0xff] %v6502_v54 }
 0x954   :  { %v1592_v37 = vmul.f32 %v6489_v43, %v1477_v47  ;;  %v6516_v43 = vld [vmem:[%s9309_s7 + $0x40] sm:$0xff] }
 0x955   :  { %9575 = vst [vmem:[#allocation48_spill] sm:$0xff] %v6516_v43  ;;  %v6530_v39 = vpop.permute.xlu0 %1452 }
 0x956   :  { %v1600_v29 = vadd.f32 %v1592_v37, %v1584_v32 }
 0x958   :  { %v1517_v27 = vpop.permute.xlu1 %1516 }
 0x959   :  { %v1608_v45 = vmul.f32 %v6502_v54, %v1517_v27 }
 0x95b   :  { %v1616_v19 = vadd.f32 %v1608_v45, %v1600_v29  ;;  %v6536_v45 = vpop.permute.xlu0 %1426 }
 0x95c   :  { %v4643_v60 = vpop.eup %4642 }
 0x95d   :  { %v1636_v1 = vadd.f32 %v1626_v6, %v1616_v19  ;;  %v6524_v37 = vpop.permute.xlu1 %1406  ;;  %v1655_v32 = vmul.f32 %v4643_v60, %v6516_v43  ;;  %v1543_v6 = vmul.f32 %v5898_v15, %v1473_v62 }
 0x95f   :  { %4644 = vtanh.f32 %v1636_v1  ;;  %v6528_v54 = vadd.f32 %v1655_v32, %v6522_v4  ;;  %v6543_v1 = vld [vmem:[%s9309_s7 + $0x48] sm:$0xff]  ;;  %v1563_v32 = vmul.f32 %v5912_v36, %v1513_v12  ;;  %v1553_v55 = vadd.f32 %v1543_v6, %v1533_v40  ;;  %v1505_v18 = vpop.permute.xlu0 %1504  ;;  %v9579_v12 = vld [vmem:[#allocation2_spill] sm:$0xff]  ;;  %v9581_v6 = vld [vmem:[#allocation9_spill] sm:$0xff] }
 0x960   :  { %9577 = vst [vmem:[#allocation50_spill] sm:$0xff] %v6543_v1  ;;  %v6549_v4 = vld [vmem:[%s9310_s8 + $0x48] sm:$0xff]  ;;  %v1544_v36 = vmul.f32 %v5929_v52, %v1477_v47  ;;  %v1605_v3 = vmul.f32 %v9579_v12, %v1505_v18 }
 0x961   :  { %1703 = vrot.lane.b32.xlu1 %v6528_v54, %s5154_s13  ;;  %9578 = vst [vmem:[#allocation51_spill] sm:$0xff] %v6549_v4  ;;  %v1573_v62 = vadd.f32 %v1563_v32, %v1553_v55  ;;  %v9584_v52 = vld [vmem:[#allocation11_spill] sm:$0xff] }
 0x962   :  { %v6534_v29 = vpop.permute.xlu1 %1448  ;;  %v1582_v47 = vmul.f32 %v6536_v45, %v9584_v52  ;;  %v1528_v52 = vmul.f32 %v6077_v13, %v6524_v37 }
 0x967   :  { %v1422_v19 = vpop.permute.xlu1 %1421 }
 0x968   :  { %v1581_v7 = vmul.f32 %v1422_v19, %v5917_v58  ;;  %v9583_v58 = vld [vmem:[#allocation10_spill] sm:$0xff] }
 0x969   :  { %v4645_v60 = vpop.eup %4644 }
 0x96a   :  { %v1656_v43 = vmul.f32 %v4645_v60, %v6543_v1  ;;  %v9580_v60 = vld [vmem:[#allocation4_spill] sm:$0xff]  ;;  %v1564_v1 = vmul.f32 %v9581_v6, %v1517_v27 }
 0x96b   :  { %v1534_v40 = vmul.f32 %v1437_v48, %v9580_v60  ;;  %v9586_v48 = vld [vmem:[#allocation13_spill] sm:$0xff] }
 0x96c   :  { %v1465_v41 = vpop.permute.xlu1 %1464  ;;  %v6553_v15 = vadd.f32 %v1656_v43, %v6549_v4  ;;  %v9582_v43 = vld [vmem:[#allocation3_spill] sm:$0xff] }
 0x96d   :  { %v1589_v8 = vmul.f32 %v5922_v21, %v1465_v41  ;;  %v1623_v4 = vadd.f32 %v1573_v62, %v9582_v43  ;;  %v1554_v32 = vadd.f32 %v1544_v36, %v1534_v40 }
 0x96e   :  { %1705 = vrot.lane.b32.xlu1 %v6553_v15, %s5154_s13 }
 0x96f   :  { %v1597_v57 = vadd.f32 %v1589_v8, %v1581_v7  ;;  %v1574_v14 = vadd.f32 %v1564_v1, %v1554_v32  ;;  %v9585_v7 = vld [vmem:[#allocation12_spill] sm:$0xff] }
 0x970   :  { %v1469_v63 = vpop.permute.xlu1 %1468 }
 0x971   :  { %v1613_v55 = vadd.f32 %v1605_v3, %v1597_v57  ;;  %v1590_v53 = vmul.f32 %v9583_v58, %v1469_v63  ;;  %v1624_v60 = vadd.f32 %v1574_v14, %v9586_v48  ;;  %v9587_v57 = vld [vmem:[#allocation17_spill] sm:$0xff]  ;;  %v1417_v58 = vpop.permute.xlu0 %1416  ;;  %v1538_v48 = vmul.f32 %v6071_v11, %v6530_v39 }
 0x972   :  { %v329_v3 = vmul.f32 %v9587_v57, %v6390_v24  ;;  %v330_v36 = vmul.f32 %v9587_v57, %v6393_v49  ;;  %v6589_v49 = vld [vmem:[%s9307_s5 + $0x20] sm:$0xff]  ;;  %v1586_v57 = vmul.f32 %v6084_v31, %v6530_v39  ;;  %v6645_v39 = vld [vmem:[%s9312_s4 + $0x10] sm:$0xff] }
 0x973   :  { %v1633_v21 = vadd.f32 %v1623_v4, %v1613_v55  ;;  %v1598_v12 = vadd.f32 %v1590_v53, %v1582_v47  ;;  %v9588_v4 = vld [vmem:[#allocation6_spill] sm:$0xff]  ;;  %v6578_v53 = vld [vmem:[%s9307_s5 + $0x70] sm:$0xff]  ;;  %v9590_v47 = vld [vmem:[#allocation15_spill] sm:$0xff] }
 0x974   :  { %v319_v1 = vmul.f32 %v9588_v4, %v6386_v17  ;;  %v1541_v14 = vmul.f32 %v6578_v53, %v1465_v41  ;;  %v9589_v55 = vld [vmem:[#allocation14_spill] sm:$0xff]  ;;  %v320_v24 = vmul.f32 %v9588_v4, %v6384_v26  ;;  %v342_v17 = vmul.f32 %v6045_v38, %v6404_v44 }
 0x975   :  { %4646 = vtanh.f32 %v1633_v21  ;;  %v1509_v23 = vpop.permute.xlu1 %1508  ;;  %v1531_v21 = vmul.f32 %v6589_v49, %v1422_v19  ;;  %v341_v41 = vmul.f32 %v6045_v38, %v6388_v5  ;;  %v6606_v19 = vld [vmem:[%s9307_s5 + $0x78] sm:$0xff]  ;;  %v1527_v5 = vmul.f32 %v6064_v0, %v6511_v33  ;;  %v6630_v0 = vld [vmem:[%s9307_s5 + $0x28] sm:$0xff] }
 0x976   :  { %v1606_v8 = vmul.f32 %v9585_v7, %v1509_v23  ;;  %v331_v43 = vadd.f32 %v329_v3, %v319_v1  ;;  %v332_v26 = vadd.f32 %v330_v36, %v320_v24  ;;  %v1542_v38 = vmul.f32 %v6606_v19, %v1469_v63  ;;  %v1493_v1 = vpop.permute.xlu0 %1492  ;;  %v6639_v36 = vld [vmem:[%s9307_s5 + $0xc8] sm:$0xff] }
 0x977   :  { %v1551_v7 = vadd.f32 %v1541_v14, %v1531_v21  ;;  %v1532_v3 = vmul.f32 %v6630_v0, %v6536_v45  ;;  %v1578_v4 = vmul.f32 %v6102_v34, %v6524_v37  ;;  %v1562_v31 = vmul.f32 %v6639_v36, %v1509_v23  ;;  %v9591_v14 = vld [vmem:[#allocation16_spill] sm:$0xff]  ;;  %v9592_v34 = vld [vmem:[#allocation22_spill] sm:$0xff]  ;;  %v6656_v23 = vld [vmem:[%s9312_s4 + $0x68] sm:$0xff] }
 0x978   :  { %v1614_v27 = vadd.f32 %v1606_v8, %v1598_v12  ;;  %v6599_v8 = vadd.f32 %v341_v41, %v331_v43  ;;  %v344_v13 = vadd.f32 %v342_v17, %v332_v26  ;;  %v1537_v37 = vmul.f32 %v9592_v34, %v6534_v29  ;;  %v9594_v17 = vld [vmem:[#allocation7_spill] sm:$0xff]  ;;  %v6662_v26 = vld [vmem:[%s9312_s4 + $0xb0] sm:$0xff] }
 0x979   :  { %9595 = vst [vmem:[#allocation2_spill] sm:$0xff] %v6662_v26 }
 0x97a   :  { %v1634_v6 = vadd.f32 %v1624_v60, %v1614_v27  ;;  %v1412_v51 = vpop.permute.xlu1 %1411  ;;  %v6616_v60 = vld [vmem:[%s9307_s5 + $0xc0] sm:$0xff] }
 0x97b   :  { %v1561_v11 = vmul.f32 %v6616_v60, %v1505_v18  ;;  %v6622_v27 = vld [vmem:[%s9312_s4 + $0x60] sm:$0xff]  ;;  %v1548_v18 = vadd.f32 %v1538_v48, %v1528_v52  ;;  %v1579_v45 = vmul.f32 %v6645_v39, %v1412_v51  ;;  %v9596_v48 = vld [vmem:[#allocation5_spill] sm:$0xff] }
 0x97c   :  { %4648 = vtanh.f32 %v1634_v6 }
 0x97f   :  { %v4647_v62 = vpop.eup %4646  ;;  %v1457_v40 = vpop.permute.xlu1 %1456 }
 0x980   :  { %v1653_v32 = vmul.f32 %v4647_v62, %v9589_v55  ;;  %v1587_v63 = vmul.f32 %v6622_v27, %v1457_v40  ;;  %v1571_v62 = vadd.f32 %v1561_v11, %v1551_v7  ;;  %v1552_v55 = vadd.f32 %v1542_v38, %v1532_v3  ;;  %v9597_v38 = vld [vmem:[#allocation18_spill] sm:$0xff]  ;;  %v9599_v3 = vld [vmem:[#allocation20_spill] sm:$0xff] }
 0x981   :  { %v1530_v11 = vmul.f32 %v9597_v38, %v1417_v58  ;;  %v9604_v38 = vld [vmem:[#allocation24_spill] sm:$0xff] }
 0x982   :  { %v6597_v12 = vadd.f32 %v1653_v32, %v9590_v47  ;;  %v9593_v32 = vld [vmem:[#allocation8_spill] sm:$0xff]  ;;  %v1595_v52 = vadd.f32 %v1587_v63, %v1579_v45  ;;  %v9598_v63 = vld [vmem:[#allocation19_spill] sm:$0xff]  ;;  %v1529_v45 = vmul.f32 %v9599_v3, %v1412_v51 }
 0x983   :  { %v1461_v44 = vpop.permute.xlu1 %1460  ;;  %v1539_v24 = vmul.f32 %v9593_v32, %v1457_v40  ;;  %v9603_v51 = vld [vmem:[#allocation23_spill] sm:$0xff] }
 0x984   :  { %1699 = vrot.lane.b32.xlu0 %v6597_v12, %s5154_s13  ;;  %v1540_v21 = vmul.f32 %v9594_v17, %v1461_v44  ;;  %v1588_v47 = vmul.f32 %v6656_v23, %v1461_v44  ;;  %v6675_v44 = vld [vmem:[%s9312_s4 + $0x18] sm:$0xff]  ;;  %v1572_v17 = vadd.f32 %v1562_v31, %v1552_v55 }
 0x985   :  { %9601 = vst [vmem:[#allocation4_spill] sm:$0xff] %v6675_v44  ;;  %v1580_v32 = vmul.f32 %v6675_v44, %v1417_v58  ;;  %v1549_v3 = vadd.f32 %v1539_v24, %v1529_v45  ;;  %v6693_v44 = vld [vmem:[%s9312_s4 + $0xb8] sm:$0xff]  ;;  %v6701_v24 = vld [vmem:[%s9308_s6 + $0x28] sm:$0xff]  ;;  %v1547_v45 = vadd.f32 %v1537_v37, %v1527_v5 }
 0x986   :  { %v4649_v6 = vpop.eup %4648 }
 0x987   :  { %v1654_v43 = vmul.f32 %v4649_v6, %v9591_v14  ;;  %v1558_v6 = vmul.f32 %v9598_v63, %v1493_v1  ;;  %v9600_v14 = vld [vmem:[#allocation21_spill] sm:$0xff]  ;;  %v1602_v63 = vmul.f32 %v9604_v38, %v1493_v1  ;;  %v1596_v31 = vadd.f32 %v1588_v47, %v1580_v32 }
 0x988   :  { %v1497_v41 = vpop.permute.xlu1 %1496 }
 0x989   :  { %v1603_v7 = vmul.f32 %v6662_v26, %v1497_v41  ;;  %v6666_v40 = vadd.f32 %v1654_v43, %v9596_v48  ;;  %v1559_v34 = vmul.f32 %v9600_v14, %v1497_v41  ;;  %v6681_v43 = vld [vmem:[%s9308_s6 + $0x20] sm:$0xff]  ;;  %v1585_v41 = vmul.f32 %v9603_v51, %v6534_v29 }
 0x98a   :  { %9602 = vst [vmem:[#allocation9_spill] sm:$0xff] %v6681_v43  ;;  %v1621_v48 = vadd.f32 %v6681_v43, %v1571_v62  ;;  %v1550_v14 = vadd.f32 %v1540_v21, %v1530_v11  ;;  %v1577_v43 = vmul.f32 %v6162_v25, %v6511_v33  ;;  %v1594_v29 = vadd.f32 %v1586_v57, %v1578_v4 }
 0x98b   :  { %v1611_v26 = vadd.f32 %v1603_v7, %v1595_v52  ;;  %1701 = vrot.lane.b32.xlu1 %v6666_v40, %s5154_s13  ;;  %v9605_v52 = vld [vmem:[#allocation25_spill] sm:$0xff]  ;;  %v1568_v51 = vadd.f32 %v1558_v6, %v1548_v18  ;;  %v1569_v1 = vadd.f32 %v1559_v34, %v1549_v3  ;;  %v1622_v21 = vadd.f32 %v6701_v24, %v1572_v17 }
 0x98c   :  { %v1501_v58 = vpop.permute.xlu1 %1500  ;;  %v346_v11 = vadd.f32 %v6170_v35, %v344_v13  ;;  %v1593_v32 = vadd.f32 %v1585_v41, %v1577_v43  ;;  %v345_v4 = vadd.f32 %v6194_v10, %v6599_v8  ;;  %v6720_v10 = vld [vmem:[%s9310_s8 + $0x20] sm:$0xff]  ;;  %v6730_v43 = vld [vmem:[%s9309_s7 + $0x28] sm:$0xff] }
 0x98d   :  { %v1631_v55 = vadd.f32 %v1621_v48, %v1611_v26  ;;  %v1560_v7 = vmul.f32 %v9605_v52, %v1501_v58  ;;  %v1604_v62 = vmul.f32 %v6693_v44, %v1501_v58  ;;  %v1610_v48 = vadd.f32 %v1602_v63, %v1594_v29 }
 0x98e   :  { %v1618_v6 = vadd.f32 %v1568_v51, %v346_v11  ;;  %v1619_v34 = vadd.f32 %v6201_v20, %v1569_v1 }
 0x98f   :  { %4650 = vtanh.f32 %v1631_v55  ;;  %v1570_v47 = vadd.f32 %v1560_v7, %v1550_v14  ;;  %v1612_v26 = vadd.f32 %v1604_v62, %v1596_v31  ;;  %v6736_v14 = vld [vmem:[%s9310_s8 + $0x28] sm:$0xff] }
 0x990   :  { %v1489_v38 = vpop.permute.xlu1 %1488 }
 0x991   :  { %v1620_v25 = vadd.f32 %v6176_v46, %v1570_v47  ;;  %v1632_v33 = vadd.f32 %v1622_v21, %v1612_v26  ;;  %v1557_v57 = vmul.f32 %v6182_v59, %v1489_v38  ;;  %v1601_v18 = vmul.f32 %v6188_v56, %v1489_v38  ;;  %v6714_v59 = vld [vmem:[%s9309_s7 + $0x20] sm:$0xff] }
 0x993   :  { %v1630_v17 = vadd.f32 %v1620_v25, %v1610_v48  ;;  %4652 = vtanh.f32 %v1632_v33  ;;  %v1567_v35 = vadd.f32 %v1557_v57, %v1547_v45  ;;  %v1609_v13 = vadd.f32 %v1601_v18, %v1593_v32 }
 0x995   :  { %4654 = vtanh.f32 %v1630_v17  ;;  %v1617_v5 = vadd.f32 %v1567_v35, %v345_v4  ;;  %v1629_v37 = vadd.f32 %v1619_v34, %v1609_v13  ;;  %v136_v35 = vld [vmem:[%s9304_s0 + $0x50] sm:$0xff]  ;;  %v137_v13 = vld [vmem:[%s9304_s0 + $0x58] sm:$0xff] }
 0x996   :  { %4656 = vtanh.f32 %v1618_v6 }
 0x997   :  { %4658 = vtanh.f32 %v1617_v5  ;;  %v9606_v5 = vmov 2  }
 0x998   :  { %4660 = vtanh.f32 %v1629_v37  ;;  %v9607_v37 = vmov 9  }
 0x999   :  { %v4651_v46 = vpop.eup %4650 }
 0x99a   :  { %v1651_v56 = vmul.f32 %v6714_v59, %v4651_v46 }
 0x99c   :  { %v6723_v20 = vadd.f32 %v6720_v10, %v1651_v56 }
 0x99d   :  { %v4653_v8 = vpop.eup %4652 }
 0x99e   :  { %1695 = vrot.lane.b32.xlu0 %v6723_v20, %s5154_s13  ;;  %v1652_v41 = vmul.f32 %v6730_v43, %v4653_v8 }
 0x99f   :  { %v4655_v63 = vpop.eup %4654 }
 0x9a0   :  { %v4657_v3 = vpop.eup %4656  ;;  %v6739_v58 = vadd.f32 %v6736_v14, %v1652_v41  ;;  %v1650_v31 = vmul.f32 %v6217_v42, %v4655_v63 }
 0x9a1   :  { %v4659_v55 = vpop.eup %4658  ;;  %v1648_v29 = vmul.f32 %v6239_v50, %v4657_v3  ;;  %v479_v50 = vld [vmem:[%s9311_s2 + $0x40] sm:$0xff] }
 0x9a2   :  { %v4661_v52 = vpop.eup %4660  ;;  %1697 = vrot.lane.b32.xlu1 %v6739_v58, %s5154_s13  ;;  %v6746_v62 = vadd.f32 %v6231_v61, %v1650_v31  ;;  %v1647_v1 = vmul.f32 %v6253_v16, %v4659_v55  ;;  %v480_v61 = vld [vmem:[%s9311_s2 + $0x48] sm:$0xff] }
 0x9a3   :  { %v1649_v7 = vmul.f32 %v6225_v28, %v4661_v52  ;;  %v6758_v42 = vadd.f32 %v6263_v22, %v1648_v29 }
 0x9a4   :  { %v6761_v28 = vadd.f32 %v6271_v9, %v1647_v1 }
 0x9a5   :  { %v6750_v51 = vadd.f32 %v6245_v30, %v1649_v7 }
 0x9a6   :  { %1693 = vrot.lane.b32.xlu1 %v6746_v62, %s5154_s13 }
 0x9a7   :  { %1691 = vrot.lane.b32.xlu0 %v6750_v51, %s5154_s13 }
 0x9aa   :  { %1689 = vrot.lane.b32.xlu1 %v6758_v42, %s5154_s13 }
 0x9ab   :  { %1687 = vrot.lane.b32.xlu0 %v6761_v28, %s5154_s13 }
 0x9ae   :  { %615 = vrot.lane.b32.xlu1 %v480_v61, %s5155_s20 }
 0x9af   :  { %613 = vrot.lane.b32.xlu0 %v479_v50, %s5155_s20 }
 0x9d3   :  { %v1704_v30 = vpop.permute.xlu1 %1703 }
 0x9d4   :  { %v1725_v16 = vmul.f32 %v1704_v30, %v6528_v54 }
 0x9d6   :  { %1753 = vrot.lane.b32.xlu0 %v1725_v16, %s5155_s20 }
 0x9e0   :  { %v1706_v22 = vpop.permute.xlu1 %1705 }
 0x9e1   :  { %v1726_v9 = vmul.f32 %v1706_v22, %v6553_v15  ;;  %v9608_v22 = vld [vmem:[#allocation31_spill] sm:$0xff] }
 0x9e3   :  { %1755 = vrot.lane.b32.xlu1 %v1726_v9, %s5155_s20  ;;  %v1668_v9 = vmul.f32 %v6758_v42, %v9608_v22 }
 0x9f6   :  { %v1700_v21 = vpop.permute.xlu0 %1699 }
 0x9f7   :  { %v1723_v47 = vmul.f32 %v1700_v21, %v6597_v12 }
 0x9f9   :  { %1749 = vrot.lane.b32.xlu0 %v1723_v47, %s5155_s20  ;;  %v9609_v47 = vld [vmem:[#allocation27_spill] sm:$0xff] }
 0x9fd   :  { %v1702_v26 = vpop.permute.xlu1 %1701 }
 0x9fe   :  { %v1724_v11 = vmul.f32 %v1702_v26, %v6666_v40  ;;  %v1667_v26 = vmul.f32 %v6761_v28, %v9609_v47 }
 0xa00   :  { %1751 = vrot.lane.b32.xlu1 %v1724_v11, %s5155_s20  ;;  %v9610_v11 = vld [vmem:[#allocation28_spill] sm:$0xff] }
 0xa10   :  { %v1696_v45 = vpop.permute.xlu0 %1695 }
 0xa11   :  { %v1721_v32 = vmul.f32 %v1696_v45, %v6723_v20  ;;  %v1674_v45 = vmul.f32 %v6666_v40, %v9610_v11 }
 0xa13   :  { %1745 = vrot.lane.b32.xlu0 %v1721_v32, %s5155_s20 }
 0xa14   :  { %v1698_v48 = vpop.permute.xlu1 %1697 }
 0xa15   :  { %v1722_v38 = vmul.f32 %v1698_v48, %v6739_v58 }
 0xa17   :  { %1747 = vrot.lane.b32.xlu1 %v1722_v38, %s5155_s20  ;;  %v9611_v38 = vld [vmem:[#allocation26_spill] sm:$0xff] }
 0xa18   :  { %v1694_v25 = vpop.permute.xlu1 %1693 }
 0xa19   :  { %v1720_v33 = vmul.f32 %v1694_v25, %v6746_v62  ;;  %v1692_v57 = vpop.permute.xlu0 %1691  ;;  %v1673_v25 = vmul.f32 %v6597_v12, %v9611_v38  ;;  %v9620_v38 = vmov 10  }
 0xa1a   :  { %v1719_v18 = vmul.f32 %v1692_v57, %v6750_v51 }
 0xa1b   :  { %1743 = vrot.lane.b32.xlu1 %v1720_v33, %s5155_s20 }
 0xa1c   :  { %1741 = vrot.lane.b32.xlu0 %v1719_v18, %s5155_s20  ;;  %v1690_v4 = vpop.permute.xlu1 %1689 }
 0xa1d   :  { %v1718_v6 = vmul.f32 %v1690_v4, %v6758_v42  ;;  %v1688_v34 = vpop.permute.xlu0 %1687  ;;  %v9612_v4 = vld [vmem:[#allocation32_spill] sm:$0xff] }
 0xa1e   :  { %v1717_v17 = vmul.f32 %v1688_v34, %v6761_v28  ;;  %v9613_v34 = vld [vmem:[#allocation29_spill] sm:$0xff] }
 0xa1f   :  { %1739 = vrot.lane.b32.xlu1 %v1718_v6, %s5155_s20  ;;  %v1672_v6 = vmul.f32 %v6739_v58, %v9612_v4 }
 0xa20   :  { %1737 = vrot.lane.b32.xlu0 %v1717_v17, %s5155_s20  ;;  %v616_v63 = vpop.permute.xlu1 %615  ;;  %v1671_v17 = vmul.f32 %v6723_v20, %v9613_v34 }
 0xa21   :  { %v614_v46 = vpop.permute.xlu0 %613  ;;  %v1676_v3 = vmul.f32 %v6553_v15, %v616_v63 }
 0xa22   :  { %v1675_v56 = vmul.f32 %v6528_v54, %v614_v46  ;;  %v9616_v46 = vld [vmem:[#allocation33_spill] sm:$0xff] }
 0xa23   :  { %349 = vperm.xlu1 %4400, %v136_v35  }
 0xa24   :  { %354 = vperm.xlu0 %4401, %v137_v13  }
 0xa27   :  { %4402 = vset.pattern.permute.xlu1 %v9523_v2 }
 0xa28   :  { %4403 = vset.pattern.permute.xlu0 %v9606_v5  ;;  %360 = vperm.xlu1 %4402, %v136_v35  }
 0xa29   :  { %372 = vperm.xlu0 %4403, %v136_v35  }
 0xa2c   :  { %364 = vperm.xlu1 %4402, %v137_v13  }
 0xa2d   :  { %4405 = vset.pattern.permute.xlu0 %v9607_v37 }
 0xa30   :  { %4404 = vset.pattern.permute.xlu1 %v9606_v5 }
 0xa31   :  { %376 = vperm.xlu1 %4404, %v137_v13  }
 0xa35   :  { %4406 = vset.pattern.permute.xlu1 %v9607_v37 }
 0xa48   :  { %v1754_v8 = vpop.permute.xlu0 %1753 }
 0xa49   :  { %v6807_v41 = vadd.f32 %v1754_v8, %v1675_v56  ;;  %v1670_v56 = vmul.f32 %v6746_v62, %v9616_v46  ;;  %v9617_v8 = vld [vmem:[#allocation30_spill] sm:$0xff] }
 0xa4a   :  { %v1669_v63 = vmul.f32 %v6750_v51, %v9617_v8 }
 0xa4b   :  { %4662 = vtanh.f32 %v6807_v41 }
 0xa55   :  { %v4663_v31 = vpop.eup %4662  ;;  %v1756_v55 = vpop.permute.xlu1 %1755 }
 0xa56   :  { %v6811_v52 = vadd.f32 %v1756_v55, %v1676_v3  ;;  %1813 = vrot.lane.b32.xlu0 %v4663_v31, %s5157_s23 }
 0xa58   :  { %4664 = vtanh.f32 %v6811_v52 }
 0xa62   :  { %v4665_v7 = vpop.eup %4664 }
 0xa63   :  { %1815 = vrot.lane.b32.xlu1 %v4665_v7, %s5157_s23 }
 0xa6b   :  { %v1750_v1 = vpop.permute.xlu0 %1749 }
 0xa6c   :  { %v6831_v18 = vadd.f32 %v1750_v1, %v1673_v25 }
 0xa72   :  { %v1752_v29 = vpop.permute.xlu1 %1751 }
 0xa73   :  { %v6828_v57 = vadd.f32 %v1752_v29, %v1674_v45 }
 0xa85   :  { %v1746_v50 = vpop.permute.xlu0 %1745 }
 0xa86   :  { %v6842_v13 = vadd.f32 %v1746_v50, %v1671_v17 }
 0xa88   :  { %9615 = vst [vmem:[#allocation10_spill] sm:$0xff] %v6842_v13 }
 0xa89   :  { %v1748_v61 = vpop.permute.xlu1 %1747 }
 0xa8a   :  { %v6839_v35 = vadd.f32 %v1748_v61, %v1672_v6  ;;  %v9621_v6 = vmov 11  }
 0xa8c   :  { %9614 = vst [vmem:[#allocation3_spill] sm:$0xff] %v6839_v35 }
 0xa8d   :  { %v1744_v30 = vpop.permute.xlu1 %1743 }
 0xa8e   :  { %v1742_v16 = vpop.permute.xlu0 %1741  ;;  %v6849_v3 = vadd.f32 %v1744_v30, %v1670_v56 }
 0xa8f   :  { %v6852_v31 = vadd.f32 %v1742_v16, %v1669_v63 }
 0xa90   :  { %9618 = vst [vmem:[#allocation11_spill] sm:$0xff] %v6849_v3 }
 0xa91   :  { %v1740_v21 = vpop.permute.xlu1 %1739  ;;  %9619 = vst [vmem:[#allocation12_spill] sm:$0xff] %v6852_v31 }
 0xa92   :  { %v6822_v32 = vadd.f32 %v1740_v21, %v1668_v9  ;;  %v1738_v48 = vpop.permute.xlu0 %1737 }
 0xa93   :  { %v6826_v33 = vadd.f32 %v1738_v48, %v1667_v26 }
 0xa94   :  { %4666 = vtanh.f32 %v6822_v32 }
 0xa95   :  { %4668 = vtanh.f32 %v6826_v33 }
 0xa96   :  { %4670 = vtanh.f32 %v6828_v57 }
 0xa97   :  { %4672 = vtanh.f32 %v6831_v18 }
 0xa98   :  { %4674 = vtanh.f32 %v6839_v35  ;;  %v9635_v35 = vld [vmem:[#allocation46_spill] sm:$0xff] }
 0xa99   :  { %4676 = vtanh.f32 %v6842_v13  ;;  %v9633_v13 = vld [vmem:[#allocation44_spill] sm:$0xff] }
 0xa9a   :  { %4678 = vtanh.f32 %v6849_v3 }
 0xa9b   :  { %4680 = vtanh.f32 %v6852_v31 }
 0xa9e   :  { %v4667_v55 = vpop.eup %4666 }
 0xa9f   :  { %v4669_v7 = vpop.eup %4668  ;;  %1799 = vrot.lane.b32.xlu1 %v4667_v55, %s5157_s23 }
 0xaa0   :  { %1797 = vrot.lane.b32.xlu0 %v4669_v7, %s5157_s23  ;;  %v4671_v29 = vpop.eup %4670 }
 0xaa1   :  { %v4673_v1 = vpop.eup %4672 }
 0xaa2   :  { %v4675_v61 = vpop.eup %4674  ;;  %v6866_v9 = vpop.permute.xlu1 %349 }
 0xaa3   :  { %1811 = vrot.lane.b32.xlu1 %v4671_v29, %s5157_s23  ;;  %v4677_v50 = vpop.eup %4676  ;;  %v6864_v22 = vpop.permute.xlu0 %354 }
 0xaa4   :  { %1809 = vrot.lane.b32.xlu0 %v4673_v1, %s5157_s23  ;;  %v4679_v30 = vpop.eup %4678 }
 0xaa5   :  { %v4681_v16 = vpop.eup %4680 }
 0xaa7   :  { %1807 = vrot.lane.b32.xlu1 %v4675_v61, %s5157_s23  ;;  %v6870_v47 = vpop.permute.xlu1 %360 }
 0xaa8   :  { %1805 = vrot.lane.b32.xlu0 %v4677_v50, %s5157_s23  ;;  %v6868_v21 = vpop.permute.xlu0 %372 }
 0xaab   :  { %1803 = vrot.lane.b32.xlu1 %v4679_v30, %s5157_s23  ;;  %v6873_v45 = vpop.permute.xlu1 %364 }
 0xaac   :  { %1801 = vrot.lane.b32.xlu0 %v4681_v16, %s5157_s23 }
 0xab0   :  { %v6875_v48 = vpop.permute.xlu1 %376 }
 0xac8   :  { %v1814_v26 = vpop.permute.xlu0 %1813 }
 0xac9   :  { %v1835_v11 = vmul.f32 %v1814_v26, %v6528_v54 }
 0xacb   :  { %1879 = vperm.xlu0 %4405, %v1835_v11  }
 0xacf   :  { %4408 = vset.pattern.permute.xlu0 %v9620_v38 }
 0xad5   :  { %v1816_v25 = vpop.permute.xlu1 %1815 }
 0xad6   :  { %v1836_v4 = vmul.f32 %v1816_v25, %v6553_v15  ;;  %v9623_v25 = vld [vmem:[#allocation35_spill] sm:$0xff] }
 0xad8   :  { %1884 = vperm.xlu1 %4406, %v1836_v4   ;;  %1924 = vperm.xlu0 %4408, %v1836_v4  }
 0xadc   :  { %4407 = vset.pattern.permute.xlu1 %v9620_v38  ;;  %4409 = vset.pattern.permute.xlu0 %v9621_v6 }
 0xadd   :  { %1920 = vperm.xlu1 %4407, %v1835_v11   ;;  %1960 = vperm.xlu0 %4409, %v1835_v11  }
 0xae1   :  { %4410 = vset.pattern.permute.xlu1 %v9621_v6  ;;  %4411 = vset.pattern.permute.xlu0 %v9607_v37 }
 0xae2   :  { %1964 = vperm.xlu1 %4410, %v1836_v4  }
 0xae6   :  { %4412 = vset.pattern.permute.xlu1 %v9607_v37 }
 0xb11   :  { %v1800_v54 = vpop.permute.xlu1 %1799 }
 0xb12   :  { %v1828_v34 = vmul.f32 %v1800_v54, %v6758_v42  ;;  %v1798_v17 = vpop.permute.xlu0 %1797 }
 0xb13   :  { %v1827_v15 = vmul.f32 %v1798_v17, %v6761_v28 }
 0xb14   :  { %1844 = vperm.xlu1 %4412, %v1828_v34  }
 0xb15   :  { %1839 = vperm.xlu0 %4411, %v1827_v15   ;;  %v1812_v8 = vpop.permute.xlu1 %1811 }
 0xb16   :  { %v1810_v46 = vpop.permute.xlu0 %1809  ;;  %v1834_v42 = vmul.f32 %v1812_v8, %v6666_v40  ;;  %v9625_v8 = vld [vmem:[#allocation36_spill] sm:$0xff] }
 0xb17   :  { %v1833_v56 = vmul.f32 %v1810_v46, %v6597_v12 }
 0xb18   :  { %4413 = vset.pattern.permute.xlu1 %v9620_v38 }
 0xb19   :  { %4414 = vset.pattern.permute.xlu0 %v9620_v38  ;;  %1888 = vperm.xlu1 %4413, %v1827_v15   ;;  %v1808_v28 = vpop.permute.xlu1 %1807 }
 0xb1a   :  { %1892 = vperm.xlu0 %4414, %v1828_v34   ;;  %v1832_v63 = vmul.f32 %v1808_v28, %v6739_v58  ;;  %v1806_v12 = vpop.permute.xlu0 %1805  ;;  %v9626_v28 = vld [vmem:[#allocation38_spill] sm:$0xff] }
 0xb1b   :  { %v1831_v55 = vmul.f32 %v1806_v12, %v6723_v20  ;;  %v9622_v20 = vmov 0   ;;  %v9627_v12 = vld [vmem:[#allocation37_spill] sm:$0xff] }
 0xb1d   :  { %4415 = vset.pattern.permute.xlu1 %v9607_v37  ;;  %v1804_v40 = vpop.permute.xlu1 %1803 }
 0xb1e   :  { %1912 = vperm.xlu0 %4414, %v1833_v56   ;;  %1869 = vperm.xlu1 %4415, %v1833_v56   ;;  %v1830_v7 = vmul.f32 %v1804_v40, %v6746_v62  ;;  %v1802_v58 = vpop.permute.xlu0 %1801 }
 0xb1f   :  { %v1829_v62 = vmul.f32 %v1802_v58, %v6750_v51 }
 0xb22   :  { %4417 = vset.pattern.permute.xlu0 %v9621_v6  ;;  %1874 = vperm.xlu1 %4415, %v1834_v42  }
 0xb23   :  { %1952 = vperm.xlu0 %4417, %v1833_v56  }
 0xb26   :  { %4416 = vset.pattern.permute.xlu1 %v9620_v38 }
 0xb27   :  { %4420 = vset.pattern.permute.xlu0 %v9607_v37  ;;  %1916 = vperm.xlu1 %4416, %v1834_v42  }
 0xb28   :  { %1864 = vperm.xlu0 %4420, %v1832_v63  }
 0xb2b   :  { %4418 = vset.pattern.permute.xlu1 %v9621_v6 }
 0xb2c   :  { %4422 = vset.pattern.permute.xlu0 %v9621_v6  ;;  %1956 = vperm.xlu1 %4418, %v1834_v42  }
 0xb2d   :  { %1944 = vperm.xlu0 %4422, %v1831_v55  }
 0xb30   :  { %4419 = vset.pattern.permute.xlu1 %v9607_v37 }
 0xb31   :  { %4425 = vset.pattern.permute.xlu0 %v9607_v37  ;;  %1859 = vperm.xlu1 %4419, %v1831_v55  }
 0xb32   :  { %1854 = vperm.xlu0 %4425, %v1830_v7  }
 0xb35   :  { %4421 = vset.pattern.permute.xlu1 %v9620_v38 }
 0xb36   :  { %4428 = vset.pattern.permute.xlu0 %v9621_v6  ;;  %1904 = vperm.xlu1 %4421, %v1831_v55  }
 0xb37   :  { %1932 = vperm.xlu0 %4428, %v1828_v34   ;;  %v9624_v34 = vld [vmem:[#allocation34_spill] sm:$0xff] }
 0xb3a   :  { %1908 = vperm.xlu1 %4421, %v1832_v63  }
 0xb3b   :  { %4430 = vset.pattern.permute.xlu0 %v9622_v20 }
 0xb3e   :  { %4423 = vset.pattern.permute.xlu1 %v9621_v6 }
 0xb3f   :  { %1948 = vperm.xlu1 %4423, %v1832_v63  }
 0xb43   :  { %4424 = vset.pattern.permute.xlu1 %v9607_v37 }
 0xb44   :  { %1849 = vperm.xlu1 %4424, %v1829_v62  }
 0xb48   :  { %4426 = vset.pattern.permute.xlu1 %v9620_v38  ;;  %v9630_v38 = vld [vmem:[#allocation41_spill] sm:$0xff] }
 0xb49   :  { %1896 = vperm.xlu1 %4426, %v1829_v62  }
 0xb4a   :  { %v1880_v1 = vpop.permute.xlu0 %1879 }
 0xb4b   :  { %v1975_v17 = vmul.f32 %v1880_v1, %v9624_v34  ;;  %v9631_v1 = vld [vmem:[#allocation40_spill] sm:$0xff] }
 0xb4d   :  { %1900 = vperm.xlu1 %4426, %v1830_v7  }
 0xb51   :  { %4427 = vset.pattern.permute.xlu1 %v9621_v6 }
 0xb52   :  { %1936 = vperm.xlu1 %4427, %v1829_v62  }
 0xb56   :  { %1940 = vperm.xlu1 %4427, %v1830_v7  }
 0xb57   :  { %v1885_v29 = vpop.permute.xlu1 %1884  ;;  %v1925_v50 = vpop.permute.xlu0 %1924 }
 0xb58   :  { %v1986_v31 = vmul.f32 %v9630_v38, %v1925_v50 }
 0xb5a   :  { %1928 = vperm.xlu1 %4427, %v1827_v15  }
 0xb5c   :  { %v1921_v61 = vpop.permute.xlu1 %1920  ;;  %v1961_v51 = vpop.permute.xlu0 %1960 }
 0xb5d   :  { %v1985_v4 = vmul.f32 %v9623_v25, %v1921_v61  ;;  %v2005_v42 = vmul.f32 %v9625_v8, %v1961_v51  ;;  %v9629_v61 = vld [vmem:[#allocation42_spill] sm:$0xff] }
 0xb5e   :  { %4429 = vset.pattern.permute.xlu1 %v9622_v20  ;;  %v9628_v20 = vld [vmem:[#allocation39_spill] sm:$0xff]  ;;  %v1976_v25 = vmul.f32 %v1885_v29, %v9629_v61 }
 0xb5f   :  { %v1995_v15 = vadd.f32 %v1985_v4, %v1975_v17  ;;  %v9632_v17 = vld [vmem:[#allocation43_spill] sm:$0xff] }
 0xb60   :  { %v9636_v61 = vld [vmem:[#allocation47_spill] sm:$0xff] }
 0xb61   :  { %v1965_v30 = vpop.permute.xlu1 %1964  ;;  %v2015_v40 = vadd.f32 %v2005_v42, %v1995_v15  ;;  %v9634_v42 = vld [vmem:[#allocation45_spill] sm:$0xff] }
 0xb62   :  { %v2006_v3 = vmul.f32 %v9632_v17, %v1965_v30 }
 0xb63   :  { %v2065_v4 = vadd.f32 %v2015_v40, %v9631_v1 }
 0xb93   :  { %v6910_v16 = vpop.permute.xlu1 %1844 }
 0xb94   :  { %v6912_v26 = vpop.permute.xlu0 %1839 }
 0xb98   :  { %v6914_v11 = vpop.permute.xlu1 %1888 }
 0xb99   :  { %v6917_v54 = vpop.permute.xlu0 %1892 }
 0xb9d   :  { %v1913_v46 = vpop.permute.xlu0 %1912  ;;  %v1870_v56 = vpop.permute.xlu1 %1869 }
 0xb9e   :  { %v2031_v63 = vmul.f32 %v9626_v28, %v1913_v46  ;;  %v2023_v55 = vmul.f32 %v1870_v56, %v9627_v12  ;;  %v1996_v28 = vadd.f32 %v1986_v31, %v1976_v25 }
 0xba0   :  { %v2039_v62 = vadd.f32 %v2031_v63, %v2023_v55  ;;  %v2016_v15 = vadd.f32 %v2006_v3, %v1996_v28  ;;  %v6943_v3 = vld [vmem:[%s9307_s5 + $0x30] sm:$0xff] }
 0xba1   :  { %v1875_v7 = vpop.permute.xlu1 %1874  ;;  %v1973_v31 = vmul.f32 %v6943_v3, %v1870_v56  ;;  %v6960_v56 = vld [vmem:[%s9312_s4 + $0x20] sm:$0xff] }
 0xba2   :  { %v1953_v58 = vpop.permute.xlu0 %1952  ;;  %v2024_v63 = vmul.f32 %v1875_v7, %v9634_v42  ;;  %v2066_v38 = vadd.f32 %v2016_v15, %v9636_v61  ;;  %v9638_v42 = vld [vmem:[#allocation49_spill] sm:$0xff]  ;;  %v6982_v61 = vld [vmem:[%s9312_s4 + $0xc0] sm:$0xff] }
 0xba3   :  { %v2047_v6 = vmul.f32 %v9628_v20, %v1953_v58 }
 0xba5   :  { %v2055_v34 = vadd.f32 %v2047_v6, %v2039_v62  ;;  %v6937_v6 = vld [vmem:[%s9307_s5 + $0x80] sm:$0xff]  ;;  %v6951_v62 = vld [vmem:[%s9307_s5 + $0xd0] sm:$0xff] }
 0xba6   :  { %v1917_v51 = vpop.permute.xlu1 %1916  ;;  %v2003_v25 = vmul.f32 %v6951_v62, %v1953_v58  ;;  %v6967_v58 = vld [vmem:[%s9312_s4 + $0x70] sm:$0xff] }
 0xba7   :  { %v2075_v8 = vadd.f32 %v2065_v4, %v2055_v34  ;;  %v2032_v12 = vmul.f32 %v9633_v13, %v1917_v51  ;;  %v6932_v40 = vpop.permute.xlu0 %1864  ;;  %v1983_v13 = vmul.f32 %v6937_v6, %v1913_v46  ;;  %v9637_v4 = vld [vmem:[#allocation48_spill] sm:$0xff] }
 0xba9   :  { %4682 = vtanh.f32 %v2075_v8  ;;  %v2040_v20 = vadd.f32 %v2032_v12, %v2024_v63  ;;  %v1993_v46 = vadd.f32 %v1983_v13, %v1973_v31  ;;  %v6991_v13 = vld [vmem:[%s9307_s5 + $0x38] sm:$0xff] }
 0xbaa   :  { %v1974_v31 = vmul.f32 %v6991_v13, %v1875_v7  ;;  %v7009_v7 = vld [vmem:[%s9312_s4 + $0x78] sm:$0xff] }
 0xbab   :  { %v1957_v55 = vpop.permute.xlu1 %1956  ;;  %v2013_v28 = vadd.f32 %v2003_v25, %v1993_v46  ;;  %9641 = vst [vmem:[#allocation6_spill] sm:$0xff] %v7009_v7 }
 0xbac   :  { %v2048_v29 = vmul.f32 %v9635_v35, %v1957_v55  ;;  %v6955_v17 = vpop.permute.xlu0 %1944 }
 0xbae   :  { %v2056_v50 = vadd.f32 %v2048_v29, %v2040_v20  ;;  %v6976_v20 = vld [vmem:[%s9307_s5 + $0x88] sm:$0xff] }
 0xbaf   :  { %v1984_v29 = vmul.f32 %v6976_v20, %v1917_v51  ;;  %v6997_v51 = vld [vmem:[%s9307_s5 + $0xd8] sm:$0xff] }
 0xbb0   :  { %v2076_v35 = vadd.f32 %v2066_v38, %v2056_v50  ;;  %v6946_v30 = vpop.permute.xlu1 %1859  ;;  %v2045_v38 = vmul.f32 %v6982_v61, %v6955_v17  ;;  %9639 = vst [vmem:[#allocation13_spill] sm:$0xff] %v6997_v51 }
 0xbb1   :  { %v2021_v12 = vmul.f32 %v6960_v56, %v6946_v30 }
 0xbb2   :  { %4684 = vtanh.f32 %v2076_v35  ;;  %v2004_v35 = vmul.f32 %v6997_v51, %v1957_v55  ;;  %v7015_v55 = vld [vmem:[%s9312_s4 + $0x28] sm:$0xff] }
 0xbb3   :  { %v4683_v1 = vpop.eup %4682  ;;  %9642 = vst [vmem:[#allocation14_spill] sm:$0xff] %v7015_v55  ;;  %v2022_v51 = vmul.f32 %v7015_v55, %v6932_v40  ;;  %v7032_v55 = vld [vmem:[%s9308_s6 + $0x38] sm:$0xff] }
 0xbb4   :  { %v2095_v34 = vmul.f32 %v4683_v1, %v9637_v4  ;;  %v7003_v1 = vld [vmem:[%s9308_s6 + $0x30] sm:$0xff]  ;;  %9646 = vst [vmem:[#allocation16_spill] sm:$0xff] %v7032_v55 }
 0xbb5   :  { %v1905_v8 = vpop.permute.xlu1 %1904  ;;  %9640 = vst [vmem:[#allocation17_spill] sm:$0xff] %v7003_v1  ;;  %v2063_v46 = vadd.f32 %v7003_v1, %v2013_v28 }
 0xbb6   :  { %v2029_v15 = vmul.f32 %v6967_v58, %v1905_v8  ;;  %v6971_v63 = vadd.f32 %v2095_v34, %v9638_v42  ;;  %v1994_v34 = vadd.f32 %v1984_v29, %v1974_v31 }
 0xbb8   :  { %v2037_v50 = vadd.f32 %v2029_v15, %v2021_v12  ;;  %2143 = vrot.lane.b32.xlu1 %v6971_v63, %s5154_s13  ;;  %v2014_v28 = vadd.f32 %v2004_v35, %v1994_v34 }
 0xbb9   :  { %v1909_v25 = vpop.permute.xlu1 %1908 }
 0xbba   :  { %v2053_v4 = vadd.f32 %v2045_v38, %v2037_v50  ;;  %v2030_v12 = vmul.f32 %v7009_v7, %v1909_v25  ;;  %v9643_v38 = vld [vmem:[#allocation50_spill] sm:$0xff]  ;;  %v7023_v7 = vld [vmem:[%s9312_s4 + $0xc8] sm:$0xff]  ;;  %v2064_v35 = vadd.f32 %v7032_v55, %v2014_v28  ;;  %v1855_v55 = vpop.permute.xlu0 %1854 }
 0xbbb   :  { %9644 = vst [vmem:[#allocation15_spill] sm:$0xff] %v7023_v7  ;;  %v7051_v28 = vld [vmem:[%s9306_s3 + $0x1] ss:$0 sm:$0xff] }
 0xbbc   :  { %v4685_v15 = vpop.eup %4684  ;;  %v2073_v42 = vadd.f32 %v2063_v46, %v2053_v4  ;;  %v2038_v31 = vadd.f32 %v2030_v12, %v2022_v51  ;;  %v9645_v4 = vld [vmem:[#allocation51_spill] sm:$0xff]  ;;  %9648 = vst [vmem:[#allocation8_spill] sm:$0xff] %v7051_v28 }
 0xbbd   :  { %v2096_v29 = vmul.f32 %v4685_v15, %v9643_v38  ;;  %v7042_v15 = vld [vmem:[%s9306_s3] ss:$0 sm:$0xff] }
 0xbbe   :  { %4686 = vtanh.f32 %v2073_v42  ;;  %v1949_v50 = vpop.permute.xlu1 %1948  ;;  %9647 = vst [vmem:[#allocation22_spill] sm:$0xff] %v7042_v15  ;;  %v357_v42 = vmul.f32 %v7042_v15, %v6866_v9  ;;  %v358_v38 = vmul.f32 %v7042_v15, %v6864_v22  ;;  %v7060_v9 = vld [vmem:[%s9306_s3 + $0x2] ss:$0 sm:$0xff] }
 0xbbf   :  { %v2046_v46 = vmul.f32 %v7023_v7, %v1949_v50  ;;  %v7027_v1 = vadd.f32 %v2096_v29, %v9645_v4  ;;  %v367_v29 = vmul.f32 %v7051_v28, %v6870_v47  ;;  %9649 = vst [vmem:[#allocation7_spill] sm:$0xff] %v7060_v9  ;;  %v379_v22 = vmul.f32 %v7060_v9, %v6868_v21 }
 0xbc0   :  { %v1981_v4 = vmul.f32 %v6578_v53, %v1905_v8  ;;  %v380_v47 = vmul.f32 %v7060_v9, %v6875_v48  ;;  %v7078_v53 = vld [vmem:[%s9310_s8 + $0x30] sm:$0xff] }
 0xbc1   :  { %v2054_v34 = vadd.f32 %v2046_v46, %v2038_v31  ;;  %2145 = vrot.lane.b32.xlu1 %v7027_v1, %s5154_s13  ;;  %v368_v31 = vmul.f32 %v7051_v28, %v6873_v45  ;;  %v7070_v45 = vld [vmem:[%s9309_s7 + $0x30] sm:$0xff]  ;;  %v1971_v28 = vmul.f32 %v6589_v49, %v6946_v30  ;;  %9651 = vst [vmem:[#allocation18_spill] sm:$0xff] %v7078_v53 }
 0xbc2   :  { %9650 = vst [vmem:[#allocation5_spill] sm:$0xff] %v7070_v45  ;;  %v1982_v30 = vmul.f32 %v6606_v19, %v1909_v25  ;;  %v2001_v19 = vmul.f32 %v6616_v60, %v6955_v17  ;;  %v7133_v60 = vld [vmem:[%s9307_s5 + $0x58] sm:$0xff]  ;;  %v1972_v17 = vmul.f32 %v6630_v0, %v6932_v40 }
 0xbc3   :  { %v2074_v51 = vadd.f32 %v2064_v35, %v2054_v34  ;;  %v7037_v12 = vpop.permute.xlu1 %1849  ;;  %v369_v34 = vadd.f32 %v367_v29, %v357_v42  ;;  %v370_v15 = vadd.f32 %v368_v31, %v358_v38  ;;  %v1991_v48 = vadd.f32 %v1981_v4, %v1971_v28  ;;  %v7090_v29 = vld [vmem:[%s9307_s5 + $0x8] sm:$0xff]  ;;  %v7107_v31 = vld [vmem:[%s9307_s5] sm:$0xff]  ;;  %v7119_v4 = vld [vmem:[%s9307_s5 + $0x50] sm:$0xff]  ;;  %9657 = vst [vmem:[#allocation25_spill] sm:$0xff] %v7133_v60 }
 0xbc4   :  { %9652 = vst [vmem:[#allocation19_spill] sm:$0xff] %v7090_v29  ;;  %v1968_v49 = vmul.f32 %v7090_v29, %v6910_v16  ;;  %v7100_v28 = vld [vmem:[%s9312_s4 + $0x8] sm:$0xff]  ;;  %9654 = vst [vmem:[#allocation21_spill] sm:$0xff] %v7107_v31  ;;  %v1992_v40 = vadd.f32 %v1982_v30, %v1972_v17  ;;  %v7172_v17 = vld [vmem:[%s9310_s8 + $0x38] sm:$0xff] }
 0xbc5   :  { %4688 = vtanh.f32 %v2074_v51  ;;  %v7083_v42 = vadd.f32 %v379_v22, %v369_v34  ;;  %v7085_v38 = vadd.f32 %v380_v47, %v370_v15  ;;  %9653 = vst [vmem:[#allocation20_spill] sm:$0xff] %v7100_v28  ;;  %v2018_v15 = vmul.f32 %v7100_v28, %v6910_v16  ;;  %9655 = vst [vmem:[#allocation23_spill] sm:$0xff] %v7119_v4  ;;  %v7126_v34 = vld [vmem:[%s9312_s4 + $0x50] sm:$0xff] }
 0xbc6   :  { %v1977_v16 = vmul.f32 %v7119_v4, %v6914_v11  ;;  %9656 = vst [vmem:[#allocation24_spill] sm:$0xff] %v7126_v34  ;;  %v2025_v47 = vmul.f32 %v7126_v34, %v6914_v11  ;;  %v1933_v4 = vpop.permute.xlu0 %1932  ;;  %v2019_v28 = vmul.f32 %v6645_v39, %v7037_v12  ;;  %v7145_v11 = vld [vmem:[%s9309_s7 + $0x38] sm:$0xff]  ;;  %9663 = vst [vmem:[#allocation32_spill] sm:$0xff] %v7172_v17 }
 0xbc7   :  { %9658 = vst [vmem:[#allocation31_spill] sm:$0xff] %v7145_v11 }
 0xbc8   :  { %v4687_v46 = vpop.eup %4686  ;;  %v1897_v35 = vpop.permute.xlu1 %1896 }
 0xbc9   :  { %v2093_v51 = vmul.f32 %v7070_v45, %v4687_v46  ;;  %v7111_v46 = vmul.f32 %v7107_v31, %v6912_v26  ;;  %v2027_v25 = vmul.f32 %v6622_v27, %v1897_v35  ;;  %v1978_v27 = vmul.f32 %v7133_v60, %v6917_v54  ;;  %v7151_v60 = vld [vmem:[%s9312_s4 + $0x58] sm:$0xff] }
 0xbca   :  { %v2002_v31 = vmul.f32 %v6639_v36, %v1949_v50  ;;  %9659 = vst [vmem:[#allocation27_spill] sm:$0xff] %v7151_v60  ;;  %v2026_v0 = vmul.f32 %v7151_v60, %v6917_v54  ;;  %v7158_v36 = vld [vmem:[%s9307_s5 + $0x60] sm:$0xff]  ;;  %v7164_v50 = vld [vmem:[%s9307_s5 + $0x68] sm:$0xff] }
 0xbcb   :  { %v7081_v21 = vadd.f32 %v7078_v53, %v2093_v51  ;;  %v2011_v51 = vadd.f32 %v2001_v19, %v1991_v48  ;;  %9660 = vst [vmem:[#allocation28_spill] sm:$0xff] %v7158_v36  ;;  %v1979_v39 = vmul.f32 %v7158_v36, %v1897_v35  ;;  %9661 = vst [vmem:[#allocation26_spill] sm:$0xff] %v7164_v50  ;;  %v9662_v54 = vld [vmem:[#allocation2_spill] sm:$0xff]  ;;  %v7180_v36 = vld [vmem:[%s9307_s5 + $0x18] sm:$0xff] }
 0xbcc   :  { %v1901_v8 = vpop.permute.xlu1 %1900  ;;  %9664 = vst [vmem:[#allocation29_spill] sm:$0xff] %v7180_v36  ;;  %v2012_v60 = vadd.f32 %v2002_v31, %v1992_v40  ;;  %v1988_v45 = vadd.f32 %v1978_v27, %v1968_v49  ;;  %v7215_v31 = vld [vmem:[%s9307_s5 + $0xb8] sm:$0xff]  ;;  %v7222_v27 = vld [vmem:[%s9312_s4] sm:$0xff]  ;;  %v2034_v40 = vadd.f32 %v2026_v0, %v2018_v15 }
 0xbcd   :  { %2139 = vrot.lane.b32.xlu0 %v7081_v21, %s5154_s13  ;;  %v1980_v48 = vmul.f32 %v7164_v50, %v1901_v8  ;;  %v1970_v50 = vmul.f32 %v7180_v36, %v1855_v55  ;;  %v9668_v36 = vld [vmem:[#allocation4_spill] sm:$0xff] }
 0xbcf   :  { %v4689_v22 = vpop.eup %4688  ;;  %v1990_v7 = vadd.f32 %v1980_v48, %v1970_v50  ;;  %v1987_v48 = vadd.f32 %v1977_v16, %v7111_v46  ;;  %v7250_v46 = vld [vmem:[%s9312_s4 + $0xa0] sm:$0xff] }
 0xbd0   :  { %v2094_v34 = vmul.f32 %v7145_v11, %v4689_v22  ;;  %v2035_v22 = vadd.f32 %v2027_v25, %v2019_v28  ;;  %v2028_v11 = vmul.f32 %v6656_v23, %v1901_v8  ;;  %v7186_v23 = vld [vmem:[%s9307_s5 + $0xa8] sm:$0xff]  ;;  %v7192_v28 = vld [vmem:[%s9307_s5 + $0x10] sm:$0xff] }
 0xbd1   :  { %v1937_v19 = vpop.permute.xlu1 %1936  ;;  %9665 = vst [vmem:[#allocation33_spill] sm:$0xff] %v7186_v23  ;;  %v1998_v8 = vmul.f32 %v7186_v23, %v1933_v4  ;;  %9666 = vst [vmem:[#allocation30_spill] sm:$0xff] %v7192_v28  ;;  %v1969_v25 = vmul.f32 %v7192_v28, %v7037_v12  ;;  %v9669_v23 = vld [vmem:[#allocation9_spill] sm:$0xff]  ;;  %v7209_v12 = vld [vmem:[%s9312_s4 + $0xa8] sm:$0xff] }
 0xbd2   :  { %v2043_v30 = vmul.f32 %v9662_v54, %v1937_v19  ;;  %v7175_v35 = vadd.f32 %v7172_v17, %v2094_v34  ;;  %v7199_v34 = vld [vmem:[%s9307_s5 + $0xb0] sm:$0xff]  ;;  %v2020_v17 = vmul.f32 %v9668_v36, %v1855_v55  ;;  %v2061_v53 = vadd.f32 %v9669_v23, %v2011_v51 }
 0xbd3   :  { %9667 = vst [vmem:[#allocation35_spill] sm:$0xff] %v7199_v34  ;;  %v1999_v54 = vmul.f32 %v7199_v34, %v1937_v19  ;;  %v2042_v28 = vmul.f32 %v7209_v12, %v1933_v4  ;;  %v1989_v9 = vadd.f32 %v1979_v39, %v1969_v25  ;;  %v2017_v4 = vmul.f32 %v7222_v27, %v6912_v26 }
 0xbd4   :  { %v2051_v29 = vadd.f32 %v2043_v30, %v2035_v22  ;;  %2141 = vrot.lane.b32.xlu1 %v7175_v35, %s5154_s13  ;;  %v2036_v34 = vadd.f32 %v2028_v11, %v2020_v17  ;;  %v2008_v11 = vadd.f32 %v1998_v8, %v1988_v45  ;;  %v7244_v45 = vld [vmem:[%s9307_s5 + $0xa0] sm:$0xff]  ;;  %v7263_v30 = vld [vmem:[%s9308_s6 + $0x10] sm:$0xff] }
 0xbd5   :  { %v1941_v19 = vpop.permute.xlu1 %1940  ;;  %v2033_v22 = vadd.f32 %v2025_v47, %v2017_v4  ;;  %v2050_v26 = vadd.f32 %v2042_v28, %v2034_v40  ;;  %v7256_v47 = vld [vmem:[%s9308_s6] sm:$0xff] }
 0xbd6   :  { %v2071_v55 = vadd.f32 %v2061_v53, %v2051_v29  ;;  %v2000_v51 = vmul.f32 %v7215_v31, %v1941_v19  ;;  %v2044_v49 = vmul.f32 %v6693_v44, %v1941_v19  ;;  %v2009_v53 = vadd.f32 %v1999_v54, %v1989_v9  ;;  %v7230_v44 = vld [vmem:[%s9308_s6 + $0x8] sm:$0xff] }
 0xbd7   :  { %v2062_v29 = vadd.f32 %v6701_v24, %v2012_v60  ;;  %v384_v50 = vadd.f32 %v7230_v44, %v7085_v38  ;;  %v7238_v24 = vld [vmem:[%s9308_s6 + $0x18] sm:$0xff]  ;;  %v383_v60 = vadd.f32 %v7256_v47, %v7083_v42 }
 0xbd8   :  { %4690 = vtanh.f32 %v2071_v55  ;;  %v2010_v36 = vadd.f32 %v2000_v51, %v1990_v7  ;;  %v2052_v39 = vadd.f32 %v2044_v49, %v2036_v34  ;;  %v2059_v17 = vadd.f32 %v7263_v30, %v2009_v53 }
 0xbd9   :  { %v1929_v15 = vpop.permute.xlu1 %1928  ;;  %v2058_v0 = vadd.f32 %v2008_v11, %v384_v50  ;;  %v7279_v11 = vld [vmem:[%s9309_s7 + $0x18] sm:$0xff] }
 0xbda   :  { %v2060_v7 = vadd.f32 %v7238_v24, %v2010_v36  ;;  %v2072_v9 = vadd.f32 %v2062_v29, %v2052_v39  ;;  %v1997_v38 = vmul.f32 %v7244_v45, %v1929_v15  ;;  %v2041_v16 = vmul.f32 %v7250_v46, %v1929_v15  ;;  %v7293_v29 = vld [vmem:[%s9310_s8 + $0x18] sm:$0xff]  ;;  %v7301_v39 = vld [vmem:[%s9309_s7 + $0x8] sm:$0xff] }
 0xbdc   :  { %v2070_v23 = vadd.f32 %v2060_v7, %v2050_v26  ;;  %4692 = vtanh.f32 %v2072_v9  ;;  %v2007_v8 = vadd.f32 %v1997_v38, %v1987_v48  ;;  %v2049_v28 = vadd.f32 %v2041_v16, %v2033_v22  ;;  %v7307_v48 = vld [vmem:[%s9310_s8 + $0x10] sm:$0xff]  ;;  %v7315_v26 = vld [vmem:[%s9309_s7] sm:$0xff]  ;;  %v7325_v7 = vld [vmem:[%s9310_s8 + $0x8] sm:$0xff] }
 0xbdd   :  { %v7333_v38 = vld [vmem:[%s9310_s8] sm:$0xff] }
 0xbde   :  { %4694 = vtanh.f32 %v2070_v23  ;;  %v2057_v25 = vadd.f32 %v2007_v8, %v383_v60  ;;  %v2069_v34 = vadd.f32 %v2059_v17, %v2049_v28 }
 0xbdf   :  { %4696 = vtanh.f32 %v2058_v0 }
 0xbe0   :  { %4698 = vtanh.f32 %v2057_v25 }
 0xbe1   :  { %4700 = vtanh.f32 %v2069_v34 }
 0xbe2   :  { %v4691_v54 = vpop.eup %4690 }
 0xbe3   :  { %v2091_v42 = vmul.f32 %v6714_v59, %v4691_v54 }
 0xbe5   :  { %v7268_v19 = vadd.f32 %v6720_v10, %v2091_v42 }
 0xbe6   :  { %v4693_v55 = vpop.eup %4692 }
 0xbe7   :  { %2135 = vrot.lane.b32.xlu0 %v7268_v19, %s5154_s13  ;;  %v2092_v51 = vmul.f32 %v6730_v43, %v4693_v55  ;;  %v7287_v43 = vld [vmem:[%s9309_s7 + $0x10] sm:$0xff] }
 0xbe8   :  { %v4695_v49 = vpop.eup %4694 }
 0xbe9   :  { %v4697_v4 = vpop.eup %4696  ;;  %v7274_v40 = vadd.f32 %v6736_v14, %v2092_v51  ;;  %v2090_v59 = vmul.f32 %v7279_v11, %v4695_v49 }
 0xbea   :  { %v4699_v10 = vpop.eup %4698  ;;  %v2088_v50 = vmul.f32 %v7301_v39, %v4697_v4 }
 0xbeb   :  { %v4701_v53 = vpop.eup %4700  ;;  %2137 = vrot.lane.b32.xlu1 %v7274_v40, %s5154_s13  ;;  %v7296_v36 = vadd.f32 %v7293_v29, %v2090_v59  ;;  %v2087_v15 = vmul.f32 %v7315_v26, %v4699_v10 }
 0xbec   :  { %v2089_v14 = vmul.f32 %v7287_v43, %v4701_v53  ;;  %v7328_v9 = vadd.f32 %v7325_v7, %v2088_v50 }
 0xbed   :  { %v7336_v16 = vadd.f32 %v7333_v38, %v2087_v15 }
 0xbee   :  { %v7310_v22 = vadd.f32 %v7307_v48, %v2089_v14 }
 0xbef   :  { %2133 = vrot.lane.b32.xlu1 %v7296_v36, %s5154_s13 }
 0xbf0   :  { %2131 = vrot.lane.b32.xlu0 %v7310_v22, %s5154_s13 }
 0xbf3   :  { %2129 = vrot.lane.b32.xlu1 %v7328_v9, %s5154_s13 }
 0xbf4   :  { %2127 = vrot.lane.b32.xlu0 %v7336_v16, %s5154_s13 }
 0xc2a   :  { %v2144_v60 = vpop.permute.xlu1 %2143 }
 0xc2b   :  { %v2165_v0 = vmul.f32 %v2144_v60, %v6971_v63  ;;  %v138_v60 = vld [vmem:[%s9304_s0 + $0x60] sm:$0xff] }
 0xc2d   :  { %2193 = vrot.lane.b32.xlu0 %v2165_v0, %s5155_s20  ;;  %v139_v0 = vld [vmem:[%s9304_s0 + $0x68] sm:$0xff] }
 0xc33   :  { %v2146_v17 = vpop.permute.xlu1 %2145 }
 0xc34   :  { %v2166_v23 = vmul.f32 %v2146_v17, %v7027_v1 }
 0xc36   :  { %2195 = vrot.lane.b32.xlu1 %v2166_v23, %s5155_s20 }
 0xc3f   :  { %v2140_v8 = vpop.permute.xlu0 %2139 }
 0xc40   :  { %v2163_v28 = vmul.f32 %v2140_v8, %v7081_v21 }
 0xc42   :  { %2189 = vrot.lane.b32.xlu0 %v2163_v28, %s5155_s20 }
 0xc46   :  { %v2142_v25 = vpop.permute.xlu1 %2141 }
 0xc47   :  { %v2164_v34 = vmul.f32 %v2142_v25, %v7175_v35 }
 0xc49   :  { %2191 = vrot.lane.b32.xlu1 %v2164_v34, %s5155_s20 }
 0xc59   :  { %v2136_v54 = vpop.permute.xlu0 %2135 }
 0xc5a   :  { %v2161_v42 = vmul.f32 %v2136_v54, %v7268_v19 }
 0xc5c   :  { %2185 = vrot.lane.b32.xlu0 %v2161_v42, %s5155_s20 }
 0xc5d   :  { %v2138_v55 = vpop.permute.xlu1 %2137 }
 0xc5e   :  { %v2162_v51 = vmul.f32 %v2138_v55, %v7274_v40  ;;  %v2108_v55 = vmul.f32 %v7328_v9, %v6822_v32 }
 0xc60   :  { %2187 = vrot.lane.b32.xlu1 %v2162_v51, %s5155_s20 }
 0xc61   :  { %v2134_v49 = vpop.permute.xlu1 %2133 }
 0xc62   :  { %v2160_v4 = vmul.f32 %v2134_v49, %v7296_v36  ;;  %v2132_v59 = vpop.permute.xlu0 %2131  ;;  %v2107_v49 = vmul.f32 %v7336_v16, %v6826_v33  ;;  %v2114_v33 = vmul.f32 %v7175_v35, %v6828_v57 }
 0xc63   :  { %v2159_v10 = vmul.f32 %v2132_v59, %v7310_v22 }
 0xc64   :  { %2183 = vrot.lane.b32.xlu1 %v2160_v4, %s5155_s20  ;;  %v2116_v4 = vmul.f32 %v7027_v1, %v6811_v52  ;;  %v2113_v52 = vmul.f32 %v7081_v21, %v6831_v18 }
 0xc65   :  { %2181 = vrot.lane.b32.xlu0 %v2159_v10, %s5155_s20  ;;  %v2130_v53 = vpop.permute.xlu1 %2129 }
 0xc66   :  { %v2158_v14 = vmul.f32 %v2130_v53, %v7328_v9  ;;  %v2128_v50 = vpop.permute.xlu0 %2127  ;;  %v2115_v53 = vmul.f32 %v6971_v63, %v6807_v41 }
 0xc67   :  { %v2157_v15 = vmul.f32 %v2128_v50, %v7336_v16 }
 0xc68   :  { %2179 = vrot.lane.b32.xlu1 %v2158_v14, %s5155_s20 }
 0xc69   :  { %2177 = vrot.lane.b32.xlu0 %v2157_v15, %s5155_s20 }
 0xc6c   :  { %387 = vperm.xlu1 %4429, %v138_v60  }
 0xc6d   :  { %392 = vperm.xlu0 %4430, %v139_v0  }
 0xc70   :  { %4431 = vset.pattern.permute.xlu1 %v9523_v2 }
 0xc71   :  { %398 = vperm.xlu1 %4431, %v138_v60   ;;  %4432 = vset.pattern.permute.xlu0 %v9606_v5 }
 0xc72   :  { %410 = vperm.xlu0 %4432, %v138_v60   ;;  %v9672_v60 = vld [vmem:[#allocation3_spill] sm:$0xff] }
 0xc75   :  { %402 = vperm.xlu1 %4431, %v139_v0  }
 0xc76   :  { %4434 = vset.pattern.permute.xlu0 %v9607_v37 }
 0xc79   :  { %4433 = vset.pattern.permute.xlu1 %v9606_v5 }
 0xc7a   :  { %414 = vperm.xlu1 %4433, %v139_v0   ;;  %v2112_v0 = vmul.f32 %v7274_v40, %v9672_v60 }
 0xc7e   :  { %4435 = vset.pattern.permute.xlu1 %v9607_v37 }
 0xc9f   :  { %v2194_v23 = vpop.permute.xlu0 %2193 }
 0xca0   :  { %v7388_v32 = vadd.f32 %v2194_v23, %v2115_v53 }
 0xca8   :  { %v2196_v17 = vpop.permute.xlu1 %2195 }
 0xca9   :  { %v7385_v50 = vadd.f32 %v2196_v17, %v2116_v4  ;;  %v9673_v17 = vld [vmem:[#allocation10_spill] sm:$0xff] }
 0xcaa   :  { %v2111_v23 = vmul.f32 %v7268_v19, %v9673_v17 }
 0xcb4   :  { %v2190_v28 = vpop.permute.xlu0 %2189 }
 0xcb5   :  { %v7399_v41 = vadd.f32 %v2190_v28, %v2113_v52 }
 0xcb7   :  { %9671 = vst [vmem:[#allocation36_spill] sm:$0xff] %v7399_v41 }
 0xcbb   :  { %v2192_v8 = vpop.permute.xlu1 %2191 }
 0xcbc   :  { %v7396_v15 = vadd.f32 %v2192_v8, %v2114_v33 }
 0xcbe   :  { %9670 = vst [vmem:[#allocation34_spill] sm:$0xff] %v7396_v15 }
 0xcce   :  { %v2186_v34 = vpop.permute.xlu0 %2185 }
 0xccf   :  { %v7409_v18 = vadd.f32 %v2186_v34, %v2111_v23 }
 0xcd1   :  { %9675 = vst [vmem:[#allocation37_spill] sm:$0xff] %v7409_v18 }
 0xcd2   :  { %v2188_v25 = vpop.permute.xlu1 %2187 }
 0xcd3   :  { %v7406_v57 = vadd.f32 %v2188_v25, %v2112_v0 }
 0xcd5   :  { %9674 = vst [vmem:[#allocation38_spill] sm:$0xff] %v7406_v57 }
 0xcd6   :  { %v2184_v54 = vpop.permute.xlu1 %2183 }
 0xcd7   :  { %v2182_v42 = vpop.permute.xlu0 %2181 }
 0xcda   :  { %v2180_v51 = vpop.permute.xlu1 %2179 }
 0xcdb   :  { %v7379_v59 = vadd.f32 %v2180_v51, %v2108_v55  ;;  %v2178_v10 = vpop.permute.xlu0 %2177  ;;  %v9676_v55 = vld [vmem:[#allocation11_spill] sm:$0xff] }
 0xcdc   :  { %v7383_v14 = vadd.f32 %v2178_v10, %v2107_v49  ;;  %v2110_v51 = vmul.f32 %v7296_v36, %v9676_v55  ;;  %v9677_v49 = vld [vmem:[#allocation12_spill] sm:$0xff] }
 0xcdd   :  { %4702 = vtanh.f32 %v7379_v59  ;;  %v2109_v4 = vmul.f32 %v7310_v22, %v9677_v49 }
 0xcde   :  { %4704 = vtanh.f32 %v7383_v14  ;;  %v7417_v10 = vadd.f32 %v2184_v54, %v2110_v51 }
 0xcdf   :  { %4706 = vtanh.f32 %v7385_v50  ;;  %v7421_v25 = vadd.f32 %v2182_v42, %v2109_v4 }
 0xce0   :  { %4708 = vtanh.f32 %v7388_v32  ;;  %9678 = vst [vmem:[#allocation39_spill] sm:$0xff] %v7417_v10 }
 0xce1   :  { %4710 = vtanh.f32 %v7396_v15  ;;  %9679 = vst [vmem:[#allocation42_spill] sm:$0xff] %v7421_v25 }
 0xce2   :  { %4712 = vtanh.f32 %v7399_v41 }
 0xce3   :  { %4714 = vtanh.f32 %v7406_v57 }
 0xce4   :  { %4716 = vtanh.f32 %v7409_v18 }
 0xce5   :  { %4718 = vtanh.f32 %v7417_v10 }
 0xce6   :  { %4720 = vtanh.f32 %v7421_v25 }
 0xce7   :  { %v4703_v8 = vpop.eup %4702 }
 0xce8   :  { %v4705_v28 = vpop.eup %4704  ;;  %2239 = vrot.lane.b32.xlu1 %v4703_v8, %s5157_s23 }
 0xce9   :  { %2237 = vrot.lane.b32.xlu0 %v4705_v28, %s5157_s23  ;;  %v4707_v34 = vpop.eup %4706 }
 0xcea   :  { %v4709_v53 = vpop.eup %4708 }
 0xceb   :  { %v4711_v33 = vpop.eup %4710  ;;  %v7433_v17 = vpop.permute.xlu1 %387 }
 0xcec   :  { %2255 = vrot.lane.b32.xlu1 %v4707_v34, %s5157_s23  ;;  %v4713_v52 = vpop.eup %4712  ;;  %v7439_v55 = vpop.permute.xlu0 %392 }
 0xced   :  { %2253 = vrot.lane.b32.xlu0 %v4709_v53, %s5157_s23  ;;  %v4715_v54 = vpop.eup %4714 }
 0xcee   :  { %v4717_v60 = vpop.eup %4716 }
 0xcef   :  { %v4719_v42 = vpop.eup %4718 }
 0xcf0   :  { %2251 = vrot.lane.b32.xlu1 %v4711_v33, %s5157_s23  ;;  %v4721_v0 = vpop.eup %4720  ;;  %v7435_v23 = vpop.permute.xlu1 %398  ;;  %v9680_v33 = vmov 10  }
 0xcf1   :  { %2249 = vrot.lane.b32.xlu0 %v4713_v52, %s5157_s23  ;;  %v7443_v28 = vpop.permute.xlu0 %410 }
 0xcf4   :  { %2247 = vrot.lane.b32.xlu1 %v4715_v54, %s5157_s23  ;;  %v7437_v8 = vpop.permute.xlu1 %402 }
 0xcf5   :  { %2245 = vrot.lane.b32.xlu0 %v4717_v60, %s5157_s23 }
 0xcf8   :  { %2243 = vrot.lane.b32.xlu1 %v4719_v42, %s5157_s23 }
 0xcf9   :  { %2241 = vrot.lane.b32.xlu0 %v4721_v0, %s5157_s23  ;;  %v7441_v51 = vpop.permute.xlu1 %414 }
 0xd5a   :  { %v2240_v49 = vpop.permute.xlu1 %2239 }
 0xd5b   :  { %v2268_v4 = vmul.f32 %v2240_v49, %v7328_v9  ;;  %v2238_v34 = vpop.permute.xlu0 %2237 }
 0xd5c   :  { %v7447_v53 = vmul.f32 %v2238_v34, %v7336_v16  ;;  %v9681_v16 = vmov 11  }
 0xd5d   :  { %2284 = vperm.xlu1 %4435, %v2268_v4  }
 0xd5e   :  { %2279 = vperm.xlu0 %4434, %v7447_v53   ;;  %v2256_v52 = vpop.permute.xlu1 %2255 }
 0xd5f   :  { %v2254_v54 = vpop.permute.xlu0 %2253  ;;  %v2276_v60 = vmul.f32 %v2256_v52, %v7027_v1 }
 0xd60   :  { %v2275_v9 = vmul.f32 %v2254_v54, %v6971_v63 }
 0xd61   :  { %4436 = vset.pattern.permute.xlu1 %v9680_v33 }
 0xd62   :  { %4437 = vset.pattern.permute.xlu0 %v9680_v33  ;;  %2328 = vperm.xlu1 %4436, %v7447_v53   ;;  %v2252_v1 = vpop.permute.xlu1 %2251 }
 0xd63   :  { %2332 = vperm.xlu0 %4437, %v2268_v4   ;;  %v2250_v42 = vpop.permute.xlu0 %2249  ;;  %v2274_v0 = vmul.f32 %v2252_v1, %v7175_v35 }
 0xd64   :  { %v2273_v63 = vmul.f32 %v2250_v42, %v7081_v21 }
 0xd66   :  { %4439 = vset.pattern.permute.xlu1 %v9607_v37  ;;  %v2248_v49 = vpop.permute.xlu1 %2247 }
 0xd67   :  { %4438 = vset.pattern.permute.xlu0 %v9607_v37  ;;  %2324 = vperm.xlu1 %4439, %v2276_v60   ;;  %v2272_v34 = vmul.f32 %v2248_v49, %v7274_v40  ;;  %v2246_v21 = vpop.permute.xlu0 %2245 }
 0xd68   :  { %2319 = vperm.xlu0 %4438, %v2275_v9   ;;  %v2271_v52 = vmul.f32 %v2246_v21, %v7268_v19  ;;  %v9682_v19 = vmov 0  }
 0xd6a   :  { %v2244_v35 = vpop.permute.xlu1 %2243 }
 0xd6b   :  { %4440 = vset.pattern.permute.xlu1 %v9680_v33  ;;  %v2270_v54 = vmul.f32 %v2244_v35, %v7296_v36  ;;  %v2242_v40 = vpop.permute.xlu0 %2241  ;;  %v7502_v35 = vld [vmem:[%s9307_s5 + $0x40] sm:$0xff] }
 0xd6c   :  { %4441 = vset.pattern.permute.xlu0 %v9680_v33  ;;  %2360 = vperm.xlu1 %4440, %v2275_v9   ;;  %9684 = vst [vmem:[#allocation40_spill] sm:$0xff] %v7502_v35 }
 0xd6d   :  { %2364 = vperm.xlu0 %4441, %v2276_v60  }
 0xd70   :  { %4443 = vset.pattern.permute.xlu1 %v9681_v16 }
 0xd71   :  { %4442 = vset.pattern.permute.xlu0 %v9681_v16  ;;  %2404 = vperm.xlu1 %4443, %v2276_v60   ;;  %v2269_v60 = vmul.f32 %v2242_v40, %v7310_v22 }
 0xd72   :  { %2400 = vperm.xlu0 %4442, %v2275_v9  }
 0xd75   :  { %4444 = vset.pattern.permute.xlu1 %v9607_v37 }
 0xd76   :  { %4445 = vset.pattern.permute.xlu0 %v9680_v33  ;;  %2309 = vperm.xlu1 %4444, %v2273_v63  }
 0xd77   :  { %2352 = vperm.xlu0 %4445, %v2273_v63  }
 0xd7a   :  { %2314 = vperm.xlu1 %4444, %v2274_v0  }
 0xd7b   :  { %4447 = vset.pattern.permute.xlu0 %v9681_v16 }
 0xd7c   :  { %2392 = vperm.xlu0 %4447, %v2273_v63  }
 0xd7e   :  { %4446 = vset.pattern.permute.xlu1 %v9680_v33 }
 0xd7f   :  { %2356 = vperm.xlu1 %4446, %v2274_v0  }
 0xd80   :  { %4450 = vset.pattern.permute.xlu0 %v9607_v37 }
 0xd81   :  { %2304 = vperm.xlu0 %4450, %v2272_v34  }
 0xd83   :  { %4448 = vset.pattern.permute.xlu1 %v9681_v16 }
 0xd84   :  { %2396 = vperm.xlu1 %4448, %v2274_v0  }
 0xd85   :  { %4452 = vset.pattern.permute.xlu0 %v9681_v16 }
 0xd86   :  { %2384 = vperm.xlu0 %4452, %v2271_v52  }
 0xd88   :  { %4449 = vset.pattern.permute.xlu1 %v9607_v37 }
 0xd89   :  { %2299 = vperm.xlu1 %4449, %v2271_v52  }
 0xd8a   :  { %4455 = vset.pattern.permute.xlu0 %v9607_v37 }
 0xd8b   :  { %2294 = vperm.xlu0 %4455, %v2270_v54  }
 0xd8d   :  { %4451 = vset.pattern.permute.xlu1 %v9680_v33 }
 0xd8e   :  { %2344 = vperm.xlu1 %4451, %v2271_v52  }
 0xd8f   :  { %4458 = vset.pattern.permute.xlu0 %v9681_v16 }
 0xd90   :  { %2372 = vperm.xlu0 %4458, %v2268_v4  }
 0xd92   :  { %2348 = vperm.xlu1 %4451, %v2272_v34  }
 0xd94   :  { %4460 = vset.pattern.permute.xlu0 %v9682_v19 }
 0xd96   :  { %4453 = vset.pattern.permute.xlu1 %v9681_v16 }
 0xd97   :  { %2388 = vperm.xlu1 %4453, %v2272_v34  }
 0xd9b   :  { %4454 = vset.pattern.permute.xlu1 %v9607_v37 }
 0xd9c   :  { %2289 = vperm.xlu1 %4454, %v2269_v60  }
 0xda0   :  { %4456 = vset.pattern.permute.xlu1 %v9680_v33 }
 0xda1   :  { %2336 = vperm.xlu1 %4456, %v2269_v60  }
 0xda5   :  { %2340 = vperm.xlu1 %4456, %v2270_v54  }
 0xda9   :  { %4457 = vset.pattern.permute.xlu1 %v9681_v16 }
 0xdaa   :  { %2376 = vperm.xlu1 %4457, %v2269_v60  }
 0xdae   :  { %2380 = vperm.xlu1 %4457, %v2270_v54  }
 0xdb2   :  { %2368 = vperm.xlu1 %4457, %v7447_v53   ;;  %v7496_v53 = vld [vmem:[%s9307_s5 + $0x90] sm:$0xff] }
 0xdb3   :  { %9683 = vst [vmem:[#allocation41_spill] sm:$0xff] %v7496_v53 }
 0xdb6   :  { %4459 = vset.pattern.permute.xlu1 %v9682_v19  ;;  %v7508_v19 = vld [vmem:[%s9307_s5 + $0xe0] sm:$0xff] }
 0xdb7   :  { %9685 = vst [vmem:[#allocation43_spill] sm:$0xff] %v7508_v19 }
 0xddc   :  { %v7485_v36 = vpop.permute.xlu1 %2284 }
 0xddd   :  { %v7487_v4 = vpop.permute.xlu0 %2279 }
 0xde1   :  { %v7489_v22 = vpop.permute.xlu1 %2328 }
 0xde2   :  { %v7491_v9 = vpop.permute.xlu0 %2332 }
 0xde6   :  { %v2325_v42 = vpop.permute.xlu1 %2324 }
 0xde7   :  { %v2320_v63 = vpop.permute.xlu0 %2319 }
 0xde8   :  { %v2415_v54 = vmul.f32 %v7502_v35, %v2320_v63  ;;  %v7520_v63 = vld [vmem:[%s9312_s4 + $0x80] sm:$0xff] }
 0xde9   :  { %9687 = vst [vmem:[#allocation45_spill] sm:$0xff] %v7520_v63 }
 0xdeb   :  { %v2361_v1 = vpop.permute.xlu1 %2360 }
 0xdec   :  { %v2365_v0 = vpop.permute.xlu0 %2364  ;;  %v2425_v21 = vmul.f32 %v7496_v53, %v2361_v1  ;;  %v7514_v1 = vld [vmem:[%s9312_s4 + $0x30] sm:$0xff] }
 0xded   :  { %9686 = vst [vmem:[#allocation44_spill] sm:$0xff] %v7514_v1 }
 0xdee   :  { %v2435_v16 = vadd.f32 %v2425_v21, %v2415_v54 }
 0xdf0   :  { %v2405_v49 = vpop.permute.xlu1 %2404 }
 0xdf1   :  { %v2401_v34 = vpop.permute.xlu0 %2400 }
 0xdf2   :  { %v2445_v40 = vmul.f32 %v7508_v19, %v2401_v34  ;;  %v7526_v34 = vld [vmem:[%s9307_s5 + $0x98] sm:$0xff] }
 0xdf3   :  { %9688 = vst [vmem:[#allocation46_spill] sm:$0xff] %v7526_v34  ;;  %v2426_v21 = vmul.f32 %v7526_v34, %v2365_v0 }
 0xdf4   :  { %v2455_v25 = vadd.f32 %v2445_v40, %v2435_v16  ;;  %v7538_v16 = vld [vmem:[%s9307_s5 + $0x48] sm:$0xff] }
 0xdf5   :  { %v2310_v52 = vpop.permute.xlu1 %2309  ;;  %9690 = vst [vmem:[#allocation48_spill] sm:$0xff] %v7538_v16  ;;  %v2416_v40 = vmul.f32 %v7538_v16, %v2325_v42  ;;  %v7556_v42 = vld [vmem:[%s9312_s4 + $0x88] sm:$0xff] }
 0xdf6   :  { %v2353_v60 = vpop.permute.xlu0 %2352  ;;  %v2463_v53 = vmul.f32 %v7514_v1, %v2310_v52  ;;  %v7532_v1 = vld [vmem:[%s9312_s4 + $0xd0] sm:$0xff]  ;;  %9693 = vst [vmem:[#allocation51_spill] sm:$0xff] %v7556_v42 }
 0xdf7   :  { %v2471_v35 = vmul.f32 %v7520_v63, %v2353_v60  ;;  %9689 = vst [vmem:[#allocation47_spill] sm:$0xff] %v7532_v1  ;;  %v7544_v63 = vld [vmem:[%s9307_s5 + $0xe8] sm:$0xff]  ;;  %v2436_v18 = vadd.f32 %v2426_v21, %v2416_v40 }
 0xdf8   :  { %9691 = vst [vmem:[#allocation49_spill] sm:$0xff] %v7544_v63  ;;  %v2446_v0 = vmul.f32 %v7544_v63, %v2405_v49  ;;  %v7562_v49 = vld [vmem:[%s9312_s4 + $0x38] sm:$0xff] }
 0xdf9   :  { %v2315_v33 = vpop.permute.xlu1 %2314  ;;  %v2479_v54 = vadd.f32 %v2471_v35, %v2463_v53  ;;  %v7550_v53 = vld [vmem:[%s9308_s6 + $0x40] sm:$0xff]  ;;  %9694 = vst [vmem:[#allocation2_spill] sm:$0xff] %v7562_v49 }
 0xdfa   :  { %9692 = vst [vmem:[#allocation50_spill] sm:$0xff] %v7550_v53  ;;  %v2505_v35 = vadd.f32 %v7550_v53, %v2455_v25  ;;  %v2456_v41 = vadd.f32 %v2446_v0, %v2436_v18  ;;  %v2464_v63 = vmul.f32 %v7562_v49, %v2315_v33  ;;  %v7574_v18 = vld [vmem:[%s9308_s6 + $0x48] sm:$0xff] }
 0xdfb   :  { %v2393_v10 = vpop.permute.xlu0 %2392  ;;  %9696 = vst [vmem:[#allocation9_spill] sm:$0xff] %v7574_v18 }
 0xdfc   :  { %v2487_v19 = vmul.f32 %v7532_v1, %v2393_v10  ;;  %v2443_v49 = vmul.f32 %v6951_v62, %v2393_v10  ;;  %v7596_v10 = vld [vmem:[%s9310_s8 + $0x40] sm:$0xff] }
 0xdfd   :  { %9698 = vst [vmem:[#allocation10_spill] sm:$0xff] %v7596_v10 }
 0xdfe   :  { %v2495_v1 = vadd.f32 %v2487_v19, %v2479_v54  ;;  %v2357_v34 = vpop.permute.xlu1 %2356  ;;  %v2506_v54 = vadd.f32 %v7574_v18, %v2456_v41  ;;  %v7587_v41 = vld [vmem:[%s9309_s7 + $0x40] sm:$0xff] }
 0xdff   :  { %v2472_v16 = vmul.f32 %v7556_v42, %v2357_v34  ;;  %9697 = vst [vmem:[#allocation3_spill] sm:$0xff] %v7587_v41  ;;  %v2424_v62 = vmul.f32 %v6976_v20, %v2357_v34  ;;  %v9700_v20 = vld [vmem:[#allocation17_spill] sm:$0xff] }
 0xe00   :  { %v2515_v57 = vadd.f32 %v2505_v35, %v2495_v1  ;;  %v7568_v1 = vld [vmem:[%s9312_s4 + $0xd8] sm:$0xff]  ;;  %v7577_v0 = vpop.permute.xlu0 %2304 }
 0xe01   :  { %v2480_v19 = vadd.f32 %v2472_v16, %v2464_v63  ;;  %9695 = vst [vmem:[#allocation4_spill] sm:$0xff] %v7568_v1  ;;  %v2423_v63 = vmul.f32 %v6937_v6, %v2353_v60 }
 0xe02   :  { %4722 = vtanh.f32 %v2515_v57  ;;  %v2413_v57 = vmul.f32 %v6943_v3, %v2310_v52 }
 0xe03   :  { %v2397_v25 = vpop.permute.xlu1 %2396 }
 0xe04   :  { %v2488_v21 = vmul.f32 %v7568_v1, %v2397_v25  ;;  %v2433_v42 = vadd.f32 %v2423_v63, %v2413_v57  ;;  %v9701_v57 = vld [vmem:[#allocation6_spill] sm:$0xff] }
 0xe05   :  { %v7582_v53 = vpop.permute.xlu0 %2384 }
 0xe06   :  { %v2496_v40 = vadd.f32 %v2488_v21, %v2480_v19  ;;  %v2453_v3 = vadd.f32 %v2443_v49, %v2433_v42  ;;  %v2485_v21 = vmul.f32 %v6982_v61, %v7582_v53  ;;  %v2414_v42 = vmul.f32 %v6991_v13, %v2315_v33  ;;  %v9699_v49 = vld [vmem:[#allocation13_spill] sm:$0xff]  ;;  %v7614_v13 = vld [vmem:[%s9309_s7 + $0x48] sm:$0xff] }
 0xe07   :  { %9703 = vst [vmem:[#allocation11_spill] sm:$0xff] %v7614_v13 }
 0xe08   :  { %v2516_v16 = vadd.f32 %v2506_v54, %v2496_v40  ;;  %v2300_v35 = vpop.permute.xlu1 %2299  ;;  %v2503_v34 = vadd.f32 %v9700_v20, %v2453_v3  ;;  %v2434_v40 = vadd.f32 %v2424_v62, %v2414_v42 }
 0xe09   :  { %v2461_v6 = vmul.f32 %v6960_v56, %v2300_v35  ;;  %v2444_v56 = vmul.f32 %v9699_v49, %v2397_v25 }
 0xe0a   :  { %4724 = vtanh.f32 %v2516_v16 }
 0xe0c   :  { %v4723_v1 = vpop.eup %4722 }
 0xe0d   :  { %v2345_v15 = vpop.permute.xlu1 %2344  ;;  %v2535_v19 = vmul.f32 %v7587_v41, %v4723_v1 }
 0xe0e   :  { %v2469_v52 = vmul.f32 %v6967_v58, %v2345_v15 }
 0xe0f   :  { %v7599_v60 = vadd.f32 %v7596_v10, %v2535_v19  ;;  %v9702_v10 = vld [vmem:[#allocation14_spill] sm:$0xff] }
 0xe10   :  { %v2477_v54 = vadd.f32 %v2469_v52, %v2461_v6  ;;  %v2462_v61 = vmul.f32 %v9702_v10, %v7577_v0  ;;  %v2454_v6 = vadd.f32 %v2444_v56, %v2434_v40  ;;  %v9704_v52 = vld [vmem:[#allocation15_spill] sm:$0xff] }
 0xe11   :  { %2583 = vrot.lane.b32.xlu1 %v7599_v60, %s5154_s13  ;;  %v2349_v58 = vpop.permute.xlu1 %2348 }
 0xe12   :  { %v2493_v1 = vadd.f32 %v2485_v21, %v2477_v54  ;;  %v2470_v63 = vmul.f32 %v9701_v57, %v2349_v58  ;;  %v7621_v21 = vld [vmem:[%s9310_s8 + $0x48] sm:$0xff]  ;;  %v9706_v54 = vld [vmem:[#allocation16_spill] sm:$0xff] }
 0xe13   :  { %9705 = vst [vmem:[#allocation12_spill] sm:$0xff] %v7621_v21  ;;  %v2504_v42 = vadd.f32 %v9706_v54, %v2454_v6  ;;  %v9708_v57 = vld [vmem:[#allocation8_spill] sm:$0xff]  ;;  %v7651_v54 = vld [vmem:[%s9307_s5 + $0x20] sm:$0xff] }
 0xe14   :  { %v4725_v16 = vpop.eup %4724  ;;  %v2513_v19 = vadd.f32 %v2503_v34, %v2493_v1  ;;  %v2478_v3 = vadd.f32 %v2470_v63, %v2462_v61  ;;  %v9707_v34 = vld [vmem:[#allocation22_spill] sm:$0xff]  ;;  %v405_v63 = vmul.f32 %v9708_v57, %v7435_v23  ;;  %v9709_v61 = vld [vmem:[#allocation7_spill] sm:$0xff]  ;;  %9712 = vst [vmem:[#allocation17_spill] sm:$0xff] %v7651_v54 }
 0xe15   :  { %v2536_v33 = vmul.f32 %v7614_v13, %v4725_v16  ;;  %v395_v1 = vmul.f32 %v9707_v34, %v7433_v17  ;;  %v396_v40 = vmul.f32 %v9707_v34, %v7439_v55  ;;  %v406_v16 = vmul.f32 %v9708_v57, %v7437_v8 }
 0xe16   :  { %4726 = vtanh.f32 %v2513_v19  ;;  %v2389_v25 = vpop.permute.xlu1 %2388  ;;  %v417_v6 = vmul.f32 %v9709_v61, %v7443_v28  ;;  %v418_v23 = vmul.f32 %v9709_v61, %v7441_v51  ;;  %v2411_v28 = vmul.f32 %v7651_v54, %v2300_v35  ;;  %v9714_v51 = vld [vmem:[#allocation19_spill] sm:$0xff]  ;;  %v9717_v61 = vld [vmem:[#allocation21_spill] sm:$0xff] }
 0xe17   :  { %v2486_v62 = vmul.f32 %v9704_v52, %v2389_v25  ;;  %v7624_v10 = vadd.f32 %v7621_v21, %v2536_v33  ;;  %v7642_v33 = vld [vmem:[%s9307_s5 + $0x70] sm:$0xff]  ;;  %v407_v55 = vadd.f32 %v405_v63, %v395_v1  ;;  %v408_v52 = vadd.f32 %v406_v16, %v396_v40  ;;  %v7666_v63 = vld [vmem:[%s9307_s5 + $0x78] sm:$0xff] }
 0xe18   :  { %9710 = vst [vmem:[#allocation13_spill] sm:$0xff] %v7642_v33  ;;  %v2421_v17 = vmul.f32 %v7642_v33, %v2345_v15  ;;  %v2408_v57 = vmul.f32 %v9714_v51, %v7485_v36  ;;  %9715 = vst [vmem:[#allocation6_spill] sm:$0xff] %v7666_v63  ;;  %v2422_v35 = vmul.f32 %v7666_v63, %v2349_v58  ;;  %v9716_v16 = vld [vmem:[#allocation20_spill] sm:$0xff]  ;;  %v7685_v58 = vld [vmem:[%s9312_s4 + $0x60] sm:$0xff] }
 0xe19   :  { %v2494_v49 = vadd.f32 %v2486_v62, %v2478_v3  ;;  %2585 = vrot.lane.b32.xlu1 %v7624_v10, %s5154_s13  ;;  %v9711_v62 = vld [vmem:[#allocation5_spill] sm:$0xff]  ;;  %v7657_v1 = vadd.f32 %v417_v6, %v407_v55  ;;  %v7659_v40 = vadd.f32 %v418_v23, %v408_v52  ;;  %v2407_v6 = vmul.f32 %v9717_v61, %v7487_v4  ;;  %v9729_v33 = vld [vmem:[#allocation26_spill] sm:$0xff] }
 0xe1a   :  { %v2431_v15 = vadd.f32 %v2421_v17, %v2411_v28  ;;  %v7678_v17 = vld [vmem:[%s9307_s5 + $0xc0] sm:$0xff]  ;;  %9719 = vst [vmem:[#allocation15_spill] sm:$0xff] %v7685_v58 }
 0xe1b   :  { %v2514_v56 = vadd.f32 %v2504_v42, %v2494_v49  ;;  %v2290_v20 = vpop.permute.xlu1 %2289  ;;  %v2295_v42 = vpop.permute.xlu0 %2294  ;;  %v9713_v49 = vld [vmem:[#allocation18_spill] sm:$0xff]  ;;  %9718 = vst [vmem:[#allocation14_spill] sm:$0xff] %v7678_v17  ;;  %v2441_v55 = vmul.f32 %v7678_v17, %v7582_v53  ;;  %v7697_v53 = vld [vmem:[%s9307_s5 + $0x28] sm:$0xff] }
 0xe1c   :  { %9723 = vst [vmem:[#allocation16_spill] sm:$0xff] %v7697_v53  ;;  %v9726_v17 = vld [vmem:[#allocation31_spill] sm:$0xff] }
 0xe1d   :  { %4728 = vtanh.f32 %v2514_v56  ;;  %v2451_v61 = vadd.f32 %v2441_v55, %v2431_v15 }
 0xe20   :  { %v4727_v19 = vpop.eup %4726  ;;  %v2337_v3 = vpop.permute.xlu1 %2336 }
 0xe21   :  { %v2533_v8 = vmul.f32 %v9711_v62, %v4727_v19  ;;  %v2458_v19 = vmul.f32 %v9716_v16, %v7485_v36  ;;  %v2467_v52 = vmul.f32 %v7685_v58, %v2337_v3  ;;  %v9720_v36 = vld [vmem:[#allocation23_spill] sm:$0xff]  ;;  %v2412_v16 = vmul.f32 %v7697_v53, %v7577_v0  ;;  %v2373_v58 = vpop.permute.xlu0 %2372  ;;  %v9728_v53 = vld [vmem:[#allocation28_spill] sm:$0xff] }
 0xe22   :  { %v2417_v62 = vmul.f32 %v9720_v36, %v7489_v22  ;;  %v7704_v36 = vld [vmem:[%s9307_s5 + $0xc8] sm:$0xff]  ;;  %v2419_v54 = vmul.f32 %v9728_v53, %v2337_v3 }
 0xe23   :  { %v7655_v56 = vadd.f32 %v9713_v49, %v2533_v8  ;;  %v9721_v8 = vld [vmem:[#allocation24_spill] sm:$0xff]  ;;  %v9722_v49 = vld [vmem:[#allocation25_spill] sm:$0xff]  ;;  %9724 = vst [vmem:[#allocation22_spill] sm:$0xff] %v7704_v36  ;;  %v9727_v0 = vld [vmem:[#allocation27_spill] sm:$0xff]  ;;  %v2432_v55 = vadd.f32 %v2422_v35, %v2412_v16 }
 0xe24   :  { %v2341_v34 = vpop.permute.xlu1 %2340  ;;  %v2465_v28 = vmul.f32 %v9721_v8, %v7489_v22  ;;  %v2418_v51 = vmul.f32 %v9722_v49, %v7491_v9  ;;  %v2442_v22 = vmul.f32 %v7704_v36, %v2389_v25  ;;  %v7710_v8 = vld [vmem:[%s9312_s4 + $0x10] sm:$0xff]  ;;  %v2466_v15 = vmul.f32 %v9727_v0, %v7491_v9  ;;  %v7721_v25 = vld [vmem:[%s9312_s4 + $0x68] sm:$0xff]  ;;  %v9735_v16 = vld [vmem:[#allocation30_spill] sm:$0xff] }
 0xe25   :  { %2579 = vrot.lane.b32.xlu0 %v7655_v56, %s5154_s13  ;;  %9725 = vst [vmem:[#allocation8_spill] sm:$0xff] %v7710_v8  ;;  %v2459_v49 = vmul.f32 %v7710_v8, %v2290_v20  ;;  %v2420_v21 = vmul.f32 %v9729_v33, %v2341_v34  ;;  %9730 = vst [vmem:[#allocation7_spill] sm:$0xff] %v7721_v25  ;;  %v2468_v36 = vmul.f32 %v7721_v25, %v2341_v34  ;;  %v9732_v35 = vld [vmem:[#allocation32_spill] sm:$0xff]  ;;  %v9733_v33 = vld [vmem:[#allocation29_spill] sm:$0xff] }
 0xe26   :  { %v9736_v0 = vld [vmem:[#allocation35_spill] sm:$0xff]  ;;  %v7740_v34 = vld [vmem:[%s9312_s4 + $0x18] sm:$0xff]  ;;  %v2452_v18 = vadd.f32 %v2442_v22, %v2432_v55  ;;  %v2457_v55 = vmul.f32 %v7222_v27, %v7487_v4 }
 0xe27   :  { %v4729_v23 = vpop.eup %4728  ;;  %v2475_v41 = vadd.f32 %v2467_v52, %v2459_v49  ;;  %v9734_v52 = vld [vmem:[#allocation33_spill] sm:$0xff]  ;;  %v2409_v49 = vmul.f32 %v9735_v16, %v2290_v20  ;;  %v2460_v25 = vmul.f32 %v7740_v34, %v2295_v42  ;;  %v2482_v20 = vmul.f32 %v7209_v12, %v2373_v58 }
 0xe28   :  { %v2534_v63 = vmul.f32 %v9726_v17, %v4729_v23  ;;  %v7727_v17 = vld [vmem:[%s9312_s4 + $0xb0] sm:$0xff]  ;;  %v2410_v23 = vmul.f32 %v9733_v33, %v2295_v42  ;;  %v2438_v53 = vmul.f32 %v9734_v52, %v2373_v58  ;;  %v7756_v22 = vld [vmem:[%s9312_s4 + $0xb8] sm:$0xff] }
 0xe29   :  { %v2377_v13 = vpop.permute.xlu1 %2376  ;;  %9731 = vst [vmem:[#allocation5_spill] sm:$0xff] %v7727_v17  ;;  %v2429_v33 = vadd.f32 %v2419_v54, %v2409_v49 }
 0xe2a   :  { %v2483_v9 = vmul.f32 %v7727_v17, %v2377_v13  ;;  %v7731_v3 = vadd.f32 %v9732_v35, %v2534_v63  ;;  %v2439_v8 = vmul.f32 %v9736_v0, %v2377_v13  ;;  %v7746_v63 = vld [vmem:[%s9308_s6 + $0x20] sm:$0xff]  ;;  %v2428_v13 = vadd.f32 %v2418_v51, %v2408_v57 }
 0xe2b   :  { %v2501_v35 = vadd.f32 %v7746_v63, %v2451_v61  ;;  %v2430_v52 = vadd.f32 %v2420_v21, %v2410_v23  ;;  %v2476_v0 = vadd.f32 %v2468_v36, %v2460_v25  ;;  %v2474_v57 = vadd.f32 %v2466_v15, %v2458_v19  ;;  %v7764_v21 = vld [vmem:[%s9308_s6 + $0x28] sm:$0xff] }
 0xe2c   :  { %v2491_v17 = vadd.f32 %v2483_v9, %v2475_v41  ;;  %2581 = vrot.lane.b32.xlu1 %v7731_v3, %s5154_s13  ;;  %v2448_v51 = vadd.f32 %v2438_v53, %v2428_v13  ;;  %v2449_v12 = vadd.f32 %v2439_v8, %v2429_v33  ;;  %v422_v36 = vadd.f32 %v7230_v44, %v7659_v40  ;;  %v7800_v33 = vld [vmem:[%s9310_s8 + $0x28] sm:$0xff] }
 0xe2d   :  { %v2381_v16 = vpop.permute.xlu1 %2380  ;;  %v2427_v25 = vadd.f32 %v2417_v62, %v2407_v6  ;;  %v2490_v9 = vadd.f32 %v2482_v20, %v2474_v57 }
 0xe2e   :  { %v2511_v42 = vadd.f32 %v2501_v35, %v2491_v17  ;;  %v2440_v41 = vmul.f32 %v7215_v31, %v2381_v16  ;;  %v2484_v61 = vmul.f32 %v7756_v22, %v2381_v16  ;;  %v2502_v31 = vadd.f32 %v7764_v21, %v2452_v18 }
 0xe2f   :  { %v2473_v17 = vadd.f32 %v2465_v28, %v2457_v55  ;;  %v421_v18 = vadd.f32 %v7256_v47, %v7657_v1  ;;  %v2498_v23 = vadd.f32 %v2448_v51, %v422_v36  ;;  %v2499_v53 = vadd.f32 %v7263_v30, %v2449_v12  ;;  %v7784_v47 = vld [vmem:[%s9310_s8 + $0x20] sm:$0xff]  ;;  %v7794_v28 = vld [vmem:[%s9309_s7 + $0x28] sm:$0xff] }
 0xe30   :  { %4730 = vtanh.f32 %v2511_v42  ;;  %v2450_v54 = vadd.f32 %v2440_v41, %v2430_v52  ;;  %v2492_v58 = vadd.f32 %v2484_v61, %v2476_v0 }
 0xe31   :  { %v2369_v27 = vpop.permute.xlu1 %2368 }
 0xe32   :  { %v2500_v4 = vadd.f32 %v7238_v24, %v2450_v54  ;;  %v2512_v19 = vadd.f32 %v2502_v31, %v2492_v58  ;;  %v2437_v8 = vmul.f32 %v7244_v45, %v2369_v27  ;;  %v2481_v15 = vmul.f32 %v7250_v46, %v2369_v27  ;;  %v7778_v45 = vld [vmem:[%s9309_s7 + $0x20] sm:$0xff] }
 0xe34   :  { %v2510_v49 = vadd.f32 %v2500_v4, %v2490_v9  ;;  %4732 = vtanh.f32 %v2512_v19  ;;  %v2447_v44 = vadd.f32 %v2437_v8, %v2427_v25  ;;  %v2489_v40 = vadd.f32 %v2481_v15, %v2473_v17 }
 0xe36   :  { %4734 = vtanh.f32 %v2510_v49  ;;  %v2497_v6 = vadd.f32 %v2447_v44, %v421_v18  ;;  %v2509_v62 = vadd.f32 %v2499_v53, %v2489_v40  ;;  %v141_v53 = vld [vmem:[%s9304_s0 + $0x78] sm:$0xff] }
 0xe37   :  { %4736 = vtanh.f32 %v2498_v23  ;;  %v140_v23 = vld [vmem:[%s9304_s0 + $0x70] sm:$0xff] }
 0xe38   :  { %4738 = vtanh.f32 %v2497_v6 }
 0xe39   :  { %4740 = vtanh.f32 %v2509_v62 }
 0xe3a   :  { %v4731_v24 = vpop.eup %4730 }
 0xe3b   :  { %v2531_v46 = vmul.f32 %v7778_v45, %v4731_v24 }
 0xe3d   :  { %v7787_v30 = vadd.f32 %v7784_v47, %v2531_v46 }
 0xe3e   :  { %v4733_v1 = vpop.eup %4732 }
 0xe3f   :  { %2575 = vrot.lane.b32.xlu0 %v7787_v30, %s5154_s13  ;;  %v2532_v35 = vmul.f32 %v7794_v28, %v4733_v1 }
 0xe40   :  { %v4735_v13 = vpop.eup %4734 }
 0xe41   :  { %v4737_v20 = vpop.eup %4736  ;;  %v7803_v52 = vadd.f32 %v7800_v33, %v2532_v35  ;;  %v2530_v16 = vmul.f32 %v7279_v11, %v4735_v13 }
 0xe42   :  { %v4739_v0 = vpop.eup %4738  ;;  %v2528_v55 = vmul.f32 %v7301_v39, %v4737_v20 }
 0xe43   :  { %v4741_v42 = vpop.eup %4740  ;;  %2577 = vrot.lane.b32.xlu1 %v7803_v52, %s5154_s13  ;;  %v7810_v61 = vadd.f32 %v7293_v29, %v2530_v16  ;;  %v2527_v51 = vmul.f32 %v7315_v26, %v4739_v0  ;;  %v2555_v0 = vmul.f32 %v7599_v60, %v7388_v32 }
 0xe44   :  { %v2529_v41 = vmul.f32 %v7287_v43, %v4741_v42  ;;  %v7822_v11 = vadd.f32 %v7325_v7, %v2528_v55 }
 0xe45   :  { %v7825_v43 = vadd.f32 %v7333_v38, %v2527_v51 }
 0xe46   :  { %v7814_v57 = vadd.f32 %v7307_v48, %v2529_v41  ;;  %v2548_v1 = vmul.f32 %v7822_v11, %v7379_v59 }
 0xe47   :  { %2573 = vrot.lane.b32.xlu1 %v7810_v61, %s5154_s13  ;;  %v2547_v13 = vmul.f32 %v7825_v43, %v7383_v14  ;;  %v9737_v14 = vld [vmem:[#allocation34_spill] sm:$0xff] }
 0xe48   :  { %2571 = vrot.lane.b32.xlu0 %v7814_v57, %s5154_s13  ;;  %v2554_v55 = vmul.f32 %v7731_v3, %v9737_v14 }
 0xe4b   :  { %2569 = vrot.lane.b32.xlu1 %v7822_v11, %s5154_s13 }
 0xe4c   :  { %2567 = vrot.lane.b32.xlu0 %v7825_v43, %s5154_s13 }
 0xe83   :  { %v2584_v29 = vpop.permute.xlu1 %2583 }
 0xe84   :  { %v2605_v39 = vmul.f32 %v2584_v29, %v7599_v60 }
 0xe86   :  { %2633 = vrot.lane.b32.xlu0 %v2605_v39, %s5155_s20  ;;  %v9739_v39 = vld [vmem:[#allocation38_spill] sm:$0xff] }
 0xe8b   :  { %v2586_v48 = vpop.permute.xlu1 %2585 }
 0xe8c   :  { %v2606_v26 = vmul.f32 %v2586_v48, %v7624_v10  ;;  %v2552_v48 = vmul.f32 %v7803_v52, %v9739_v39 }
 0xe8e   :  { %2635 = vrot.lane.b32.xlu1 %v2606_v26, %s5155_s20  ;;  %v9740_v26 = vld [vmem:[#allocation37_spill] sm:$0xff] }
 0xe97   :  { %v2580_v7 = vpop.permute.xlu0 %2579 }
 0xe98   :  { %v2603_v38 = vmul.f32 %v2580_v7, %v7655_v56  ;;  %v2551_v7 = vmul.f32 %v7787_v30, %v9740_v26 }
 0xe9a   :  { %2629 = vrot.lane.b32.xlu0 %v2603_v38, %s5155_s20 }
 0xe9e   :  { %v2582_v12 = vpop.permute.xlu1 %2581 }
 0xe9f   :  { %v2604_v31 = vmul.f32 %v2582_v12, %v7731_v3 }
 0xea1   :  { %2631 = vrot.lane.b32.xlu1 %v2604_v31, %s5155_s20 }
 0xeb1   :  { %v2576_v54 = vpop.permute.xlu0 %2575 }
 0xeb2   :  { %v2601_v58 = vmul.f32 %v2576_v54, %v7787_v30  ;;  %v9741_v54 = vld [vmem:[#allocation39_spill] sm:$0xff] }
 0xeb4   :  { %2625 = vrot.lane.b32.xlu0 %v2601_v58, %s5155_s20  ;;  %v2550_v58 = vmul.f32 %v7810_v61, %v9741_v54 }
 0xeb5   :  { %v2578_v36 = vpop.permute.xlu1 %2577 }
 0xeb6   :  { %v2602_v25 = vmul.f32 %v2578_v36, %v7803_v52 }
 0xeb8   :  { %2627 = vrot.lane.b32.xlu1 %v2602_v25, %s5155_s20  ;;  %v9742_v25 = vld [vmem:[#allocation42_spill] sm:$0xff] }
 0xeb9   :  { %v2574_v17 = vpop.permute.xlu1 %2573 }
 0xeba   :  { %v2600_v9 = vmul.f32 %v2574_v17, %v7810_v61  ;;  %v2572_v27 = vpop.permute.xlu0 %2571  ;;  %v2549_v17 = vmul.f32 %v7814_v57, %v9742_v25 }
 0xebb   :  { %v2599_v4 = vmul.f32 %v2572_v27, %v7814_v57 }
 0xebc   :  { %2623 = vrot.lane.b32.xlu1 %v2600_v9, %s5155_s20 }
 0xebd   :  { %2621 = vrot.lane.b32.xlu0 %v2599_v4, %s5155_s20  ;;  %v2570_v19 = vpop.permute.xlu1 %2569 }
 0xebe   :  { %v2598_v8 = vmul.f32 %v2570_v19, %v7822_v11  ;;  %v2568_v15 = vpop.permute.xlu0 %2567 }
 0xebf   :  { %v2597_v18 = vmul.f32 %v2568_v15, %v7825_v43 }
 0xec0   :  { %2619 = vrot.lane.b32.xlu1 %v2598_v8, %s5155_s20 }
 0xec1   :  { %2617 = vrot.lane.b32.xlu0 %v2597_v18, %s5155_s20 }
 0xec4   :  { %425 = vperm.xlu1 %4459, %v140_v23  }
 0xec5   :  { %430 = vperm.xlu0 %4460, %v141_v53  }
 0xec8   :  { %4461 = vset.pattern.permute.xlu1 %v9523_v2 }
 0xec9   :  { %436 = vperm.xlu1 %4461, %v140_v23   ;;  %4462 = vset.pattern.permute.xlu0 %v9606_v5 }
 0xeca   :  { %448 = vperm.xlu0 %4462, %v140_v23  }
 0xecd   :  { %440 = vperm.xlu1 %4461, %v141_v53  }
 0xece   :  { %4464 = vset.pattern.permute.xlu0 %v9607_v37 }
 0xed1   :  { %4463 = vset.pattern.permute.xlu1 %v9606_v5  ;;  %v2556_v5 = vmul.f32 %v7624_v10, %v7385_v50  ;;  %v9738_v50 = vld [vmem:[#allocation36_spill] sm:$0xff] }
 0xed2   :  { %452 = vperm.xlu1 %4463, %v141_v53   ;;  %v2553_v51 = vmul.f32 %v7655_v56, %v9738_v50 }
 0xed6   :  { %4465 = vset.pattern.permute.xlu1 %v9607_v37 }
 0xef8   :  { %v2634_v44 = vpop.permute.xlu0 %2633 }
 0xef9   :  { %v7877_v59 = vadd.f32 %v2634_v44, %v2555_v0 }
 0xf00   :  { %v2636_v49 = vpop.permute.xlu1 %2635 }
 0xf01   :  { %v7874_v41 = vadd.f32 %v2636_v49, %v2556_v5  ;;  %v9743_v5 = vmov 10  }
 0xf0c   :  { %v2630_v6 = vpop.permute.xlu0 %2629 }
 0xf0d   :  { %v7888_v32 = vadd.f32 %v2630_v6, %v2553_v51 }
 0xf13   :  { %v2632_v40 = vpop.permute.xlu1 %2631 }
 0xf14   :  { %v7885_v29 = vadd.f32 %v2632_v40, %v2554_v55 }
 0xf26   :  { %v2626_v24 = vpop.permute.xlu0 %2625 }
 0xf27   :  { %v7898_v12 = vadd.f32 %v2626_v24, %v2551_v7 }
 0xf2a   :  { %v2628_v62 = vpop.permute.xlu1 %2627 }
 0xf2b   :  { %v7895_v38 = vadd.f32 %v2628_v62, %v2552_v48 }
 0xf2e   :  { %v2624_v46 = vpop.permute.xlu1 %2623 }
 0xf2f   :  { %v2622_v2 = vpop.permute.xlu0 %2621  ;;  %v7906_v9 = vadd.f32 %v2624_v46, %v2550_v58 }
 0xf30   :  { %v7910_v27 = vadd.f32 %v2622_v2, %v2549_v17 }
 0xf32   :  { %v2620_v35 = vpop.permute.xlu1 %2619 }
 0xf33   :  { %v7868_v20 = vadd.f32 %v2620_v35, %v2548_v1  ;;  %v2618_v16 = vpop.permute.xlu0 %2617 }
 0xf34   :  { %v7872_v42 = vadd.f32 %v2618_v16, %v2547_v13 }
 0xf35   :  { %4742 = vtanh.f32 %v7868_v20 }
 0xf36   :  { %4744 = vtanh.f32 %v7872_v42 }
 0xf37   :  { %4746 = vtanh.f32 %v7874_v41 }
 0xf38   :  { %4748 = vtanh.f32 %v7877_v59 }
 0xf39   :  { %4750 = vtanh.f32 %v7885_v29 }
 0xf3a   :  { %4752 = vtanh.f32 %v7888_v32 }
 0xf3b   :  { %4754 = vtanh.f32 %v7895_v38 }
 0xf3c   :  { %4756 = vtanh.f32 %v7898_v12 }
 0xf3d   :  { %4758 = vtanh.f32 %v7906_v9 }
 0xf3e   :  { %4760 = vtanh.f32 %v7910_v27 }
 0xf3f   :  { %v4743_v31 = vpop.eup %4742 }
 0xf40   :  { %v4745_v36 = vpop.eup %4744  ;;  %2679 = vrot.lane.b32.xlu1 %v4743_v31, %s5157_s23 }
 0xf41   :  { %2677 = vrot.lane.b32.xlu0 %v4745_v36, %s5157_s23  ;;  %v4747_v4 = vpop.eup %4746 }
 0xf42   :  { %v4749_v19 = vpop.eup %4748 }
 0xf43   :  { %v4751_v8 = vpop.eup %4750  ;;  %v7922_v44 = vpop.permute.xlu1 %425 }
 0xf44   :  { %2695 = vrot.lane.b32.xlu1 %v4747_v4, %s5157_s23  ;;  %v4753_v15 = vpop.eup %4752  ;;  %v7928_v62 = vpop.permute.xlu0 %430 }
 0xf45   :  { %2693 = vrot.lane.b32.xlu0 %v4749_v19, %s5157_s23  ;;  %v4755_v18 = vpop.eup %4754  ;;  %v9745_v19 = vld [vmem:[#allocation41_spill] sm:$0xff] }
 0xf46   :  { %v4757_v23 = vpop.eup %4756 }
 0xf47   :  { %v4759_v53 = vpop.eup %4758 }
 0xf48   :  { %2691 = vrot.lane.b32.xlu1 %v4751_v8, %s5157_s23  ;;  %v4761_v49 = vpop.eup %4760  ;;  %v7924_v40 = vpop.permute.xlu1 %436 }
 0xf49   :  { %2689 = vrot.lane.b32.xlu0 %v4753_v15, %s5157_s23  ;;  %v7932_v46 = vpop.permute.xlu0 %448 }
 0xf4c   :  { %2687 = vrot.lane.b32.xlu1 %v4755_v18, %s5157_s23  ;;  %v7926_v6 = vpop.permute.xlu1 %440  ;;  %v9746_v18 = vld [vmem:[#allocation40_spill] sm:$0xff] }
 0xf4d   :  { %2685 = vrot.lane.b32.xlu0 %v4757_v23, %s5157_s23 }
 0xf50   :  { %2683 = vrot.lane.b32.xlu1 %v4759_v53, %s5157_s23  ;;  %v9747_v53 = vld [vmem:[#allocation43_spill] sm:$0xff] }
 0xf51   :  { %2681 = vrot.lane.b32.xlu0 %v4761_v49, %s5157_s23  ;;  %v7930_v24 = vpop.permute.xlu1 %452 }
 0xfb2   :  { %v2680_v2 = vpop.permute.xlu1 %2679 }
 0xfb3   :  { %v2708_v1 = vmul.f32 %v2680_v2, %v7822_v11  ;;  %v2678_v35 = vpop.permute.xlu0 %2677 }
 0xfb4   :  { %v7936_v13 = vmul.f32 %v2678_v35, %v7825_v43  ;;  %v9744_v43 = vmov 11   ;;  %v9748_v35 = vld [vmem:[#allocation44_spill] sm:$0xff] }
 0xfb5   :  { %2724 = vperm.xlu1 %4465, %v2708_v1  }
 0xfb6   :  { %2719 = vperm.xlu0 %4464, %v7936_v13   ;;  %v2696_v16 = vpop.permute.xlu1 %2695 }
 0xfb7   :  { %v2694_v0 = vpop.permute.xlu0 %2693  ;;  %v2716_v14 = vmul.f32 %v2696_v16, %v7624_v10  ;;  %v9749_v16 = vld [vmem:[#allocation45_spill] sm:$0xff] }
 0xfb8   :  { %v2715_v11 = vmul.f32 %v2694_v0, %v7599_v60 }
 0xfb9   :  { %4466 = vset.pattern.permute.xlu1 %v9743_v5 }
 0xfba   :  { %4467 = vset.pattern.permute.xlu0 %v9743_v5  ;;  %2768 = vperm.xlu1 %4466, %v7936_v13   ;;  %v2692_v10 = vpop.permute.xlu1 %2691 }
 0xfbb   :  { %2772 = vperm.xlu0 %4467, %v2708_v1   ;;  %v2690_v55 = vpop.permute.xlu0 %2689  ;;  %v2714_v50 = vmul.f32 %v2692_v10, %v7731_v3 }
 0xfbc   :  { %v2713_v60 = vmul.f32 %v2690_v55, %v7655_v56 }
 0xfbe   :  { %4469 = vset.pattern.permute.xlu1 %v9607_v37  ;;  %v2688_v51 = vpop.permute.xlu1 %2687 }
 0xfbf   :  { %4468 = vset.pattern.permute.xlu0 %v9607_v37  ;;  %2764 = vperm.xlu1 %4469, %v2716_v14   ;;  %v2712_v39 = vmul.f32 %v2688_v51, %v7803_v52  ;;  %v2686_v56 = vpop.permute.xlu0 %2685  ;;  %v9751_v51 = vld [vmem:[#allocation47_spill] sm:$0xff] }
 0xfc0   :  { %2759 = vperm.xlu0 %4468, %v2715_v11   ;;  %v2711_v48 = vmul.f32 %v2686_v56, %v7787_v30  ;;  %v9752_v56 = vld [vmem:[#allocation48_spill] sm:$0xff] }
 0xfc2   :  { %v2684_v3 = vpop.permute.xlu1 %2683 }
 0xfc3   :  { %4470 = vset.pattern.permute.xlu1 %v9743_v5  ;;  %v2710_v26 = vmul.f32 %v2684_v3, %v7810_v61  ;;  %v2682_v30 = vpop.permute.xlu0 %2681  ;;  %v9753_v3 = vld [vmem:[#allocation49_spill] sm:$0xff] }
 0xfc4   :  { %4471 = vset.pattern.permute.xlu0 %v9743_v5  ;;  %2800 = vperm.xlu1 %4470, %v2715_v11   ;;  %v2709_v52 = vmul.f32 %v2682_v30, %v7814_v57  ;;  %v9754_v30 = vld [vmem:[#allocation50_spill] sm:$0xff] }
 0xfc5   :  { %2804 = vperm.xlu0 %4471, %v2716_v14  }
 0xfc8   :  { %4473 = vset.pattern.permute.xlu1 %v9744_v43 }
 0xfc9   :  { %4472 = vset.pattern.permute.xlu0 %v9744_v43  ;;  %2844 = vperm.xlu1 %4473, %v2716_v14  }
 0xfca   :  { %2840 = vperm.xlu0 %4472, %v2715_v11  }
 0xfcd   :  { %4474 = vset.pattern.permute.xlu1 %v9607_v37 }
 0xfce   :  { %4475 = vset.pattern.permute.xlu0 %v9743_v5  ;;  %2749 = vperm.xlu1 %4474, %v2713_v60  }
 0xfcf   :  { %2792 = vperm.xlu0 %4475, %v2713_v60  }
 0xfd2   :  { %2754 = vperm.xlu1 %4474, %v2714_v50  }
 0xfd3   :  { %4477 = vset.pattern.permute.xlu0 %v9744_v43 }
 0xfd4   :  { %2832 = vperm.xlu0 %4477, %v2713_v60   ;;  %v9750_v60 = vld [vmem:[#allocation46_spill] sm:$0xff] }
 0xfd6   :  { %4476 = vset.pattern.permute.xlu1 %v9743_v5 }
 0xfd7   :  { %2796 = vperm.xlu1 %4476, %v2714_v50  }
 0xfd8   :  { %4480 = vset.pattern.permute.xlu0 %v9607_v37 }
 0xfd9   :  { %2744 = vperm.xlu0 %4480, %v2712_v39  }
 0xfdb   :  { %4478 = vset.pattern.permute.xlu1 %v9744_v43 }
 0xfdc   :  { %2836 = vperm.xlu1 %4478, %v2714_v50  }
 0xfdd   :  { %4482 = vset.pattern.permute.xlu0 %v9744_v43 }
 0xfde   :  { %2824 = vperm.xlu0 %4482, %v2711_v48  }
 0xfe0   :  { %4479 = vset.pattern.permute.xlu1 %v9607_v37 }
 0xfe1   :  { %2739 = vperm.xlu1 %4479, %v2711_v48  }
 0xfe2   :  { %4485 = vset.pattern.permute.xlu0 %v9607_v37 }
 0xfe3   :  { %2734 = vperm.xlu0 %4485, %v2710_v26  }
 0xfe5   :  { %4481 = vset.pattern.permute.xlu1 %v9743_v5 }
 0xfe6   :  { %2784 = vperm.xlu1 %4481, %v2711_v48  }
 0xfe7   :  { %4488 = vset.pattern.permute.xlu0 %v9744_v43 }
 0xfe8   :  { %2812 = vperm.xlu0 %4488, %v2708_v1  }
 0xfea   :  { %2788 = vperm.xlu1 %4481, %v2712_v39  }
 0xfec   :  { %4490 = vset.pattern.permute.xlu0 %v9607_v37 }
 0xfee   :  { %4483 = vset.pattern.permute.xlu1 %v9744_v43 }
 0xfef   :  { %2828 = vperm.xlu1 %4483, %v2712_v39  }
 0xff3   :  { %4484 = vset.pattern.permute.xlu1 %v9607_v37 }
 0xff4   :  { %2729 = vperm.xlu1 %4484, %v2709_v52  }
 0xff8   :  { %4486 = vset.pattern.permute.xlu1 %v9743_v5 }
 0xff9   :  { %2776 = vperm.xlu1 %4486, %v2709_v52  }
 0xffd   :  { %2780 = vperm.xlu1 %4486, %v2710_v26  }
0x1001   :  { %4487 = vset.pattern.permute.xlu1 %v9744_v43 }
0x1002   :  { %2816 = vperm.xlu1 %4487, %v2709_v52  }
0x1006   :  { %2820 = vperm.xlu1 %4487, %v2710_v26  }
0x100a   :  { %2808 = vperm.xlu1 %4487, %v7936_v13  }
0x100e   :  { %4489 = vset.pattern.permute.xlu1 %v9607_v37 }
0x1034   :  { %v7974_v61 = vpop.permute.xlu1 %2724 }
0x1035   :  { %v7976_v7 = vpop.permute.xlu0 %2719 }
0x1039   :  { %v7978_v57 = vpop.permute.xlu1 %2768 }
0x103a   :  { %v7980_v31 = vpop.permute.xlu0 %2772 }
0x103e   :  { %v2765_v54 = vpop.permute.xlu1 %2764 }
0x103f   :  { %v2760_v58 = vpop.permute.xlu0 %2759  ;;  %v2856_v48 = vmul.f32 %v9752_v56, %v2765_v54  ;;  %v8015_v56 = vld [vmem:[%s9307_s5 + $0xd0] sm:$0xff] }
0x1040   :  { %v2855_v23 = vmul.f32 %v9746_v18, %v2760_v58 }
0x1043   :  { %v2801_v36 = vpop.permute.xlu1 %2800 }
0x1044   :  { %v2805_v25 = vpop.permute.xlu0 %2804  ;;  %v2865_v8 = vmul.f32 %v9745_v19, %v2801_v36 }
0x1045   :  { %v2866_v10 = vmul.f32 %v9750_v60, %v2805_v25 }
0x1046   :  { %v2875_v1 = vadd.f32 %v2865_v8, %v2855_v23  ;;  %v9755_v8 = vld [vmem:[#allocation51_spill] sm:$0xff] }
0x1048   :  { %v2845_v17 = vpop.permute.xlu1 %2844 }
0x1049   :  { %v2841_v4 = vpop.permute.xlu0 %2840  ;;  %v2886_v26 = vmul.f32 %v9753_v3, %v2845_v17 }
0x104a   :  { %v2885_v49 = vmul.f32 %v9747_v53, %v2841_v4  ;;  %v2876_v4 = vadd.f32 %v2866_v10, %v2856_v48  ;;  %v9756_v53 = vld [vmem:[#allocation2_spill] sm:$0xff] }
0x104b   :  { %v8007_v10 = vld [vmem:[%s9307_s5 + $0x80] sm:$0xff] }
0x104c   :  { %v2895_v11 = vadd.f32 %v2885_v49, %v2875_v1  ;;  %v2896_v23 = vadd.f32 %v2886_v26, %v2876_v4 }
0x104d   :  { %v2750_v15 = vpop.permute.xlu1 %2749 }
0x104e   :  { %v2793_v2 = vpop.permute.xlu0 %2792  ;;  %v2903_v13 = vmul.f32 %v9748_v35, %v2750_v15  ;;  %v2945_v52 = vadd.f32 %v9754_v30, %v2895_v11  ;;  %v9757_v35 = vld [vmem:[#allocation4_spill] sm:$0xff] }
0x104f   :  { %v2911_v0 = vmul.f32 %v9749_v16, %v2793_v2  ;;  %v9758_v16 = vld [vmem:[#allocation9_spill] sm:$0xff]  ;;  %v8001_v11 = vld [vmem:[%s9307_s5 + $0x30] sm:$0xff] }
0x1050   :  { %v2946_v54 = vadd.f32 %v9758_v16, %v2896_v23  ;;  %v2853_v60 = vmul.f32 %v8001_v11, %v2750_v15  ;;  %v8053_v16 = vld [vmem:[%s9307_s5 + $0x38] sm:$0xff] }
0x1051   :  { %v2755_v14 = vpop.permute.xlu1 %2754  ;;  %v2919_v50 = vadd.f32 %v2911_v0, %v2903_v13  ;;  %9764 = vst [vmem:[#allocation21_spill] sm:$0xff] %v8053_v16 }
0x1052   :  { %v2904_v49 = vmul.f32 %v9756_v53, %v2755_v14  ;;  %v9762_v53 = vld [vmem:[#allocation10_spill] sm:$0xff] }
0x1053   :  { %v2833_v55 = vpop.permute.xlu0 %2832 }
0x1054   :  { %v2927_v39 = vmul.f32 %v9751_v51, %v2833_v55  ;;  %v2883_v48 = vmul.f32 %v8015_v56, %v2833_v55  ;;  %v8031_v55 = vld [vmem:[%s9312_s4 + $0x70] sm:$0xff] }
0x1055   :  { %9760 = vst [vmem:[#allocation18_spill] sm:$0xff] %v8031_v55 }
0x1056   :  { %v2935_v58 = vadd.f32 %v2927_v39, %v2919_v50  ;;  %v2797_v36 = vpop.permute.xlu1 %2796  ;;  %v2863_v50 = vmul.f32 %v8007_v10, %v2793_v2  ;;  %v8024_v2 = vld [vmem:[%s9312_s4 + $0x20] sm:$0xff] }
0x1057   :  { %v2912_v18 = vmul.f32 %v9755_v8, %v2797_v36 }
0x1058   :  { %v2955_v19 = vadd.f32 %v2945_v52, %v2935_v58  ;;  %v7996_v17 = vpop.permute.xlu0 %2744  ;;  %v2873_v15 = vadd.f32 %v2863_v50, %v2853_v60  ;;  %v9759_v52 = vld [vmem:[#allocation3_spill] sm:$0xff]  ;;  %v8067_v50 = vld [vmem:[%s9308_s6 + $0x30] sm:$0xff] }
0x1059   :  { %v2920_v1 = vadd.f32 %v2912_v18, %v2904_v49  ;;  %v8037_v18 = vld [vmem:[%s9307_s5 + $0x88] sm:$0xff]  ;;  %9766 = vst [vmem:[#allocation24_spill] sm:$0xff] %v8067_v50 }
0x105a   :  { %4762 = vtanh.f32 %v2955_v19  ;;  %v2893_v4 = vadd.f32 %v2883_v48, %v2873_v15  ;;  %9761 = vst [vmem:[#allocation19_spill] sm:$0xff] %v8037_v18  ;;  %v2864_v23 = vmul.f32 %v8037_v18, %v2797_v36  ;;  %v8059_v36 = vld [vmem:[%s9307_s5 + $0xd8] sm:$0xff] }
0x105b   :  { %v2837_v25 = vpop.permute.xlu1 %2836  ;;  %9765 = vst [vmem:[#allocation23_spill] sm:$0xff] %v8059_v36 }
0x105c   :  { %v2928_v13 = vmul.f32 %v9757_v35, %v2837_v25 }
0x105d   :  { %v8018_v26 = vpop.permute.xlu0 %2824 }
0x105e   :  { %v2936_v0 = vadd.f32 %v2928_v13, %v2920_v1  ;;  %v8046_v1 = vld [vmem:[%s9312_s4 + $0xc0] sm:$0xff] }
0x105f   :  { %9763 = vst [vmem:[#allocation20_spill] sm:$0xff] %v8046_v1  ;;  %v2925_v35 = vmul.f32 %v8046_v1, %v8018_v26 }
0x1060   :  { %v2956_v51 = vadd.f32 %v2946_v54, %v2936_v0  ;;  %v8010_v39 = vpop.permute.xlu1 %2739  ;;  %v2854_v54 = vmul.f32 %v8053_v16, %v2755_v14  ;;  %v2884_v0 = vmul.f32 %v8059_v36, %v2837_v25 }
0x1061   :  { %v2901_v19 = vmul.f32 %v8024_v2, %v8010_v39 }
0x1062   :  { %4764 = vtanh.f32 %v2956_v51  ;;  %v2943_v51 = vadd.f32 %v8067_v50, %v2893_v4  ;;  %v2874_v14 = vadd.f32 %v2864_v23, %v2854_v54  ;;  %v9784_v50 = vld [vmem:[#allocation8_spill] sm:$0xff] }
0x1064   :  { %v4763_v3 = vpop.eup %4762  ;;  %v2894_v4 = vadd.f32 %v2884_v0, %v2874_v14 }
0x1065   :  { %v2785_v30 = vpop.permute.xlu1 %2784  ;;  %v2975_v58 = vmul.f32 %v9759_v52, %v4763_v3  ;;  %v8073_v3 = vld [vmem:[%s9312_s4 + $0x78] sm:$0xff] }
0x1066   :  { %v2909_v8 = vmul.f32 %v8031_v55, %v2785_v30  ;;  %9767 = vst [vmem:[#allocation25_spill] sm:$0xff] %v8073_v3 }
0x1067   :  { %v8041_v49 = vadd.f32 %v9762_v53, %v2975_v58  ;;  %v8079_v58 = vld [vmem:[%s9312_s4 + $0x28] sm:$0xff] }
0x1068   :  { %v2917_v13 = vadd.f32 %v2909_v8, %v2901_v19  ;;  %9768 = vst [vmem:[#allocation31_spill] sm:$0xff] %v8079_v58  ;;  %v2902_v19 = vmul.f32 %v8079_v58, %v7996_v17  ;;  %v9769_v8 = vld [vmem:[#allocation11_spill] sm:$0xff]  ;;  %v8096_v58 = vld [vmem:[%s9308_s6 + $0x38] sm:$0xff] }
0x1069   :  { %3023 = vrot.lane.b32.xlu1 %v8041_v49, %s5154_s13  ;;  %v2789_v60 = vpop.permute.xlu1 %2788  ;;  %9772 = vst [vmem:[#allocation28_spill] sm:$0xff] %v8096_v58  ;;  %v2944_v0 = vadd.f32 %v8096_v58, %v2894_v4 }
0x106a   :  { %v2933_v48 = vadd.f32 %v2925_v35, %v2917_v13  ;;  %v2910_v25 = vmul.f32 %v8073_v3, %v2789_v60  ;;  %v8087_v13 = vld [vmem:[%s9312_s4 + $0xc8] sm:$0xff]  ;;  %v2735_v3 = vpop.permute.xlu0 %2734 }
0x106b   :  { %9770 = vst [vmem:[#allocation27_spill] sm:$0xff] %v8087_v13 }
0x106c   :  { %v4765_v15 = vpop.eup %4764  ;;  %v2953_v52 = vadd.f32 %v2943_v51, %v2933_v48  ;;  %v2918_v35 = vadd.f32 %v2910_v25, %v2902_v19  ;;  %v9771_v51 = vld [vmem:[#allocation12_spill] sm:$0xff] }
0x106d   :  { %v2976_v23 = vmul.f32 %v9769_v8, %v4765_v15 }
0x106e   :  { %4766 = vtanh.f32 %v2953_v52  ;;  %v2829_v53 = vpop.permute.xlu1 %2828  ;;  %v5042_v52 = vld [vmem:[%s9306_s3] ss:$0 sm:$0xff] }
0x106f   :  { %v2926_v54 = vmul.f32 %v8087_v13, %v2829_v53  ;;  %v8091_v48 = vadd.f32 %v9771_v51, %v2976_v23  ;;  %v433_v19 = vmul.f32 %v5042_v52, %v7922_v44  ;;  %v434_v8 = vmul.f32 %v5042_v52, %v7928_v62  ;;  %v5043_v23 = vld [vmem:[%s9306_s3 + $0x1] ss:$0 sm:$0xff]  ;;  %v5044_v51 = vld [vmem:[%s9306_s3 + $0x2] ss:$0 sm:$0xff] }
0x1070   :  { %v443_v4 = vmul.f32 %v5043_v23, %v7924_v40  ;;  %v456_v13 = vmul.f32 %v5044_v51, %v7930_v24  ;;  %v8122_v40 = vld [vmem:[%s9309_s7 + $0x30] sm:$0xff] }
0x1071   :  { %v2934_v14 = vadd.f32 %v2926_v54, %v2918_v35  ;;  %3025 = vrot.lane.b32.xlu1 %v8091_v48, %s5154_s13  ;;  %v444_v35 = vmul.f32 %v5043_v23, %v7926_v6  ;;  %9774 = vst [vmem:[#allocation26_spill] sm:$0xff] %v8122_v40 }
0x1072   :  { %v445_v62 = vadd.f32 %v443_v4, %v433_v19 }
0x1073   :  { %v2954_v25 = vadd.f32 %v2944_v0, %v2934_v14  ;;  %v8101_v15 = vpop.permute.xlu1 %2729  ;;  %v455_v0 = vmul.f32 %v5044_v51, %v7932_v46  ;;  %v9773_v14 = vld [vmem:[#allocation13_spill] sm:$0xff]  ;;  %v446_v52 = vadd.f32 %v444_v35, %v434_v8  ;;  %v8130_v46 = vld [vmem:[%s9310_s8 + $0x30] sm:$0xff]  ;;  %v5047_v35 = vld [vmem:[%s9307_s5 + $0x8] sm:$0xff] }
0x1074   :  { %v2861_v44 = vmul.f32 %v9773_v14, %v2785_v30  ;;  %9776 = vst [vmem:[#allocation32_spill] sm:$0xff] %v8130_v46  ;;  %v8149_v14 = vld [vmem:[%s9312_s4 + $0x8] sm:$0xff]  ;;  %v2899_v36 = vmul.f32 %v9784_v50, %v8101_v15  ;;  %v8198_v50 = vld [vmem:[%s9307_s5 + $0x60] sm:$0xff] }
0x1075   :  { %4768 = vtanh.f32 %v2954_v25  ;;  %v9775_v25 = vld [vmem:[#allocation17_spill] sm:$0xff]  ;;  %v8135_v8 = vadd.f32 %v455_v0, %v445_v62  ;;  %v8137_v4 = vadd.f32 %v456_v13, %v446_v52  ;;  %9778 = vst [vmem:[#allocation29_spill] sm:$0xff] %v8149_v14  ;;  %v2898_v13 = vmul.f32 %v8149_v14, %v7974_v61  ;;  %v5049_v0 = vld [vmem:[%s9307_s5] sm:$0xff]  ;;  %v9780_v52 = vld [vmem:[#allocation15_spill] sm:$0xff] }
0x1076   :  { %v2851_v23 = vmul.f32 %v9775_v25, %v8010_v39  ;;  %v2848_v39 = vmul.f32 %v5047_v35, %v7974_v61  ;;  %v8169_v61 = vld [vmem:[%s9312_s4 + $0x50] sm:$0xff]  ;;  %9787 = vst [vmem:[#allocation34_spill] sm:$0xff] %v8198_v50 }
0x1077   :  { %9781 = vst [vmem:[#allocation33_spill] sm:$0xff] %v8169_v61 }
0x1078   :  { %v4767_v54 = vpop.eup %4766  ;;  %v2777_v58 = vpop.permute.xlu1 %2776  ;;  %v2871_v24 = vadd.f32 %v2861_v44, %v2851_v23  ;;  %v8157_v44 = vmul.f32 %v5049_v0, %v7976_v7  ;;  %v5050_v23 = vld [vmem:[%s9307_s5 + $0x50] sm:$0xff] }
0x1079   :  { %v2973_v6 = vmul.f32 %v8122_v40, %v4767_v54  ;;  %v9777_v54 = vld [vmem:[#allocation6_spill] sm:$0xff]  ;;  %v2857_v35 = vmul.f32 %v5050_v23, %v7978_v57 }
0x107a   :  { %v2862_v51 = vmul.f32 %v9777_v54, %v2789_v60  ;;  %v9779_v60 = vld [vmem:[#allocation14_spill] sm:$0xff]  ;;  %v2905_v54 = vmul.f32 %v8169_v61, %v7978_v57  ;;  %v8185_v57 = vld [vmem:[%s9309_s7 + $0x38] sm:$0xff] }
0x107b   :  { %v8133_v30 = vadd.f32 %v8130_v46, %v2973_v6  ;;  %v2881_v62 = vmul.f32 %v9779_v60, %v8018_v26  ;;  %v2907_v6 = vmul.f32 %v9780_v52, %v2777_v58  ;;  %v5052_v26 = vld [vmem:[%s9307_s5 + $0x58] sm:$0xff]  ;;  %v9782_v60 = vld [vmem:[#allocation16_spill] sm:$0xff]  ;;  %v2813_v46 = vpop.permute.xlu0 %2812  ;;  %v9783_v23 = vld [vmem:[#allocation22_spill] sm:$0xff]  ;;  %9785 = vst [vmem:[#allocation30_spill] sm:$0xff] %v8185_v57 }
0x107c   :  { %v2781_v19 = vpop.permute.xlu1 %2780  ;;  %v2858_v0 = vmul.f32 %v5052_v26, %v7980_v31  ;;  %v2852_v52 = vmul.f32 %v9782_v60, %v7996_v17  ;;  %v2882_v40 = vmul.f32 %v9783_v23, %v2829_v53  ;;  %v8191_v26 = vld [vmem:[%s9312_s4 + $0x58] sm:$0xff]  ;;  %v2859_v53 = vmul.f32 %v8198_v50, %v2777_v58 }
0x107d   :  { %3019 = vrot.lane.b32.xlu0 %v8133_v30, %s5154_s13  ;;  %v2891_v14 = vadd.f32 %v2881_v62, %v2871_v24  ;;  %9786 = vst [vmem:[#allocation35_spill] sm:$0xff] %v8191_v26  ;;  %v2906_v17 = vmul.f32 %v8191_v26, %v7980_v31  ;;  %v8204_v62 = vld [vmem:[%s9307_s5 + $0x68] sm:$0xff]  ;;  %v2915_v23 = vadd.f32 %v2907_v6, %v2899_v36  ;;  %v9790_v31 = vld [vmem:[#allocation5_spill] sm:$0xff]  ;;  %v8229_v6 = vld [vmem:[%s9307_s5 + $0x10] sm:$0xff] }
0x107e   :  { %v2872_v24 = vadd.f32 %v2862_v51, %v2852_v52  ;;  %9788 = vst [vmem:[#allocation36_spill] sm:$0xff] %v8204_v62  ;;  %v8212_v52 = vld [vmem:[%s9310_s8 + $0x38] sm:$0xff]  ;;  %v5059_v36 = vld [vmem:[%s9307_s5 + $0xa8] sm:$0xff]  ;;  %9793 = vst [vmem:[#allocation39_spill] sm:$0xff] %v8229_v6  ;;  %v2868_v1 = vadd.f32 %v2858_v0, %v2848_v39 }
0x107f   :  { %v4769_v25 = vpop.eup %4768  ;;  %9791 = vst [vmem:[#allocation38_spill] sm:$0xff] %v8212_v52  ;;  %v8220_v26 = vld [vmem:[%s9307_s5 + $0x18] sm:$0xff]  ;;  %v8259_v39 = vld [vmem:[%s9312_s4] sm:$0xff] }
0x1080   :  { %v2974_v61 = vmul.f32 %v8185_v57, %v4769_v25  ;;  %v2860_v25 = vmul.f32 %v8204_v62, %v2781_v19  ;;  %v9789_v57 = vld [vmem:[#allocation7_spill] sm:$0xff]  ;;  %9792 = vst [vmem:[#allocation37_spill] sm:$0xff] %v8220_v26  ;;  %v2850_v62 = vmul.f32 %v8220_v26, %v2735_v3  ;;  %v2892_v26 = vadd.f32 %v2882_v40, %v2872_v24 }
0x1081   :  { %v2817_v60 = vpop.permute.xlu1 %2816  ;;  %v2908_v16 = vmul.f32 %v9789_v57, %v2781_v19  ;;  %v2878_v19 = vmul.f32 %v5059_v36, %v2813_v46  ;;  %v8236_v57 = vld [vmem:[%s9307_s5 + $0xb0] sm:$0xff]  ;;  %v2941_v36 = vadd.f32 %v7746_v63, %v2891_v14  ;;  %v8252_v63 = vld [vmem:[%s9307_s5 + $0xb8] sm:$0xff]  ;;  %v2914_v14 = vadd.f32 %v2906_v17, %v2898_v13 }
0x1082   :  { %v2923_v51 = vmul.f32 %v9790_v31, %v2817_v60  ;;  %v8215_v58 = vadd.f32 %v8212_v52, %v2974_v61  ;;  %v2849_v61 = vmul.f32 %v8229_v6, %v8101_v15  ;;  %9794 = vst [vmem:[#allocation42_spill] sm:$0xff] %v8236_v57  ;;  %v2879_v31 = vmul.f32 %v8236_v57, %v2817_v60  ;;  %v8246_v15 = vld [vmem:[%s9312_s4 + $0xa8] sm:$0xff] }
0x1083   :  { %v2900_v52 = vmul.f32 %v7740_v34, %v2735_v3  ;;  %v2922_v6 = vmul.f32 %v8246_v15, %v2813_v46  ;;  %v2870_v55 = vadd.f32 %v2860_v25, %v2850_v62  ;;  %v2897_v46 = vmul.f32 %v8259_v39, %v7976_v7  ;;  %v8272_v7 = vld [vmem:[%s9308_s6 + $0x18] sm:$0xff] }
0x1084   :  { %v2931_v50 = vadd.f32 %v2923_v51, %v2915_v23  ;;  %3021 = vrot.lane.b32.xlu1 %v8215_v58, %s5154_s13  ;;  %v2869_v18 = vadd.f32 %v2859_v53, %v2849_v61  ;;  %v2942_v24 = vadd.f32 %v7764_v21, %v2892_v26  ;;  %v2867_v25 = vadd.f32 %v2857_v35, %v8157_v44  ;;  %v5069_v44 = vld [vmem:[%s9308_s6] sm:$0xff]  ;;  %v8291_v26 = vld [vmem:[%s9308_s6 + $0x10] sm:$0xff] }
0x1085   :  { %v2821_v60 = vpop.permute.xlu1 %2820  ;;  %v2916_v57 = vadd.f32 %v2908_v16, %v2900_v52  ;;  %v2888_v16 = vadd.f32 %v2878_v19, %v2868_v1  ;;  %v2913_v23 = vadd.f32 %v2905_v54, %v2897_v46  ;;  %v2930_v51 = vadd.f32 %v2922_v6, %v2914_v14 }
0x1086   :  { %v2951_v34 = vadd.f32 %v2941_v36, %v2931_v50  ;;  %v2880_v3 = vmul.f32 %v8252_v63, %v2821_v60  ;;  %v2924_v40 = vmul.f32 %v7756_v22, %v2821_v60  ;;  %v2889_v0 = vadd.f32 %v2879_v31, %v2869_v18  ;;  %v5065_v22 = vld [vmem:[%s9308_s6 + $0x8] sm:$0xff]  ;;  %v5067_v18 = vld [vmem:[%s9307_s5 + $0xa0] sm:$0xff] }
0x1087   :  { %v460_v62 = vadd.f32 %v5065_v22, %v8137_v4  ;;  %v8281_v4 = vld [vmem:[%s9312_s4 + $0xa0] sm:$0xff]  ;;  %v459_v35 = vadd.f32 %v5069_v44, %v8135_v8 }
0x1088   :  { %4770 = vtanh.f32 %v2951_v34  ;;  %v2890_v50 = vadd.f32 %v2880_v3, %v2870_v55  ;;  %v2932_v53 = vadd.f32 %v2924_v40, %v2916_v57  ;;  %v2939_v17 = vadd.f32 %v8291_v26, %v2889_v0 }
0x1089   :  { %v2809_v52 = vpop.permute.xlu1 %2808  ;;  %v2938_v54 = vadd.f32 %v2888_v16, %v460_v62  ;;  %v8307_v16 = vld [vmem:[%s9309_s7 + $0x18] sm:$0xff]  ;;  %v8332_v62 = vld [vmem:[%s9310_s8 + $0x10] sm:$0xff] }
0x108a   :  { %v2940_v21 = vadd.f32 %v8272_v7, %v2890_v50  ;;  %v2952_v55 = vadd.f32 %v2942_v24, %v2932_v53  ;;  %v2877_v1 = vmul.f32 %v5067_v18, %v2809_v52  ;;  %v2921_v13 = vmul.f32 %v8281_v4, %v2809_v52  ;;  %v8321_v24 = vld [vmem:[%s9310_s8 + $0x18] sm:$0xff]  ;;  %v5074_v53 = vld [vmem:[%s9309_s7 + $0x8] sm:$0xff] }
0x108b   :  { %v5077_v52 = vld [vmem:[%s9310_s8 + $0x8] sm:$0xff] }
0x108c   :  { %v2950_v19 = vadd.f32 %v2940_v21, %v2930_v51  ;;  %4772 = vtanh.f32 %v2952_v55  ;;  %v2887_v6 = vadd.f32 %v2877_v1, %v2867_v25  ;;  %v2929_v61 = vadd.f32 %v2921_v13, %v2913_v23  ;;  %v5076_v23 = vld [vmem:[%s9309_s7] sm:$0xff] }
0x108d   :  { %v5078_v55 = vld [vmem:[%s9310_s8] sm:$0xff] }
0x108e   :  { %4774 = vtanh.f32 %v2950_v19  ;;  %v2937_v57 = vadd.f32 %v2887_v6, %v459_v35  ;;  %v2949_v31 = vadd.f32 %v2939_v17, %v2929_v61 }
0x108f   :  { %4776 = vtanh.f32 %v2938_v54 }
0x1090   :  { %4778 = vtanh.f32 %v2937_v57 }
0x1091   :  { %4780 = vtanh.f32 %v2949_v31 }
0x1092   :  { %v4771_v36 = vpop.eup %4770 }
0x1093   :  { %v2971_v8 = vmul.f32 %v7778_v45, %v4771_v36 }
0x1095   :  { %v8296_v60 = vadd.f32 %v7784_v47, %v2971_v8 }
0x1096   :  { %v4773_v34 = vpop.eup %4772 }
0x1097   :  { %3015 = vrot.lane.b32.xlu0 %v8296_v60, %s5154_s13  ;;  %v2972_v3 = vmul.f32 %v7794_v28, %v4773_v34  ;;  %v8315_v28 = vld [vmem:[%s9309_s7 + $0x10] sm:$0xff] }
0x1098   :  { %v4775_v40 = vpop.eup %4774 }
0x1099   :  { %v4777_v46 = vpop.eup %4776  ;;  %v8302_v14 = vadd.f32 %v7800_v33, %v2972_v3  ;;  %v2970_v45 = vmul.f32 %v8307_v16, %v4775_v40 }
0x109a   :  { %v4779_v47 = vpop.eup %4778  ;;  %v2968_v22 = vmul.f32 %v5074_v53, %v4777_v46 }
0x109b   :  { %v4781_v0 = vpop.eup %4780  ;;  %3017 = vrot.lane.b32.xlu1 %v8302_v14, %s5154_s13  ;;  %v8324_v50 = vadd.f32 %v8321_v24, %v2970_v45  ;;  %v2967_v51 = vmul.f32 %v5076_v23, %v4779_v47 }
0x109c   :  { %v2969_v33 = vmul.f32 %v8315_v28, %v4781_v0  ;;  %v8347_v21 = vadd.f32 %v5077_v52, %v2968_v22 }
0x109d   :  { %v8352_v18 = vadd.f32 %v5078_v55, %v2967_v51 }
0x109e   :  { %v8335_v25 = vadd.f32 %v8332_v62, %v2969_v33 }
0x109f   :  { %3013 = vrot.lane.b32.xlu1 %v8324_v50, %s5154_s13 }
0x10a0   :  { %3011 = vrot.lane.b32.xlu0 %v8335_v25, %s5154_s13 }
0x10a3   :  { %3009 = vrot.lane.b32.xlu1 %v8347_v21, %s5154_s13 }
0x10a4   :  { %3007 = vrot.lane.b32.xlu0 %v8352_v18, %s5154_s13 }
0x10db   :  { %v3024_v1 = vpop.permute.xlu1 %3023 }
0x10dc   :  { %v3045_v13 = vmul.f32 %v3024_v1, %v8041_v49 }
0x10de   :  { %3073 = vrot.lane.b32.xlu0 %v3045_v13, %s5155_s20  ;;  %v2988_v13 = vmul.f32 %v8347_v21, %v7868_v20  ;;  %v2994_v20 = vmul.f32 %v8215_v58, %v7885_v29 }
0x10e3   :  { %v3026_v44 = vpop.permute.xlu1 %3025 }
0x10e4   :  { %v3046_v35 = vmul.f32 %v3026_v44, %v8091_v48 }
0x10e6   :  { %3075 = vrot.lane.b32.xlu1 %v3046_v35, %s5155_s20  ;;  %v2987_v35 = vmul.f32 %v8352_v18, %v7872_v42  ;;  %v2993_v42 = vmul.f32 %v8133_v30, %v7888_v32 }
0x10ef   :  { %v3020_v54 = vpop.permute.xlu0 %3019 }
0x10f0   :  { %v3043_v17 = vmul.f32 %v3020_v54, %v8133_v30  ;;  %v2996_v54 = vmul.f32 %v8091_v48, %v7874_v41 }
0x10f2   :  { %3069 = vrot.lane.b32.xlu0 %v3043_v17, %s5155_s20 }
0x10f6   :  { %v3022_v19 = vpop.permute.xlu1 %3021 }
0x10f7   :  { %v3044_v6 = vmul.f32 %v3022_v19, %v8215_v58 }
0x10f9   :  { %3071 = vrot.lane.b32.xlu1 %v3044_v6, %s5155_s20  ;;  %v2995_v6 = vmul.f32 %v8041_v49, %v7877_v59 }
0x1109   :  { %v3016_v61 = vpop.permute.xlu0 %3015 }
0x110a   :  { %v3041_v57 = vmul.f32 %v3016_v61, %v8296_v60 }
0x110c   :  { %3065 = vrot.lane.b32.xlu0 %v3041_v57, %s5155_s20 }
0x110d   :  { %v3018_v31 = vpop.permute.xlu1 %3017 }
0x110e   :  { %v3042_v36 = vmul.f32 %v3018_v31, %v8302_v14 }
0x1110   :  { %3067 = vrot.lane.b32.xlu1 %v3042_v36, %s5155_s20  ;;  %v2992_v36 = vmul.f32 %v8302_v14, %v7895_v38 }
0x1111   :  { %v3014_v8 = vpop.permute.xlu1 %3013 }
0x1112   :  { %v3040_v34 = vmul.f32 %v3014_v8, %v8324_v50  ;;  %v3012_v3 = vpop.permute.xlu0 %3011  ;;  %v2991_v8 = vmul.f32 %v8296_v60, %v7898_v12 }
0x1113   :  { %v3039_v40 = vmul.f32 %v3012_v3, %v8335_v25  ;;  %v2990_v3 = vmul.f32 %v8324_v50, %v7906_v9 }
0x1114   :  { %3063 = vrot.lane.b32.xlu1 %v3040_v34, %s5155_s20 }
0x1115   :  { %3061 = vrot.lane.b32.xlu0 %v3039_v40, %s5155_s20  ;;  %v3010_v46 = vpop.permute.xlu1 %3009 }
0x1116   :  { %v3038_v45 = vmul.f32 %v3010_v46, %v8347_v21  ;;  %v3008_v47 = vpop.permute.xlu0 %3007  ;;  %v2989_v46 = vmul.f32 %v8335_v25, %v7910_v27 }
0x1117   :  { %v3037_v0 = vmul.f32 %v3008_v47, %v8352_v18 }
0x1118   :  { %3059 = vrot.lane.b32.xlu1 %v3038_v45, %s5155_s20 }
0x1119   :  { %3057 = vrot.lane.b32.xlu0 %v3037_v0, %s5155_s20 }
0x1150   :  { %v3074_v53 = vpop.permute.xlu0 %3073 }
0x1151   :  { %v8388_v31 = vadd.f32 %v3074_v53, %v2995_v6 }
0x1158   :  { %v3076_v33 = vpop.permute.xlu1 %3075 }
0x1159   :  { %v8386_v57 = vadd.f32 %v3076_v33, %v2996_v54 }
0x1164   :  { %v3070_v23 = vpop.permute.xlu0 %3069 }
0x1165   :  { %v8398_v59 = vadd.f32 %v3070_v23, %v2993_v42 }
0x116b   :  { %v3072_v22 = vpop.permute.xlu1 %3071 }
0x116c   :  { %v8395_v41 = vadd.f32 %v3072_v22, %v2994_v20 }
0x117e   :  { %v3066_v52 = vpop.permute.xlu0 %3065 }
0x117f   :  { %v8408_v32 = vadd.f32 %v3066_v52, %v2991_v8 }
0x1182   :  { %v3068_v51 = vpop.permute.xlu1 %3067 }
0x1183   :  { %v8405_v29 = vadd.f32 %v3068_v51, %v2992_v36 }
0x1186   :  { %v3064_v55 = vpop.permute.xlu1 %3063 }
0x1187   :  { %v3062_v1 = vpop.permute.xlu0 %3061  ;;  %v8416_v38 = vadd.f32 %v3064_v55, %v2990_v3 }
0x1188   :  { %v8420_v12 = vadd.f32 %v3062_v1, %v2989_v46 }
0x118a   :  { %v3060_v44 = vpop.permute.xlu1 %3059 }
0x118b   :  { %v3088_v17 = vadd.f32 %v3060_v44, %v2988_v13  ;;  %v3058_v19 = vpop.permute.xlu0 %3057 }
0x118c   :  { %v3087_v61 = vadd.f32 %v3058_v19, %v2987_v35 }
0x118d   :  { %4782 = vtanh.f32 %v3088_v17 }
0x118e   :  { %4784 = vtanh.f32 %v3087_v61 }
0x118f   :  { %4786 = vtanh.f32 %v8386_v57 }
0x1190   :  { %4788 = vtanh.f32 %v8388_v31 }
0x1191   :  { %4790 = vtanh.f32 %v8395_v41 }
0x1192   :  { %4792 = vtanh.f32 %v8398_v59 }
0x1193   :  { %4794 = vtanh.f32 %v8405_v29 }
0x1194   :  { %4796 = vtanh.f32 %v8408_v32 }
0x1195   :  { %4798 = vtanh.f32 %v8416_v38 }
0x1196   :  { %4800 = vtanh.f32 %v8420_v12 }
0x1197   :  { %v4783_v34 = vpop.eup %4782 }
0x1198   :  { %v4785_v40 = vpop.eup %4784  ;;  %3119 = vrot.lane.b32.xlu1 %v4783_v34, %s5157_s23 }
0x1199   :  { %3117 = vrot.lane.b32.xlu0 %v4785_v40, %s5157_s23  ;;  %v4787_v45 = vpop.eup %4786  ;;  %v8481_v40 = vld [vmem:[%s9307_s5 + $0x90] sm:$0xff] }
0x119a   :  { %v4789_v47 = vpop.eup %4788 }
0x119b   :  { %v4791_v9 = vpop.eup %4790 }
0x119c   :  { %3135 = vrot.lane.b32.xlu1 %v4787_v45, %s5157_s23  ;;  %v4793_v27 = vpop.eup %4792 }
0x119d   :  { %3133 = vrot.lane.b32.xlu0 %v4789_v47, %s5157_s23  ;;  %v4795_v0 = vpop.eup %4794  ;;  %v8487_v47 = vld [vmem:[%s9307_s5 + $0x40] sm:$0xff] }
0x119e   :  { %v4797_v33 = vpop.eup %4796 }
0x119f   :  { %v4799_v53 = vpop.eup %4798 }
0x11a0   :  { %3131 = vrot.lane.b32.xlu1 %v4791_v9, %s5157_s23  ;;  %v4801_v22 = vpop.eup %4800 }
0x11a1   :  { %3129 = vrot.lane.b32.xlu0 %v4793_v27, %s5157_s23 }
0x11a4   :  { %3127 = vrot.lane.b32.xlu1 %v4795_v0, %s5157_s23 }
0x11a5   :  { %3125 = vrot.lane.b32.xlu0 %v4797_v33, %s5157_s23  ;;  %v8493_v33 = vld [vmem:[%s9307_s5 + $0xe0] sm:$0xff] }
0x11a8   :  { %3123 = vrot.lane.b32.xlu1 %v4799_v53, %s5157_s23 }
0x11a9   :  { %3121 = vrot.lane.b32.xlu0 %v4801_v22, %s5157_s23 }
0x120a   :  { %v3120_v23 = vpop.permute.xlu1 %3119 }
0x120b   :  { %v3148_v51 = vmul.f32 %v3120_v23, %v8347_v21  ;;  %v3118_v52 = vpop.permute.xlu0 %3117 }
0x120c   :  { %v8434_v55 = vmul.f32 %v3118_v52, %v8352_v18  ;;  %v8499_v52 = vld [vmem:[%s9312_s4 + $0x80] sm:$0xff] }
0x120d   :  { %3164 = vperm.xlu0 %4490, %v3148_v51   ;;  %9795 = vst [vmem:[#allocation41_spill] sm:$0xff] %v8499_v52 }
0x120e   :  { %3159 = vperm.xlu1 %4489, %v8434_v55   ;;  %v3136_v44 = vpop.permute.xlu1 %3135 }
0x120f   :  { %v3134_v1 = vpop.permute.xlu0 %3133  ;;  %v3156_v35 = vmul.f32 %v3136_v44, %v8091_v48  ;;  %v8511_v44 = vld [vmem:[%s9312_s4 + $0xd0] sm:$0xff] }
0x1210   :  { %v3155_v13 = vmul.f32 %v3134_v1, %v8041_v49  ;;  %v8505_v1 = vld [vmem:[%s9312_s4 + $0x30] sm:$0xff]  ;;  %9797 = vst [vmem:[#allocation43_spill] sm:$0xff] %v8511_v44 }
0x1211   :  { %9796 = vst [vmem:[#allocation40_spill] sm:$0xff] %v8505_v1 }
0x1212   :  { %4491 = vset.pattern.permute.xlu1 %v9743_v5  ;;  %3199 = vperm.xlu0 %4490, %v3155_v13   ;;  %v3132_v18 = vpop.permute.xlu1 %3131 }
0x1213   :  { %3208 = vperm.xlu1 %4491, %v8434_v55   ;;  %v3130_v21 = vpop.permute.xlu0 %3129  ;;  %v3154_v17 = vmul.f32 %v3132_v18, %v8215_v58  ;;  %v8517_v18 = vld [vmem:[%s9308_s6 + $0x40] sm:$0xff] }
0x1214   :  { %v3153_v49 = vmul.f32 %v3130_v21, %v8133_v30  ;;  %9798 = vst [vmem:[#allocation44_spill] sm:$0xff] %v8517_v18 }
0x1216   :  { %4494 = vset.pattern.permute.xlu0 %v9743_v5  ;;  %v3128_v48 = vpop.permute.xlu1 %3127 }
0x1217   :  { %3212 = vperm.xlu1 %4491, %v3148_v51   ;;  %3244 = vperm.xlu0 %4494, %v3156_v35   ;;  %v3152_v54 = vmul.f32 %v3128_v48, %v8302_v14  ;;  %v3126_v30 = vpop.permute.xlu0 %3125 }
0x1218   :  { %v3151_v19 = vmul.f32 %v3126_v30, %v8296_v60  ;;  %v8523_v30 = vld [vmem:[%s9307_s5 + $0x48] sm:$0xff] }
0x121a   :  { %v3124_v6 = vpop.permute.xlu1 %3123 }
0x121b   :  { %4492 = vset.pattern.permute.xlu1 %v9607_v37  ;;  %4495 = vset.pattern.permute.xlu0 %v9744_v43  ;;  %v3150_v61 = vmul.f32 %v3124_v6, %v8324_v50  ;;  %v3122_v14 = vpop.permute.xlu0 %3121  ;;  %v8529_v6 = vld [vmem:[%s9307_s5 + $0x98] sm:$0xff] }
0x121c   :  { %3204 = vperm.xlu1 %4492, %v3156_v35   ;;  %3280 = vperm.xlu0 %4495, %v3155_v13   ;;  %v3149_v20 = vmul.f32 %v3122_v14, %v8335_v25  ;;  %v8535_v14 = vld [vmem:[%s9307_s5 + $0xe8] sm:$0xff] }
0x1220   :  { %4493 = vset.pattern.permute.xlu1 %v9743_v5  ;;  %4498 = vset.pattern.permute.xlu0 %v9743_v5 }
0x1221   :  { %3240 = vperm.xlu1 %4493, %v3155_v13   ;;  %3232 = vperm.xlu0 %4498, %v3153_v49  }
0x1225   :  { %4496 = vset.pattern.permute.xlu1 %v9744_v43  ;;  %4500 = vset.pattern.permute.xlu0 %v9744_v43 }
0x1226   :  { %3284 = vperm.xlu1 %4496, %v3156_v35   ;;  %3272 = vperm.xlu0 %4500, %v3153_v49  }
0x122a   :  { %4497 = vset.pattern.permute.xlu1 %v9607_v37  ;;  %4503 = vset.pattern.permute.xlu0 %v9607_v37 }
0x122b   :  { %3184 = vperm.xlu0 %4503, %v3152_v54   ;;  %3189 = vperm.xlu1 %4497, %v3153_v49  }
0x122f   :  { %4505 = vset.pattern.permute.xlu0 %v9744_v43  ;;  %3194 = vperm.xlu1 %4497, %v3154_v17  }
0x1230   :  { %3264 = vperm.xlu0 %4505, %v3151_v19  }
0x1233   :  { %4499 = vset.pattern.permute.xlu1 %v9743_v5 }
0x1234   :  { %3236 = vperm.xlu1 %4499, %v3154_v17   ;;  %4508 = vset.pattern.permute.xlu0 %v9607_v37 }
0x1235   :  { %3174 = vperm.xlu0 %4508, %v3150_v61  }
0x1238   :  { %4501 = vset.pattern.permute.xlu1 %v9744_v43 }
0x1239   :  { %3276 = vperm.xlu1 %4501, %v3154_v17   ;;  %4510 = vset.pattern.permute.xlu0 %v9744_v43 }
0x123a   :  { %3256 = vperm.xlu0 %4510, %v3149_v20  }
0x123d   :  { %4502 = vset.pattern.permute.xlu1 %v9607_v37 }
0x123e   :  { %3179 = vperm.xlu1 %4502, %v3151_v19   ;;  %3252 = vperm.xlu0 %4510, %v3148_v51  }
0x1242   :  { %4504 = vset.pattern.permute.xlu1 %v9743_v5  ;;  %4513 = vset.pattern.permute.xlu0 %v9607_v37 }
0x1243   :  { %3224 = vperm.xlu1 %4504, %v3151_v19  }
0x1247   :  { %3228 = vperm.xlu1 %4504, %v3152_v54  }
0x124b   :  { %4506 = vset.pattern.permute.xlu1 %v9744_v43 }
0x124c   :  { %3268 = vperm.xlu1 %4506, %v3152_v54  }
0x1250   :  { %4507 = vset.pattern.permute.xlu1 %v9607_v37 }
0x1251   :  { %3169 = vperm.xlu1 %4507, %v3149_v20  }
0x1255   :  { %4509 = vset.pattern.permute.xlu1 %v9743_v5 }
0x1256   :  { %3216 = vperm.xlu1 %4509, %v3149_v20  }
0x125a   :  { %3220 = vperm.xlu1 %4509, %v3150_v61  }
0x125e   :  { %4511 = vset.pattern.permute.xlu1 %v9744_v43 }
0x125f   :  { %3260 = vperm.xlu1 %4511, %v3150_v61  }
0x1263   :  { %3248 = vperm.xlu1 %4511, %v8434_v55  }
0x1267   :  { %4512 = vset.pattern.permute.xlu1 %v9607_v37 }
0x128c   :  { %v8470_v58 = vpop.permute.xlu0 %3164 }
0x128d   :  { %v8472_v60 = vpop.permute.xlu1 %3159 }
0x1291   :  { %v3200_v50 = vpop.permute.xlu0 %3199 }
0x1292   :  { %v8474_v25 = vpop.permute.xlu1 %3208  ;;  %v3293_v9 = vmul.f32 %v8487_v47, %v3200_v50 }
0x1296   :  { %v8476_v42 = vpop.permute.xlu1 %3212  ;;  %v3245_v36 = vpop.permute.xlu0 %3244 }
0x1297   :  { %v3302_v61 = vmul.f32 %v8529_v6, %v3245_v36  ;;  %v8547_v36 = vld [vmem:[%s9312_s4 + $0x38] sm:$0xff] }
0x129b   :  { %v3205_v8 = vpop.permute.xlu1 %3204  ;;  %v3281_v34 = vpop.permute.xlu0 %3280 }
0x129c   :  { %v3317_v53 = vmul.f32 %v8493_v33, %v3281_v34  ;;  %v3294_v17 = vmul.f32 %v8523_v30, %v3205_v8  ;;  %v8541_v8 = vld [vmem:[%s9312_s4 + $0x88] sm:$0xff] }
0x129e   :  { %v3310_v34 = vadd.f32 %v3302_v61, %v3294_v17 }
0x12a0   :  { %v3241_v3 = vpop.permute.xlu1 %3240  ;;  %v3233_v45 = vpop.permute.xlu0 %3232 }
0x12a1   :  { %v3301_v46 = vmul.f32 %v8481_v40, %v3241_v3  ;;  %v3341_v55 = vmul.f32 %v8499_v52, %v3233_v45  ;;  %v3299_v17 = vmul.f32 %v8007_v10, %v3233_v45 }
0x12a3   :  { %v3309_v0 = vadd.f32 %v3301_v46, %v3293_v9 }
0x12a5   :  { %v3285_v27 = vpop.permute.xlu1 %3284  ;;  %v3273_v22 = vpop.permute.xlu0 %3272  ;;  %v3325_v51 = vadd.f32 %v3317_v53, %v3309_v0  ;;  %v8553_v53 = vld [vmem:[%s9312_s4 + $0xd8] sm:$0xff] }
0x12a6   :  { %v3357_v35 = vmul.f32 %v8511_v44, %v3273_v22  ;;  %v3318_v20 = vmul.f32 %v8535_v14, %v3285_v27  ;;  %9799 = vst [vmem:[#allocation45_spill] sm:$0xff] %v8553_v53  ;;  %v3315_v10 = vmul.f32 %v8015_v56, %v3273_v22  ;;  %v9808_v22 = vld [vmem:[#allocation24_spill] sm:$0xff] }
0x12a7   :  { %v3373_v48 = vadd.f32 %v8517_v18, %v3325_v51 }
0x12a8   :  { %v3326_v46 = vadd.f32 %v3318_v20, %v3310_v34  ;;  %v8569_v20 = vld [vmem:[%s9309_s7 + $0x40] sm:$0xff] }
0x12a9   :  { %9801 = vst [vmem:[#allocation47_spill] sm:$0xff] %v8569_v20 }
0x12aa   :  { %v3190_v23 = vpop.permute.xlu1 %3189 }
0x12ab   :  { %v3333_v13 = vmul.f32 %v8505_v1, %v3190_v23 }
0x12ad   :  { %v3349_v21 = vadd.f32 %v3341_v55, %v3333_v13  ;;  %v8559_v55 = vld [vmem:[%s9308_s6 + $0x48] sm:$0xff] }
0x12ae   :  { %v3195_v49 = vpop.permute.xlu1 %3194  ;;  %9800 = vst [vmem:[#allocation46_spill] sm:$0xff] %v8559_v55  ;;  %v3374_v13 = vadd.f32 %v8559_v55, %v3326_v46 }
0x12af   :  { %v3365_v54 = vadd.f32 %v3357_v35, %v3349_v21  ;;  %v3334_v9 = vmul.f32 %v8547_v36, %v3195_v49  ;;  %v3291_v35 = vmul.f32 %v8001_v11, %v3190_v23  ;;  %v8575_v11 = vld [vmem:[%s9310_s8 + $0x40] sm:$0xff] }
0x12b0   :  { %9802 = vst [vmem:[#allocation48_spill] sm:$0xff] %v8575_v11 }
0x12b1   :  { %v3381_v19 = vadd.f32 %v3373_v48, %v3365_v54  ;;  %v8563_v48 = vpop.permute.xlu0 %3184 }
0x12b3   :  { %4802 = vtanh.f32 %v3381_v19  ;;  %v3237_v50 = vpop.permute.xlu1 %3236 }
0x12b4   :  { %v3342_v3 = vmul.f32 %v8541_v8, %v3237_v50 }
0x12b5   :  { %v3265_v45 = vpop.permute.xlu0 %3264 }
0x12b6   :  { %v3350_v27 = vadd.f32 %v3342_v3, %v3334_v9  ;;  %v3307_v3 = vadd.f32 %v3299_v17, %v3291_v35  ;;  %v9804_v35 = vld [vmem:[#allocation19_spill] sm:$0xff] }
0x12b8   :  { %v3277_v0 = vpop.permute.xlu1 %3276  ;;  %v3323_v9 = vadd.f32 %v3315_v10, %v3307_v3 }
0x12b9   :  { %v3358_v51 = vmul.f32 %v8553_v53, %v3277_v0  ;;  %v9809_v53 = vld [vmem:[#allocation25_spill] sm:$0xff] }
0x12ba   :  { %v3371_v44 = vadd.f32 %v9808_v22, %v3323_v9 }
0x12bb   :  { %v3366_v21 = vadd.f32 %v3358_v51, %v3350_v27  ;;  %v9803_v51 = vld [vmem:[#allocation18_spill] sm:$0xff] }
0x12bd   :  { %v4803_v54 = vpop.eup %4802  ;;  %v3382_v19 = vadd.f32 %v3374_v13, %v3366_v21  ;;  %v3180_v61 = vpop.permute.xlu1 %3179  ;;  %v3300_v21 = vmul.f32 %v9804_v35, %v3237_v50 }
0x12be   :  { %v3397_v34 = vmul.f32 %v8569_v20, %v4803_v54  ;;  %v3331_v27 = vmul.f32 %v8024_v2, %v3180_v61  ;;  %v9805_v54 = vld [vmem:[#allocation20_spill] sm:$0xff]  ;;  %v9806_v20 = vld [vmem:[#allocation21_spill] sm:$0xff]  ;;  %v3175_v35 = vpop.permute.xlu0 %3174 }
0x12bf   :  { %4804 = vtanh.f32 %v3382_v19  ;;  %v3355_v17 = vmul.f32 %v9805_v54, %v3265_v45 }
0x12c0   :  { %v8578_v23 = vadd.f32 %v8575_v11, %v3397_v34  ;;  %v3292_v34 = vmul.f32 %v9806_v20, %v3195_v49  ;;  %v9807_v11 = vld [vmem:[#allocation23_spill] sm:$0xff] }
0x12c1   :  { %v3316_v18 = vmul.f32 %v9807_v11, %v3277_v0  ;;  %v9811_v11 = vld [vmem:[#allocation27_spill] sm:$0xff] }
0x12c2   :  { %v3225_v46 = vpop.permute.xlu1 %3224  ;;  %3435 = vrot.lane.b32.xlu1 %v8578_v23, %s5154_s13  ;;  %v3308_v1 = vadd.f32 %v3300_v21, %v3292_v34  ;;  %v8620_v21 = vld [vmem:[%s9307_s5 + $0x20] sm:$0xff] }
0x12c3   :  { %v3339_v13 = vmul.f32 %v9803_v51, %v3225_v46  ;;  %v9810_v51 = vld [vmem:[#allocation31_spill] sm:$0xff]  ;;  %9815 = vst [vmem:[#allocation51_spill] sm:$0xff] %v8620_v21  ;;  %v3289_v54 = vmul.f32 %v8620_v21, %v3180_v61  ;;  %v9835_v21 = vld [vmem:[#allocation42_spill] sm:$0xff] }
0x12c4   :  { %v3332_v52 = vmul.f32 %v9810_v51, %v8563_v48  ;;  %v3324_v50 = vadd.f32 %v3316_v18, %v3308_v1  ;;  %v9813_v1 = vld [vmem:[#allocation28_spill] sm:$0xff] }
0x12c5   :  { %v3347_v19 = vadd.f32 %v3339_v13, %v3331_v27  ;;  %v8596_v27 = vld [vmem:[%s9309_s7 + $0x48] sm:$0xff] }
0x12c6   :  { %v3229_v56 = vpop.permute.xlu1 %3228  ;;  %v3372_v18 = vadd.f32 %v9813_v1, %v3324_v50  ;;  %v8632_v50 = vld [vmem:[%s9312_s4 + $0x10] sm:$0xff] }
0x12c7   :  { %v3363_v55 = vadd.f32 %v3355_v17, %v3347_v19  ;;  %v3340_v3 = vmul.f32 %v9809_v53, %v3229_v56  ;;  %9817 = vst [vmem:[#allocation4_spill] sm:$0xff] %v8632_v50 }
0x12c9   :  { %v4805_v10 = vpop.eup %4804  ;;  %v3379_v2 = vadd.f32 %v3371_v44, %v3363_v55  ;;  %v3348_v20 = vadd.f32 %v3340_v3, %v3332_v52  ;;  %v8603_v44 = vld [vmem:[%s9310_s8 + $0x48] sm:$0xff]  ;;  %v8612_v55 = vld [vmem:[%s9307_s5 + $0x70] sm:$0xff] }
0x12ca   :  { %v3398_v49 = vmul.f32 %v8596_v27, %v4805_v10  ;;  %9812 = vst [vmem:[#allocation49_spill] sm:$0xff] %v8603_v44  ;;  %9814 = vst [vmem:[#allocation50_spill] sm:$0xff] %v8612_v55  ;;  %v3297_v13 = vmul.f32 %v8612_v55, %v3225_v46  ;;  %v8626_v46 = vld [vmem:[%s9307_s5 + $0xc0] sm:$0xff]  ;;  %v3257_v10 = vpop.permute.xlu0 %3256  ;;  %v9833_v55 = vld [vmem:[#allocation37_spill] sm:$0xff] }
0x12cb   :  { %4806 = vtanh.f32 %v3379_v2  ;;  %v3269_v0 = vpop.permute.xlu1 %3268  ;;  %9816 = vst [vmem:[#allocation2_spill] sm:$0xff] %v8626_v46  ;;  %v3313_v22 = vmul.f32 %v8626_v46, %v3265_v45 }
0x12cc   :  { %v3356_v9 = vmul.f32 %v9811_v11, %v3269_v0  ;;  %v8606_v53 = vadd.f32 %v8603_v44, %v3398_v49  ;;  %v3305_v34 = vadd.f32 %v3297_v13, %v3289_v54  ;;  %v8638_v49 = vld [vmem:[%s9312_s4 + $0x60] sm:$0xff]  ;;  %v9822_v54 = vld [vmem:[#allocation32_spill] sm:$0xff]  ;;  %v3311_v44 = vmul.f32 %v9835_v21, %v3257_v10 }
0x12cd   :  { %9818 = vst [vmem:[#allocation9_spill] sm:$0xff] %v8638_v49  ;;  %v9819_v11 = vld [vmem:[#allocation26_spill] sm:$0xff]  ;;  %v3327_v21 = vmul.f32 %v8259_v39, %v8472_v60 }
0x12ce   :  { %v3364_v52 = vadd.f32 %v3356_v9, %v3348_v20  ;;  %3437 = vrot.lane.b32.xlu0 %v8606_v53, %s5154_s13  ;;  %v3321_v51 = vadd.f32 %v3313_v22, %v3305_v34  ;;  %v8645_v9 = vld [vmem:[%s9307_s5 + $0x78] sm:$0xff]  ;;  %v8660_v34 = vld [vmem:[%s9307_s5 + $0x28] sm:$0xff] }
0x12cf   :  { %9820 = vst [vmem:[#allocation3_spill] sm:$0xff] %v8645_v9  ;;  %v3298_v1 = vmul.f32 %v8645_v9, %v3229_v56  ;;  %9823 = vst [vmem:[#allocation11_spill] sm:$0xff] %v8660_v34  ;;  %v3290_v22 = vmul.f32 %v8660_v34, %v8563_v48  ;;  %v8667_v56 = vld [vmem:[%s9307_s5 + $0xc8] sm:$0xff]  ;;  %v9828_v34 = vld [vmem:[#allocation29_spill] sm:$0xff] }
0x12d0   :  { %v3380_v17 = vadd.f32 %v3372_v18, %v3364_v52  ;;  %v3170_v19 = vpop.permute.xlu1 %3169  ;;  %v8651_v18 = vld [vmem:[%s9312_s4 + $0xb0] sm:$0xff]  ;;  %9824 = vst [vmem:[#allocation12_spill] sm:$0xff] %v8667_v56  ;;  %v8686_v9 = vld [vmem:[%s9312_s4 + $0x68] sm:$0xff] }
0x12d1   :  { %v3329_v61 = vmul.f32 %v8632_v50, %v3170_v19  ;;  %9821 = vst [vmem:[#allocation10_spill] sm:$0xff] %v8651_v18  ;;  %v3353_v13 = vmul.f32 %v8651_v18, %v3257_v10  ;;  %v3328_v50 = vmul.f32 %v9828_v34, %v8470_v58  ;;  %9830 = vst [vmem:[#allocation17_spill] sm:$0xff] %v8686_v9  ;;  %v8718_v10 = vld [vmem:[%s9308_s6 + $0x28] sm:$0xff] }
0x12d2   :  { %4808 = vtanh.f32 %v3380_v17  ;;  %v3288_v58 = vmul.f32 %v9833_v55, %v3175_v35 }
0x12d5   :  { %v4807_v3 = vpop.eup %4806  ;;  %v3217_v2 = vpop.permute.xlu1 %3216 }
0x12d6   :  { %v3337_v20 = vmul.f32 %v8638_v49, %v3217_v2  ;;  %v3395_v45 = vmul.f32 %v9819_v11, %v4807_v3  ;;  %v3314_v3 = vmul.f32 %v8667_v56, %v3269_v0  ;;  %v9825_v11 = vld [vmem:[#allocation34_spill] sm:$0xff]  ;;  %v9827_v49 = vld [vmem:[#allocation36_spill] sm:$0xff]  ;;  %v3253_v0 = vpop.permute.xlu0 %3252  ;;  %v3306_v56 = vadd.f32 %v3298_v1, %v3290_v22 }
0x12d8   :  { %v3345_v52 = vadd.f32 %v3337_v20, %v3329_v61  ;;  %v8655_v17 = vadd.f32 %v9822_v54, %v3395_v45  ;;  %v3295_v61 = vmul.f32 %v9825_v11, %v3217_v2  ;;  %v8674_v45 = vld [vmem:[%s9308_s6 + $0x20] sm:$0xff]  ;;  %v9829_v2 = vld [vmem:[#allocation39_spill] sm:$0xff]  ;;  %v3322_v22 = vadd.f32 %v3314_v3, %v3306_v56 }
0x12d9   :  { %v3221_v20 = vpop.permute.xlu1 %3220  ;;  %9826 = vst [vmem:[#allocation13_spill] sm:$0xff] %v8674_v45  ;;  %v3369_v54 = vadd.f32 %v8674_v45, %v3321_v51  ;;  %v3287_v11 = vmul.f32 %v9829_v2, %v3170_v19  ;;  %v9832_v45 = vld [vmem:[#allocation35_spill] sm:$0xff]  ;;  %v8697_v19 = vld [vmem:[%s9312_s4 + $0x18] sm:$0xff]  ;;  %v9836_v56 = vld [vmem:[#allocation38_spill] sm:$0xff] }
0x12da   :  { %v3361_v18 = vadd.f32 %v3353_v13, %v3345_v52  ;;  %v3296_v48 = vmul.f32 %v9827_v49, %v3221_v20  ;;  %3431 = vrot.lane.b32.xlu1 %v8655_v17, %s5154_s13  ;;  %v3338_v51 = vmul.f32 %v8686_v9, %v3221_v20  ;;  %v9831_v49 = vld [vmem:[#allocation33_spill] sm:$0xff]  ;;  %v3336_v46 = vmul.f32 %v9832_v45, %v8476_v42  ;;  %v9834_v20 = vld [vmem:[#allocation30_spill] sm:$0xff] }
0x12db   :  { %v3335_v52 = vmul.f32 %v9831_v49, %v8474_v25  ;;  %v3330_v1 = vmul.f32 %v8697_v19, %v3175_v35  ;;  %v3303_v2 = vadd.f32 %v3295_v61, %v3287_v11  ;;  %v3352_v25 = vmul.f32 %v8246_v15, %v3253_v0 }
0x12dc   :  { %v4809_v13 = vpop.eup %4808  ;;  %v3377_v34 = vadd.f32 %v3369_v54, %v3361_v18  ;;  %v3304_v42 = vadd.f32 %v3296_v48, %v3288_v58  ;;  %v8707_v54 = vld [vmem:[%s9312_s4 + $0xb8] sm:$0xff]  ;;  %v3344_v15 = vadd.f32 %v3336_v46, %v3328_v50 }
0x12dd   :  { %v3396_v9 = vmul.f32 %v9834_v20, %v4809_v13  ;;  %v3346_v55 = vadd.f32 %v3338_v51, %v3330_v1  ;;  %v3319_v61 = vadd.f32 %v3311_v44, %v3303_v2  ;;  %v3343_v11 = vadd.f32 %v3335_v52, %v3327_v21  ;;  %v8729_v52 = vld [vmem:[%s9309_s7 + $0x20] sm:$0xff]  ;;  %v8745_v1 = vld [vmem:[%s9309_s7 + $0x28] sm:$0xff] }
0x12de   :  { %4810 = vtanh.f32 %v3377_v34  ;;  %v3261_v45 = vpop.permute.xlu1 %3260  ;;  %v3360_v51 = vadd.f32 %v3352_v25, %v3344_v15  ;;  %v8751_v20 = vld [vmem:[%s9310_s8 + $0x28] sm:$0xff] }
0x12df   :  { %v3312_v18 = vmul.f32 %v8252_v63, %v3261_v45  ;;  %v3354_v35 = vmul.f32 %v8707_v54, %v3261_v45  ;;  %v8711_v3 = vadd.f32 %v9836_v56, %v3396_v9  ;;  %v3370_v63 = vadd.f32 %v8718_v10, %v3322_v22 }
0x12e0   :  { %v3367_v49 = vadd.f32 %v8291_v26, %v3319_v61 }
0x12e1   :  { %v3320_v48 = vadd.f32 %v3312_v18, %v3304_v42  ;;  %v3362_v0 = vadd.f32 %v3354_v35, %v3346_v55  ;;  %3433 = vrot.lane.b32.xlu0 %v8711_v3, %s5154_s13 }
0x12e2   :  { %v3249_v9 = vpop.permute.xlu1 %3248 }
0x12e3   :  { %v3368_v13 = vadd.f32 %v8272_v7, %v3320_v48  ;;  %v3378_v39 = vadd.f32 %v3370_v63, %v3362_v0  ;;  %v3351_v60 = vmul.f32 %v8281_v4, %v3249_v9  ;;  %v8735_v7 = vld [vmem:[%s9310_s8 + $0x20] sm:$0xff] }
0x12e5   :  { %v3376_v46 = vadd.f32 %v3368_v13, %v3360_v51  ;;  %4812 = vtanh.f32 %v3378_v39  ;;  %v3359_v50 = vadd.f32 %v3351_v60, %v3343_v11  ;;  %v3413_v60 = vmul.f32 %v8578_v23, %v8388_v31 }
0x12e7   :  { %4814 = vtanh.f32 %v3376_v46  ;;  %v3375_v44 = vadd.f32 %v3367_v49, %v3359_v50  ;;  %v3414_v49 = vmul.f32 %v8606_v53, %v8386_v57  ;;  %v3412_v57 = vmul.f32 %v8711_v3, %v8395_v41 }
0x12e8   :  { %v4811_v58 = vpop.eup %4810 }
0x12e9   :  { %4816 = vtanh.f32 %v3375_v44  ;;  %v3393_v34 = vmul.f32 %v8729_v52, %v4811_v58 }
0x12eb   :  { %v8738_v4 = vadd.f32 %v8735_v7, %v3393_v34 }
0x12ed   :  { %3427 = vrot.lane.b32.xlu1 %v8738_v4, %s5154_s13 }
0x12ef   :  { %v4813_v26 = vpop.eup %4812 }
0x12f0   :  { %v3394_v22 = vmul.f32 %v8745_v1, %v4813_v26  ;;  %v3411_v26 = vmul.f32 %v8655_v17, %v8398_v59  ;;  %v3409_v59 = vmul.f32 %v8738_v4, %v8408_v32 }
0x12f1   :  { %v4815_v2 = vpop.eup %4814 }
0x12f2   :  { %v8754_v25 = vadd.f32 %v8751_v20, %v3394_v22  ;;  %v3392_v42 = vmul.f32 %v8307_v16, %v4815_v2 }
0x12f3   :  { %v4817_v45 = vpop.eup %4816 }
0x12f4   :  { %3429 = vrot.lane.b32.xlu0 %v8754_v25, %s5154_s13  ;;  %v3391_v55 = vmul.f32 %v8315_v28, %v4817_v45  ;;  %v8764_v35 = vadd.f32 %v8321_v24, %v3392_v42  ;;  %v3410_v41 = vmul.f32 %v8754_v25, %v8405_v29 }
0x12f6   :  { %v8761_v18 = vadd.f32 %v8332_v62, %v3391_v55  ;;  %v3408_v32 = vmul.f32 %v8764_v35, %v8416_v38 }
0x12f8   :  { %3423 = vrot.lane.b32.xlu1 %v8761_v18, %s5154_s13  ;;  %3425 = vrot.lane.b32.xlu0 %v8764_v35, %s5154_s13 }
0x1334   :  { %v3436_v56 = vpop.permute.xlu1 %3435 }
0x1335   :  { %v3453_v16 = vmul.f32 %v3436_v56, %v8578_v23 }
0x1337   :  { %3475 = vrot.lane.b32.xlu1 %v3453_v16, %s5155_s20 }
0x1340   :  { %v3438_v21 = vpop.permute.xlu0 %3437 }
0x1341   :  { %v3454_v28 = vmul.f32 %v3438_v21, %v8606_v53 }
0x1343   :  { %3477 = vrot.lane.b32.xlu0 %v3454_v28, %s5155_s20 }
0x134c   :  { %v3432_v62 = vpop.permute.xlu1 %3431 }
0x134d   :  { %v3451_v24 = vmul.f32 %v3432_v62, %v8655_v17 }
0x134f   :  { %3471 = vrot.lane.b32.xlu1 %v3451_v24, %s5155_s20  ;;  %v3407_v24 = vmul.f32 %v8761_v18, %v8420_v12 }
0x1353   :  { %v3434_v15 = vpop.permute.xlu0 %3433 }
0x1354   :  { %v3452_v63 = vmul.f32 %v3434_v15, %v8711_v3 }
0x1356   :  { %3473 = vrot.lane.b32.xlu0 %v3452_v63, %s5155_s20 }
0x135f   :  { %v3428_v61 = vpop.permute.xlu1 %3427 }
0x1360   :  { %v3449_v48 = vmul.f32 %v3428_v61, %v8738_v4 }
0x1362   :  { %3467 = vrot.lane.b32.xlu1 %v3449_v48, %s5155_s20 }
0x1366   :  { %v3430_v0 = vpop.permute.xlu0 %3429 }
0x1367   :  { %v3450_v11 = vmul.f32 %v3430_v0, %v8754_v25 }
0x1369   :  { %3469 = vrot.lane.b32.xlu0 %v3450_v11, %s5155_s20 }
0x136a   :  { %v3424_v9 = vpop.permute.xlu1 %3423  ;;  %v3426_v51 = vpop.permute.xlu0 %3425 }
0x136b   :  { %v3447_v13 = vmul.f32 %v3424_v9, %v8761_v18  ;;  %v3448_v39 = vmul.f32 %v3426_v51, %v8764_v35 }
0x136d   :  { %3463 = vrot.lane.b32.xlu1 %v3447_v13, %s5155_s20  ;;  %3465 = vrot.lane.b32.xlu0 %v3448_v39, %s5155_s20 }
0x13a9   :  { %v3476_v46 = vpop.permute.xlu1 %3475 }
0x13aa   :  { %v8788_v50 = vadd.f32 %v3476_v46, %v3413_v60 }
0x13ac   :  { %4818 = vtanh.f32 %v8788_v50 }
0x13b5   :  { %v3478_v44 = vpop.permute.xlu0 %3477 }
0x13b6   :  { %v4819_v58 = vpop.eup %4818  ;;  %v8793_v34 = vadd.f32 %v3478_v44, %v3414_v49 }
0x13b7   :  { %3523 = vrot.lane.b32.xlu1 %v4819_v58, %s5157_s23 }
0x13b8   :  { %4820 = vtanh.f32 %v8793_v34 }
0x13c1   :  { %v3472_v31 = vpop.permute.xlu1 %3471 }
0x13c2   :  { %v4821_v22 = vpop.eup %4820  ;;  %v8799_v2 = vadd.f32 %v3472_v31, %v3411_v26 }
0x13c3   :  { %3525 = vrot.lane.b32.xlu0 %v4821_v22, %s5157_s23 }
0x13c4   :  { %4822 = vtanh.f32 %v8799_v2 }
0x13c8   :  { %v3474_v42 = vpop.permute.xlu0 %3473 }
0x13c9   :  { %v8805_v45 = vadd.f32 %v3474_v42, %v3412_v57 }
0x13cb   :  { %4824 = vtanh.f32 %v8805_v45 }
0x13ce   :  { %v4823_v55 = vpop.eup %4822 }
0x13cf   :  { %3519 = vrot.lane.b32.xlu1 %v4823_v55, %s5157_s23 }
0x13d4   :  { %v3468_v56 = vpop.permute.xlu1 %3467 }
0x13d5   :  { %v4825_v16 = vpop.eup %4824  ;;  %v8811_v21 = vadd.f32 %v3468_v56, %v3409_v59 }
0x13d6   :  { %3521 = vrot.lane.b32.xlu0 %v4825_v16, %s5157_s23 }
0x13d7   :  { %4826 = vtanh.f32 %v8811_v21 }
0x13db   :  { %v3470_v28 = vpop.permute.xlu0 %3469 }
0x13dc   :  { %v8817_v62 = vadd.f32 %v3470_v28, %v3410_v41 }
0x13de   :  { %4828 = vtanh.f32 %v8817_v62 }
0x13df   :  { %v3464_v15 = vpop.permute.xlu1 %3463  ;;  %v3466_v63 = vpop.permute.xlu0 %3465 }
0x13e0   :  { %v3487_v61 = vadd.f32 %v3464_v15, %v3407_v24  ;;  %v3488_v48 = vadd.f32 %v3466_v63, %v3408_v32 }
0x13e1   :  { %v4827_v0 = vpop.eup %4826 }
0x13e2   :  { %4830 = vtanh.f32 %v3487_v61  ;;  %3515 = vrot.lane.b32.xlu1 %v4827_v0, %s5157_s23 }
0x13e3   :  { %4832 = vtanh.f32 %v3488_v48 }
0x13e8   :  { %v4829_v29 = vpop.eup %4828 }
0x13e9   :  { %3517 = vrot.lane.b32.xlu0 %v4829_v29, %s5157_s23 }
0x13ec   :  { %v4831_v11 = vpop.eup %4830 }
0x13ed   :  { %v4833_v9 = vpop.eup %4832  ;;  %3511 = vrot.lane.b32.xlu1 %v4831_v11, %s5157_s23  ;;  %v9837_v11 = vld [vmem:[#allocation41_spill] sm:$0xff] }
0x13ee   :  { %3513 = vrot.lane.b32.xlu0 %v4833_v9, %s5157_s23  ;;  %v9838_v9 = vld [vmem:[#allocation45_spill] sm:$0xff] }
0x1429   :  { %v3524_v12 = vpop.permute.xlu1 %3523 }
0x142a   :  { %v3541_v38 = vmul.f32 %v3524_v12, %v8578_v23 }
0x142c   :  { %3575 = vperm.xlu1 %4512, %v3541_v38  }
0x1430   :  { %4514 = vset.pattern.permute.xlu1 %v9743_v5 }
0x1431   :  { %3608 = vperm.xlu1 %4514, %v3541_v38  }
0x1435   :  { %v3526_v51 = vpop.permute.xlu0 %3525 }
0x1436   :  { %v3542_v13 = vmul.f32 %v3526_v51, %v8606_v53 }
0x1438   :  { %3612 = vperm.xlu1 %4514, %v3542_v13   ;;  %3580 = vperm.xlu0 %4513, %v3542_v13  }
0x143c   :  { %4515 = vset.pattern.permute.xlu1 %v9744_v43  ;;  %4516 = vset.pattern.permute.xlu0 %v9744_v43 }
0x143d   :  { %3640 = vperm.xlu1 %4515, %v3541_v38   ;;  %3644 = vperm.xlu0 %4516, %v3542_v13   ;;  %v9840_v13 = vld [vmem:[#allocation46_spill] sm:$0xff] }
0x1441   :  { %v3520_v39 = vpop.permute.xlu1 %3519  ;;  %4517 = vset.pattern.permute.xlu0 %v9607_v37  ;;  %4518 = vset.pattern.permute.xlu1 %v9607_v37 }
0x1442   :  { %v3539_v23 = vmul.f32 %v3520_v39, %v8655_v17 }
0x1444   :  { %3565 = vperm.xlu0 %4517, %v3539_v23  }
0x1448   :  { %4519 = vset.pattern.permute.xlu0 %v9743_v5  ;;  %v3522_v60 = vpop.permute.xlu0 %3521 }
0x1449   :  { %v3540_v53 = vmul.f32 %v3522_v60, %v8711_v3  ;;  %3600 = vperm.xlu0 %4519, %v3539_v23   ;;  %v9841_v60 = vld [vmem:[#allocation43_spill] sm:$0xff] }
0x144b   :  { %3570 = vperm.xlu1 %4518, %v3540_v53  }
0x144d   :  { %4522 = vset.pattern.permute.xlu0 %v9744_v43 }
0x144e   :  { %3636 = vperm.xlu0 %4522, %v3540_v53  }
0x144f   :  { %4520 = vset.pattern.permute.xlu1 %v9743_v5 }
0x1450   :  { %3604 = vperm.xlu1 %4520, %v3540_v53  }
0x1452   :  { %4524 = vset.pattern.permute.xlu0 %v9743_v5 }
0x1454   :  { %v3516_v46 = vpop.permute.xlu1 %3515  ;;  %4521 = vset.pattern.permute.xlu1 %v9744_v43 }
0x1455   :  { %v3537_v17 = vmul.f32 %v3516_v46, %v8738_v4  ;;  %3632 = vperm.xlu1 %4521, %v3539_v23  }
0x1457   :  { %3592 = vperm.xlu0 %4524, %v3537_v17  }
0x1459   :  { %4523 = vset.pattern.permute.xlu1 %v9607_v37 }
0x145a   :  { %3555 = vperm.xlu1 %4523, %v3537_v17  }
0x145b   :  { %v3518_v3 = vpop.permute.xlu0 %3517 }
0x145c   :  { %v3538_v49 = vmul.f32 %v3518_v3, %v8754_v25 }
0x145e   :  { %3560 = vperm.xlu1 %4523, %v3538_v49  }
0x145f   :  { %v3512_v44 = vpop.permute.xlu1 %3511 }
0x1460   :  { %v3535_v58 = vmul.f32 %v3512_v44, %v8761_v18  ;;  %v3514_v4 = vpop.permute.xlu0 %3513  ;;  %v8872_v44 = vld [vmem:[%s9307_s5 + $0x88] sm:$0xff] }
0x1461   :  { %v3536_v25 = vmul.f32 %v3514_v4, %v8764_v35 }
0x1462   :  { %3584 = vperm.xlu0 %4524, %v3535_v58   ;;  %4525 = vset.pattern.permute.xlu1 %v9743_v5 }
0x1463   :  { %3596 = vperm.xlu1 %4525, %v3538_v49  }
0x1466   :  { %4528 = vset.pattern.permute.xlu0 %v9744_v43 }
0x1467   :  { %3628 = vperm.xlu0 %4528, %v3538_v49   ;;  %4526 = vset.pattern.permute.xlu1 %v9744_v43 }
0x1468   :  { %3624 = vperm.xlu1 %4526, %v3537_v17  }
0x146b   :  { %4531 = vset.pattern.permute.xlu0 %v9607_v37 }
0x146c   :  { %4527 = vset.pattern.permute.xlu1 %v9607_v37 }
0x146d   :  { %3545 = vperm.xlu1 %4527, %v3535_v58  }
0x1471   :  { %3550 = vperm.xlu1 %4527, %v3536_v25  }
0x1475   :  { %4529 = vset.pattern.permute.xlu1 %v9743_v5 }
0x1476   :  { %3588 = vperm.xlu1 %4529, %v3536_v25  }
0x147a   :  { %4530 = vset.pattern.permute.xlu1 %v9744_v43 }
0x147b   :  { %3616 = vperm.xlu1 %4530, %v3535_v58  }
0x147f   :  { %3620 = vperm.xlu1 %4530, %v3536_v25  }
0x1483   :  { %4532 = vset.pattern.permute.xlu1 %v9607_v37 }
0x14ab   :  { %v3576_v18 = vpop.permute.xlu1 %3575 }
0x14ac   :  { %v3651_v32 = vmul.f32 %v8487_v47, %v3576_v18  ;;  %v8878_v18 = vld [vmem:[%s9307_s5 + $0x38] sm:$0xff] }
0x14b0   :  { %v3609_v31 = vpop.permute.xlu1 %3608 }
0x14b1   :  { %v3657_v28 = vmul.f32 %v8481_v40, %v3609_v31  ;;  %v9839_v40 = vld [vmem:[#allocation40_spill] sm:$0xff]  ;;  %v8884_v31 = vld [vmem:[%s9307_s5 + $0x80] sm:$0xff] }
0x14b7   :  { %v3581_v26 = vpop.permute.xlu0 %3580  ;;  %v3613_v57 = vpop.permute.xlu1 %3612 }
0x14b8   :  { %v3658_v35 = vmul.f32 %v8529_v6, %v3613_v57  ;;  %v3652_v56 = vmul.f32 %v8523_v30, %v3581_v26  ;;  %v3663_v6 = vadd.f32 %v3657_v28, %v3651_v32 }
0x14ba   :  { %v3664_v24 = vadd.f32 %v3658_v35, %v3652_v56  ;;  %v8890_v56 = vld [vmem:[%s9307_s5 + $0x30] sm:$0xff] }
0x14bc   :  { %v3645_v22 = vpop.permute.xlu0 %3644  ;;  %v3641_v55 = vpop.permute.xlu1 %3640 }
0x14bd   :  { %v3670_v41 = vmul.f32 %v8535_v14, %v3645_v22  ;;  %v3669_v15 = vmul.f32 %v8493_v33, %v3641_v55 }
0x14bf   :  { %v3676_v48 = vadd.f32 %v3670_v41, %v3664_v24  ;;  %v3675_v38 = vadd.f32 %v3669_v15, %v3663_v6  ;;  %v8908_v15 = vld [vmem:[%s9312_s4 + $0x78] sm:$0xff] }
0x14c1   :  { %v3712_v47 = vadd.f32 %v9840_v13, %v3676_v48 }
0x14c3   :  { %v3566_v42 = vpop.permute.xlu0 %3565 }
0x14c4   :  { %v3681_v51 = vmul.f32 %v9839_v40, %v3566_v42  ;;  %v3649_v41 = vmul.f32 %v8890_v56, %v3566_v42 }
0x14c8   :  { %v3601_v59 = vpop.permute.xlu0 %3600 }
0x14c9   :  { %v3687_v30 = vmul.f32 %v9837_v11, %v3601_v59  ;;  %v3655_v22 = vmul.f32 %v8884_v31, %v3601_v59  ;;  %v8902_v59 = vld [vmem:[%s9307_s5 + $0xd8] sm:$0xff] }
0x14ca   :  { %v3571_v16 = vpop.permute.xlu1 %3570 }
0x14cb   :  { %v3682_v0 = vmul.f32 %v8547_v36, %v3571_v16  ;;  %v3693_v23 = vadd.f32 %v3687_v30, %v3681_v51  ;;  %v9842_v36 = vld [vmem:[#allocation44_spill] sm:$0xff]  ;;  %v3650_v26 = vmul.f32 %v8878_v18, %v3571_v16  ;;  %v3661_v48 = vadd.f32 %v3655_v22, %v3649_v41  ;;  %v9844_v51 = vld [vmem:[#allocation47_spill] sm:$0xff] }
0x14cc   :  { %v3711_v17 = vadd.f32 %v9842_v36, %v3675_v38  ;;  %v8896_v16 = vld [vmem:[%s9307_s5 + $0xd0] sm:$0xff] }
0x14cd   :  { %v3637_v63 = vpop.permute.xlu0 %3636  ;;  %v9845_v36 = vld [vmem:[#allocation48_spill] sm:$0xff] }
0x14ce   :  { %v3700_v12 = vmul.f32 %v9838_v9, %v3637_v63  ;;  %v3668_v32 = vmul.f32 %v8902_v59, %v3637_v63  ;;  %v8921_v63 = vld [vmem:[%s9312_s4 + $0x28] sm:$0xff]  ;;  %v9843_v9 = vld [vmem:[#allocation49_spill] sm:$0xff] }
0x14cf   :  { %v3605_v61 = vpop.permute.xlu1 %3604 }
0x14d0   :  { %v3688_v29 = vmul.f32 %v8541_v8, %v3605_v61  ;;  %v3656_v58 = vmul.f32 %v8872_v44, %v3605_v61 }
0x14d2   :  { %v3694_v14 = vadd.f32 %v3688_v29, %v3682_v0  ;;  %v3662_v57 = vadd.f32 %v3656_v58, %v3650_v26  ;;  %v8915_v0 = vld [vmem:[%s9312_s4 + $0x20] sm:$0xff]  ;;  %v8960_v26 = vld [vmem:[%s9308_s6 + $0x30] sm:$0xff] }
0x14d4   :  { %v3706_v39 = vadd.f32 %v3700_v12, %v3694_v14  ;;  %v3633_v33 = vpop.permute.xlu1 %3632  ;;  %v3674_v11 = vadd.f32 %v3668_v32, %v3662_v57  ;;  %v8930_v14 = vld [vmem:[%s9312_s4 + $0x70] sm:$0xff] }
0x14d5   :  { %v3699_v53 = vmul.f32 %v9841_v60, %v3633_v33  ;;  %v3667_v28 = vmul.f32 %v8896_v16, %v3633_v33 }
0x14d6   :  { %v3718_v46 = vadd.f32 %v3712_v47, %v3706_v39  ;;  %v3593_v4 = vpop.permute.xlu0 %3592  ;;  %v8937_v39 = vld [vmem:[%s9312_s4 + $0xc8] sm:$0xff] }
0x14d7   :  { %v3705_v8 = vadd.f32 %v3699_v53, %v3693_v23  ;;  %v3685_v38 = vmul.f32 %v8930_v14, %v3593_v4  ;;  %v8945_v53 = vld [vmem:[%s9312_s4 + $0xc0] sm:$0xff] }
0x14d8   :  { %4834 = vtanh.f32 %v3718_v46 }
0x14d9   :  { %v3717_v3 = vadd.f32 %v3711_v17, %v3705_v8  ;;  %v3556_v49 = vpop.permute.xlu1 %3555  ;;  %v8954_v8 = vld [vmem:[%s9308_s6 + $0x38] sm:$0xff] }
0x14da   :  { %v3679_v29 = vmul.f32 %v8915_v0, %v3556_v49 }
0x14db   :  { %4836 = vtanh.f32 %v3717_v3  ;;  %v3710_v3 = vadd.f32 %v8954_v8, %v3674_v11 }
0x14dc   :  { %v3691_v60 = vadd.f32 %v3685_v38, %v3679_v29 }
0x14dd   :  { %v3561_v25 = vpop.permute.xlu1 %3560 }
0x14de   :  { %v3680_v30 = vmul.f32 %v8921_v63, %v3561_v25 }
0x14e1   :  { %v3585_v55 = vpop.permute.xlu0 %3584 }
0x14e2   :  { %v4835_v35 = vpop.eup %4834  ;;  %v3597_v24 = vpop.permute.xlu1 %3596 }
0x14e3   :  { %v3686_v42 = vmul.f32 %v8908_v15, %v3597_v24  ;;  %v3730_v61 = vmul.f32 %v8596_v27, %v4835_v35  ;;  %v3673_v27 = vadd.f32 %v3667_v28, %v3661_v48  ;;  %v9847_v48 = vld [vmem:[#allocation50_spill] sm:$0xff] }
0x14e4   :  { %v3653_v29 = vmul.f32 %v9847_v48, %v3593_v4  ;;  %v9852_v4 = vld [vmem:[#allocation9_spill] sm:$0xff] }
0x14e5   :  { %v4837_v6 = vpop.eup %4836  ;;  %v8925_v12 = vadd.f32 %v9843_v9, %v3730_v61  ;;  %v3692_v47 = vadd.f32 %v3686_v42, %v3680_v30  ;;  %v3709_v22 = vadd.f32 %v8960_v26, %v3673_v27  ;;  %v9846_v42 = vld [vmem:[#allocation51_spill] sm:$0xff] }
0x14e6   :  { %v3629_v40 = vpop.permute.xlu0 %3628  ;;  %v3729_v13 = vmul.f32 %v9844_v51, %v4837_v6  ;;  %v3647_v61 = vmul.f32 %v9846_v42, %v3556_v49  ;;  %v9848_v6 = vld [vmem:[#allocation2_spill] sm:$0xff]  ;;  %v9849_v9 = vld [vmem:[#allocation3_spill] sm:$0xff] }
0x14e7   :  { %v3698_v33 = vmul.f32 %v8937_v39, %v3629_v40  ;;  %v3625_v23 = vpop.permute.xlu1 %3624  ;;  %3759 = vrot.lane.b32.xlu1 %v8925_v12, %s5154_s13  ;;  %v3654_v38 = vmul.f32 %v9849_v9, %v3597_v24  ;;  %v8982_v24 = vld [vmem:[%s9309_s7 + $0x30] sm:$0xff]  ;;  %v9856_v9 = vld [vmem:[#allocation13_spill] sm:$0xff] }
0x14e8   :  { %v3697_v46 = vmul.f32 %v8945_v53, %v3625_v23  ;;  %v8949_v17 = vadd.f32 %v9845_v36, %v3729_v13  ;;  %v3665_v11 = vmul.f32 %v9848_v6, %v3625_v23  ;;  %v3659_v51 = vadd.f32 %v3653_v29, %v3647_v61  ;;  %v9850_v13 = vld [vmem:[#allocation4_spill] sm:$0xff]  ;;  %v8974_v36 = vld [vmem:[%s9309_s7 + $0x38] sm:$0xff]  ;;  %v9855_v61 = vld [vmem:[#allocation10_spill] sm:$0xff] }
0x14e9   :  { %v3704_v58 = vadd.f32 %v3698_v33, %v3692_v47  ;;  %v9853_v23 = vld [vmem:[#allocation12_spill] sm:$0xff] }
0x14ea   :  { %v3703_v57 = vadd.f32 %v3697_v46, %v3691_v60  ;;  %3757 = vrot.lane.b32.xlu0 %v8949_v17, %s5154_s13  ;;  %v9851_v60 = vld [vmem:[#allocation11_spill] sm:$0xff]  ;;  %v8998_v29 = vld [vmem:[%s9310_s8 + $0x30] sm:$0xff] }
0x14eb   :  { %v3716_v35 = vadd.f32 %v3710_v3, %v3704_v58  ;;  %v3648_v46 = vmul.f32 %v9851_v60, %v3561_v25  ;;  %v3683_v3 = vmul.f32 %v9852_v4, %v3585_v55  ;;  %v3666_v58 = vmul.f32 %v9853_v23, %v3629_v40  ;;  %v9854_v40 = vld [vmem:[#allocation17_spill] sm:$0xff] }
0x14ec   :  { %v3715_v41 = vadd.f32 %v3709_v22, %v3703_v57  ;;  %v3546_v28 = vpop.permute.xlu1 %3545  ;;  %v3671_v22 = vadd.f32 %v3665_v11, %v3659_v51 }
0x14ed   :  { %4838 = vtanh.f32 %v3716_v35  ;;  %v3677_v47 = vmul.f32 %v9850_v13, %v3546_v28  ;;  %v3660_v25 = vadd.f32 %v3654_v38, %v3648_v46 }
0x14ee   :  { %4840 = vtanh.f32 %v3715_v41  ;;  %v8988_v41 = vld [vmem:[%s9310_s8 + $0x38] sm:$0xff]  ;;  %v3707_v38 = vadd.f32 %v9856_v9, %v3671_v22 }
0x14ef   :  { %v3689_v55 = vadd.f32 %v3683_v3, %v3677_v47  ;;  %v3672_v11 = vadd.f32 %v3666_v58, %v3660_v25 }
0x14f0   :  { %v3551_v32 = vpop.permute.xlu1 %3550 }
0x14f1   :  { %v3708_v60 = vadd.f32 %v8718_v10, %v3672_v11  ;;  %v3741_v11 = vmul.f32 %v8949_v17, %v8788_v50 }
0x14f5   :  { %v3589_v30 = vpop.permute.xlu1 %3588 }
0x14f6   :  { %v3684_v42 = vmul.f32 %v9854_v40, %v3589_v30 }
0x14f7   :  { %v4839_v27 = vpop.eup %4838 }
0x14f8   :  { %v4841_v33 = vpop.eup %4840  ;;  %v3728_v49 = vmul.f32 %v8974_v36, %v4839_v27  ;;  %v3678_v27 = vmul.f32 %v8697_v19, %v3551_v32 }
0x14f9   :  { %v3727_v57 = vmul.f32 %v8982_v24, %v4841_v33 }
0x14fa   :  { %v3617_v35 = vpop.permute.xlu1 %3616  ;;  %v8991_v28 = vadd.f32 %v8988_v41, %v3728_v49  ;;  %v3690_v13 = vadd.f32 %v3684_v42, %v3678_v27  ;;  %v3742_v42 = vmul.f32 %v8925_v12, %v8793_v34 }
0x14fb   :  { %v3695_v48 = vmul.f32 %v9855_v61, %v3617_v35  ;;  %v9001_v6 = vadd.f32 %v8998_v29, %v3727_v57 }
0x14fc   :  { %3755 = vrot.lane.b32.xlu1 %v8991_v28, %s5154_s13  ;;  %v3740_v34 = vmul.f32 %v8991_v28, %v8805_v45 }
0x14fd   :  { %v3701_v51 = vadd.f32 %v3695_v48, %v3689_v55  ;;  %3753 = vrot.lane.b32.xlu0 %v9001_v6, %s5154_s13  ;;  %v3739_v50 = vmul.f32 %v9001_v6, %v8799_v2 }
0x14fe   :  { %v3621_v30 = vpop.permute.xlu1 %3620 }
0x14ff   :  { %v3713_v47 = vadd.f32 %v3707_v38, %v3701_v51  ;;  %v3696_v33 = vmul.f32 %v8707_v54, %v3621_v30 }
0x1501   :  { %4842 = vtanh.f32 %v3713_v47  ;;  %v3702_v46 = vadd.f32 %v3696_v33, %v3690_v13 }
0x1503   :  { %v3714_v49 = vadd.f32 %v3708_v60, %v3702_v46 }
0x1505   :  { %4844 = vtanh.f32 %v3714_v49 }
0x150b   :  { %v4843_v4 = vpop.eup %4842 }
0x150c   :  { %v3725_v3 = vmul.f32 %v8729_v52, %v4843_v4 }
0x150e   :  { %v9013_v19 = vadd.f32 %v8735_v7, %v3725_v3 }
0x150f   :  { %v4845_v32 = vpop.eup %4844 }
0x1510   :  { %3749 = vrot.lane.b32.xlu0 %v9013_v19, %s5154_s13  ;;  %v3726_v23 = vmul.f32 %v8745_v1, %v4845_v32  ;;  %v3737_v45 = vmul.f32 %v9013_v19, %v8811_v21 }
0x1512   :  { %v9019_v54 = vadd.f32 %v8751_v20, %v3726_v23 }
0x1514   :  { %3751 = vrot.lane.b32.xlu1 %v9019_v54, %s5154_s13  ;;  %v3738_v4 = vmul.f32 %v9019_v54, %v8817_v62 }
0x1559   :  { %v3760_v10 = vpop.permute.xlu1 %3759 }
0x155a   :  { %v3772_v58 = vmul.f32 %v3760_v10, %v8925_v12 }
0x155c   :  { %3789 = vrot.lane.b32.xlu1 %v3772_v58, %s5155_s20  ;;  %v3758_v52 = vpop.permute.xlu0 %3757 }
0x155d   :  { %v3771_v7 = vmul.f32 %v3758_v52, %v8949_v17 }
0x155f   :  { %3787 = vrot.lane.b32.xlu0 %v3771_v7, %s5155_s20 }
0x156e   :  { %v3756_v22 = vpop.permute.xlu1 %3755 }
0x156f   :  { %v3770_v57 = vmul.f32 %v3756_v22, %v8991_v28  ;;  %v3754_v1 = vpop.permute.xlu0 %3753 }
0x1570   :  { %v3769_v20 = vmul.f32 %v3754_v1, %v9001_v6 }
0x1571   :  { %3785 = vrot.lane.b32.xlu1 %v3770_v57, %s5155_s20 }
0x1572   :  { %3783 = vrot.lane.b32.xlu0 %v3769_v20, %s5155_s20 }
0x1582   :  { %v3750_v25 = vpop.permute.xlu0 %3749 }
0x1583   :  { %v3767_v35 = vmul.f32 %v3750_v25, %v9013_v19 }
0x1585   :  { %3779 = vrot.lane.b32.xlu0 %v3767_v35, %s5155_s20 }
0x1586   :  { %v3752_v55 = vpop.permute.xlu1 %3751 }
0x1587   :  { %v3768_v40 = vmul.f32 %v3752_v55, %v9019_v54 }
0x1589   :  { %3781 = vrot.lane.b32.xlu1 %v3768_v40, %s5155_s20  ;;  %v9090_v40 = vld [vmem:[%s9307_s5 + $0x90] sm:$0xff] }
0x15ce   :  { %v3790_v61 = vpop.permute.xlu1 %3789 }
0x15cf   :  { %v9037_v48 = vadd.f32 %v3790_v61, %v3742_v42  ;;  %v9096_v61 = vld [vmem:[%s9307_s5 + $0x40] sm:$0xff] }
0x15d1   :  { %4846 = vtanh.f32 %v9037_v48  ;;  %v3788_v9 = vpop.permute.xlu0 %3787 }
0x15d2   :  { %v9042_v38 = vadd.f32 %v3788_v9, %v3741_v11  ;;  %v9102_v9 = vld [vmem:[%s9307_s5 + $0xe0] sm:$0xff] }
0x15d4   :  { %4848 = vtanh.f32 %v9042_v38 }
0x15db   :  { %v4847_v27 = vpop.eup %4846 }
0x15dc   :  { %3825 = vrot.lane.b32.xlu1 %v4847_v27, %s5157_s23 }
0x15de   :  { %v4849_v51 = vpop.eup %4848 }
0x15df   :  { %3823 = vrot.lane.b32.xlu0 %v4849_v51, %s5157_s23 }
0x15e3   :  { %v3786_v30 = vpop.permute.xlu1 %3785 }
0x15e4   :  { %v9051_v13 = vadd.f32 %v3786_v30, %v3740_v34  ;;  %v3784_v47 = vpop.permute.xlu0 %3783 }
0x15e5   :  { %v9053_v33 = vadd.f32 %v3784_v47, %v3739_v50  ;;  %v9108_v50 = vld [vmem:[%s9312_s4 + $0x30] sm:$0xff] }
0x15e6   :  { %4850 = vtanh.f32 %v9051_v13 }
0x15e7   :  { %4852 = vtanh.f32 %v9053_v33 }
0x15f0   :  { %v4851_v60 = vpop.eup %4850 }
0x15f1   :  { %v4853_v46 = vpop.eup %4852  ;;  %3821 = vrot.lane.b32.xlu1 %v4851_v60, %s5157_s23  ;;  %v9114_v60 = vld [vmem:[%s9312_s4 + $0x80] sm:$0xff] }
0x15f2   :  { %3819 = vrot.lane.b32.xlu0 %v4853_v46, %s5157_s23 }
0x15f7   :  { %v3780_v49 = vpop.permute.xlu0 %3779 }
0x15f8   :  { %v3797_v2 = vadd.f32 %v3780_v49, %v3737_v45 }
0x15fa   :  { %4854 = vtanh.f32 %v3797_v2  ;;  %v9120_v2 = vld [vmem:[%s9307_s5 + $0x98] sm:$0xff] }
0x15fb   :  { %v3782_v3 = vpop.permute.xlu1 %3781 }
0x15fc   :  { %v3798_v32 = vadd.f32 %v3782_v3, %v3738_v4 }
0x15fe   :  { %4856 = vtanh.f32 %v3798_v32 }
0x1604   :  { %v4855_v23 = vpop.eup %4854 }
0x1605   :  { %3815 = vrot.lane.b32.xlu0 %v4855_v23, %s5157_s23  ;;  %v9126_v23 = vld [vmem:[%s9312_s4 + $0xd0] sm:$0xff] }
0x1608   :  { %v4857_v10 = vpop.eup %4856 }
0x1609   :  { %3817 = vrot.lane.b32.xlu1 %v4857_v10, %s5157_s23 }
0x164e   :  { %v3826_v58 = vpop.permute.xlu1 %3825 }
0x164f   :  { %v3838_v52 = vmul.f32 %v3826_v58, %v8925_v12  ;;  %v9132_v58 = vld [vmem:[%s9307_s5 + $0x48] sm:$0xff] }
0x1651   :  { %3866 = vperm.xlu1 %4532, %v3838_v52   ;;  %v3824_v21 = vpop.permute.xlu0 %3823 }
0x1652   :  { %v3837_v7 = vmul.f32 %v3824_v21, %v8949_v17  ;;  %v9138_v21 = vld [vmem:[%s9308_s6 + $0x40] sm:$0xff] }
0x1654   :  { %3861 = vperm.xlu0 %4531, %v3837_v7  }
0x1655   :  { %4533 = vset.pattern.permute.xlu1 %v9743_v5 }
0x1656   :  { %3886 = vperm.xlu1 %4533, %v3837_v7  }
0x1658   :  { %4534 = vset.pattern.permute.xlu0 %v9743_v5 }
0x1659   :  { %3890 = vperm.xlu0 %4534, %v3838_v52  }
0x165a   :  { %4536 = vset.pattern.permute.xlu1 %v9744_v43 }
0x165b   :  { %3914 = vperm.xlu1 %4536, %v3838_v52  }
0x165d   :  { %4535 = vset.pattern.permute.xlu0 %v9744_v43 }
0x165e   :  { %3910 = vperm.xlu0 %4535, %v3837_v7  }
0x165f   :  { %4537 = vset.pattern.permute.xlu1 %v9607_v37 }
0x1662   :  { %4538 = vset.pattern.permute.xlu0 %v9743_v5 }
0x1663   :  { %v3822_v17 = vpop.permute.xlu1 %3821 }
0x1664   :  { %v3820_v62 = vpop.permute.xlu0 %3819  ;;  %v3836_v22 = vmul.f32 %v3822_v17, %v8991_v28  ;;  %v9144_v17 = vld [vmem:[%s9307_s5 + $0xe8] sm:$0xff] }
0x1665   :  { %v3835_v12 = vmul.f32 %v3820_v62, %v9001_v6 }
0x1667   :  { %3878 = vperm.xlu0 %4538, %v3835_v12   ;;  %3851 = vperm.xlu1 %4537, %v3835_v12  }
0x166b   :  { %4540 = vset.pattern.permute.xlu0 %v9744_v43  ;;  %3856 = vperm.xlu1 %4537, %v3836_v22  }
0x166c   :  { %3902 = vperm.xlu0 %4540, %v3835_v12  }
0x166f   :  { %4539 = vset.pattern.permute.xlu1 %v9743_v5 }
0x1670   :  { %3882 = vperm.xlu1 %4539, %v3836_v22   ;;  %4543 = vset.pattern.permute.xlu0 %v9607_v37 }
0x1674   :  { %4541 = vset.pattern.permute.xlu1 %v9744_v43 }
0x1675   :  { %3906 = vperm.xlu1 %4541, %v3836_v22  }
0x1677   :  { %v3816_v57 = vpop.permute.xlu0 %3815 }
0x1678   :  { %v3833_v6 = vmul.f32 %v3816_v57, %v9013_v19 }
0x1679   :  { %4542 = vset.pattern.permute.xlu1 %v9607_v37 }
0x167a   :  { %3841 = vperm.xlu1 %4542, %v3833_v6  }
0x167b   :  { %v3818_v1 = vpop.permute.xlu1 %3817 }
0x167c   :  { %v3834_v28 = vmul.f32 %v3818_v1, %v9019_v54  ;;  %v9150_v1 = vld [vmem:[%s9312_s4 + $0x88] sm:$0xff] }
0x167e   :  { %3846 = vperm.xlu0 %4543, %v3834_v28   ;;  %4544 = vset.pattern.permute.xlu1 %v9743_v5 }
0x167f   :  { %3870 = vperm.xlu1 %4544, %v3833_v6  }
0x1682   :  { %4546 = vset.pattern.permute.xlu0 %v9744_v43 }
0x1683   :  { %3898 = vperm.xlu0 %4546, %v3834_v28   ;;  %3874 = vperm.xlu1 %4544, %v3834_v28  }
0x1687   :  { %4545 = vset.pattern.permute.xlu1 %v9744_v43  ;;  %4548 = vset.pattern.permute.xlu0 %v9607_v37 }
0x1688   :  { %3894 = vperm.xlu1 %4545, %v3833_v6  }
0x168c   :  { %4547 = vset.pattern.permute.xlu1 %v9607_v37 }
0x16d0   :  { %v3867_v19 = vpop.permute.xlu1 %3866 }
0x16d1   :  { %v3920_v52 = vmul.f32 %v9132_v58, %v3867_v19 }
0x16d3   :  { %v3862_v20 = vpop.permute.xlu0 %3861 }
0x16d4   :  { %v3919_v11 = vmul.f32 %v9096_v61, %v3862_v20  ;;  %v9156_v20 = vld [vmem:[%s9312_s4 + $0x38] sm:$0xff] }
0x16d5   :  { %v3887_v25 = vpop.permute.xlu1 %3886 }
0x16d6   :  { %v3923_v42 = vmul.f32 %v9090_v40, %v3887_v25 }
0x16d8   :  { %v3891_v35 = vpop.permute.xlu0 %3890  ;;  %v3927_v30 = vadd.f32 %v3923_v42, %v3919_v11  ;;  %v9168_v11 = vld [vmem:[%s9308_s6 + $0x48] sm:$0xff] }
0x16d9   :  { %v3924_v4 = vmul.f32 %v9120_v2, %v3891_v35 }
0x16da   :  { %v3915_v54 = vpop.permute.xlu1 %3914 }
0x16db   :  { %v3928_v12 = vadd.f32 %v3924_v4, %v3920_v52  ;;  %v3932_v22 = vmul.f32 %v9144_v17, %v3915_v54 }
0x16dd   :  { %v3911_v55 = vpop.permute.xlu0 %3910  ;;  %v3936_v19 = vadd.f32 %v3932_v22, %v3928_v12  ;;  %v9183_v22 = vld [vmem:[%s9310_s8 + $0x40] sm:$0xff] }
0x16de   :  { %v3931_v27 = vmul.f32 %v9102_v9, %v3911_v55  ;;  %v9162_v55 = vld [vmem:[%s9312_s4 + $0xd8] sm:$0xff] }
0x16e0   :  { %v3935_v45 = vadd.f32 %v3931_v27, %v3927_v30  ;;  %v3960_v27 = vadd.f32 %v9168_v11, %v3936_v19 }
0x16e2   :  { %v3959_v7 = vadd.f32 %v9138_v21, %v3935_v45 }
0x16e6   :  { %v3852_v51 = vpop.permute.xlu1 %3851  ;;  %v3879_v34 = vpop.permute.xlu0 %3878 }
0x16e7   :  { %v3939_v47 = vmul.f32 %v9108_v50, %v3852_v51  ;;  %v3943_v46 = vmul.f32 %v9114_v60, %v3879_v34 }
0x16e9   :  { %v3947_v32 = vadd.f32 %v3943_v46, %v3939_v47 }
0x16ea   :  { %v3857_v49 = vpop.permute.xlu1 %3856 }
0x16eb   :  { %v3903_v3 = vpop.permute.xlu0 %3902  ;;  %v3940_v25 = vmul.f32 %v9156_v20, %v3857_v49 }
0x16ec   :  { %v3951_v10 = vmul.f32 %v9126_v23, %v3903_v3 }
0x16ee   :  { %v3955_v62 = vadd.f32 %v3951_v10, %v3947_v32  ;;  %v9175_v10 = vld [vmem:[%s9309_s7 + $0x40] sm:$0xff] }
0x16ef   :  { %v3883_v57 = vpop.permute.xlu1 %3882 }
0x16f0   :  { %v3963_v6 = vadd.f32 %v3959_v7, %v3955_v62  ;;  %v3944_v28 = vmul.f32 %v9150_v1, %v3883_v57  ;;  %v3922_v4 = vmul.f32 %v8872_v44, %v3883_v57  ;;  %v3918_v62 = vmul.f32 %v8878_v18, %v3857_v49 }
0x16f1   :  { %v3917_v57 = vmul.f32 %v8890_v56, %v3852_v51  ;;  %v3929_v18 = vmul.f32 %v8896_v16, %v3903_v3  ;;  %v9201_v16 = vld [vmem:[%s9309_s7 + $0x48] sm:$0xff] }
0x16f2   :  { %4858 = vtanh.f32 %v3963_v6  ;;  %v3948_v54 = vadd.f32 %v3944_v28, %v3940_v25  ;;  %v3921_v6 = vmul.f32 %v8884_v31, %v3879_v34  ;;  %v3926_v28 = vadd.f32 %v3922_v4, %v3918_v62 }
0x16f4   :  { %v3907_v35 = vpop.permute.xlu1 %3906 }
0x16f5   :  { %v3952_v42 = vmul.f32 %v9162_v55, %v3907_v35  ;;  %v3930_v12 = vmul.f32 %v8902_v59, %v3907_v35 }
0x16f7   :  { %v3956_v30 = vadd.f32 %v3952_v42, %v3948_v54  ;;  %v3934_v19 = vadd.f32 %v3930_v12, %v3926_v28  ;;  %v3925_v54 = vadd.f32 %v3921_v6, %v3917_v57 }
0x16f9   :  { %v3964_v47 = vadd.f32 %v3960_v27, %v3956_v30  ;;  %v3842_v46 = vpop.permute.xlu1 %3841  ;;  %v3933_v51 = vadd.f32 %v3929_v18, %v3925_v54 }
0x16fa   :  { %v3937_v34 = vmul.f32 %v8915_v0, %v3842_v46 }
0x16fb   :  { %4860 = vtanh.f32 %v3964_v47 }
0x16fc   :  { %v4859_v45 = vpop.eup %4858 }
0x16fd   :  { %v3847_v32 = vpop.permute.xlu0 %3846  ;;  %v3971_v52 = vmul.f32 %v9175_v10, %v4859_v45  ;;  %v3957_v45 = vadd.f32 %v8960_v26, %v3933_v51 }
0x16fe   :  { %v3871_v7 = vpop.permute.xlu1 %3870  ;;  %v3938_v25 = vmul.f32 %v8921_v63, %v3847_v32  ;;  %v3958_v63 = vadd.f32 %v8954_v8, %v3934_v19 }
0x16ff   :  { %v9186_v44 = vadd.f32 %v9183_v22, %v3971_v52  ;;  %v3941_v42 = vmul.f32 %v8930_v14, %v3871_v7 }
0x1701   :  { %3989 = vrot.lane.b32.xlu1 %v9186_v44, %s5154_s13  ;;  %v3945_v47 = vadd.f32 %v3941_v42, %v3937_v34 }
0x1702   :  { %v3875_v49 = vpop.permute.xlu1 %3874  ;;  %v3899_v59 = vpop.permute.xlu0 %3898 }
0x1703   :  { %v3942_v35 = vmul.f32 %v8908_v15, %v3875_v49  ;;  %v3950_v31 = vmul.f32 %v8937_v39, %v3899_v59  ;;  %v9209_v39 = vld [vmem:[%s9310_s8 + $0x48] sm:$0xff] }
0x1705   :  { %v4861_v27 = vpop.eup %4860  ;;  %v3946_v56 = vadd.f32 %v3942_v35, %v3938_v25 }
0x1706   :  { %v3972_v3 = vmul.f32 %v9201_v16, %v4861_v27 }
0x1707   :  { %v3954_v15 = vadd.f32 %v3950_v31, %v3946_v56  ;;  %v3895_v30 = vpop.permute.xlu1 %3894 }
0x1708   :  { %v3949_v14 = vmul.f32 %v8945_v53, %v3895_v30  ;;  %v3976_v0 = vadd.f32 %v9209_v39, %v3972_v3 }
0x1709   :  { %v3962_v46 = vadd.f32 %v3958_v63, %v3954_v15 }
0x170a   :  { %v3953_v4 = vadd.f32 %v3949_v14, %v3945_v47  ;;  %3991 = vrot.lane.b32.xlu0 %v3976_v0, %s5154_s13  ;;  %v3980_v19 = vmul.f32 %v3976_v0, %v9037_v48 }
0x170b   :  { %4862 = vtanh.f32 %v3962_v46 }
0x170c   :  { %v3961_v8 = vadd.f32 %v3957_v45, %v3953_v4 }
0x170e   :  { %4864 = vtanh.f32 %v3961_v8 }
0x1715   :  { %v4863_v32 = vpop.eup %4862 }
0x1716   :  { %v3970_v52 = vmul.f32 %v8974_v36, %v4863_v32 }
0x1718   :  { %v4865_v53 = vpop.eup %4864  ;;  %v3974_v7 = vadd.f32 %v8988_v41, %v3970_v52 }
0x1719   :  { %v3969_v62 = vmul.f32 %v8982_v24, %v4865_v53 }
0x171a   :  { %3987 = vrot.lane.b32.xlu0 %v3974_v7, %s5154_s13 }
0x171b   :  { %v3973_v12 = vadd.f32 %v8998_v29, %v3969_v62  ;;  %v3979_v29 = vmul.f32 %v9186_v44, %v9042_v38  ;;  %v3978_v38 = vmul.f32 %v3974_v7, %v9051_v13 }
0x171d   :  { %3985 = vrot.lane.b32.xlu1 %v3973_v12, %s5154_s13  ;;  %v3977_v31 = vmul.f32 %v3973_v12, %v9053_v33 }
0x1773   :  { %v3990_v26 = vpop.permute.xlu1 %3989 }
0x1774   :  { %v3999_v57 = vmul.f32 %v3990_v26, %v9186_v44 }
0x1776   :  { %4009 = vrot.lane.b32.xlu1 %v3999_v57, %s5155_s20 }
0x177c   :  { %v3992_v6 = vpop.permute.xlu0 %3991 }
0x177d   :  { %v4000_v28 = vmul.f32 %v3992_v6, %v3976_v0 }
0x177f   :  { %4011 = vrot.lane.b32.xlu0 %v4000_v28, %s5155_s20 }
0x178c   :  { %v3988_v36 = vpop.permute.xlu0 %3987 }
0x178d   :  { %v3998_v18 = vmul.f32 %v3988_v36, %v3974_v7 }
0x178f   :  { %v3986_v41 = vpop.permute.xlu1 %3985  ;;  %4007 = vrot.lane.b32.xlu0 %v3998_v18, %s5155_s20 }
0x1790   :  { %v3997_v24 = vmul.f32 %v3986_v41, %v3973_v12 }
0x1792   :  { %4005 = vrot.lane.b32.xlu1 %v3997_v24, %s5155_s20 }
0x17e8   :  { %v4010_v49 = vpop.permute.xlu1 %4009 }
0x17e9   :  { %v9227_v59 = vadd.f32 %v4010_v49, %v3979_v29 }
0x17eb   :  { %4866 = vtanh.f32 %v9227_v59 }
0x17f1   :  { %v4012_v25 = vpop.permute.xlu0 %4011 }
0x17f2   :  { %v9231_v35 = vadd.f32 %v4012_v25, %v3980_v19 }
0x17f4   :  { %4868 = vtanh.f32 %v9231_v35 }
0x17f5   :  { %v4867_v54 = vpop.eup %4866 }
0x17f6   :  { %4033 = vrot.lane.b32.xlu1 %v4867_v54, %s5157_s23 }
0x17fe   :  { %v4869_v42 = vpop.eup %4868 }
0x17ff   :  { %4035 = vrot.lane.b32.xlu0 %v4869_v42, %s5157_s23 }
0x1801   :  { %v4008_v27 = vpop.permute.xlu0 %4007 }
0x1802   :  { %v4018_v56 = vadd.f32 %v4008_v27, %v3978_v38 }
0x1804   :  { %4870 = vtanh.f32 %v4018_v56  ;;  %v4006_v51 = vpop.permute.xlu1 %4005 }
0x1805   :  { %v4017_v48 = vadd.f32 %v4006_v51, %v3977_v31 }
0x1807   :  { %4872 = vtanh.f32 %v4017_v48 }
0x180e   :  { %v4871_v34 = vpop.eup %4870 }
0x180f   :  { %4031 = vrot.lane.b32.xlu0 %v4871_v34, %s5157_s23 }
0x1811   :  { %v4873_v3 = vpop.eup %4872 }
0x1812   :  { %4029 = vrot.lane.b32.xlu1 %v4873_v3, %s5157_s23 }
0x1868   :  { %v4034_v63 = vpop.permute.xlu1 %4033 }
0x1869   :  { %v4043_v15 = vmul.f32 %v4034_v63, %v9186_v44 }
0x186b   :  { %4057 = vperm.xlu1 %4547, %v4043_v15  }
0x186f   :  { %4549 = vset.pattern.permute.xlu1 %v9743_v5 }
0x1870   :  { %4074 = vperm.xlu1 %4549, %v4043_v15  }
0x1871   :  { %v4036_v13 = vpop.permute.xlu0 %4035 }
0x1872   :  { %v4044_v30 = vmul.f32 %v4036_v13, %v3976_v0 }
0x1874   :  { %4078 = vperm.xlu1 %4549, %v4044_v30   ;;  %4062 = vperm.xlu0 %4548, %v4044_v30  }
0x1878   :  { %4550 = vset.pattern.permute.xlu1 %v9744_v43 }
0x1879   :  { %4090 = vperm.xlu1 %4550, %v4043_v15  }
0x187d   :  { %4551 = vset.pattern.permute.xlu1 %v9607_v37 }
0x1881   :  { %v4032_v33 = vpop.permute.xlu0 %4031 }
0x1882   :  { %v4042_v47 = vmul.f32 %v4032_v33, %v3974_v7 }
0x1884   :  { %v4030_v14 = vpop.permute.xlu1 %4029  ;;  %4052 = vperm.xlu1 %4551, %v4042_v47  }
0x1885   :  { %v4041_v46 = vmul.f32 %v4030_v14, %v3973_v12  ;;  %v4292_v14 = vld [vmem:[%s9313_s9] ss:$0 sm:$0xff] }
0x1887   :  { %4047 = vperm.xlu0 %4548, %v4041_v46  }
0x1888   :  { %4554 = vset.pattern.permute.xlu1 %v9743_v5 }
0x1889   :  { %4070 = vperm.xlu1 %4554, %v4042_v47  }
0x188b   :  { %4552 = vset.pattern.permute.xlu0 %v9743_v5 }
0x188c   :  { %4066 = vperm.xlu0 %4552, %v4041_v46  }
0x188d   :  { %4555 = vset.pattern.permute.xlu1 %v9744_v43 }
0x188e   :  { %4082 = vperm.xlu1 %4555, %v4041_v46  }
0x1890   :  { %4553 = vset.pattern.permute.xlu0 %v9744_v43 }
0x1891   :  { %4094 = vperm.xlu0 %4553, %v4044_v30  }
0x1892   :  { %4086 = vperm.xlu1 %4555, %v4042_v47  }
0x1895   :  { %4556 = vset.pattern.permute.xlu0 %v9607_v37 }
0x1896   :  { %4557 = vset.pattern.permute.xlu1 %v9607_v37 }
0x18ea   :  { %v4058_v44 = vpop.permute.xlu1 %4057 }
0x18eb   :  { %v4097_v7 = vmul.f32 %v9096_v61, %v4058_v44  ;;  %v4294_v44 = vld [vmem:[%s9313_s9 + $0x2] ss:$0 sm:$0xff] }
0x18ef   :  { %v4075_v0 = vpop.permute.xlu1 %4074 }
0x18f0   :  { %v4099_v52 = vmul.f32 %v9090_v40, %v4075_v0 }
0x18f2   :  { %v4101_v26 = vadd.f32 %v4099_v52, %v4097_v7 }
0x18f3   :  { %v4079_v45 = vpop.permute.xlu1 %4078  ;;  %v4063_v8 = vpop.permute.xlu0 %4062 }
0x18f4   :  { %v4100_v36 = vmul.f32 %v9120_v2, %v4079_v45  ;;  %v4098_v18 = vmul.f32 %v9132_v58, %v4063_v8 }
0x18f6   :  { %v4102_v25 = vadd.f32 %v4100_v36, %v4098_v18 }
0x18f8   :  { %v4091_v4 = vpop.permute.xlu1 %4090 }
0x18f9   :  { %v4103_v62 = vmul.f32 %v9102_v9, %v4091_v4 }
0x18fb   :  { %v4105_v6 = vadd.f32 %v4103_v62, %v4101_v26 }
0x18fd   :  { %v4117_v9 = vadd.f32 %v9138_v21, %v4105_v6 }
0x1903   :  { %v4053_v32 = vpop.permute.xlu1 %4052 }
0x1904   :  { %v4108_v29 = vmul.f32 %v9156_v20, %v4053_v32 }
0x1906   :  { %v4048_v53 = vpop.permute.xlu0 %4047 }
0x1907   :  { %v4107_v28 = vmul.f32 %v9108_v50, %v4048_v53 }
0x1908   :  { %v4071_v12 = vpop.permute.xlu1 %4070 }
0x1909   :  { %v4110_v40 = vmul.f32 %v9150_v1, %v4071_v12 }
0x190b   :  { %v4067_v57 = vpop.permute.xlu0 %4066  ;;  %v4112_v54 = vadd.f32 %v4110_v40, %v4108_v29 }
0x190c   :  { %v4109_v37 = vmul.f32 %v9114_v60, %v4067_v57 }
0x190d   :  { %v4083_v41 = vpop.permute.xlu1 %4082 }
0x190e   :  { %v4111_v24 = vadd.f32 %v4109_v37, %v4107_v28  ;;  %v4113_v61 = vmul.f32 %v9126_v23, %v4083_v41 }
0x1910   :  { %v4115_v49 = vadd.f32 %v4113_v61, %v4111_v24  ;;  %v4095_v19 = vpop.permute.xlu0 %4094 }
0x1911   :  { %v4104_v50 = vmul.f32 %v9144_v17, %v4095_v19  ;;  %v4087_v60 = vpop.permute.xlu1 %4086 }
0x1912   :  { %v4119_v2 = vadd.f32 %v4117_v9, %v4115_v49  ;;  %v4114_v58 = vmul.f32 %v9162_v55, %v4087_v60 }
0x1913   :  { %v4106_v42 = vadd.f32 %v4104_v50, %v4102_v25 }
0x1914   :  { %4874 = vtanh.f32 %v4119_v2  ;;  %v4116_v1 = vadd.f32 %v4114_v58, %v4112_v54 }
0x1915   :  { %v4118_v38 = vadd.f32 %v9168_v11, %v4106_v42 }
0x1917   :  { %v4120_v23 = vadd.f32 %v4118_v38, %v4116_v1 }
0x1919   :  { %4876 = vtanh.f32 %v4120_v23 }
0x191e   :  { %v4875_v21 = vpop.eup %4874 }
0x191f   :  { %v4123_v20 = vmul.f32 %v9175_v10, %v4875_v21 }
0x1921   :  { %v4125_v27 = vadd.f32 %v9183_v22, %v4123_v20 }
0x1923   :  { %v4877_v56 = vpop.eup %4876  ;;  %4131 = vrot.lane.b32.xlu0 %v4125_v27, %s5154_s13  ;;  %v4127_v10 = vmul.f32 %v4125_v27, %v9227_v59 }
0x1924   :  { %v4124_v17 = vmul.f32 %v9201_v16, %v4877_v56 }
0x1926   :  { %v4126_v31 = vadd.f32 %v9209_v39, %v4124_v17 }
0x1928   :  { %4133 = vrot.lane.b32.xlu1 %v4126_v31, %s5154_s13  ;;  %v4128_v3 = vmul.f32 %v4126_v31, %v9231_v35 }
0x1995   :  { %v4132_v55 = vpop.permute.xlu0 %4131 }
0x1996   :  { %v4137_v51 = vmul.f32 %v4132_v55, %v4125_v27 }
0x1998   :  { %4141 = vrot.lane.b32.xlu0 %v4137_v51, %s5155_s20 }
0x199a   :  { %v4134_v11 = vpop.permute.xlu1 %4133 }
0x199b   :  { %v4138_v48 = vmul.f32 %v4134_v11, %v4126_v31 }
0x199d   :  { %4143 = vrot.lane.b32.xlu1 %v4138_v48, %s5155_s20 }
0x1a0a   :  { %v4142_v22 = vpop.permute.xlu0 %4141 }
0x1a0b   :  { %v4147_v34 = vadd.f32 %v4142_v22, %v4127_v10 }
0x1a0d   :  { %4878 = vtanh.f32 %v4147_v34 }
0x1a0f   :  { %v4144_v16 = vpop.permute.xlu1 %4143 }
0x1a10   :  { %v4148_v63 = vadd.f32 %v4144_v16, %v4128_v3 }
0x1a12   :  { %4880 = vtanh.f32 %v4148_v63 }
0x1a17   :  { %v4879_v39 = vpop.eup %4878 }
0x1a18   :  { %4153 = vrot.lane.b32.xlu0 %v4879_v39, %s5157_s23 }
0x1a1c   :  { %v4881_v15 = vpop.eup %4880 }
0x1a1d   :  { %4155 = vrot.lane.b32.xlu1 %v4881_v15, %s5157_s23 }
0x1a8a   :  { %v4154_v13 = vpop.permute.xlu0 %4153 }
0x1a8b   :  { %v4159_v30 = vmul.f32 %v4154_v13, %v4125_v27 }
0x1a8d   :  { %4185 = vperm.xlu0 %4556, %v4159_v30  }
0x1a8f   :  { %v4156_v33 = vpop.permute.xlu1 %4155 }
0x1a90   :  { %v4160_v47 = vmul.f32 %v4156_v33, %v4126_v31 }
0x1a91   :  { %4559 = vset.pattern.permute.xlu0 %v9743_v5 }
0x1a92   :  { %4190 = vperm.xlu1 %4557, %v4160_v47   ;;  %4202 = vperm.xlu0 %4559, %v4160_v47  }
0x1a96   :  { %4558 = vset.pattern.permute.xlu1 %v9743_v5  ;;  %4561 = vset.pattern.permute.xlu0 %v9744_v43  ;;  %v4295_v5 = vld [vmem:[%s9314_s10] ss:$0 sm:$0xff] }
0x1a97   :  { %4198 = vperm.xlu1 %4558, %v4159_v30  }
0x1a9b   :  { %4560 = vset.pattern.permute.xlu1 %v9744_v43  ;;  %v4293_v43 = vld [vmem:[%s9313_s9 + $0x1] ss:$0 sm:$0xff] }
0x1a9c   :  { %4208 = vperm.xlu1 %4560, %v4159_v30  }
0x1aa0   :  { %4212 = vperm.xlu1 %4560, %v4160_v47  }
0x1b0c   :  { %v4186_v46 = vpop.permute.xlu0 %4185 }
0x1b0d   :  { %v4193_v0 = vmul.f32 %v4292_v14, %v4186_v46 }
0x1b0f   :  { %v4195_v52 = vadd.f32 %v4295_v5, %v4193_v0 }
0x1b11   :  { %v4191_v59 = vpop.permute.xlu1 %4190  ;;  %v4203_v32 = vpop.permute.xlu0 %4202 }
0x1b12   :  { %v4194_v53 = vmul.f32 %v4292_v14, %v4191_v59  ;;  %v4206_v12 = vmul.f32 %v4293_v43, %v4203_v32 }
0x1b14   :  { %v4196_v6 = vadd.f32 %v4295_v5, %v4194_v53 }
0x1b16   :  { %v4199_v35 = vpop.permute.xlu1 %4198 }
0x1b17   :  { %v4205_v4 = vmul.f32 %v4293_v43, %v4199_v35 }
0x1b1b   :  { %v4209_v45 = vpop.permute.xlu1 %4208 }
0x1b1c   :  { %v4215_v8 = vmul.f32 %v4294_v44, %v4209_v45 }
0x1b1e   :  { %v4217_v7 = vadd.f32 %v4215_v8, %v4205_v4 }
0x1b1f   :  { %v4213_v62 = vpop.permute.xlu1 %4212 }
0x1b20   :  { %v4216_v26 = vmul.f32 %v4294_v44, %v4213_v62  ;;  %v4219_v57 = vadd.f32 %v4217_v7, %v4195_v52 }
0x1b22   :  { %v4218_v28 = vadd.f32 %v4216_v26, %v4206_v12  ;;  %v4221_v37 = vmax.f32 %v4219_v57, 0.0 }
0x1b24   :  { %v4224_v36 = vsel %vm4223_vm0, %v4221_v37, -inf  ;;  %v4220_v18 = vadd.f32 %v4218_v28, %v4196_v6 }
0x1b25   :  { %4225 = vmax.xlane.f32.xlu0 %v4224_v36 }
0x1b26   :  { %v4222_v41 = vmax.f32 %v4220_v18, 0.0 }
0x1b28   :  { %v4228_v40 = vsel %vm4227_vm1, %v4222_v41, -inf }
0x1b29   :  { %4229 = vmax.xlane.f32.xlu1 %v4228_v40 }
0x1bb2   :  { %v4226_v24 = vpop.xlane.xlu0 %4225 }
0x1bb3   :  { %v4231_v61 = vsub.f32 %v4221_v37, %v4226_v24 }
0x1bb5   :  { %v4233_v9 = vmul.f32 1.442695, %v4231_v61 }
0x1bb6   :  { %v4230_v29 = vpop.xlane.xlu1 %4229 }
0x1bb7   :  { %4882 = vpow2.f32 %v4233_v9  ;;  %v4232_v49 = vsub.f32 %v4222_v41, %v4230_v29 }
0x1bb9   :  { %v4235_v19 = vmul.f32 1.442695, %v4232_v49 }
0x1bbb   :  { %4884 = vpow2.f32 %v4235_v19 }
0x1bc1   :  { %v4883_v25 = vpop.eup %4882 }
0x1bc2   :  { %v4237_v50 = vsel %vm4223_vm0, %v4883_v25, 0.0 }
0x1bc3   :  { %4238 = vadd.xlane.f32.xlu0 %v4237_v50 }
0x1bc5   :  { %v4885_v60 = vpop.eup %4884 }
0x1bc6   :  { %v4240_v54 = vsel %vm4227_vm1, %v4885_v60, 0.0 }
0x1bc7   :  { %4241 = vadd.xlane.f32.xlu0 %v4240_v54 }
0x1c50   :  { %v4239_v2 = vpop.xlane.xlu0 %4238 }
0x1c51   :  { %4886 = vrcp.f32 %v4239_v2 }
0x1c54   :  { %v4242_v58 = vpop.xlane.xlu0 %4241 }
0x1c55   :  { %4888 = vrcp.f32 %v4242_v58 }
0x1c5b   :  { %v4887_v42 = vpop.eup %4886 }
0x1c5c   :  { %v4244_v1 = vmul.f32 %v4887_v42, %v4883_v25 }
0x1c5e   :  { %4247 = vst.msk [vmem:[%s9315_s11] sm:$0xff] %vm4223_vm0, %v4244_v1 }
0x1c5f   :  { %v4889_v38 = vpop.eup %4888 }
0x1c60   :  { %v4246_v23 = vmul.f32 %v4889_v38, %v4885_v60 }
0x1c62   :  { %4248 = vst.msk [vmem:[%s9315_s11 + $0x8] sm:$0x3] %vm4227_vm1, %v4246_v23 }

</bundles_post_ra>
